<compile_context>
chip_gen: v5e
topology: v5e:2x2
jax: 0.10.0
libtpu: 0.0.40
codegen_flags: <defaults>
</compile_context>

<pallas_src>
import functools

import jax
import jax.numpy as jnp
from jax import lax
from jax.experimental import pallas as pl
from jax.experimental.pallas import tpu as pltpu

# ----------------------------- configuration -------------------------------
C_IN = 4          # module arg c_in (small demo; real module uses 64)
C_MID = 256       # hidden channels of trans_feature conv1
C_OUT = 64        # output channels of trans_feature conv2 (fixed by module)
NUM_POINT = 8     # module arg num_point (real module uses 128)
STRIDE = 4.0      # module arg stride
H = W = 16        # feature map spatial size
B = 2             # batch size
POLY_NUM = 6      # number of polygons
TILE_N = 8        # polygon rows per grid step (sublane aligned)
LANE = 128


def _round_up(x, m):
    return (x + m - 1) // m * m


# ===================== kernel A: trans_feature (conv) ========================
def conv_kernel(x_ref, w1_ref, b1_ref, w2_ref, b2_ref, feat_ref, *, h, w):
    """conv3x3(pad=1) + ReLU + conv1x1 for one image, spatial dim flattened.

    9 shifted-tap matmuls: zero rows concatenated in VMEM provide the vertical
    zero padding, an iota-derived column mask kills horizontal wrap-around.
    """
    hw = h * w
    x = x_ref[0].astype(jnp.float32)                        # (HW, C_IN)
    zpad = jnp.zeros((w + 1, x.shape[1]), jnp.float32)
    xz = jnp.concatenate([zpad, x, zpad], axis=0)           # (HW + 2W + 2, C_IN)

    pos = lax.broadcasted_iota(jnp.int32, (hw, 1), 0)
    xx = pos % w                                            # column of each pixel

    acc = jnp.zeros((hw, C_MID), jnp.float32)
    for t in range(9):
        dy, dx = t // 3 - 1, t % 3 - 1
        start = (w + 1) + dy * w + dx
        tap = xz[start:start + hw, :]                       # (HW, C_IN)
        if dx != 0:
            valid = (xx + dx >= 0) & (xx + dx <= w - 1)
            tap = jnp.where(valid, tap, 0.0)
        acc = acc + jnp.dot(tap.astype(jnp.bfloat16), w1_ref[t],
                            preferred_element_type=jnp.float32)
    h1 = jnp.maximum(acc + b1_ref[...], 0.0)                # bias/ReLU in f32
    feat = jnp.dot(h1.astype(jnp.bfloat16), w2_ref[...],
                   preferred_element_type=jnp.float32) + b2_ref[...]
    feat_ref[0] = feat.astype(feat_ref.dtype)


def trans_feature_pallas(x_flat, w1_taps, b1, w2, b2, *, h, w):
    b, hw, c_in = x_flat.shape
    flops = 2 * b * hw * (9 * c_in * C_MID + C_MID * C_OUT)
    bytes_accessed = ((x_flat.size + w1_taps.size + w2.size + b * hw * C_OUT) * 2
                      + (b1.size + b2.size) * 4)
    return pl.pallas_call(
        functools.partial(conv_kernel, h=h, w=w),
        out_shape=jax.ShapeDtypeStruct((b, hw, C_OUT), jnp.bfloat16),
        grid=(b,),
        in_specs=[
            pl.BlockSpec((1, hw, c_in), lambda i: (i, 0, 0)),
            pl.BlockSpec((9, c_in, C_MID), lambda i: (0, 0, 0)),
            pl.BlockSpec((1, C_MID), lambda i: (0, 0)),
            pl.BlockSpec((C_MID, C_OUT), lambda i: (0, 0)),
            pl.BlockSpec((1, C_OUT), lambda i: (0, 0)),
        ],
        out_specs=pl.BlockSpec((1, hw, C_OUT), lambda i: (i, 0, 0)),
        compiler_params=pltpu.CompilerParams(dimension_semantics=("parallel",)),
        cost_estimate=pl.CostEstimate(flops=int(flops), transcendentals=0,
                                      bytes_accessed=int(bytes_accessed)),
    )(x_flat, w1_taps, b1, w2, b2)


# ============== kernel B: grid_sample gather + global_deform =================
def deform_kernel(gidx_ref, gwts_ref, feat_ref, wp_ref, bf_ref, init_ref,
                  out_ref, acc_ref, g_ref, *, k_pts, tile_n, w, stride):
    i = pl.program_id(0)           # polygon-row tile ("parallel")
    p = pl.program_id(1)           # point index (reduction axis, "arbitrary")

    @pl.when(p == 0)
    def _init():
        acc_ref[...] = jnp.zeros_like(acc_ref)

    col = lax.broadcasted_iota(jnp.int32, (w, 1), 0)        # hoisted out of loop

    # Bilinear gather for point p of the tile_n polygons of this tile:
    # 2 dynamic feature-row loads + one-hot column weights + sublane reduce.
    for r in range(tile_n):
        s = ((i * tile_n + r) * k_pts + p) * 4
        r0 = gidx_ref[s]
        r1 = gidx_ref[s + 1]
        x0 = gidx_ref[s + 2]
        x1 = gidx_ref[s + 3]
        w00 = gwts_ref[s]
        w01 = gwts_ref[s + 1]
        w10 = gwts_ref[s + 2]
        w11 = gwts_ref[s + 3]
        row0 = feat_ref[r0].astype(jnp.float32)             # (W, C_OUT)
        row1 = feat_ref[r1].astype(jnp.float32)
        is0 = col == x0
        is1 = col == x1
        wc0 = jnp.where(is0, w00, 0.0) + jnp.where(is1, w01, 0.0)
        wc1 = jnp.where(is0, w10, 0.0) + jnp.where(is1, w11, 0.0)
        gval = jnp.sum(row0 * wc0 + row1 * wc1, axis=0, keepdims=True)  # (1, C_OUT)
        g_ref[r:r + 1, :] = gval

    # trans_poly with trans_fuse algebraically folded in (done in the wrapper).
    acc_ref[...] += jnp.dot(g_ref[...].astype(jnp.bfloat16), wp_ref[0],
                            preferred_element_type=jnp.float32)

    @pl.when(p == k_pts - 1)
    def _finalize():
        out_ref[...] = (acc_ref[...] + bf_ref[...]) * stride + init_ref[...]


def global_deform_pallas(gidx, gwts, feat_rows, wp_fused, bf, init_pad, *,
                         k_pts, w, stride):
    n_pad, p2_pad = init_pad.shape
    bh, _, c_out = feat_rows.shape
    n_tiles = n_pad // TILE_N
    flops = 2 * n_pad * k_pts * c_out * p2_pad + 8 * n_pad * k_pts * w * c_out
    bytes_accessed = ((feat_rows.size + wp_fused.size) * 2
                      + (init_pad.size + n_pad * p2_pad + gidx.size
                         + gwts.size + bf.size) * 4)
    return pl.pallas_call(
        functools.partial(deform_kernel, k_pts=k_pts, tile_n=TILE_N, w=w,
                          stride=stride),
        out_shape=jax.ShapeDtypeStruct((n_pad, p2_pad), jnp.float32),
        grid_spec=pltpu.PrefetchScalarGridSpec(
            num_scalar_prefetch=2,
            grid=(n_tiles, k_pts),
            in_specs=[
                pl.BlockSpec((bh, w, c_out), lambda i, p, gi, gw: (0, 0, 0)),
                pl.BlockSpec((1, c_out, p2_pad), lambda i, p, gi, gw: (p, 0, 0)),
                pl.BlockSpec((1, p2_pad), lambda i, p, gi, gw: (0, 0)),
                pl.BlockSpec((TILE_N, p2_pad), lambda i, p, gi, gw: (i, 0)),
            ],
            out_specs=pl.BlockSpec((TILE_N, p2_pad), lambda i, p, gi, gw: (i, 0)),
            scratch_shapes=[pltpu.VMEM((TILE_N, p2_pad), jnp.float32),
                            pltpu.VMEM((TILE_N, c_out), jnp.float32)],
        ),
        compiler_params=pltpu.CompilerParams(
            dimension_semantics=("parallel", "arbitrary")),
        cost_estimate=pl.CostEstimate(flops=int(flops), transcendentals=0,
                                      bytes_accessed=int(bytes_accessed)),
    )(gidx, gwts, feat_rows, wp_fused, bf, init_pad)


# ------------------------------- JAX glue -----------------------------------
def _gather_tables(points, ct_img_idx, n_pad, b, h, w):
    """Per (polygon, point): two feature-row indices (img*H + y0/y1, clamped),
    two column indices and four bilinear corner weights, matching
    F.grid_sample(bilinear, zeros padding, align_corners=False) composed with
    get_gcn_feature's coord/(size/2)-1 normalization (net: pixel coord - 0.5).
    Out-of-image corners get weight 0 and clamped (always in-bounds) indices."""
    n, k, _ = points.shape
    ix = points[..., 0] - 0.5
    iy = points[..., 1] - 0.5
    x0f = jnp.floor(ix)
    y0f = jnp.floor(iy)
    wx1 = ix - x0f
    wx0 = 1.0 - wx1
    wy1 = iy - y0f
    wy0 = 1.0 - wy1
    x0 = x0f.astype(jnp.int32)
    y0 = y0f.astype(jnp.int32)
    x1 = x0 + 1
    y1 = y0 + 1
    vx0 = (x0 >= 0) & (x0 < w)
    vx1 = (x1 >= 0) & (x1 < w)
    vy0 = (y0 >= 0) & (y0 < h)
    vy1 = (y1 >= 0) & (y1 < h)
    img = jnp.clip(ct_img_idx.astype(jnp.int32), 0, b - 1)[:, None]
    r0 = img * h + jnp.clip(y0, 0, h - 1)
    r1 = img * h + jnp.clip(y1, 0, h - 1)
    c0 = jnp.clip(x0, 0, w - 1)
    c1 = jnp.clip(x1, 0, w - 1)
    w00 = jnp.where(vy0 & vx0, wy0 * wx0, 0.0)
    w01 = jnp.where(vy0 & vx1, wy0 * wx1, 0.0)
    w10 = jnp.where(vy1 & vx0, wy1 * wx0, 0.0)
    w11 = jnp.where(vy1 & vx1, wy1 * wx1, 0.0)
    idx = jnp.stack([r0, r1, c0, c1], axis=-1)               # (N, K, 4)
    wts = jnp.stack([w00, w01, w10, w11], axis=-1)           # (N, K, 4)
    idx = jnp.zeros((n_pad, k, 4), jnp.int32).at[:n].set(idx)
    wts = jnp.zeros((n_pad, k, 4), jnp.float32).at[:n].set(wts)
    return idx.reshape(-1), wts.reshape(-1)


def init_params(key):
    k = jax.random.split(key, 6)
    return {
        "w1": 0.05 * jax.random.normal(k[0], (C_MID, C_IN, 3, 3), jnp.float32),
        "b1": 0.05 * jax.random.normal(k[1], (C_MID,), jnp.float32),
        "w2": 0.05 * jax.random.normal(k[2], (C_OUT, C_MID, 1, 1), jnp.float32),
        "b2": 0.05 * jax.random.normal(k[3], (C_OUT,), jnp.float32),
        # nn.Linear stores (out_features, in_features)
        "wp": 0.02 * jax.random.normal(k[4], (NUM_POINT * 4, (NUM_POINT + 1) * C_OUT),
                                       jnp.float32),
        "wf": 0.02 * jax.random.normal(k[5], (NUM_POINT * 2, NUM_POINT * 4),
                                       jnp.float32),
        "bf": 0.01 * jnp.arange(NUM_POINT * 2, dtype=jnp.float32),
    }


@functools.partial(jax.jit, static_argnames=("ignore",))
def refine_forward(params, feature, ct_polys, init_polys, ct_img_idx, ignore=False):
    if ignore or init_polys.shape[0] == 0:
        return init_polys

    b, c_in, h, w = feature.shape
    n, p_pts, _ = init_polys.shape
    k = p_pts + 1
    p2 = p_pts * 2
    n_pad = _round_up(n, TILE_N)
    p2_pad = _round_up(p2, LANE)

    # ---- trans_feature operands (NHWC, spatial flattened, bf16 operands) ----
    x_flat = jnp.transpose(feature, (0, 2, 3, 1)).reshape(b, h * w, c_in)
    x_flat = x_flat.astype(jnp.bfloat16)
    w1_taps = jnp.transpose(params["w1"], (2, 3, 1, 0)).reshape(9, c_in, C_MID)
    w1_taps = w1_taps.astype(jnp.bfloat16)
    b1 = params["b1"].reshape(1, C_MID).astype(jnp.float32)
    w2 = params["w2"].reshape(C_OUT, C_MID).T.astype(jnp.bfloat16)
    b2 = params["b2"].reshape(1, C_OUT).astype(jnp.float32)

    feat = trans_feature_pallas(x_flat, w1_taps, b1, w2, b2, h=h, w=w)
    feat_rows = feat.reshape(b * h, w, C_OUT)      # row-slab layout for the gather

    # ---- bilinear gather tables (SMEM scalars, scalar-prefetched) ----
    points = jnp.concatenate([ct_polys[:, None, :], init_polys], axis=1)  # (N,K,2)
    gidx, gwts = _gather_tables(points, ct_img_idx, n_pad, b, h, w)

    # ---- global_deform weights: fold trans_fuse into trans_poly and absorb
    #      the channel-major flatten into per-point (64, P*2) chunks ----
    # PyTorch x_feat[n, c*(P+1)+p] = gcn[n, c, p]  =>  wp_r[p, c, m] = wp[m, c*(P+1)+p]
    wp_r = params["wp"].reshape(p_pts * 4, C_OUT, k).transpose(2, 1, 0)   # (K,64,P*4)
    wp_fused = jnp.einsum("pcm,jm->pcj", wp_r, params["wf"])              # (K,64,P*2)
    wp_fused = jnp.pad(wp_fused, ((0, 0), (0, 0), (0, p2_pad - p2)))
    wp_fused = wp_fused.astype(jnp.bfloat16)
    bf = jnp.pad(params["bf"], (0, p2_pad - p2)).reshape(1, p2_pad)
    bf = bf.astype(jnp.float32)
    init_pad = jnp.zeros((n_pad, p2_pad), jnp.float32)
    init_pad = init_pad.at[:n, :p2].set(init_polys.reshape(n, p2))

    out = global_deform_pallas(gidx, gwts, feat_rows, wp_fused, bf, init_pad,
                               k_pts=k, w=w, stride=STRIDE)
    return out[:n, :p2].reshape(n, p_pts, 2)


# --------------------------- pure-JAX reference ------------------------------
def refine_reference(params, feature, ct_polys, init_polys, ct_img_idx):
    b, c_in, h, w = feature.shape
    n, p_pts, _ = init_polys.shape
    k = p_pts + 1
    x = lax.conv_general_dilated(feature, params["w1"], (1, 1), ((1, 1), (1, 1)),
                                 dimension_numbers=("NCHW", "OIHW", "NCHW"))
    x = jnp.maximum(x + params["b1"][None, :, None, None], 0.0)
    feat = lax.conv_general_dilated(x, params["w2"], (1, 1), ((0, 0), (0, 0)),
                                    dimension_numbers=("NCHW", "OIHW", "NCHW"))
    feat = feat + params["b2"][None, :, None, None]               # (B, 64, H, W)

    pts = jnp.concatenate([ct_polys[:, None, :], init_polys], axis=1)   # (N, K, 2)
    ix = pts[..., 0] - 0.5
    iy = pts[..., 1] - 0.5
    x0 = jnp.floor(ix)
    y0 = jnp.floor(iy)
    wx1 = ix - x0
    wy1 = iy - y0
    feat_n = feat[ct_img_idx].reshape(n, C_OUT, h * w)            # (N, 64, HW)

    def corner(yc, xc, wgt):
        valid = (xc >= 0) & (xc <= w - 1) & (yc >= 0) & (yc <= h - 1)
        xi = jnp.clip(xc, 0, w - 1).astype(jnp.int32)
        yi = jnp.clip(yc, 0, h - 1).astype(jnp.int32)
        v = jnp.take_along_axis(feat_n, (yi * w + xi)[:, None, :], axis=2)
        return jnp.where(valid, wgt, 0.0)[:, None, :] * v         # (N, 64, K)

    gcn = (corner(y0, x0, (1 - wy1) * (1 - wx1))
           + corner(y0, x0 + 1, (1 - wy1) * wx1)
           + corner(y0 + 1, x0, wy1 * (1 - wx1))
           + corner(y0 + 1, x0 + 1, wy1 * wx1))
    x_feat = gcn.reshape(n, C_OUT * k)
    off = x_feat @ params["wp"].T @ params["wf"].T + params["bf"]
    return off.reshape(n, p_pts, 2) * STRIDE + init_polys


# --------------------------------- demo --------------------------------------
if __name__ == "__main__":
    key = jax.random.PRNGKey(0)
    kparam, kfeat, kct, kinit = jax.random.split(key, 4)

    params = init_params(kparam)
    feature = jax.random.normal(kfeat, (B, C_IN, H, W), jnp.float32)
    ct_polys = jax.random.uniform(kct, (POLY_NUM, 2), jnp.float32, 1.0, W - 1.0)
    init_polys = jax.random.uniform(kinit, (POLY_NUM, NUM_POINT, 2),
                                    jnp.float32, 0.0, float(W))
    ct_img_idx = jnp.array([0, 0, 0, 1, 1, 1], dtype=jnp.int32)

    coarse = refine_forward(params, feature, ct_polys, init_polys, ct_img_idx)
    coarse = jax.block_until_ready(coarse)

    assert coarse.shape == (POLY_NUM, NUM_POINT, 2)
    assert bool(jnp.all(jnp.isfinite(coarse)))

    ref = refine_reference(params, feature, ct_polys, init_polys, ct_img_idx)
    max_err = float(jnp.max(jnp.abs(coarse - ref)))
    assert max_err < 5e-2, f"max abs error vs reference: {max_err}"
    print("KERNEL_OK")
</pallas_src>

<mosaic_0001>
module attributes {stable_mosaic.version = 11 : i64} {
  func.func @conv_kernel(%arg0: i32, %arg1: memref<1x256x4xbf16, #tpu.memory_space<vmem>>, %arg2: memref<9x4x256xbf16, #tpu.memory_space<vmem>>, %arg3: memref<1x256xf32, #tpu.memory_space<vmem>>, %arg4: memref<256x64xbf16, #tpu.memory_space<vmem>>, %arg5: memref<1x64xf32, #tpu.memory_space<vmem>>, %arg6: memref<1x256x64xbf16, #tpu.memory_space<vmem>>) attributes {dimension_semantics = [#tpu.dimension_semantics<parallel>], iteration_bounds = array<i64: 2>, scalar_prefetch = 0 : i64, scratch_operands = 0 : i64, tpu.core_type = #tpu.core_type<tc>, window_params = [{transform_indices = @transform_0, window_bounds = array<i64: 1, 256, 4>}, {pipeline_mode = #tpu.pipeline_mode<synchronous>, transform_indices = @transform_1, window_bounds = array<i64: 9, 4, 256>}, {pipeline_mode = #tpu.pipeline_mode<synchronous>, transform_indices = @transform_2, window_bounds = array<i64: 1, 256>}, {pipeline_mode = #tpu.pipeline_mode<synchronous>, transform_indices = @transform_3, window_bounds = array<i64: 256, 64>}, {pipeline_mode = #tpu.pipeline_mode<synchronous>, transform_indices = @transform_4, window_bounds = array<i64: 1, 64>}, {transform_indices = @transform_5, window_bounds = array<i64: 1, 256, 64>}]} {
    %c0 = arith.constant 0 : index
    %c0_0 = arith.constant 0 : index
    %c0_1 = arith.constant 0 : index
    %0 = vector.load %arg1[%c0, %c0_0, %c0_1] : memref<1x256x4xbf16, #tpu.memory_space<vmem>>, vector<1x256x4xbf16>
    %1 = vector.shape_cast %0 : vector<1x256x4xbf16> to vector<256x4xbf16>
    %2 = arith.extf %1 : vector<256x4xbf16> to vector<256x4xf32>
    %cst = arith.constant 0.000000e+00 : f32
    %3 = vector.broadcast %cst : f32 to vector<17x4xf32>
    %4 = tpu.concatenate %3, %2, %3 in 0 : vector<17x4xf32>, vector<256x4xf32>, vector<17x4xf32> -> vector<290x4xf32>
    %5 = tpu.iota {dimensions = array<i32: 0>} : vector<256x1xi32>
    %c16_i32 = arith.constant 16 : i32
    %c0_i32 = arith.constant 0 : i32
    %6 = arith.cmpi eq, %c16_i32, %c0_i32 : i32
    %c1_i32 = arith.constant 1 : i32
    %7 = arith.select %6, %c1_i32, %c16_i32 : i32
    %8 = vector.broadcast %7 : i32 to vector<256x1xi32>
    %9 = arith.remsi %5, %8 : vector<256x1xi32>
    %c0_i32_2 = arith.constant 0 : i32
    %10 = vector.broadcast %c0_i32_2 : i32 to vector<256x1xi32>
    %11 = arith.cmpi ne, %9, %10 : vector<256x1xi32>
    %c0_i32_3 = arith.constant 0 : i32
    %12 = vector.broadcast %c0_i32_3 : i32 to vector<256x1xi32>
    %13 = arith.cmpi slt, %9, %12 : vector<256x1xi32>
    %c0_i32_4 = arith.constant 0 : i32
    %14 = arith.cmpi slt, %7, %c0_i32_4 : i32
    %15 = vector.broadcast %14 : i1 to vector<256x1xi1>
    %16 = vector.broadcast %15 : vector<256x1xi1> to vector<256x1xi1>
    %17 = arith.xori %13, %16 : vector<256x1xi1>
    %18 = arith.andi %17, %11 : vector<256x1xi1>
    %19 = vector.broadcast %7 : i32 to vector<256x1xi32>
    %20 = arith.addi %9, %19 : vector<256x1xi32>
    %21 = arith.select %18, %20, %9 : vector<256x1xi1>, vector<256x1xi32>
    %cst_5 = arith.constant 0.000000e+00 : f32
    %22 = vector.broadcast %cst_5 : f32 to vector<256x256xf32>
    %23 = vector.extract_strided_slice %4 {offsets = [0, 0], sizes = [256, 4], strides = [1, 1]} : vector<290x4xf32> to vector<256x4xf32>
    %c-1_i32 = arith.constant -1 : i32
    %24 = vector.broadcast %c-1_i32 : i32 to vector<256x1xi32>
    %25 = arith.addi %21, %24 : vector<256x1xi32>
    %c0_i32_6 = arith.constant 0 : i32
    %26 = vector.broadcast %c0_i32_6 : i32 to vector<256x1xi32>
    %27 = arith.cmpi sge, %25, %26 : vector<256x1xi32>
    %c-1_i32_7 = arith.constant -1 : i32
    %28 = vector.broadcast %c-1_i32_7 : i32 to vector<256x1xi32>
    %29 = arith.addi %21, %28 : vector<256x1xi32>
    %c15_i32 = arith.constant 15 : i32
    %30 = vector.broadcast %c15_i32 : i32 to vector<256x1xi32>
    %31 = arith.cmpi sle, %29, %30 : vector<256x1xi32>
    %32 = arith.andi %27, %31 : vector<256x1xi1>
    %cst_8 = arith.constant 0.000000e+00 : f32
    %33 = vector.shape_cast %32 : vector<256x1xi1> to vector<256x1xi1>
    %34 = vector.broadcast %33 : vector<256x1xi1> to vector<256x4xi1>
    %35 = vector.broadcast %cst_8 : f32 to vector<256x4xf32>
    %36 = arith.select %34, %23, %35 : vector<256x4xi1>, vector<256x4xf32>
    %37 = arith.truncf %36 : vector<256x4xf32> to vector<256x4xbf16>
    %c0_9 = arith.constant 0 : index
    %c0_10 = arith.constant 0 : index
    %c0_11 = arith.constant 0 : index
    %38 = vector.load %arg2[%c0_9, %c0_10, %c0_11] : memref<9x4x256xbf16, #tpu.memory_space<vmem>>, vector<1x4x256xbf16>
    %39 = vector.shape_cast %38 : vector<1x4x256xbf16> to vector<4x256xbf16>
    %cst_12 = arith.constant dense<0.000000e+00> : vector<256x256xf32>
    %40 = tpu.matmul %37, %39, %cst_12 {dimension_numbers = #tpu.dot_dimension_numbers<[1], [0], [0], [1], [0, 0, 1, 1], [], []>} : vector<256x4xbf16>, vector<4x256xbf16>, vector<256x256xf32> -> vector<256x256xf32>
    %41 = arith.addf %22, %40 : vector<256x256xf32>
    %42 = vector.extract_strided_slice %4 {offsets = [1, 0], sizes = [256, 4], strides = [1, 1]} : vector<290x4xf32> to vector<256x4xf32>
    %43 = arith.truncf %42 : vector<256x4xf32> to vector<256x4xbf16>
    %c1 = arith.constant 1 : index
    %c0_13 = arith.constant 0 : index
    %c0_14 = arith.constant 0 : index
    %44 = vector.load %arg2[%c1, %c0_13, %c0_14] : memref<9x4x256xbf16, #tpu.memory_space<vmem>>, vector<1x4x256xbf16>
    %45 = vector.shape_cast %44 : vector<1x4x256xbf16> to vector<4x256xbf16>
    %cst_15 = arith.constant dense<0.000000e+00> : vector<256x256xf32>
    %46 = tpu.matmul %43, %45, %cst_15 {dimension_numbers = #tpu.dot_dimension_numbers<[1], [0], [0], [1], [0, 0, 1, 1], [], []>} : vector<256x4xbf16>, vector<4x256xbf16>, vector<256x256xf32> -> vector<256x256xf32>
    %47 = arith.addf %41, %46 : vector<256x256xf32>
    %48 = vector.extract_strided_slice %4 {offsets = [2, 0], sizes = [256, 4], strides = [1, 1]} : vector<290x4xf32> to vector<256x4xf32>
    %c1_i32_16 = arith.constant 1 : i32
    %49 = vector.broadcast %c1_i32_16 : i32 to vector<256x1xi32>
    %50 = arith.addi %21, %49 : vector<256x1xi32>
    %c0_i32_17 = arith.constant 0 : i32
    %51 = vector.broadcast %c0_i32_17 : i32 to vector<256x1xi32>
    %52 = arith.cmpi sge, %50, %51 : vector<256x1xi32>
    %c1_i32_18 = arith.constant 1 : i32
    %53 = vector.broadcast %c1_i32_18 : i32 to vector<256x1xi32>
    %54 = arith.addi %21, %53 : vector<256x1xi32>
    %c15_i32_19 = arith.constant 15 : i32
    %55 = vector.broadcast %c15_i32_19 : i32 to vector<256x1xi32>
    %56 = arith.cmpi sle, %54, %55 : vector<256x1xi32>
    %57 = arith.andi %52, %56 : vector<256x1xi1>
    %cst_20 = arith.constant 0.000000e+00 : f32
    %58 = vector.shape_cast %57 : vector<256x1xi1> to vector<256x1xi1>
    %59 = vector.broadcast %58 : vector<256x1xi1> to vector<256x4xi1>
    %60 = vector.broadcast %cst_20 : f32 to vector<256x4xf32>
    %61 = arith.select %59, %48, %60 : vector<256x4xi1>, vector<256x4xf32>
    %62 = arith.truncf %61 : vector<256x4xf32> to vector<256x4xbf16>
    %c2 = arith.constant 2 : index
    %c0_21 = arith.constant 0 : index
    %c0_22 = arith.constant 0 : index
    %63 = vector.load %arg2[%c2, %c0_21, %c0_22] : memref<9x4x256xbf16, #tpu.memory_space<vmem>>, vector<1x4x256xbf16>
    %64 = vector.shape_cast %63 : vector<1x4x256xbf16> to vector<4x256xbf16>
    %cst_23 = arith.constant dense<0.000000e+00> : vector<256x256xf32>
    %65 = tpu.matmul %62, %64, %cst_23 {dimension_numbers = #tpu.dot_dimension_numbers<[1], [0], [0], [1], [0, 0, 1, 1], [], []>} : vector<256x4xbf16>, vector<4x256xbf16>, vector<256x256xf32> -> vector<256x256xf32>
    %66 = arith.addf %47, %65 : vector<256x256xf32>
    %67 = vector.extract_strided_slice %4 {offsets = [16, 0], sizes = [256, 4], strides = [1, 1]} : vector<290x4xf32> to vector<256x4xf32>
    %c-1_i32_24 = arith.constant -1 : i32
    %68 = vector.broadcast %c-1_i32_24 : i32 to vector<256x1xi32>
    %69 = arith.addi %21, %68 : vector<256x1xi32>
    %c0_i32_25 = arith.constant 0 : i32
    %70 = vector.broadcast %c0_i32_25 : i32 to vector<256x1xi32>
    %71 = arith.cmpi sge, %69, %70 : vector<256x1xi32>
    %c-1_i32_26 = arith.constant -1 : i32
    %72 = vector.broadcast %c-1_i32_26 : i32 to vector<256x1xi32>
    %73 = arith.addi %21, %72 : vector<256x1xi32>
    %c15_i32_27 = arith.constant 15 : i32
    %74 = vector.broadcast %c15_i32_27 : i32 to vector<256x1xi32>
    %75 = arith.cmpi sle, %73, %74 : vector<256x1xi32>
    %76 = arith.andi %71, %75 : vector<256x1xi1>
    %cst_28 = arith.constant 0.000000e+00 : f32
    %77 = vector.shape_cast %76 : vector<256x1xi1> to vector<256x1xi1>
    %78 = vector.broadcast %77 : vector<256x1xi1> to vector<256x4xi1>
    %79 = vector.broadcast %cst_28 : f32 to vector<256x4xf32>
    %80 = arith.select %78, %67, %79 : vector<256x4xi1>, vector<256x4xf32>
    %81 = arith.truncf %80 : vector<256x4xf32> to vector<256x4xbf16>
    %c3 = arith.constant 3 : index
    %c0_29 = arith.constant 0 : index
    %c0_30 = arith.constant 0 : index
    %82 = vector.load %arg2[%c3, %c0_29, %c0_30] : memref<9x4x256xbf16, #tpu.memory_space<vmem>>, vector<1x4x256xbf16>
    %83 = vector.shape_cast %82 : vector<1x4x256xbf16> to vector<4x256xbf16>
    %cst_31 = arith.constant dense<0.000000e+00> : vector<256x256xf32>
    %84 = tpu.matmul %81, %83, %cst_31 {dimension_numbers = #tpu.dot_dimension_numbers<[1], [0], [0], [1], [0, 0, 1, 1], [], []>} : vector<256x4xbf16>, vector<4x256xbf16>, vector<256x256xf32> -> vector<256x256xf32>
    %85 = arith.addf %66, %84 : vector<256x256xf32>
    %86 = vector.extract_strided_slice %4 {offsets = [17, 0], sizes = [256, 4], strides = [1, 1]} : vector<290x4xf32> to vector<256x4xf32>
    %87 = arith.truncf %86 : vector<256x4xf32> to vector<256x4xbf16>
    %c4 = arith.constant 4 : index
    %c0_32 = arith.constant 0 : index
    %c0_33 = arith.constant 0 : index
    %88 = vector.load %arg2[%c4, %c0_32, %c0_33] : memref<9x4x256xbf16, #tpu.memory_space<vmem>>, vector<1x4x256xbf16>
    %89 = vector.shape_cast %88 : vector<1x4x256xbf16> to vector<4x256xbf16>
    %cst_34 = arith.constant dense<0.000000e+00> : vector<256x256xf32>
    %90 = tpu.matmul %87, %89, %cst_34 {dimension_numbers = #tpu.dot_dimension_numbers<[1], [0], [0], [1], [0, 0, 1, 1], [], []>} : vector<256x4xbf16>, vector<4x256xbf16>, vector<256x256xf32> -> vector<256x256xf32>
    %91 = arith.addf %85, %90 : vector<256x256xf32>
    %92 = vector.extract_strided_slice %4 {offsets = [18, 0], sizes = [256, 4], strides = [1, 1]} : vector<290x4xf32> to vector<256x4xf32>
    %c1_i32_35 = arith.constant 1 : i32
    %93 = vector.broadcast %c1_i32_35 : i32 to vector<256x1xi32>
    %94 = arith.addi %21, %93 : vector<256x1xi32>
    %c0_i32_36 = arith.constant 0 : i32
    %95 = vector.broadcast %c0_i32_36 : i32 to vector<256x1xi32>
    %96 = arith.cmpi sge, %94, %95 : vector<256x1xi32>
    %c1_i32_37 = arith.constant 1 : i32
    %97 = vector.broadcast %c1_i32_37 : i32 to vector<256x1xi32>
    %98 = arith.addi %21, %97 : vector<256x1xi32>
    %c15_i32_38 = arith.constant 15 : i32
    %99 = vector.broadcast %c15_i32_38 : i32 to vector<256x1xi32>
    %100 = arith.cmpi sle, %98, %99 : vector<256x1xi32>
    %101 = arith.andi %96, %100 : vector<256x1xi1>
    %cst_39 = arith.constant 0.000000e+00 : f32
    %102 = vector.shape_cast %101 : vector<256x1xi1> to vector<256x1xi1>
    %103 = vector.broadcast %102 : vector<256x1xi1> to vector<256x4xi1>
    %104 = vector.broadcast %cst_39 : f32 to vector<256x4xf32>
    %105 = arith.select %103, %92, %104 : vector<256x4xi1>, vector<256x4xf32>
    %106 = arith.truncf %105 : vector<256x4xf32> to vector<256x4xbf16>
    %c5 = arith.constant 5 : index
    %c0_40 = arith.constant 0 : index
    %c0_41 = arith.constant 0 : index
    %107 = vector.load %arg2[%c5, %c0_40, %c0_41] : memref<9x4x256xbf16, #tpu.memory_space<vmem>>, vector<1x4x256xbf16>
    %108 = vector.shape_cast %107 : vector<1x4x256xbf16> to vector<4x256xbf16>
    %cst_42 = arith.constant dense<0.000000e+00> : vector<256x256xf32>
    %109 = tpu.matmul %106, %108, %cst_42 {dimension_numbers = #tpu.dot_dimension_numbers<[1], [0], [0], [1], [0, 0, 1, 1], [], []>} : vector<256x4xbf16>, vector<4x256xbf16>, vector<256x256xf32> -> vector<256x256xf32>
    %110 = arith.addf %91, %109 : vector<256x256xf32>
    %111 = vector.extract_strided_slice %4 {offsets = [32, 0], sizes = [256, 4], strides = [1, 1]} : vector<290x4xf32> to vector<256x4xf32>
    %c-1_i32_43 = arith.constant -1 : i32
    %112 = vector.broadcast %c-1_i32_43 : i32 to vector<256x1xi32>
    %113 = arith.addi %21, %112 : vector<256x1xi32>
    %c0_i32_44 = arith.constant 0 : i32
    %114 = vector.broadcast %c0_i32_44 : i32 to vector<256x1xi32>
    %115 = arith.cmpi sge, %113, %114 : vector<256x1xi32>
    %c-1_i32_45 = arith.constant -1 : i32
    %116 = vector.broadcast %c-1_i32_45 : i32 to vector<256x1xi32>
    %117 = arith.addi %21, %116 : vector<256x1xi32>
    %c15_i32_46 = arith.constant 15 : i32
    %118 = vector.broadcast %c15_i32_46 : i32 to vector<256x1xi32>
    %119 = arith.cmpi sle, %117, %118 : vector<256x1xi32>
    %120 = arith.andi %115, %119 : vector<256x1xi1>
    %cst_47 = arith.constant 0.000000e+00 : f32
    %121 = vector.shape_cast %120 : vector<256x1xi1> to vector<256x1xi1>
    %122 = vector.broadcast %121 : vector<256x1xi1> to vector<256x4xi1>
    %123 = vector.broadcast %cst_47 : f32 to vector<256x4xf32>
    %124 = arith.select %122, %111, %123 : vector<256x4xi1>, vector<256x4xf32>
    %125 = arith.truncf %124 : vector<256x4xf32> to vector<256x4xbf16>
    %c6 = arith.constant 6 : index
    %c0_48 = arith.constant 0 : index
    %c0_49 = arith.constant 0 : index
    %126 = vector.load %arg2[%c6, %c0_48, %c0_49] : memref<9x4x256xbf16, #tpu.memory_space<vmem>>, vector<1x4x256xbf16>
    %127 = vector.shape_cast %126 : vector<1x4x256xbf16> to vector<4x256xbf16>
    %cst_50 = arith.constant dense<0.000000e+00> : vector<256x256xf32>
    %128 = tpu.matmul %125, %127, %cst_50 {dimension_numbers = #tpu.dot_dimension_numbers<[1], [0], [0], [1], [0, 0, 1, 1], [], []>} : vector<256x4xbf16>, vector<4x256xbf16>, vector<256x256xf32> -> vector<256x256xf32>
    %129 = arith.addf %110, %128 : vector<256x256xf32>
    %130 = vector.extract_strided_slice %4 {offsets = [33, 0], sizes = [256, 4], strides = [1, 1]} : vector<290x4xf32> to vector<256x4xf32>
    %131 = arith.truncf %130 : vector<256x4xf32> to vector<256x4xbf16>
    %c7 = arith.constant 7 : index
    %c0_51 = arith.constant 0 : index
    %c0_52 = arith.constant 0 : index
    %132 = vector.load %arg2[%c7, %c0_51, %c0_52] : memref<9x4x256xbf16, #tpu.memory_space<vmem>>, vector<1x4x256xbf16>
    %133 = vector.shape_cast %132 : vector<1x4x256xbf16> to vector<4x256xbf16>
    %cst_53 = arith.constant dense<0.000000e+00> : vector<256x256xf32>
    %134 = tpu.matmul %131, %133, %cst_53 {dimension_numbers = #tpu.dot_dimension_numbers<[1], [0], [0], [1], [0, 0, 1, 1], [], []>} : vector<256x4xbf16>, vector<4x256xbf16>, vector<256x256xf32> -> vector<256x256xf32>
    %135 = arith.addf %129, %134 : vector<256x256xf32>
    %136 = vector.extract_strided_slice %4 {offsets = [34, 0], sizes = [256, 4], strides = [1, 1]} : vector<290x4xf32> to vector<256x4xf32>
    %c1_i32_54 = arith.constant 1 : i32
    %137 = vector.broadcast %c1_i32_54 : i32 to vector<256x1xi32>
    %138 = arith.addi %21, %137 : vector<256x1xi32>
    %c0_i32_55 = arith.constant 0 : i32
    %139 = vector.broadcast %c0_i32_55 : i32 to vector<256x1xi32>
    %140 = arith.cmpi sge, %138, %139 : vector<256x1xi32>
    %c1_i32_56 = arith.constant 1 : i32
    %141 = vector.broadcast %c1_i32_56 : i32 to vector<256x1xi32>
    %142 = arith.addi %21, %141 : vector<256x1xi32>
    %c15_i32_57 = arith.constant 15 : i32
    %143 = vector.broadcast %c15_i32_57 : i32 to vector<256x1xi32>
    %144 = arith.cmpi sle, %142, %143 : vector<256x1xi32>
    %145 = arith.andi %140, %144 : vector<256x1xi1>
    %cst_58 = arith.constant 0.000000e+00 : f32
    %146 = vector.shape_cast %145 : vector<256x1xi1> to vector<256x1xi1>
    %147 = vector.broadcast %146 : vector<256x1xi1> to vector<256x4xi1>
    %148 = vector.broadcast %cst_58 : f32 to vector<256x4xf32>
    %149 = arith.select %147, %136, %148 : vector<256x4xi1>, vector<256x4xf32>
    %150 = arith.truncf %149 : vector<256x4xf32> to vector<256x4xbf16>
    %c8 = arith.constant 8 : index
    %c0_59 = arith.constant 0 : index
    %c0_60 = arith.constant 0 : index
    %151 = vector.load %arg2[%c8, %c0_59, %c0_60] : memref<9x4x256xbf16, #tpu.memory_space<vmem>>, vector<1x4x256xbf16>
    %152 = vector.shape_cast %151 : vector<1x4x256xbf16> to vector<4x256xbf16>
    %cst_61 = arith.constant dense<0.000000e+00> : vector<256x256xf32>
    %153 = tpu.matmul %150, %152, %cst_61 {dimension_numbers = #tpu.dot_dimension_numbers<[1], [0], [0], [1], [0, 0, 1, 1], [], []>} : vector<256x4xbf16>, vector<4x256xbf16>, vector<256x256xf32> -> vector<256x256xf32>
    %154 = arith.addf %135, %153 : vector<256x256xf32>
    %c0_62 = arith.constant 0 : index
    %c0_63 = arith.constant 0 : index
    %155 = vector.load %arg3[%c0_62, %c0_63] : memref<1x256xf32, #tpu.memory_space<vmem>>, vector<1x256xf32>
    %156 = vector.broadcast %155 : vector<1x256xf32> to vector<256x256xf32>
    %157 = arith.addf %154, %156 : vector<256x256xf32>
    %cst_64 = arith.constant 0.000000e+00 : f32
    %158 = vector.broadcast %cst_64 : f32 to vector<256x256xf32>
    %159 = arith.maximumf %157, %158 : vector<256x256xf32>
    %160 = arith.truncf %159 : vector<256x256xf32> to vector<256x256xbf16>
    %c0_65 = arith.constant 0 : index
    %c0_66 = arith.constant 0 : index
    %161 = vector.load %arg4[%c0_65, %c0_66] : memref<256x64xbf16, #tpu.memory_space<vmem>>, vector<256x64xbf16>
    %cst_67 = arith.constant dense<0.000000e+00> : vector<256x64xf32>
    %162 = tpu.matmul %160, %161, %cst_67 {dimension_numbers = #tpu.dot_dimension_numbers<[1], [0], [0], [1], [0, 0, 1, 1], [], []>} : vector<256x256xbf16>, vector<256x64xbf16>, vector<256x64xf32> -> vector<256x64xf32>
    %c0_68 = arith.constant 0 : index
    %c0_69 = arith.constant 0 : index
    %163 = vector.load %arg5[%c0_68, %c0_69] : memref<1x64xf32, #tpu.memory_space<vmem>>, vector<1x64xf32>
    %164 = vector.broadcast %163 : vector<1x64xf32> to vector<256x64xf32>
    %165 = arith.addf %162, %164 : vector<256x64xf32>
    %166 = arith.truncf %165 : vector<256x64xf32> to vector<256x64xbf16>
    %c0_70 = arith.constant 0 : index
    %c0_71 = arith.constant 0 : index
    %c0_72 = arith.constant 0 : index
    %167 = vector.load %arg6[%c0_70, %c0_71, %c0_72] : memref<1x256x64xbf16, #tpu.memory_space<vmem>>, vector<1x256x64xbf16>
    %168 = vector.shape_cast %167 : vector<1x256x64xbf16> to vector<256x64xbf16>
    %169 = vector.shape_cast %166 : vector<256x64xbf16> to vector<1x256x64xbf16>
    tpu.vector_store %arg6[%c0_70, %c0_71, %c0_72], %169 {strides = array<i32>} : memref<1x256x64xbf16, #tpu.memory_space<vmem>>, vector<1x256x64xbf16>,
    return
  }
  func.func @transform_0(%arg0: i32) -> (i32, i32, i32) {
    %c0_i32 = arith.constant 0 : i32
    %c0_i32_0 = arith.constant 0 : i32
    %c0_i32_1 = arith.constant 0 : i32
    return %arg0, %c0_i32, %c0_i32_0 : i32, i32, i32
  }
  func.func @transform_1(%arg0: i32) -> (i32, i32, i32) {
    %c0_i32 = arith.constant 0 : i32
    %c0_i32_0 = arith.constant 0 : i32
    %c0_i32_1 = arith.constant 0 : i32
    %c0_i32_2 = arith.constant 0 : i32
    return %c0_i32, %c0_i32_0, %c0_i32_1 : i32, i32, i32
  }
  func.func @transform_2(%arg0: i32) -> (i32, i32) {
    %c0_i32 = arith.constant 0 : i32
    %c0_i32_0 = arith.constant 0 : i32
    %c0_i32_1 = arith.constant 0 : i32
    return %c0_i32, %c0_i32_0 : i32, i32
  }
  func.func @transform_3(%arg0: i32) -> (i32, i32) {
    %c0_i32 = arith.constant 0 : i32
    %c0_i32_0 = arith.constant 0 : i32
    %c0_i32_1 = arith.constant 0 : i32
    return %c0_i32, %c0_i32_0 : i32, i32
  }
  func.func @transform_4(%arg0: i32) -> (i32, i32) {
    %c0_i32 = arith.constant 0 : i32
    %c0_i32_0 = arith.constant 0 : i32
    %c0_i32_1 = arith.constant 0 : i32
    return %c0_i32, %c0_i32_0 : i32, i32
  }
  func.func @transform_5(%arg0: i32) -> (i32, i32, i32) {
    %c0_i32 = arith.constant 0 : i32
    %c0_i32_0 = arith.constant 0 : i32
    %c0_i32_1 = arith.constant 0 : i32
    return %arg0, %c0_i32, %c0_i32_0 : i32, i32, i32
  }
}

module attributes {stable_mosaic.version = 11 : i64} {
  func.func @deform_kernel(%arg0: i32, %arg1: i32, %arg2: memref<288xi32, #tpu.memory_space<smem>>, %arg3: memref<288xf32, #tpu.memory_space<smem>>, %arg4: memref<32x16x64xbf16, #tpu.memory_space<vmem>>, %arg5: memref<1x64x128xbf16, #tpu.memory_space<vmem>>, %arg6: memref<1x128xf32, #tpu.memory_space<vmem>>, %arg7: memref<8x128xf32, #tpu.memory_space<vmem>>, %arg8: memref<8x128xf32, #tpu.memory_space<vmem>>, %arg9: memref<8x128xf32, #tpu.memory_space<vmem>>, %arg10: memref<8x64xf32, #tpu.memory_space<vmem>>) attributes {dimension_semantics = [#tpu.dimension_semantics<parallel>, #tpu.dimension_semantics<arbitrary>], iteration_bounds = array<i64: 1, 9>, scalar_prefetch = 2 : i64, scratch_operands = 2 : i64, tpu.core_type = #tpu.core_type<tc>, window_params = [{pipeline_mode = #tpu.pipeline_mode<synchronous>, transform_indices = @transform_0, window_bounds = array<i64: 32, 16, 64>}, {transform_indices = @transform_1, window_bounds = array<i64: 1, 64, 128>}, {pipeline_mode = #tpu.pipeline_mode<synchronous>, transform_indices = @transform_2, window_bounds = array<i64: 1, 128>}, {transform_indices = @transform_3, window_bounds = array<i64: 8, 128>}, {transform_indices = @transform_4, window_bounds = array<i64: 8, 128>}]} {
    %c0_i32 = arith.constant 0 : i32
    %0 = arith.cmpi eq, %arg1, %c0_i32 : i32
    %1 = arith.extui %0 : i1 to i32
    %c0_i32_0 = arith.constant 0 : i32
    %2 = arith.cmpi ne, %1, %c0_i32_0 : i32
    scf.if %2 {
      %cst_163 = arith.constant 0.000000e+00 : f32
      %503 = vector.broadcast %cst_163 : f32 to vector<8x128xf32>
      %c0_164 = arith.constant 0 : index
      %c0_165 = arith.constant 0 : index
      %504 = vector.load %arg9[%c0_164, %c0_165] : memref<8x128xf32, #tpu.memory_space<vmem>>, vector<8x128xf32>
      tpu.vector_store %arg9[%c0_164, %c0_165], %503 {strides = array<i32>} : memref<8x128xf32, #tpu.memory_space<vmem>>, vector<8x128xf32>,
    } else {
    }
    %3 = tpu.iota {dimensions = array<i32: 0>} : vector<16x1xi32>
    %c8_i32 = arith.constant 8 : i32
    %4 = arith.muli %arg0, %c8_i32 : i32
    %c0_i32_1 = arith.constant 0 : i32
    %5 = arith.addi %4, %c0_i32_1 : i32
    %c9_i32 = arith.constant 9 : i32
    %6 = arith.muli %5, %c9_i32 : i32
    %7 = arith.addi %6, %arg1 : i32
    %c4_i32 = arith.constant 4 : i32
    %8 = arith.muli %7, %c4_i32 : i32
    %9 = arith.index_cast %8 : i32 to index
    %10 = memref.load %arg2[%9] : memref<288xi32, #tpu.memory_space<smem>>
    %c1_i32 = arith.constant 1 : i32
    %11 = arith.addi %8, %c1_i32 : i32
    %12 = arith.index_cast %11 : i32 to index
    %13 = memref.load %arg2[%12] : memref<288xi32, #tpu.memory_space<smem>>
    %c2_i32 = arith.constant 2 : i32
    %14 = arith.addi %8, %c2_i32 : i32
    %15 = arith.index_cast %14 : i32 to index
    %16 = memref.load %arg2[%15] : memref<288xi32, #tpu.memory_space<smem>>
    %c3_i32 = arith.constant 3 : i32
    %17 = arith.addi %8, %c3_i32 : i32
    %18 = arith.index_cast %17 : i32 to index
    %19 = memref.load %arg2[%18] : memref<288xi32, #tpu.memory_space<smem>>
    %20 = arith.index_cast %8 : i32 to index
    %21 = memref.load %arg3[%20] : memref<288xf32, #tpu.memory_space<smem>>
    %c1_i32_2 = arith.constant 1 : i32
    %22 = arith.addi %8, %c1_i32_2 : i32
    %23 = arith.index_cast %22 : i32 to index
    %24 = memref.load %arg3[%23] : memref<288xf32, #tpu.memory_space<smem>>
    %c2_i32_3 = arith.constant 2 : i32
    %25 = arith.addi %8, %c2_i32_3 : i32
    %26 = arith.index_cast %25 : i32 to index
    %27 = memref.load %arg3[%26] : memref<288xf32, #tpu.memory_space<smem>>
    %c3_i32_4 = arith.constant 3 : i32
    %28 = arith.addi %8, %c3_i32_4 : i32
    %29 = arith.index_cast %28 : i32 to index
    %30 = memref.load %arg3[%29] : memref<288xf32, #tpu.memory_space<smem>>
    %31 = arith.index_cast %10 : i32 to index
    %c0 = arith.constant 0 : index
    %c0_5 = arith.constant 0 : index
    %32 = vector.load %arg4[%31, %c0, %c0_5] : memref<32x16x64xbf16, #tpu.memory_space<vmem>>, vector<1x16x64xbf16>
    %33 = vector.shape_cast %32 : vector<1x16x64xbf16> to vector<16x64xbf16>
    %34 = arith.extf %33 : vector<16x64xbf16> to vector<16x64xf32>
    %35 = arith.index_cast %13 : i32 to index
    %c0_6 = arith.constant 0 : index
    %c0_7 = arith.constant 0 : index
    %36 = vector.load %arg4[%35, %c0_6, %c0_7] : memref<32x16x64xbf16, #tpu.memory_space<vmem>>, vector<1x16x64xbf16>
    %37 = vector.shape_cast %36 : vector<1x16x64xbf16> to vector<16x64xbf16>
    %38 = arith.extf %37 : vector<16x64xbf16> to vector<16x64xf32>
    %39 = vector.broadcast %16 : i32 to vector<16x1xi32>
    %40 = arith.cmpi eq, %3, %39 : vector<16x1xi32>
    %41 = vector.broadcast %19 : i32 to vector<16x1xi32>
    %42 = arith.cmpi eq, %3, %41 : vector<16x1xi32>
    %cst = arith.constant 0.000000e+00 : f32
    %43 = vector.broadcast %21 : f32 to vector<16x1xf32>
    %44 = vector.broadcast %cst : f32 to vector<16x1xf32>
    %45 = arith.select %40, %43, %44 : vector<16x1xi1>, vector<16x1xf32>
    %cst_8 = arith.constant 0.000000e+00 : f32
    %46 = vector.broadcast %24 : f32 to vector<16x1xf32>
    %47 = vector.broadcast %cst_8 : f32 to vector<16x1xf32>
    %48 = arith.select %42, %46, %47 : vector<16x1xi1>, vector<16x1xf32>
    %49 = arith.addf %45, %48 : vector<16x1xf32>
    %cst_9 = arith.constant 0.000000e+00 : f32
    %50 = vector.broadcast %27 : f32 to vector<16x1xf32>
    %51 = vector.broadcast %cst_9 : f32 to vector<16x1xf32>
    %52 = arith.select %40, %50, %51 : vector<16x1xi1>, vector<16x1xf32>
    %cst_10 = arith.constant 0.000000e+00 : f32
    %53 = vector.broadcast %30 : f32 to vector<16x1xf32>
    %54 = vector.broadcast %cst_10 : f32 to vector<16x1xf32>
    %55 = arith.select %42, %53, %54 : vector<16x1xi1>, vector<16x1xf32>
    %56 = arith.addf %52, %55 : vector<16x1xf32>
    %57 = vector.broadcast %49 : vector<16x1xf32> to vector<16x64xf32>
    %58 = arith.mulf %34, %57 : vector<16x64xf32>
    %59 = vector.broadcast %56 : vector<16x1xf32> to vector<16x64xf32>
    %60 = arith.mulf %38, %59 : vector<16x64xf32>
    %61 = arith.addf %58, %60 : vector<16x64xf32>
    %cst_11 = arith.constant dense<0.000000e+00> : vector<64xf32>
    %62 = vector.multi_reduction <add>, %61, %cst_11 [0] : vector<16x64xf32> to vector<64xf32>
    %63 = vector.shape_cast %62 : vector<64xf32> to vector<1x64xf32>
    %c0_12 = arith.constant 0 : index
    %c0_13 = arith.constant 0 : index
    %64 = vector.load %arg10[%c0_12, %c0_13] : memref<8x64xf32, #tpu.memory_space<vmem>>, vector<1x64xf32>
    tpu.vector_store %arg10[%c0_12, %c0_13], %63 {strides = array<i32>} : memref<8x64xf32, #tpu.memory_space<vmem>>, vector<1x64xf32>,
    %c8_i32_14 = arith.constant 8 : i32
    %65 = arith.muli %arg0, %c8_i32_14 : i32
    %c1_i32_15 = arith.constant 1 : i32
    %66 = arith.addi %65, %c1_i32_15 : i32
    %c9_i32_16 = arith.constant 9 : i32
    %67 = arith.muli %66, %c9_i32_16 : i32
    %68 = arith.addi %67, %arg1 : i32
    %c4_i32_17 = arith.constant 4 : i32
    %69 = arith.muli %68, %c4_i32_17 : i32
    %70 = arith.index_cast %69 : i32 to index
    %71 = memref.load %arg2[%70] : memref<288xi32, #tpu.memory_space<smem>>
    %c1_i32_18 = arith.constant 1 : i32
    %72 = arith.addi %69, %c1_i32_18 : i32
    %73 = arith.index_cast %72 : i32 to index
    %74 = memref.load %arg2[%73] : memref<288xi32, #tpu.memory_space<smem>>
    %c2_i32_19 = arith.constant 2 : i32
    %75 = arith.addi %69, %c2_i32_19 : i32
    %76 = arith.index_cast %75 : i32 to index
    %77 = memref.load %arg2[%76] : memref<288xi32, #tpu.memory_space<smem>>
    %c3_i32_20 = arith.constant 3 : i32
    %78 = arith.addi %69, %c3_i32_20 : i32
    %79 = arith.index_cast %78 : i32 to index
    %80 = memref.load %arg2[%79] : memref<288xi32, #tpu.memory_space<smem>>
    %81 = arith.index_cast %69 : i32 to index
    %82 = memref.load %arg3[%81] : memref<288xf32, #tpu.memory_space<smem>>
    %c1_i32_21 = arith.constant 1 : i32
    %83 = arith.addi %69, %c1_i32_21 : i32
    %84 = arith.index_cast %83 : i32 to index
    %85 = memref.load %arg3[%84] : memref<288xf32, #tpu.memory_space<smem>>
    %c2_i32_22 = arith.constant 2 : i32
    %86 = arith.addi %69, %c2_i32_22 : i32
    %87 = arith.index_cast %86 : i32 to index
    %88 = memref.load %arg3[%87] : memref<288xf32, #tpu.memory_space<smem>>
    %c3_i32_23 = arith.constant 3 : i32
    %89 = arith.addi %69, %c3_i32_23 : i32
    %90 = arith.index_cast %89 : i32 to index
    %91 = memref.load %arg3[%90] : memref<288xf32, #tpu.memory_space<smem>>
    %92 = arith.index_cast %71 : i32 to index
    %c0_24 = arith.constant 0 : index
    %c0_25 = arith.constant 0 : index
    %93 = vector.load %arg4[%92, %c0_24, %c0_25] : memref<32x16x64xbf16, #tpu.memory_space<vmem>>, vector<1x16x64xbf16>
    %94 = vector.shape_cast %93 : vector<1x16x64xbf16> to vector<16x64xbf16>
    %95 = arith.extf %94 : vector<16x64xbf16> to vector<16x64xf32>
    %96 = arith.index_cast %74 : i32 to index
    %c0_26 = arith.constant 0 : index
    %c0_27 = arith.constant 0 : index
    %97 = vector.load %arg4[%96, %c0_26, %c0_27] : memref<32x16x64xbf16, #tpu.memory_space<vmem>>, vector<1x16x64xbf16>
    %98 = vector.shape_cast %97 : vector<1x16x64xbf16> to vector<16x64xbf16>
    %99 = arith.extf %98 : vector<16x64xbf16> to vector<16x64xf32>
    %100 = vector.broadcast %77 : i32 to vector<16x1xi32>
    %101 = arith.cmpi eq, %3, %100 : vector<16x1xi32>
    %102 = vector.broadcast %80 : i32 to vector<16x1xi32>
    %103 = arith.cmpi eq, %3, %102 : vector<16x1xi32>
    %cst_28 = arith.constant 0.000000e+00 : f32
    %104 = vector.broadcast %82 : f32 to vector<16x1xf32>
    %105 = vector.broadcast %cst_28 : f32 to vector<16x1xf32>
    %106 = arith.select %101, %104, %105 : vector<16x1xi1>, vector<16x1xf32>
    %cst_29 = arith.constant 0.000000e+00 : f32
    %107 = vector.broadcast %85 : f32 to vector<16x1xf32>
    %108 = vector.broadcast %cst_29 : f32 to vector<16x1xf32>
    %109 = arith.select %103, %107, %108 : vector<16x1xi1>, vector<16x1xf32>
    %110 = arith.addf %106, %109 : vector<16x1xf32>
    %cst_30 = arith.constant 0.000000e+00 : f32
    %111 = vector.broadcast %88 : f32 to vector<16x1xf32>
    %112 = vector.broadcast %cst_30 : f32 to vector<16x1xf32>
    %113 = arith.select %101, %111, %112 : vector<16x1xi1>, vector<16x1xf32>
    %cst_31 = arith.constant 0.000000e+00 : f32
    %114 = vector.broadcast %91 : f32 to vector<16x1xf32>
    %115 = vector.broadcast %cst_31 : f32 to vector<16x1xf32>
    %116 = arith.select %103, %114, %115 : vector<16x1xi1>, vector<16x1xf32>
    %117 = arith.addf %113, %116 : vector<16x1xf32>
    %118 = vector.broadcast %110 : vector<16x1xf32> to vector<16x64xf32>
    %119 = arith.mulf %95, %118 : vector<16x64xf32>
    %120 = vector.broadcast %117 : vector<16x1xf32> to vector<16x64xf32>
    %121 = arith.mulf %99, %120 : vector<16x64xf32>
    %122 = arith.addf %119, %121 : vector<16x64xf32>
    %cst_32 = arith.constant dense<0.000000e+00> : vector<64xf32>
    %123 = vector.multi_reduction <add>, %122, %cst_32 [0] : vector<16x64xf32> to vector<64xf32>
    %124 = vector.shape_cast %123 : vector<64xf32> to vector<1x64xf32>
    %c1 = arith.constant 1 : index
    %c0_33 = arith.constant 0 : index
    %125 = vector.load %arg10[%c1, %c0_33] : memref<8x64xf32, #tpu.memory_space<vmem>>, vector<1x64xf32>
    tpu.vector_store %arg10[%c1, %c0_33], %124 {strides = array<i32>} : memref<8x64xf32, #tpu.memory_space<vmem>>, vector<1x64xf32>,
    %c8_i32_34 = arith.constant 8 : i32
    %126 = arith.muli %arg0, %c8_i32_34 : i32
    %c2_i32_35 = arith.constant 2 : i32
    %127 = arith.addi %126, %c2_i32_35 : i32
    %c9_i32_36 = arith.constant 9 : i32
    %128 = arith.muli %127, %c9_i32_36 : i32
    %129 = arith.addi %128, %arg1 : i32
    %c4_i32_37 = arith.constant 4 : i32
    %130 = arith.muli %129, %c4_i32_37 : i32
    %131 = arith.index_cast %130 : i32 to index
    %132 = memref.load %arg2[%131] : memref<288xi32, #tpu.memory_space<smem>>
    %c1_i32_38 = arith.constant 1 : i32
    %133 = arith.addi %130, %c1_i32_38 : i32
    %134 = arith.index_cast %133 : i32 to index
    %135 = memref.load %arg2[%134] : memref<288xi32, #tpu.memory_space<smem>>
    %c2_i32_39 = arith.constant 2 : i32
    %136 = arith.addi %130, %c2_i32_39 : i32
    %137 = arith.index_cast %136 : i32 to index
    %138 = memref.load %arg2[%137] : memref<288xi32, #tpu.memory_space<smem>>
    %c3_i32_40 = arith.constant 3 : i32
    %139 = arith.addi %130, %c3_i32_40 : i32
    %140 = arith.index_cast %139 : i32 to index
    %141 = memref.load %arg2[%140] : memref<288xi32, #tpu.memory_space<smem>>
    %142 = arith.index_cast %130 : i32 to index
    %143 = memref.load %arg3[%142] : memref<288xf32, #tpu.memory_space<smem>>
    %c1_i32_41 = arith.constant 1 : i32
    %144 = arith.addi %130, %c1_i32_41 : i32
    %145 = arith.index_cast %144 : i32 to index
    %146 = memref.load %arg3[%145] : memref<288xf32, #tpu.memory_space<smem>>
    %c2_i32_42 = arith.constant 2 : i32
    %147 = arith.addi %130, %c2_i32_42 : i32
    %148 = arith.index_cast %147 : i32 to index
    %149 = memref.load %arg3[%148] : memref<288xf32, #tpu.memory_space<smem>>
    %c3_i32_43 = arith.constant 3 : i32
    %150 = arith.addi %130, %c3_i32_43 : i32
    %151 = arith.index_cast %150 : i32 to index
    %152 = memref.load %arg3[%151] : memref<288xf32, #tpu.memory_space<smem>>
    %153 = arith.index_cast %132 : i32 to index
    %c0_44 = arith.constant 0 : index
    %c0_45 = arith.constant 0 : index
    %154 = vector.load %arg4[%153, %c0_44, %c0_45] : memref<32x16x64xbf16, #tpu.memory_space<vmem>>, vector<1x16x64xbf16>
    %155 = vector.shape_cast %154 : vector<1x16x64xbf16> to vector<16x64xbf16>
    %156 = arith.extf %155 : vector<16x64xbf16> to vector<16x64xf32>
    %157 = arith.index_cast %135 : i32 to index
    %c0_46 = arith.constant 0 : index
    %c0_47 = arith.constant 0 : index
    %158 = vector.load %arg4[%157, %c0_46, %c0_47] : memref<32x16x64xbf16, #tpu.memory_space<vmem>>, vector<1x16x64xbf16>
    %159 = vector.shape_cast %158 : vector<1x16x64xbf16> to vector<16x64xbf16>
    %160 = arith.extf %159 : vector<16x64xbf16> to vector<16x64xf32>
    %161 = vector.broadcast %138 : i32 to vector<16x1xi32>
    %162 = arith.cmpi eq, %3, %161 : vector<16x1xi32>
    %163 = vector.broadcast %141 : i32 to vector<16x1xi32>
    %164 = arith.cmpi eq, %3, %163 : vector<16x1xi32>
    %cst_48 = arith.constant 0.000000e+00 : f32
    %165 = vector.broadcast %143 : f32 to vector<16x1xf32>
    %166 = vector.broadcast %cst_48 : f32 to vector<16x1xf32>
    %167 = arith.select %162, %165, %166 : vector<16x1xi1>, vector<16x1xf32>
    %cst_49 = arith.constant 0.000000e+00 : f32
    %168 = vector.broadcast %146 : f32 to vector<16x1xf32>
    %169 = vector.broadcast %cst_49 : f32 to vector<16x1xf32>
    %170 = arith.select %164, %168, %169 : vector<16x1xi1>, vector<16x1xf32>
    %171 = arith.addf %167, %170 : vector<16x1xf32>
    %cst_50 = arith.constant 0.000000e+00 : f32
    %172 = vector.broadcast %149 : f32 to vector<16x1xf32>
    %173 = vector.broadcast %cst_50 : f32 to vector<16x1xf32>
    %174 = arith.select %162, %172, %173 : vector<16x1xi1>, vector<16x1xf32>
    %cst_51 = arith.constant 0.000000e+00 : f32
    %175 = vector.broadcast %152 : f32 to vector<16x1xf32>
    %176 = vector.broadcast %cst_51 : f32 to vector<16x1xf32>
    %177 = arith.select %164, %175, %176 : vector<16x1xi1>, vector<16x1xf32>
    %178 = arith.addf %174, %177 : vector<16x1xf32>
    %179 = vector.broadcast %171 : vector<16x1xf32> to vector<16x64xf32>
    %180 = arith.mulf %156, %179 : vector<16x64xf32>
    %181 = vector.broadcast %178 : vector<16x1xf32> to vector<16x64xf32>
    %182 = arith.mulf %160, %181 : vector<16x64xf32>
    %183 = arith.addf %180, %182 : vector<16x64xf32>
    %cst_52 = arith.constant dense<0.000000e+00> : vector<64xf32>
    %184 = vector.multi_reduction <add>, %183, %cst_52 [0] : vector<16x64xf32> to vector<64xf32>
    %185 = vector.shape_cast %184 : vector<64xf32> to vector<1x64xf32>
    %c2 = arith.constant 2 : index
    %c0_53 = arith.constant 0 : index
    %186 = vector.load %arg10[%c2, %c0_53] : memref<8x64xf32, #tpu.memory_space<vmem>>, vector<1x64xf32>
    tpu.vector_store %arg10[%c2, %c0_53], %185 {strides = array<i32>} : memref<8x64xf32, #tpu.memory_space<vmem>>, vector<1x64xf32>,
    %c8_i32_54 = arith.constant 8 : i32
    %187 = arith.muli %arg0, %c8_i32_54 : i32
    %c3_i32_55 = arith.constant 3 : i32
    %188 = arith.addi %187, %c3_i32_55 : i32
    %c9_i32_56 = arith.constant 9 : i32
    %189 = arith.muli %188, %c9_i32_56 : i32
    %190 = arith.addi %189, %arg1 : i32
    %c4_i32_57 = arith.constant 4 : i32
    %191 = arith.muli %190, %c4_i32_57 : i32
    %192 = arith.index_cast %191 : i32 to index
    %193 = memref.load %arg2[%192] : memref<288xi32, #tpu.memory_space<smem>>
    %c1_i32_58 = arith.constant 1 : i32
    %194 = arith.addi %191, %c1_i32_58 : i32
    %195 = arith.index_cast %194 : i32 to index
    %196 = memref.load %arg2[%195] : memref<288xi32, #tpu.memory_space<smem>>
    %c2_i32_59 = arith.constant 2 : i32
    %197 = arith.addi %191, %c2_i32_59 : i32
    %198 = arith.index_cast %197 : i32 to index
    %199 = memref.load %arg2[%198] : memref<288xi32, #tpu.memory_space<smem>>
    %c3_i32_60 = arith.constant 3 : i32
    %200 = arith.addi %191, %c3_i32_60 : i32
    %201 = arith.index_cast %200 : i32 to index
    %202 = memref.load %arg2[%201] : memref<288xi32, #tpu.memory_space<smem>>
    %203 = arith.index_cast %191 : i32 to index
    %204 = memref.load %arg3[%203] : memref<288xf32, #tpu.memory_space<smem>>
    %c1_i32_61 = arith.constant 1 : i32
    %205 = arith.addi %191, %c1_i32_61 : i32
    %206 = arith.index_cast %205 : i32 to index
    %207 = memref.load %arg3[%206] : memref<288xf32, #tpu.memory_space<smem>>
    %c2_i32_62 = arith.constant 2 : i32
    %208 = arith.addi %191, %c2_i32_62 : i32
    %209 = arith.index_cast %208 : i32 to index
    %210 = memref.load %arg3[%209] : memref<288xf32, #tpu.memory_space<smem>>
    %c3_i32_63 = arith.constant 3 : i32
    %211 = arith.addi %191, %c3_i32_63 : i32
    %212 = arith.index_cast %211 : i32 to index
    %213 = memref.load %arg3[%212] : memref<288xf32, #tpu.memory_space<smem>>
    %214 = arith.index_cast %193 : i32 to index
    %c0_64 = arith.constant 0 : index
    %c0_65 = arith.constant 0 : index
    %215 = vector.load %arg4[%214, %c0_64, %c0_65] : memref<32x16x64xbf16, #tpu.memory_space<vmem>>, vector<1x16x64xbf16>
    %216 = vector.shape_cast %215 : vector<1x16x64xbf16> to vector<16x64xbf16>
    %217 = arith.extf %216 : vector<16x64xbf16> to vector<16x64xf32>
    %218 = arith.index_cast %196 : i32 to index
    %c0_66 = arith.constant 0 : index
    %c0_67 = arith.constant 0 : index
    %219 = vector.load %arg4[%218, %c0_66, %c0_67] : memref<32x16x64xbf16, #tpu.memory_space<vmem>>, vector<1x16x64xbf16>
    %220 = vector.shape_cast %219 : vector<1x16x64xbf16> to vector<16x64xbf16>
    %221 = arith.extf %220 : vector<16x64xbf16> to vector<16x64xf32>
    %222 = vector.broadcast %199 : i32 to vector<16x1xi32>
    %223 = arith.cmpi eq, %3, %222 : vector<16x1xi32>
    %224 = vector.broadcast %202 : i32 to vector<16x1xi32>
    %225 = arith.cmpi eq, %3, %224 : vector<16x1xi32>
    %cst_68 = arith.constant 0.000000e+00 : f32
    %226 = vector.broadcast %204 : f32 to vector<16x1xf32>
    %227 = vector.broadcast %cst_68 : f32 to vector<16x1xf32>
    %228 = arith.select %223, %226, %227 : vector<16x1xi1>, vector<16x1xf32>
    %cst_69 = arith.constant 0.000000e+00 : f32
    %229 = vector.broadcast %207 : f32 to vector<16x1xf32>
    %230 = vector.broadcast %cst_69 : f32 to vector<16x1xf32>
    %231 = arith.select %225, %229, %230 : vector<16x1xi1>, vector<16x1xf32>
    %232 = arith.addf %228, %231 : vector<16x1xf32>
    %cst_70 = arith.constant 0.000000e+00 : f32
    %233 = vector.broadcast %210 : f32 to vector<16x1xf32>
    %234 = vector.broadcast %cst_70 : f32 to vector<16x1xf32>
    %235 = arith.select %223, %233, %234 : vector<16x1xi1>, vector<16x1xf32>
    %cst_71 = arith.constant 0.000000e+00 : f32
    %236 = vector.broadcast %213 : f32 to vector<16x1xf32>
    %237 = vector.broadcast %cst_71 : f32 to vector<16x1xf32>
    %238 = arith.select %225, %236, %237 : vector<16x1xi1>, vector<16x1xf32>
    %239 = arith.addf %235, %238 : vector<16x1xf32>
    %240 = vector.broadcast %232 : vector<16x1xf32> to vector<16x64xf32>
    %241 = arith.mulf %217, %240 : vector<16x64xf32>
    %242 = vector.broadcast %239 : vector<16x1xf32> to vector<16x64xf32>
    %243 = arith.mulf %221, %242 : vector<16x64xf32>
    %244 = arith.addf %241, %243 : vector<16x64xf32>
    %cst_72 = arith.constant dense<0.000000e+00> : vector<64xf32>
    %245 = vector.multi_reduction <add>, %244, %cst_72 [0] : vector<16x64xf32> to vector<64xf32>
    %246 = vector.shape_cast %245 : vector<64xf32> to vector<1x64xf32>
    %c3 = arith.constant 3 : index
    %c0_73 = arith.constant 0 : index
    %247 = vector.load %arg10[%c3, %c0_73] : memref<8x64xf32, #tpu.memory_space<vmem>>, vector<1x64xf32>
    tpu.vector_store %arg10[%c3, %c0_73], %246 {strides = array<i32>} : memref<8x64xf32, #tpu.memory_space<vmem>>, vector<1x64xf32>,
    %c8_i32_74 = arith.constant 8 : i32
    %248 = arith.muli %arg0, %c8_i32_74 : i32
    %c4_i32_75 = arith.constant 4 : i32
    %249 = arith.addi %248, %c4_i32_75 : i32
    %c9_i32_76 = arith.constant 9 : i32
    %250 = arith.muli %249, %c9_i32_76 : i32
    %251 = arith.addi %250, %arg1 : i32
    %c4_i32_77 = arith.constant 4 : i32
    %252 = arith.muli %251, %c4_i32_77 : i32
    %253 = arith.index_cast %252 : i32 to index
    %254 = memref.load %arg2[%253] : memref<288xi32, #tpu.memory_space<smem>>
    %c1_i32_78 = arith.constant 1 : i32
    %255 = arith.addi %252, %c1_i32_78 : i32
    %256 = arith.index_cast %255 : i32 to index
    %257 = memref.load %arg2[%256] : memref<288xi32, #tpu.memory_space<smem>>
    %c2_i32_79 = arith.constant 2 : i32
    %258 = arith.addi %252, %c2_i32_79 : i32
    %259 = arith.index_cast %258 : i32 to index
    %260 = memref.load %arg2[%259] : memref<288xi32, #tpu.memory_space<smem>>
    %c3_i32_80 = arith.constant 3 : i32
    %261 = arith.addi %252, %c3_i32_80 : i32
    %262 = arith.index_cast %261 : i32 to index
    %263 = memref.load %arg2[%262] : memref<288xi32, #tpu.memory_space<smem>>
    %264 = arith.index_cast %252 : i32 to index
    %265 = memref.load %arg3[%264] : memref<288xf32, #tpu.memory_space<smem>>
    %c1_i32_81 = arith.constant 1 : i32
    %266 = arith.addi %252, %c1_i32_81 : i32
    %267 = arith.index_cast %266 : i32 to index
    %268 = memref.load %arg3[%267] : memref<288xf32, #tpu.memory_space<smem>>
    %c2_i32_82 = arith.constant 2 : i32
    %269 = arith.addi %252, %c2_i32_82 : i32
    %270 = arith.index_cast %269 : i32 to index
    %271 = memref.load %arg3[%270] : memref<288xf32, #tpu.memory_space<smem>>
    %c3_i32_83 = arith.constant 3 : i32
    %272 = arith.addi %252, %c3_i32_83 : i32
    %273 = arith.index_cast %272 : i32 to index
    %274 = memref.load %arg3[%273] : memref<288xf32, #tpu.memory_space<smem>>
    %275 = arith.index_cast %254 : i32 to index
    %c0_84 = arith.constant 0 : index
    %c0_85 = arith.constant 0 : index
    %276 = vector.load %arg4[%275, %c0_84, %c0_85] : memref<32x16x64xbf16, #tpu.memory_space<vmem>>, vector<1x16x64xbf16>
    %277 = vector.shape_cast %276 : vector<1x16x64xbf16> to vector<16x64xbf16>
    %278 = arith.extf %277 : vector<16x64xbf16> to vector<16x64xf32>
    %279 = arith.index_cast %257 : i32 to index
    %c0_86 = arith.constant 0 : index
    %c0_87 = arith.constant 0 : index
    %280 = vector.load %arg4[%279, %c0_86, %c0_87] : memref<32x16x64xbf16, #tpu.memory_space<vmem>>, vector<1x16x64xbf16>
    %281 = vector.shape_cast %280 : vector<1x16x64xbf16> to vector<16x64xbf16>
    %282 = arith.extf %281 : vector<16x64xbf16> to vector<16x64xf32>
    %283 = vector.broadcast %260 : i32 to vector<16x1xi32>
    %284 = arith.cmpi eq, %3, %283 : vector<16x1xi32>
    %285 = vector.broadcast %263 : i32 to vector<16x1xi32>
    %286 = arith.cmpi eq, %3, %285 : vector<16x1xi32>
    %cst_88 = arith.constant 0.000000e+00 : f32
    %287 = vector.broadcast %265 : f32 to vector<16x1xf32>
    %288 = vector.broadcast %cst_88 : f32 to vector<16x1xf32>
    %289 = arith.select %284, %287, %288 : vector<16x1xi1>, vector<16x1xf32>
    %cst_89 = arith.constant 0.000000e+00 : f32
    %290 = vector.broadcast %268 : f32 to vector<16x1xf32>
    %291 = vector.broadcast %cst_89 : f32 to vector<16x1xf32>
    %292 = arith.select %286, %290, %291 : vector<16x1xi1>, vector<16x1xf32>
    %293 = arith.addf %289, %292 : vector<16x1xf32>
    %cst_90 = arith.constant 0.000000e+00 : f32
    %294 = vector.broadcast %271 : f32 to vector<16x1xf32>
    %295 = vector.broadcast %cst_90 : f32 to vector<16x1xf32>
    %296 = arith.select %284, %294, %295 : vector<16x1xi1>, vector<16x1xf32>
    %cst_91 = arith.constant 0.000000e+00 : f32
    %297 = vector.broadcast %274 : f32 to vector<16x1xf32>
    %298 = vector.broadcast %cst_91 : f32 to vector<16x1xf32>
    %299 = arith.select %286, %297, %298 : vector<16x1xi1>, vector<16x1xf32>
    %300 = arith.addf %296, %299 : vector<16x1xf32>
    %301 = vector.broadcast %293 : vector<16x1xf32> to vector<16x64xf32>
    %302 = arith.mulf %278, %301 : vector<16x64xf32>
    %303 = vector.broadcast %300 : vector<16x1xf32> to vector<16x64xf32>
    %304 = arith.mulf %282, %303 : vector<16x64xf32>
    %305 = arith.addf %302, %304 : vector<16x64xf32>
    %cst_92 = arith.constant dense<0.000000e+00> : vector<64xf32>
    %306 = vector.multi_reduction <add>, %305, %cst_92 [0] : vector<16x64xf32> to vector<64xf32>
    %307 = vector.shape_cast %306 : vector<64xf32> to vector<1x64xf32>
    %c4 = arith.constant 4 : index
    %c0_93 = arith.constant 0 : index
    %308 = vector.load %arg10[%c4, %c0_93] : memref<8x64xf32, #tpu.memory_space<vmem>>, vector<1x64xf32>
    tpu.vector_store %arg10[%c4, %c0_93], %307 {strides = array<i32>} : memref<8x64xf32, #tpu.memory_space<vmem>>, vector<1x64xf32>,
    %c8_i32_94 = arith.constant 8 : i32
    %309 = arith.muli %arg0, %c8_i32_94 : i32
    %c5_i32 = arith.constant 5 : i32
    %310 = arith.addi %309, %c5_i32 : i32
    %c9_i32_95 = arith.constant 9 : i32
    %311 = arith.muli %310, %c9_i32_95 : i32
    %312 = arith.addi %311, %arg1 : i32
    %c4_i32_96 = arith.constant 4 : i32
    %313 = arith.muli %312, %c4_i32_96 : i32
    %314 = arith.index_cast %313 : i32 to index
    %315 = memref.load %arg2[%314] : memref<288xi32, #tpu.memory_space<smem>>
    %c1_i32_97 = arith.constant 1 : i32
    %316 = arith.addi %313, %c1_i32_97 : i32
    %317 = arith.index_cast %316 : i32 to index
    %318 = memref.load %arg2[%317] : memref<288xi32, #tpu.memory_space<smem>>
    %c2_i32_98 = arith.constant 2 : i32
    %319 = arith.addi %313, %c2_i32_98 : i32
    %320 = arith.index_cast %319 : i32 to index
    %321 = memref.load %arg2[%320] : memref<288xi32, #tpu.memory_space<smem>>
    %c3_i32_99 = arith.constant 3 : i32
    %322 = arith.addi %313, %c3_i32_99 : i32
    %323 = arith.index_cast %322 : i32 to index
    %324 = memref.load %arg2[%323] : memref<288xi32, #tpu.memory_space<smem>>
    %325 = arith.index_cast %313 : i32 to index
    %326 = memref.load %arg3[%325] : memref<288xf32, #tpu.memory_space<smem>>
    %c1_i32_100 = arith.constant 1 : i32
    %327 = arith.addi %313, %c1_i32_100 : i32
    %328 = arith.index_cast %327 : i32 to index
    %329 = memref.load %arg3[%328] : memref<288xf32, #tpu.memory_space<smem>>
    %c2_i32_101 = arith.constant 2 : i32
    %330 = arith.addi %313, %c2_i32_101 : i32
    %331 = arith.index_cast %330 : i32 to index
    %332 = memref.load %arg3[%331] : memref<288xf32, #tpu.memory_space<smem>>
    %c3_i32_102 = arith.constant 3 : i32
    %333 = arith.addi %313, %c3_i32_102 : i32
    %334 = arith.index_cast %333 : i32 to index
    %335 = memref.load %arg3[%334] : memref<288xf32, #tpu.memory_space<smem>>
    %336 = arith.index_cast %315 : i32 to index
    %c0_103 = arith.constant 0 : index
    %c0_104 = arith.constant 0 : index
    %337 = vector.load %arg4[%336, %c0_103, %c0_104] : memref<32x16x64xbf16, #tpu.memory_space<vmem>>, vector<1x16x64xbf16>
    %338 = vector.shape_cast %337 : vector<1x16x64xbf16> to vector<16x64xbf16>
    %339 = arith.extf %338 : vector<16x64xbf16> to vector<16x64xf32>
    %340 = arith.index_cast %318 : i32 to index
    %c0_105 = arith.constant 0 : index
    %c0_106 = arith.constant 0 : index
    %341 = vector.load %arg4[%340, %c0_105, %c0_106] : memref<32x16x64xbf16, #tpu.memory_space<vmem>>, vector<1x16x64xbf16>
    %342 = vector.shape_cast %341 : vector<1x16x64xbf16> to vector<16x64xbf16>
    %343 = arith.extf %342 : vector<16x64xbf16> to vector<16x64xf32>
    %344 = vector.broadcast %321 : i32 to vector<16x1xi32>
    %345 = arith.cmpi eq, %3, %344 : vector<16x1xi32>
    %346 = vector.broadcast %324 : i32 to vector<16x1xi32>
    %347 = arith.cmpi eq, %3, %346 : vector<16x1xi32>
    %cst_107 = arith.constant 0.000000e+00 : f32
    %348 = vector.broadcast %326 : f32 to vector<16x1xf32>
    %349 = vector.broadcast %cst_107 : f32 to vector<16x1xf32>
    %350 = arith.select %345, %348, %349 : vector<16x1xi1>, vector<16x1xf32>
    %cst_108 = arith.constant 0.000000e+00 : f32
    %351 = vector.broadcast %329 : f32 to vector<16x1xf32>
    %352 = vector.broadcast %cst_108 : f32 to vector<16x1xf32>
    %353 = arith.select %347, %351, %352 : vector<16x1xi1>, vector<16x1xf32>
    %354 = arith.addf %350, %353 : vector<16x1xf32>
    %cst_109 = arith.constant 0.000000e+00 : f32
    %355 = vector.broadcast %332 : f32 to vector<16x1xf32>
    %356 = vector.broadcast %cst_109 : f32 to vector<16x1xf32>
    %357 = arith.select %345, %355, %356 : vector<16x1xi1>, vector<16x1xf32>
    %cst_110 = arith.constant 0.000000e+00 : f32
    %358 = vector.broadcast %335 : f32 to vector<16x1xf32>
    %359 = vector.broadcast %cst_110 : f32 to vector<16x1xf32>
    %360 = arith.select %347, %358, %359 : vector<16x1xi1>, vector<16x1xf32>
    %361 = arith.addf %357, %360 : vector<16x1xf32>
    %362 = vector.broadcast %354 : vector<16x1xf32> to vector<16x64xf32>
    %363 = arith.mulf %339, %362 : vector<16x64xf32>
    %364 = vector.broadcast %361 : vector<16x1xf32> to vector<16x64xf32>
    %365 = arith.mulf %343, %364 : vector<16x64xf32>
    %366 = arith.addf %363, %365 : vector<16x64xf32>
    %cst_111 = arith.constant dense<0.000000e+00> : vector<64xf32>
    %367 = vector.multi_reduction <add>, %366, %cst_111 [0] : vector<16x64xf32> to vector<64xf32>
    %368 = vector.shape_cast %367 : vector<64xf32> to vector<1x64xf32>
    %c5 = arith.constant 5 : index
    %c0_112 = arith.constant 0 : index
    %369 = vector.load %arg10[%c5, %c0_112] : memref<8x64xf32, #tpu.memory_space<vmem>>, vector<1x64xf32>
    tpu.vector_store %arg10[%c5, %c0_112], %368 {strides = array<i32>} : memref<8x64xf32, #tpu.memory_space<vmem>>, vector<1x64xf32>,
    %c8_i32_113 = arith.constant 8 : i32
    %370 = arith.muli %arg0, %c8_i32_113 : i32
    %c6_i32 = arith.constant 6 : i32
    %371 = arith.addi %370, %c6_i32 : i32
    %c9_i32_114 = arith.constant 9 : i32
    %372 = arith.muli %371, %c9_i32_114 : i32
    %373 = arith.addi %372, %arg1 : i32
    %c4_i32_115 = arith.constant 4 : i32
    %374 = arith.muli %373, %c4_i32_115 : i32
    %375 = arith.index_cast %374 : i32 to index
    %376 = memref.load %arg2[%375] : memref<288xi32, #tpu.memory_space<smem>>
    %c1_i32_116 = arith.constant 1 : i32
    %377 = arith.addi %374, %c1_i32_116 : i32
    %378 = arith.index_cast %377 : i32 to index
    %379 = memref.load %arg2[%378] : memref<288xi32, #tpu.memory_space<smem>>
    %c2_i32_117 = arith.constant 2 : i32
    %380 = arith.addi %374, %c2_i32_117 : i32
    %381 = arith.index_cast %380 : i32 to index
    %382 = memref.load %arg2[%381] : memref<288xi32, #tpu.memory_space<smem>>
    %c3_i32_118 = arith.constant 3 : i32
    %383 = arith.addi %374, %c3_i32_118 : i32
    %384 = arith.index_cast %383 : i32 to index
    %385 = memref.load %arg2[%384] : memref<288xi32, #tpu.memory_space<smem>>
    %386 = arith.index_cast %374 : i32 to index
    %387 = memref.load %arg3[%386] : memref<288xf32, #tpu.memory_space<smem>>
    %c1_i32_119 = arith.constant 1 : i32
    %388 = arith.addi %374, %c1_i32_119 : i32
    %389 = arith.index_cast %388 : i32 to index
    %390 = memref.load %arg3[%389] : memref<288xf32, #tpu.memory_space<smem>>
    %c2_i32_120 = arith.constant 2 : i32
    %391 = arith.addi %374, %c2_i32_120 : i32
    %392 = arith.index_cast %391 : i32 to index
    %393 = memref.load %arg3[%392] : memref<288xf32, #tpu.memory_space<smem>>
    %c3_i32_121 = arith.constant 3 : i32
    %394 = arith.addi %374, %c3_i32_121 : i32
    %395 = arith.index_cast %394 : i32 to index
    %396 = memref.load %arg3[%395] : memref<288xf32, #tpu.memory_space<smem>>
    %397 = arith.index_cast %376 : i32 to index
    %c0_122 = arith.constant 0 : index
    %c0_123 = arith.constant 0 : index
    %398 = vector.load %arg4[%397, %c0_122, %c0_123] : memref<32x16x64xbf16, #tpu.memory_space<vmem>>, vector<1x16x64xbf16>
    %399 = vector.shape_cast %398 : vector<1x16x64xbf16> to vector<16x64xbf16>
    %400 = arith.extf %399 : vector<16x64xbf16> to vector<16x64xf32>
    %401 = arith.index_cast %379 : i32 to index
    %c0_124 = arith.constant 0 : index
    %c0_125 = arith.constant 0 : index
    %402 = vector.load %arg4[%401, %c0_124, %c0_125] : memref<32x16x64xbf16, #tpu.memory_space<vmem>>, vector<1x16x64xbf16>
    %403 = vector.shape_cast %402 : vector<1x16x64xbf16> to vector<16x64xbf16>
    %404 = arith.extf %403 : vector<16x64xbf16> to vector<16x64xf32>
    %405 = vector.broadcast %382 : i32 to vector<16x1xi32>
    %406 = arith.cmpi eq, %3, %405 : vector<16x1xi32>
    %407 = vector.broadcast %385 : i32 to vector<16x1xi32>
    %408 = arith.cmpi eq, %3, %407 : vector<16x1xi32>
    %cst_126 = arith.constant 0.000000e+00 : f32
    %409 = vector.broadcast %387 : f32 to vector<16x1xf32>
    %410 = vector.broadcast %cst_126 : f32 to vector<16x1xf32>
    %411 = arith.select %406, %409, %410 : vector<16x1xi1>, vector<16x1xf32>
    %cst_127 = arith.constant 0.000000e+00 : f32
    %412 = vector.broadcast %390 : f32 to vector<16x1xf32>
    %413 = vector.broadcast %cst_127 : f32 to vector<16x1xf32>
    %414 = arith.select %408, %412, %413 : vector<16x1xi1>, vector<16x1xf32>
    %415 = arith.addf %411, %414 : vector<16x1xf32>
    %cst_128 = arith.constant 0.000000e+00 : f32
    %416 = vector.broadcast %393 : f32 to vector<16x1xf32>
    %417 = vector.broadcast %cst_128 : f32 to vector<16x1xf32>
    %418 = arith.select %406, %416, %417 : vector<16x1xi1>, vector<16x1xf32>
    %cst_129 = arith.constant 0.000000e+00 : f32
    %419 = vector.broadcast %396 : f32 to vector<16x1xf32>
    %420 = vector.broadcast %cst_129 : f32 to vector<16x1xf32>
    %421 = arith.select %408, %419, %420 : vector<16x1xi1>, vector<16x1xf32>
    %422 = arith.addf %418, %421 : vector<16x1xf32>
    %423 = vector.broadcast %415 : vector<16x1xf32> to vector<16x64xf32>
    %424 = arith.mulf %400, %423 : vector<16x64xf32>
    %425 = vector.broadcast %422 : vector<16x1xf32> to vector<16x64xf32>
    %426 = arith.mulf %404, %425 : vector<16x64xf32>
    %427 = arith.addf %424, %426 : vector<16x64xf32>
    %cst_130 = arith.constant dense<0.000000e+00> : vector<64xf32>
    %428 = vector.multi_reduction <add>, %427, %cst_130 [0] : vector<16x64xf32> to vector<64xf32>
    %429 = vector.shape_cast %428 : vector<64xf32> to vector<1x64xf32>
    %c6 = arith.constant 6 : index
    %c0_131 = arith.constant 0 : index
    %430 = vector.load %arg10[%c6, %c0_131] : memref<8x64xf32, #tpu.memory_space<vmem>>, vector<1x64xf32>
    tpu.vector_store %arg10[%c6, %c0_131], %429 {strides = array<i32>} : memref<8x64xf32, #tpu.memory_space<vmem>>, vector<1x64xf32>,
    %c8_i32_132 = arith.constant 8 : i32
    %431 = arith.muli %arg0, %c8_i32_132 : i32
    %c7_i32 = arith.constant 7 : i32
    %432 = arith.addi %431, %c7_i32 : i32
    %c9_i32_133 = arith.constant 9 : i32
    %433 = arith.muli %432, %c9_i32_133 : i32
    %434 = arith.addi %433, %arg1 : i32
    %c4_i32_134 = arith.constant 4 : i32
    %435 = arith.muli %434, %c4_i32_134 : i32
    %436 = arith.index_cast %435 : i32 to index
    %437 = memref.load %arg2[%436] : memref<288xi32, #tpu.memory_space<smem>>
    %c1_i32_135 = arith.constant 1 : i32
    %438 = arith.addi %435, %c1_i32_135 : i32
    %439 = arith.index_cast %438 : i32 to index
    %440 = memref.load %arg2[%439] : memref<288xi32, #tpu.memory_space<smem>>
    %c2_i32_136 = arith.constant 2 : i32
    %441 = arith.addi %435, %c2_i32_136 : i32
    %442 = arith.index_cast %441 : i32 to index
    %443 = memref.load %arg2[%442] : memref<288xi32, #tpu.memory_space<smem>>
    %c3_i32_137 = arith.constant 3 : i32
    %444 = arith.addi %435, %c3_i32_137 : i32
    %445 = arith.index_cast %444 : i32 to index
    %446 = memref.load %arg2[%445] : memref<288xi32, #tpu.memory_space<smem>>
    %447 = arith.index_cast %435 : i32 to index
    %448 = memref.load %arg3[%447] : memref<288xf32, #tpu.memory_space<smem>>
    %c1_i32_138 = arith.constant 1 : i32
    %449 = arith.addi %435, %c1_i32_138 : i32
    %450 = arith.index_cast %449 : i32 to index
    %451 = memref.load %arg3[%450] : memref<288xf32, #tpu.memory_space<smem>>
    %c2_i32_139 = arith.constant 2 : i32
    %452 = arith.addi %435, %c2_i32_139 : i32
    %453 = arith.index_cast %452 : i32 to index
    %454 = memref.load %arg3[%453] : memref<288xf32, #tpu.memory_space<smem>>
    %c3_i32_140 = arith.constant 3 : i32
    %455 = arith.addi %435, %c3_i32_140 : i32
    %456 = arith.index_cast %455 : i32 to index
    %457 = memref.load %arg3[%456] : memref<288xf32, #tpu.memory_space<smem>>
    %458 = arith.index_cast %437 : i32 to index
    %c0_141 = arith.constant 0 : index
    %c0_142 = arith.constant 0 : index
    %459 = vector.load %arg4[%458, %c0_141, %c0_142] : memref<32x16x64xbf16, #tpu.memory_space<vmem>>, vector<1x16x64xbf16>
    %460 = vector.shape_cast %459 : vector<1x16x64xbf16> to vector<16x64xbf16>
    %461 = arith.extf %460 : vector<16x64xbf16> to vector<16x64xf32>
    %462 = arith.index_cast %440 : i32 to index
    %c0_143 = arith.constant 0 : index
    %c0_144 = arith.constant 0 : index
    %463 = vector.load %arg4[%462, %c0_143, %c0_144] : memref<32x16x64xbf16, #tpu.memory_space<vmem>>, vector<1x16x64xbf16>
    %464 = vector.shape_cast %463 : vector<1x16x64xbf16> to vector<16x64xbf16>
    %465 = arith.extf %464 : vector<16x64xbf16> to vector<16x64xf32>
    %466 = vector.broadcast %443 : i32 to vector<16x1xi32>
    %467 = arith.cmpi eq, %3, %466 : vector<16x1xi32>
    %468 = vector.broadcast %446 : i32 to vector<16x1xi32>
    %469 = arith.cmpi eq, %3, %468 : vector<16x1xi32>
    %cst_145 = arith.constant 0.000000e+00 : f32
    %470 = vector.broadcast %448 : f32 to vector<16x1xf32>
    %471 = vector.broadcast %cst_145 : f32 to vector<16x1xf32>
    %472 = arith.select %467, %470, %471 : vector<16x1xi1>, vector<16x1xf32>
    %cst_146 = arith.constant 0.000000e+00 : f32
    %473 = vector.broadcast %451 : f32 to vector<16x1xf32>
    %474 = vector.broadcast %cst_146 : f32 to vector<16x1xf32>
    %475 = arith.select %469, %473, %474 : vector<16x1xi1>, vector<16x1xf32>
    %476 = arith.addf %472, %475 : vector<16x1xf32>
    %cst_147 = arith.constant 0.000000e+00 : f32
    %477 = vector.broadcast %454 : f32 to vector<16x1xf32>
    %478 = vector.broadcast %cst_147 : f32 to vector<16x1xf32>
    %479 = arith.select %467, %477, %478 : vector<16x1xi1>, vector<16x1xf32>
    %cst_148 = arith.constant 0.000000e+00 : f32
    %480 = vector.broadcast %457 : f32 to vector<16x1xf32>
    %481 = vector.broadcast %cst_148 : f32 to vector<16x1xf32>
    %482 = arith.select %469, %480, %481 : vector<16x1xi1>, vector<16x1xf32>
    %483 = arith.addf %479, %482 : vector<16x1xf32>
    %484 = vector.broadcast %476 : vector<16x1xf32> to vector<16x64xf32>
    %485 = arith.mulf %461, %484 : vector<16x64xf32>
    %486 = vector.broadcast %483 : vector<16x1xf32> to vector<16x64xf32>
    %487 = arith.mulf %465, %486 : vector<16x64xf32>
    %488 = arith.addf %485, %487 : vector<16x64xf32>
    %cst_149 = arith.constant dense<0.000000e+00> : vector<64xf32>
    %489 = vector.multi_reduction <add>, %488, %cst_149 [0] : vector<16x64xf32> to vector<64xf32>
    %490 = vector.shape_cast %489 : vector<64xf32> to vector<1x64xf32>
    %c7 = arith.constant 7 : index
    %c0_150 = arith.constant 0 : index
    %491 = vector.load %arg10[%c7, %c0_150] : memref<8x64xf32, #tpu.memory_space<vmem>>, vector<1x64xf32>
    tpu.vector_store %arg10[%c7, %c0_150], %490 {strides = array<i32>} : memref<8x64xf32, #tpu.memory_space<vmem>>, vector<1x64xf32>,
    %c0_151 = arith.constant 0 : index
    %c0_152 = arith.constant 0 : index
    %492 = vector.load %arg9[%c0_151, %c0_152] : memref<8x128xf32, #tpu.memory_space<vmem>>, vector<8x128xf32>
    %c0_153 = arith.constant 0 : index
    %c0_154 = arith.constant 0 : index
    %493 = vector.load %arg10[%c0_153, %c0_154] : memref<8x64xf32, #tpu.memory_space<vmem>>, vector<8x64xf32>
    %494 = arith.truncf %493 : vector<8x64xf32> to vector<8x64xbf16>
    %c0_155 = arith.constant 0 : index
    %c0_156 = arith.constant 0 : index
    %c0_157 = arith.constant 0 : index
    %495 = vector.load %arg5[%c0_155, %c0_156, %c0_157] : memref<1x64x128xbf16, #tpu.memory_space<vmem>>, vector<1x64x128xbf16>
    %496 = vector.shape_cast %495 : vector<1x64x128xbf16> to vector<64x128xbf16>
    %cst_158 = arith.constant dense<0.000000e+00> : vector<8x128xf32>
    %497 = tpu.matmul %494, %496, %cst_158 {dimension_numbers = #tpu.dot_dimension_numbers<[1], [0], [0], [1], [0, 0, 1, 1], [], []>} : vector<8x64xbf16>, vector<64x128xbf16>, vector<8x128xf32> -> vector<8x128xf32>
    %498 = arith.addf %492, %497 : vector<8x128xf32>
    %c0_159 = arith.constant 0 : index
    %c0_160 = arith.constant 0 : index
    %499 = vector.load %arg9[%c0_159, %c0_160] : memref<8x128xf32, #tpu.memory_space<vmem>>, vector<8x128xf32>
    tpu.vector_store %arg9[%c0_159, %c0_160], %498 {strides = array<i32>} : memref<8x128xf32, #tpu.memory_space<vmem>>, vector<8x128xf32>,
    %c8_i32_161 = arith.constant 8 : i32
    %500 = arith.cmpi eq, %arg1, %c8_i32_161 : i32
    %501 = arith.extui %500 : i1 to i32
    %c0_i32_162 = arith.constant 0 : i32
    %502 = arith.cmpi ne, %501, %c0_i32_162 : i32
    scf.if %502 {
      %c0_163 = arith.constant 0 : index
      %c0_164 = arith.constant 0 : index
      %503 = vector.load %arg9[%c0_163, %c0_164] : memref<8x128xf32, #tpu.memory_space<vmem>>, vector<8x128xf32>
      %c0_165 = arith.constant 0 : index
      %c0_166 = arith.constant 0 : index
      %504 = vector.load %arg6[%c0_165, %c0_166] : memref<1x128xf32, #tpu.memory_space<vmem>>, vector<1x128xf32>
      %505 = vector.broadcast %504 : vector<1x128xf32> to vector<8x128xf32>
      %506 = arith.addf %503, %505 : vector<8x128xf32>
      %cst_167 = arith.constant 4.000000e+00 : f32
      %507 = vector.broadcast %cst_167 : f32 to vector<8x128xf32>
      %508 = arith.mulf %506, %507 : vector<8x128xf32>
      %c0_168 = arith.constant 0 : index
      %c0_169 = arith.constant 0 : index
      %509 = vector.load %arg7[%c0_168, %c0_169] : memref<8x128xf32, #tpu.memory_space<vmem>>, vector<8x128xf32>
      %510 = arith.addf %508, %509 : vector<8x128xf32>
      %c0_170 = arith.constant 0 : index
      %c0_171 = arith.constant 0 : index
      %511 = vector.load %arg8[%c0_170, %c0_171] : memref<8x128xf32, #tpu.memory_space<vmem>>, vector<8x128xf32>
      tpu.vector_store %arg8[%c0_170, %c0_171], %510 {strides = array<i32>} : memref<8x128xf32, #tpu.memory_space<vmem>>, vector<8x128xf32>,
    } else {
    }
    return
  }
  func.func @transform_0(%arg0: i32, %arg1: i32, %arg2: memref<288xi32, #tpu.memory_space<smem>>, %arg3: memref<288xf32, #tpu.memory_space<smem>>) -> (i32, i32, i32) {
    %c0_i32 = arith.constant 0 : i32
    %c0_i32_0 = arith.constant 0 : i32
    %c0_i32_1 = arith.constant 0 : i32
    %c0_i32_2 = arith.constant 0 : i32
    return %c0_i32, %c0_i32_0, %c0_i32_1 : i32, i32, i32
  }
  func.func @transform_1(%arg0: i32, %arg1: i32, %arg2: memref<288xi32, #tpu.memory_space<smem>>, %arg3: memref<288xf32, #tpu.memory_space<smem>>) -> (i32, i32, i32) {
    %c0_i32 = arith.constant 0 : i32
    %c0_i32_0 = arith.constant 0 : i32
    %c0_i32_1 = arith.constant 0 : i32
    return %arg1, %c0_i32, %c0_i32_0 : i32, i32, i32
  }
  func.func @transform_2(%arg0: i32, %arg1: i32, %arg2: memref<288xi32, #tpu.memory_space<smem>>, %arg3: memref<288xf32, #tpu.memory_space<smem>>) -> (i32, i32) {
    %c0_i32 = arith.constant 0 : i32
    %c0_i32_0 = arith.constant 0 : i32
    %c0_i32_1 = arith.constant 0 : i32
    return %c0_i32, %c0_i32_0 : i32, i32
  }
  func.func @transform_3(%arg0: i32, %arg1: i32, %arg2: memref<288xi32, #tpu.memory_space<smem>>, %arg3: memref<288xf32, #tpu.memory_space<smem>>) -> (i32, i32) {
    %c0_i32 = arith.constant 0 : i32
    %c0_i32_0 = arith.constant 0 : i32
    return %arg0, %c0_i32 : i32, i32
  }
  func.func @transform_4(%arg0: i32, %arg1: i32, %arg2: memref<288xi32, #tpu.memory_space<smem>>, %arg3: memref<288xf32, #tpu.memory_space<smem>>) -> (i32, i32) {
    %c0_i32 = arith.constant 0 : i32
    %c0_i32_0 = arith.constant 0 : i32
    return %arg0, %c0_i32 : i32, i32
  }
}

</mosaic_0001>

<bundles_post_ra>
// kernel: refine_forward.3
= control target key start
LH: loop header
LB: loop body
LE: loop exit
PB: predicated region body
PF: predicated region fallthrough
CT: control target
= control target key end

     0   :  { %s1206_s27 = smov [#allocation5]   ;;  %s1207_s28 = smov [#allocation6]   ;;  %s2040_s0 = inlined_call_operand.vmem [shape: s32[288], index: 0, kind: input, shape index: {}]   ;;  %s2041_s2 = inlined_call_operand.vmem [shape: bf16[32,16,64], index: 2, kind: input, shape index: {}]   ;;  %s2042_s3 = inlined_call_operand.vmem [shape: bf16[9,64,128], index: 3, kind: input, shape index: {}]   ;;  %s2043_s4 = inlined_call_operand.vmem [shape: f32[1,128], index: 4, kind: input, shape index: {}]   ;;  %s2044_s5 = inlined_call_operand.vmem [shape: f32[8,128], index: 5, kind: input, shape index: {}]   ;;  %s2045_s6 = inlined_call_operand.vmem [shape: f32[8,128], index: 6, kind: output, shape index: {}]   ;;  %s2046_s1 = inlined_call_operand.vmem [shape: f32[288], index: 1, kind: input, shape index: {}]  }
   0x1   :  { %s12_s23 = sshll.u32 %s2040_s0, 4  ;;  %s17_s26 = sshll.u32 %s2046_s1, 4  ;;  %s13_s23 = int_to_ptr.vmem [resolvable:$true] %s12_s23  ;;  %s18_s26 = int_to_ptr.vmem [resolvable:$true] %s17_s26 }
   0x2   :  { %15 = dma.vmem_to_smem %s13_s23, 48, %s1206_s27, [#allocation4] }
   0x3   :  { %20 = dma.vmem_to_smem %s18_s26, 48, %s1207_s28, [#allocation4] }
   0x4   :  { %1192 = dma.done.wait [#allocation4], 96 }
   0x5   :  { %1193 = vsyncadd [#allocation4], 4294967200 }
   0x6   :  { %23 = sfence }
   0x7   :  { %s1250_s29 = smov 0   ;;  %s1252_s30 = smov 0  }
   0x8   :  { %s1254_s7 = smov 0  }
   0x9 LB: > { %s38_s0 = sadd.s32 1, %s1200_s30  ;;  %p964_p0 = scmp.ge.s32.totalorder %s1204_s7, 1  ;;  %s1204_s7 = sphi %s1254_s7, %s29_s7   ;;  %s1200_s30 = sphi %s1252_s30, %s2118_s30   ;;  %s1196_s29 = sphi %s1250_s29, %s2117_s29  }
   0xa   : > { %p39_p1 = scmp.ge.s32.totalorder %s38_s0, 9  ;;  %p198_p2 = scmp.lt.s32.totalorder %s1204_s7, 10 }
   0xc   : > { %s2120_s0 = smov (%p39_p1, %s38_s0), 0  ;;  %p199_p3 = pnand %p964_p0, %p198_p2 }
   0xd   : > { %p227_p4 = scmp.lt.s32.totalorder (!%p199_p3), %s1196_s29, 8  ;;  %p967_p5 = scmp.ne.s32.totalorder (!%p199_p3), %s1196_s29, 0 }
   0xe   : > { %202 = sbr.rel (%p199_p3) target bundleno = 290 (0x122), region = 36 }
  0x13   : > { %s228_s1 = scalar_select %p227_p4, %s1196_s29, 8 }
  0x14   : > { %244 = sbr.rel (%p967_p5) target bundleno = 27 (0x1b), region = 40 }
  0x15   : > { %s1029_s8 = sshll.u32 %s228_s1, 5 }
  0x16   : > { %s1275_s11 = scalar_lea.vmem %s2042_s3, %s1029_s8 }
  0x19   : > { %v1208_v0 = vmov 0.0  }
  0x1a   : > { %245 = vst [vmem:[#allocation2] sm:$0xff] %v1208_v0 }
  0x1b PF: > { %v246_v1 = vlaneseq  ;;  %s1279_s12 = sshll.u32 %s1196_s29, 2  ;;  %vm305_vm4 = vcmask 523264   ;;  %vm315_vm9 = vcmask 516096   ;;  %p1025_p6 = scmp.ne.s32.totalorder %s1196_s29, 8 }
  0x1c   : > { %s252_s13 = sld [smem:[#allocation5 + %s1279_s12]]  ;;  %s253_s14 = sadd.s32 1, %s1279_s12 }
  0x1d   : > { %v1283_v2 = vshrl.u32 %v246_v1, 7  ;;  %s254_s15 = sld [smem:[#allocation5 + %s253_s14]]  ;;  %s255_s16 = sadd.s32 2, %s1279_s12 }
  0x1e   : > { %s256_s17 = sld [smem:[#allocation5 + %s255_s16]]  ;;  %s257_s18 = sadd.s32 3, %s1279_s12 }
  0x1f   : > { %s258_s19 = sld [smem:[#allocation5 + %s257_s18]]  ;;  %s1288_s20 = sadd.s32 36, %s1279_s12  ;;  %v1293_v3 = vadd.s32 8, %v1283_v2 }
  0x20   : > { %s259_s21 = sld [smem:[#allocation6 + %s1279_s12]]  ;;  %s325_s24 = sadd.s32 2, %s1288_s20 }
  0x21   : > { %s1295_s23 = sld [smem:[#allocation6 + %s253_s14]] }
  0x22   : > { %s1298_s25 = sld [smem:[#allocation6 + %s255_s16]]  ;;  %s1030_s26 = sshll.u32 %s252_s13, 3 }
  0x23   : > { %s1300_s27 = sld [smem:[#allocation6 + %s257_s18]]  ;;  %s265_s8 = scalar_lea.vmem %s2041_s2, %s1030_s26 }
  0x24   : > { %v1065_v4 = vld [vmem:[%s265_s8] sm:$0xff]   ;;  %s1031_s9 = sshll.u32 %s254_s15, 3  ;;  %v277_v5 = vstv %s256_s17  ;;  %s1306_s10 = sld [smem:[#allocation5 + %s1288_s20]] }
  0x25   : > { %s272_s16 = scalar_lea.vmem %s2041_s2, %s1031_s9  ;;  %vm1312_vm0 = vcmp.eq.s32.totalorder %v1283_v2, %v277_v5  ;;  %vm1317_vm1 = vcmp.eq.s32.totalorder %v1293_v3, %v277_v5  ;;  %s2053_s13 = sadd.s32 1, %s1288_s20  ;;  %v1066_v8 = vunpack.c.l.bf16 %v1065_v4  ;;  %v280_v10 = vstv %s258_s19 }
  0x26   : > { %s1323_s15 = sld [smem:[#allocation5 + %s2053_s13]]  ;;  %v1069_v9 = vld [vmem:[%s272_s16] sm:$0xff]   ;;  %v283_v11 = vstv %s259_s21  ;;  %s327_s18 = sadd.s32 3, %s1288_s20  ;;  %v1067_v12 = vunpack.c.h.bf16 %v1065_v4  ;;  %vm1331_vm2 = vcmp.eq.s32.totalorder %v1283_v2, %v280_v10  ;;  %vm1336_vm3 = vcmp.eq.s32.totalorder %v1293_v3, %v280_v10 }
  0x27   : > { %s1327_s17 = sld [smem:[#allocation5 + %s325_s24]]  ;;  %v1070_v13 = vunpack.c.l.bf16 %v1069_v9  ;;  %s1343_s19 = sadd.s32 72, %s1279_s12  ;;  %v284_v16 = vsel %vm1312_vm0, %v283_v11, 0.0  ;;  %v285_v17 = vsel %vm1317_vm1, %v283_v11, 0.0  ;;  %v286_v18 = vstv %s1295_s23 }
  0x28   : > { %s1340_s22 = sld [smem:[#allocation5 + %s327_s18]]  ;;  %v291_v19 = vstv %s1298_s25  ;;  %s390_s26 = sadd.s32 1, %s1343_s19  ;;  %v287_v20 = vsel %vm1331_vm2, %v286_v18, 0.0  ;;  %v288_v21 = vsel %vm1336_vm3, %v286_v18, 0.0  ;;  %v1071_v24 = vunpack.c.h.bf16 %v1069_v9 }
  0x29   : > { %s1352_s21 = sld [smem:[#allocation6 + %s1288_s20]]  ;;  %v292_v22 = vsel %vm1312_vm0, %v291_v19, 0.0  ;;  %v293_v23 = vsel %vm1317_vm1, %v291_v19, 0.0  ;;  %s2058_s28 = smov %s2053_s13  ;;  %v289_v25 = vadd.f32 %v287_v20, %v284_v16  ;;  %v290_v26 = vadd.f32 %v288_v21, %v285_v17 }
  0x2a   : > { %s1365_s1 = sld [smem:[#allocation6 + %s2058_s28]]  ;;  %s392_s23 = sadd.s32 2, %s1343_s19  ;;  %v294_v27 = vstv %s1300_s27 }
  0x2b   : > { %s1371_s25 = sld [smem:[#allocation6 + %s325_s24]]  ;;  %s1034_s8 = sshll.u32 %s1306_s10, 3  ;;  %v295_v28 = vsel %vm1331_vm2, %v294_v27, 0.0  ;;  %v296_v29 = vsel %vm1336_vm3, %v294_v27, 0.0  ;;  %v299_v32 = vmul.f32 %v1066_v8, %v289_v25  ;;  %v300_v33 = vmul.f32 %v1067_v12, %v290_v26 }
  0x2c   : > { %s1378_s9 = sld [smem:[#allocation6 + %s327_s18]]  ;;  %s335_s13 = scalar_lea.vmem %s2041_s2, %s1034_s8  ;;  %v297_v30 = vadd.f32 %v295_v28, %v292_v22  ;;  %v298_v31 = vadd.f32 %v296_v29, %v293_v23 }
  0x2d   : > { %v1073_v34 = vld [vmem:[%s335_s13] sm:$0xff]   ;;  %s1035_s20 = sshll.u32 %s1323_s15, 3  ;;  %s1385_s24 = sld [smem:[#allocation5 + %s1343_s19]]  ;;  %v347_v36 = vstv %s1327_s17 }
  0x2e   : > { %v1074_v35 = vunpack.c.l.bf16 %v1073_v34  ;;  %s342_s18 = scalar_lea.vmem %s2041_s2, %s1035_s20  ;;  %v350_v37 = vstv %s1340_s22  ;;  %s1394_s28 = sld [smem:[#allocation5 + %s390_s26]]  ;;  %v301_v38 = vmul.f32 %v1070_v13, %v297_v30  ;;  %v302_v39 = vmul.f32 %v1071_v24, %v298_v31 }
  0x2f   : > { %v1077_v40 = vld [vmem:[%s342_s18] sm:$0xff]   ;;  %vm1397_vm5 = vcmp.eq.s32.totalorder %v1283_v2, %v347_v36  ;;  %vm1402_vm6 = vcmp.eq.s32.totalorder %v1293_v3, %v347_v36  ;;  %s1408_s15 = sld [smem:[#allocation5 + %s392_s23]]  ;;  %s394_s17 = sadd.s32 3, %s1343_s19  ;;  %v1075_v43 = vunpack.c.h.bf16 %v1073_v34  ;;  %vm1412_vm7 = vcmp.eq.s32.totalorder %v1283_v2, %v350_v37 }
  0x30   : > { %v1078_v44 = vunpack.c.l.bf16 %v1077_v40  ;;  %vm1417_vm8 = vcmp.eq.s32.totalorder %v1293_v3, %v350_v37  ;;  %s1421_s22 = sld [smem:[#allocation5 + %s394_s17]]  ;;  %s1424_s8 = sadd.s32 108, %s1279_s12  ;;  %v303_v47 = vadd.f32 %v301_v38, %v299_v32  ;;  %v304_v48 = vadd.f32 %v302_v39, %v300_v33 }
  0x31   : > { %v353_v49 = vstv %s1352_s21  ;;  %v356_v50 = vstv %s1365_s1  ;;  %s1429_s14 = sld [smem:[#allocation6 + %s1343_s19]]  ;;  %s457_s16 = sadd.s32 1, %s1424_s8  ;;  %v1079_v60 = vunpack.c.h.bf16 %v1077_v40  ;;  %v361_v61 = vstv %s1371_s25 }
  0x32   : > { %v354_v51 = vsel %vm1397_vm5, %v353_v49, 0.0  ;;  %v355_v52 = vsel %vm1402_vm6, %v353_v49, 0.0  ;;  %v357_v53 = vsel %vm1412_vm7, %v356_v50, 0.0  ;;  %v358_v54 = vsel %vm1417_vm8, %v356_v50, 0.0  ;;  %s1442_s21 = sld [smem:[#allocation6 + %s390_s26]]  ;;  %s459_s1 = sadd.s32 2, %s1424_s8 }
  0x33   : > { %v306_v55 = vsel %vm305_vm4, %v303_v47, 0.0  ;;  %v307_v56 = vsel %vm305_vm4, %v304_v48, 0.0  ;;  %v359_v57 = vadd.f32 %v357_v53, %v354_v51  ;;  %v360_v58 = vadd.f32 %v358_v54, %v355_v52  ;;  %s1449_s13 = sld [smem:[#allocation6 + %s392_s23]]  ;;  %s1038_s20 = sshll.u32 %s1385_s24, 3 }
  0x34   : > { %v308_v59 = vadd.f32 %v307_v56, %v306_v55  ;;  %v364_v62 = vstv %s1378_s9  ;;  %s1454_s27 = sld [smem:[#allocation6 + %s394_s17]]  ;;  %s402_s18 = scalar_lea.vmem %s2041_s2, %s1038_s20  ;;  %v362_v63 = vsel %vm1397_vm5, %v361_v61, 0.0  ;;  %v363_v0 = vsel %vm1402_vm6, %v361_v61, 0.0 }
  0x35   : > { %v365_v1 = vsel %vm1412_vm7, %v364_v62, 0.0  ;;  %v366_v4 = vsel %vm1417_vm8, %v364_v62, 0.0  ;;  %v1467_v5 = vld [vmem:[%s402_s18] sm:$0xff]   ;;  %s1039_s19 = sshll.u32 %s1394_s28, 3  ;;  %v369_v9 = vmul.f32 %v1074_v35, %v359_v57  ;;  %s1474_s24 = sld [smem:[#allocation5 + %s1424_s8]]  ;;  %v370_v10 = vmul.f32 %v1075_v43, %v360_v58 }
  0x36   : > { %v309_v6 = vrot.slane %v308_v59, 4  ;;  %v367_v7 = vadd.f32 %v365_v1, %v362_v63  ;;  %v368_v8 = vadd.f32 %v366_v4, %v363_v0  ;;  %s409_s9 = scalar_lea.vmem %s2041_s2, %s1039_s19  ;;  %v1082_v11 = vunpack.c.l.bf16 %v1467_v5  ;;  %s1483_s28 = sld [smem:[#allocation5 + %s457_s16]] }
  0x37   : > { %v1083_v12 = vunpack.c.h.bf16 %v1467_v5  ;;  %v1478_v13 = vld [vmem:[%s409_s9] sm:$0xff]   ;;  %v414_v14 = vstv %s1408_s15  ;;  %s461_s17 = sadd.s32 3, %s1424_s8  ;;  %s1488_s20 = sadd.s32 144, %s1279_s12  ;;  %v417_v22 = vstv %s1421_s22  ;;  %v420_v28 = vstv %s1429_s14 }
  0x38   : > { %v310_v15 = vadd.f32 %v309_v6, %v308_v59  ;;  %v371_v16 = vmul.f32 %v1078_v44, %v367_v7  ;;  %v372_v17 = vmul.f32 %v1079_v60, %v368_v8  ;;  %v1086_v18 = vunpack.c.l.bf16 %v1478_v13  ;;  %s1504_s15 = sld [smem:[#allocation5 + %s459_s1]]  ;;  %s524_s10 = sadd.s32 1, %s1488_s20 }
  0x39   : > { %v1087_v19 = vunpack.c.h.bf16 %v1478_v13  ;;  %vm1492_vm10 = vcmp.eq.s32.totalorder %v1283_v2, %v414_v14  ;;  %vm1497_vm11 = vcmp.eq.s32.totalorder %v1293_v3, %v414_v14  ;;  %vm1507_vm12 = vcmp.eq.s32.totalorder %v1283_v2, %v417_v22  ;;  %s1513_s26 = sld [smem:[#allocation5 + %s461_s17]]  ;;  %s526_s23 = sadd.s32 2, %s1488_s20 }
  0x3a   : > { %v311_v23 = vrot.slane %v310_v15, 2  ;;  %v373_v24 = vadd.f32 %v371_v16, %v369_v9  ;;  %v374_v25 = vadd.f32 %v372_v17, %v370_v10  ;;  %vm1516_vm13 = vcmp.eq.s32.totalorder %v1293_v3, %v417_v22  ;;  %s1524_s22 = sld [smem:[#allocation6 + %s1424_s8]] }
  0x3b   : > { %v423_v29 = vstv %s1442_s21  ;;  %v428_v30 = vstv %s1449_s13  ;;  %v421_v34 = vsel %vm1492_vm10, %v420_v28, 0.0  ;;  %s1533_s18 = sld [smem:[#allocation6 + %s457_s16]]  ;;  %s1042_s14 = sshll.u32 %s1474_s24, 3  ;;  %v422_v36 = vsel %vm1497_vm11, %v420_v28, 0.0 }
  0x3c   : > { %v312_v31 = vadd.f32 %v311_v23, %v310_v15  ;;  %v375_v32 = vsel %vm305_vm4, %v373_v24, 0.0  ;;  %v376_v33 = vsel %vm305_vm4, %v374_v25, 0.0  ;;  %v424_v37 = vsel %vm1507_vm12, %v423_v29, 0.0  ;;  %s469_s19 = scalar_lea.vmem %s2041_s2, %s1042_s14  ;;  %s1043_s16 = sshll.u32 %s1483_s28, 3 }
  0x3d   : > { %v377_v35 = vadd.f32 %v376_v33, %v375_v32  ;;  %v425_v38 = vsel %vm1516_vm13, %v423_v29, 0.0  ;;  %v426_v40 = vadd.f32 %v424_v37, %v421_v34  ;;  %v429_v42 = vsel %vm1492_vm10, %v428_v30, 0.0  ;;  %v1548_v43 = vld [vmem:[%s469_s19] sm:$0xff]   ;;  %s1552_s25 = sld [smem:[#allocation5 + %s1488_s20]]  ;;  %s476_s14 = scalar_lea.vmem %s2041_s2, %s1043_s16 }
  0x3e   : > { %v313_v39 = vrot.slane %v312_v31, 1  ;;  %v427_v41 = vadd.f32 %v425_v38, %v422_v36  ;;  %v430_v45 = vsel %vm1497_vm11, %v428_v30, 0.0  ;;  %v431_v46 = vstv %s1454_s27  ;;  %s1563_s21 = sld [smem:[#allocation5 + %s524_s10]]  ;;  %v1573_v52 = vld [vmem:[%s476_s14] sm:$0xff]   ;;  %s528_s28 = sadd.s32 3, %s1488_s20 }
  0x3f   : > { %v378_v44 = vrot.slane %v377_v35, 4  ;;  %v1090_v47 = vunpack.c.l.bf16 %v1548_v43  ;;  %v432_v49 = vsel %vm1507_vm12, %v431_v46, 0.0  ;;  %v433_v50 = vsel %vm1516_vm13, %v431_v46, 0.0  ;;  %s1571_s27 = sld [smem:[#allocation6 + %s459_s1]]  ;;  %s1581_s19 = sadd.s32 180, %s1279_s12 }
  0x40   : > { %v314_v48 = vadd.f32 %v313_v39, %v312_v31  ;;  %v436_v51 = vmul.f32 %v1082_v11, %v426_v40  ;;  %v434_v54 = vadd.f32 %v432_v49, %v429_v42  ;;  %v435_v55 = vadd.f32 %v433_v50, %v430_v45  ;;  %s1578_s13 = sld [smem:[#allocation6 + %s461_s17]]  ;;  %s593_s24 = sadd.s32 2, %s1581_s19 }
  0x41   : > { %v379_v53 = vadd.f32 %v378_v44, %v377_v35  ;;  %v437_v56 = vmul.f32 %v1083_v12, %v427_v41  ;;  %v1091_v57 = vunpack.c.h.bf16 %v1548_v43  ;;  %v1094_v58 = vunpack.c.l.bf16 %v1573_v52  ;;  %s1590_s1 = sld [smem:[#allocation5 + %s526_s23]] }
  0x42   : > { %316 = vst.msk [vmem:[#allocation3] sm:$0x1] %vm315_vm9, %v314_v48  ;;  %v1095_v59 = vunpack.c.h.bf16 %v1573_v52  ;;  %v481_v60 = vstv %s1504_s15  ;;  %v438_v62 = vmul.f32 %v1086_v18, %v434_v54  ;;  %v439_v63 = vmul.f32 %v1087_v19, %v435_v55  ;;  %s1601_s8 = sld [smem:[#allocation5 + %s528_s28]]  ;;  %s591_s15 = sadd.s32 1, %s1581_s19 }
  0x43   : > { %v380_v61 = vrot.slane %v379_v53, 2  ;;  %vm1595_vm14 = vcmp.eq.s32.totalorder %v1283_v2, %v481_v60  ;;  %vm1604_vm15 = vcmp.eq.s32.totalorder %v1293_v3, %v481_v60  ;;  %v484_v4 = vstv %s1513_s26  ;;  %s1046_s17 = sshll.u32 %s1552_s25, 3  ;;  %s1619_s16 = sld [smem:[#allocation6 + %s1488_s20]] }
  0x44   : > { %v487_v5 = vstv %s1524_s22  ;;  %v490_v6 = vstv %s1533_s18  ;;  %v440_v8 = vadd.f32 %v438_v62, %v436_v51  ;;  %v441_v9 = vadd.f32 %v439_v63, %v437_v56  ;;  %s536_s26 = scalar_lea.vmem %s2041_s2, %s1046_s17  ;;  %s1047_s22 = sshll.u32 %s1563_s21, 3 }
  0x45   : > { %v381_v7 = vadd.f32 %v380_v61, %v379_v53  ;;  %vm1614_vm0 = vcmp.eq.s32.totalorder %v1283_v2, %v484_v4  ;;  %vm1625_vm1 = vcmp.eq.s32.totalorder %v1293_v3, %v484_v4  ;;  %v488_v12 = vsel %vm1595_vm14, %v487_v5, 0.0  ;;  %s1637_s18 = sld [smem:[#allocation5 + %s1581_s19]]  ;;  %s543_s17 = scalar_lea.vmem %s2041_s2, %s1047_s22  ;;  %v1665_v27 = vld [vmem:[%s536_s26] sm:$0xff]  }
  0x46   : > { %v489_v13 = vsel %vm1604_vm15, %v487_v5, 0.0  ;;  %v491_v14 = vsel %vm1614_vm0, %v490_v6, 0.0  ;;  %v442_v16 = vsel %vm305_vm4, %v440_v8, 0.0  ;;  %v443_v17 = vsel %vm305_vm4, %v441_v9, 0.0  ;;  %s1648_s9 = sld [smem:[#allocation5 + %s591_s15]]  ;;  %v1667_v28 = vld [vmem:[%s543_s17] sm:$0xff]  }
  0x47   : > { %v382_v15 = vrot.slane %v381_v7, 1  ;;  %v492_v18 = vsel %vm1625_vm1, %v490_v6, 0.0  ;;  %v444_v19 = vadd.f32 %v443_v17, %v442_v16  ;;  %v493_v20 = vadd.f32 %v491_v14, %v488_v12  ;;  %s1653_s21 = sld [smem:[#allocation6 + %s524_s10]] }
  0x48   : > { %v494_v21 = vadd.f32 %v492_v18, %v489_v13  ;;  %v495_v22 = vstv %s1571_s27  ;;  %v498_v26 = vstv %s1578_s13  ;;  %s1663_s22 = sld [smem:[#allocation6 + %s526_s23]]  ;;  %s595_s27 = sadd.s32 3, %s1581_s19  ;;  %v1098_v37 = vunpack.c.l.bf16 %v1665_v27 }
  0x49   : > { %v383_v23 = vadd.f32 %v382_v15, %v381_v7  ;;  %v496_v24 = vsel %vm1595_vm14, %v495_v22, 0.0  ;;  %v497_v25 = vsel %vm1604_vm15, %v495_v22, 0.0  ;;  %v445_v29 = vrot.slane %v444_v19, 4  ;;  %s1676_s10 = sld [smem:[#allocation6 + %s528_s28]]  ;;  %s1679_s23 = sadd.s32 216, %s1279_s12 }
  0x4a   : > { %v499_v30 = vsel %vm1614_vm0, %v498_v26, 0.0  ;;  %v500_v31 = vsel %vm1625_vm1, %v498_v26, 0.0  ;;  %v503_v34 = vmul.f32 %v1090_v47, %v493_v20  ;;  %v504_v35 = vmul.f32 %v1091_v57, %v494_v21  ;;  %s1686_s13 = sld [smem:[#allocation5 + %s593_s24]]  ;;  %s658_s17 = sadd.s32 1, %s1679_s23 }
  0x4b   : > { %384 = vst.msk [vmem:[#allocation3 + $0x1] sm:$0x1] %vm315_vm9, %v383_v23  ;;  %v501_v32 = vadd.f32 %v499_v30, %v496_v24  ;;  %v502_v33 = vadd.f32 %v500_v31, %v497_v25  ;;  %v446_v36 = vadd.f32 %v445_v29, %v444_v19  ;;  %v1099_v38 = vunpack.c.h.bf16 %v1665_v27  ;;  %s1693_s20 = sld [smem:[#allocation5 + %s595_s27]]  ;;  %s1050_s28 = sshll.u32 %s1637_s18, 3 }
  0x4c   : > { %v1102_v39 = vunpack.c.l.bf16 %v1667_v28  ;;  %v548_v42 = vstv %s1590_s1  ;;  %v551_v43 = vstv %s1601_s8  ;;  %s603_s14 = scalar_lea.vmem %s2041_s2, %s1050_s28  ;;  %s1722_s1 = sld [smem:[#allocation6 + %s1581_s19]]  ;;  %v554_v51 = vstv %s1619_s16 }
  0x4d   : > { %v505_v40 = vmul.f32 %v1094_v58, %v501_v32  ;;  %v506_v41 = vmul.f32 %v1095_v59, %v502_v33  ;;  %v447_v44 = vrot.slane %v446_v36, 2  ;;  %vm1707_vm2 = vcmp.eq.s32.totalorder %v1283_v2, %v548_v42  ;;  %s1051_s8 = sshll.u32 %s1648_s9, 3  ;;  %s1732_s18 = sld [smem:[#allocation5 + %s1679_s23]]  ;;  %v1739_v56 = vld [vmem:[%s603_s14] sm:$0xff]  }
  0x4e   : > { %vm1712_vm3 = vcmp.eq.s32.totalorder %v1293_v3, %v548_v42  ;;  %vm1717_vm5 = vcmp.eq.s32.totalorder %v1283_v2, %v551_v43  ;;  %vm1726_vm6 = vcmp.eq.s32.totalorder %v1293_v3, %v551_v43  ;;  %v555_v53 = vsel %vm1707_vm2, %v554_v51, 0.0  ;;  %s1743_s9 = sld [smem:[#allocation5 + %s658_s17]]  ;;  %s610_s26 = scalar_lea.vmem %s2041_s2, %s1051_s8 }
  0x4f   : > { %v507_v48 = vadd.f32 %v505_v40, %v503_v34  ;;  %v508_v49 = vadd.f32 %v506_v41, %v504_v35  ;;  %v448_v52 = vadd.f32 %v447_v44, %v446_v36  ;;  %v556_v54 = vsel %vm1712_vm3, %v554_v51, 0.0  ;;  %s1753_s16 = sld [smem:[#allocation6 + %s591_s15]]  ;;  %s2048_s14 = sadd.s32 2, %s1679_s23  ;;  %v1778_v11 = vld [vmem:[%s610_s26] sm:$0xff]  }
  0x50   : > { %v557_v55 = vstv %s1653_s21  ;;  %s1760_s25 = sld [smem:[#allocation6 + %s593_s24]]  ;;  %v1103_v1 = vunpack.c.h.bf16 %v1667_v28  ;;  %v562_v4 = vstv %s1663_s22  ;;  %v565_v5 = vstv %s1676_s10  ;;  %s1772_s21 = sadd.s32 252, %s1279_s12 }
  0x51   : > { %v509_v57 = vsel %vm305_vm4, %v507_v48, 0.0  ;;  %v510_v58 = vsel %vm305_vm4, %v508_v49, 0.0  ;;  %v558_v59 = vsel %vm1717_vm5, %v557_v55, 0.0  ;;  %v559_v60 = vsel %vm1726_vm6, %v557_v55, 0.0  ;;  %s1768_s15 = sld [smem:[#allocation6 + %s595_s27]]  ;;  %s2047_s12 = sadd.s32 3, %s1679_s23 }
  0x52   : > { %v449_v61 = vrot.slane %v448_v52, 1  ;;  %v511_v62 = vadd.f32 %v510_v58, %v509_v57  ;;  %v560_v63 = vadd.f32 %v558_v59, %v555_v53  ;;  %v561_v0 = vadd.f32 %v559_v60, %v556_v54  ;;  %s1789_s19 = sld [smem:[#allocation5 + %s2048_s14]]  ;;  %s725_s24 = sadd.s32 1, %s1772_s21 }
  0x53   : > { %v1106_v6 = vunpack.c.l.bf16 %v1739_v56  ;;  %v563_v9 = vsel %vm1707_vm2, %v562_v4, 0.0  ;;  %v564_v10 = vsel %vm1712_vm3, %v562_v4, 0.0  ;;  %v566_v12 = vsel %vm1717_vm5, %v565_v5, 0.0  ;;  %s1054_s22 = sshll.u32 %s1732_s18, 3  ;;  %s1798_s27 = sld [smem:[#allocation5 + %s1772_s21]] }
  0x54   : > { %v450_v7 = vadd.f32 %v449_v61, %v448_v52  ;;  %v512_v8 = vrot.slane %v511_v62, 4  ;;  %v567_v13 = vsel %vm1726_vm6, %v565_v5, 0.0  ;;  %v570_v14 = vmul.f32 %v1098_v37, %v560_v63  ;;  %s1809_s10 = sld [smem:[#allocation5 + %s2047_s12]]  ;;  %s670_s18 = scalar_lea.vmem %s2041_s2, %s1054_s22 }
  0x55   : > { %v1107_v15 = vunpack.c.h.bf16 %v1739_v56  ;;  %v568_v17 = vadd.f32 %v566_v12, %v563_v9  ;;  %v569_v18 = vadd.f32 %v567_v13, %v564_v10  ;;  %v571_v19 = vmul.f32 %v1099_v38, %v561_v0  ;;  %s1847_s28 = sld [smem:[#allocation6 + %s658_s17]]  ;;  %s2099_s22 = sadd.s32 2, %s1679_s23  ;;  %v1864_v48 = vld [vmem:[%s670_s18] sm:$0xff]  }
  0x56   : > { %451 = vst.msk [vmem:[#allocation3 + $0x2] sm:$0x1] %vm315_vm9, %v450_v7  ;;  %v513_v16 = vadd.f32 %v512_v8, %v511_v62  ;;  %v1110_v20 = vunpack.c.l.bf16 %v1778_v11  ;;  %v615_v21 = vstv %s1686_s13  ;;  %v618_v22 = vstv %s1693_s20  ;;  %s1055_s13 = sshll.u32 %s1743_s9, 3  ;;  %s1829_s20 = sld [smem:[#allocation6 + %s1679_s23]]  ;;  %v1063_v8 = vld [vmem:[%s1275_s11 + $0x18] sm:$0xff] }
  0x57   : > { %v621_v23 = vstv %s1722_s1  ;;  %v572_v25 = vmul.f32 %v1102_v39, %v568_v17  ;;  %v573_v26 = vmul.f32 %v1103_v1, %v569_v18  ;;  %vm1803_vm7 = vcmp.eq.s32.totalorder %v1283_v2, %v615_v21  ;;  %s1838_s9 = sld [smem:[#allocation5 + %s725_s24]]  ;;  %s677_s14 = scalar_lea.vmem %s2041_s2, %s1055_s13  ;;  %829 = vmatpush.bf16.msra.mxu0 %v1063_v8 }
  0x58   : > { %v514_v24 = vrot.slane %v513_v16, 2  ;;  %v1111_v29 = vunpack.c.h.bf16 %v1778_v11  ;;  %vm1814_vm8 = vcmp.eq.s32.totalorder %v1293_v3, %v615_v21  ;;  %vm1819_vm10 = vcmp.eq.s32.totalorder %v1283_v2, %v618_v22  ;;  %v1870_v53 = vld [vmem:[%s677_s14] sm:$0xff]   ;;  %s727_s17 = sadd.s32 2, %s1772_s21  ;;  %s2100_s14 = sadd.s32 3, %s1679_s23 }
  0x59   : > { %vm1824_vm11 = vcmp.eq.s32.totalorder %v1293_v3, %v618_v22  ;;  %v574_v33 = vadd.f32 %v572_v25, %v570_v14  ;;  %v575_v34 = vadd.f32 %v573_v26, %v571_v19  ;;  %v622_v35 = vsel %vm1803_vm7, %v621_v23, 0.0  ;;  %s729_s12 = sadd.s32 3, %s1772_s21  ;;  %s1926_s8 = sld [smem:[#allocation6 + %s1772_s21]]  ;;  %v1062_v26 = vld [vmem:[%s1275_s11 + $0x10] sm:$0xff] }
  0x5a   : > { %v515_v32 = vadd.f32 %v514_v24, %v513_v16  ;;  %v623_v36 = vsel %vm1814_vm8, %v621_v23, 0.0  ;;  %v624_v37 = vstv %s1753_s16  ;;  %v629_v38 = vstv %s1760_s25  ;;  %s1858_s16 = sld [smem:[#allocation6 + %s2099_s22]]  ;;  %s1058_s25 = sshll.u32 %s1798_s27, 3 }
  0x5b   : > { %v632_v39 = vstv %s1768_s15  ;;  %v576_v41 = vsel %vm305_vm4, %v574_v33, 0.0  ;;  %v577_v42 = vsel %vm305_vm4, %v575_v34, 0.0  ;;  %v625_v43 = vsel %vm1819_vm10, %v624_v37, 0.0  ;;  %s1881_s15 = sld [smem:[#allocation6 + %s2100_s14]]  ;;  %s737_s13 = scalar_lea.vmem %s2041_s2, %s1058_s25  ;;  %830 = vmatpush.bf16.msra.mxu0 %v1062_v26 }
  0x5c   : > { %v516_v40 = vrot.slane %v515_v32, 1  ;;  %v578_v44 = vadd.f32 %v577_v42, %v576_v41  ;;  %v626_v45 = vsel %vm1824_vm11, %v624_v37, 0.0  ;;  %v627_v46 = vadd.f32 %v625_v43, %v622_v35  ;;  %s1890_s27 = sld [smem:[#allocation5 + %s727_s17]]  ;;  %v1937_v21 = vld [vmem:[%s737_s13] sm:$0xff]  }
  0x5d   : > { %v630_v47 = vsel %vm1803_vm7, %v629_v38, 0.0  ;;  %v628_v50 = vadd.f32 %v626_v45, %v623_v36  ;;  %v631_v51 = vsel %vm1814_vm8, %v629_v38, 0.0  ;;  %v633_v52 = vsel %vm1819_vm10, %v632_v39, 0.0  ;;  %s1059_s1 = sshll.u32 %s1838_s9, 3  ;;  %s1935_s18 = sld [smem:[#allocation6 + %s725_s24]] }
  0x5e   : > { %v517_v49 = vadd.f32 %v516_v40, %v515_v32  ;;  %v579_v54 = vrot.slane %v578_v44, 4  ;;  %v634_v55 = vsel %vm1824_vm11, %v632_v39, 0.0  ;;  %v635_v57 = vadd.f32 %v633_v52, %v630_v47  ;;  %s1961_s24 = sld [smem:[#allocation6 + %s727_s17]] }
  0x5f   : > { %v637_v58 = vmul.f32 %v1106_v6, %v627_v46  ;;  %v636_v59 = vadd.f32 %v634_v55, %v631_v51  ;;  %v638_v60 = vmul.f32 %v1107_v15, %v628_v50  ;;  %v1114_v61 = vunpack.c.l.bf16 %v1864_v48  ;;  %s1965_s26 = sld [smem:[#allocation6 + %s729_s12]] }
  0x60   : > { %518 = vst.msk [vmem:[#allocation3 + $0x3] sm:$0x1] %vm315_vm9, %v517_v49  ;;  %v1115_v62 = vunpack.c.h.bf16 %v1864_v48  ;;  %v580_v63 = vadd.f32 %v579_v54, %v578_v44  ;;  %v639_v56 = vmul.f32 %v1110_v20, %v635_v57  ;;  %v1118_v0 = vunpack.c.l.bf16 %v1870_v53  ;;  %v1061_v44 = vld [vmem:[%s1275_s11 + $0x8] sm:$0xff] }
  0x61   : > { %v682_v1 = vstv %s1789_s19  ;;  %v640_v4 = vmul.f32 %v1111_v29, %v636_v59  ;;  %v685_v7 = vstv %s1809_s10  ;;  %s1920_s10 = sld [smem:[#allocation5 + %s729_s12]]  ;;  %v688_v14 = vstv %s1829_s20  ;;  %831 = vmatpush.bf16.msra.mxu0 %v1061_v44 }
  0x62   : > { %vm1893_vm12 = vcmp.eq.s32.totalorder %v1283_v2, %v682_v1  ;;  %vm1898_vm13 = vcmp.eq.s32.totalorder %v1293_v3, %v682_v1  ;;  %v581_v9 = vrot.slane %v580_v63, 2  ;;  %v641_v10 = vadd.f32 %v639_v56, %v637_v58 }
  0x63   : > { %vm1909_vm14 = vcmp.eq.s32.totalorder %v1283_v2, %v685_v7  ;;  %vm1914_vm15 = vcmp.eq.s32.totalorder %v1293_v3, %v685_v7  ;;  %v642_v13 = vadd.f32 %v640_v4, %v638_v60  ;;  %v691_v15 = vstv %s1847_s28  ;;  %s744_s28 = scalar_lea.vmem %s2041_s2, %s1059_s1 }
  0x64   : > { %v696_v16 = vstv %s1858_s16  ;;  %v582_v17 = vadd.f32 %v581_v9, %v580_v63  ;;  %v643_v18 = vsel %vm305_vm4, %v641_v10, 0.0  ;;  %v689_v19 = vsel %vm1893_vm12, %v688_v14, 0.0  ;;  %v1125_v35 = vld [vmem:[%s744_s28] sm:$0xff]  }
  0x65   : > { %v690_v20 = vsel %vm1898_vm13, %v688_v14, 0.0  ;;  %v644_v22 = vsel %vm305_vm4, %v642_v13, 0.0  ;;  %v692_v23 = vsel %vm1909_vm14, %v691_v15, 0.0  ;;  %v693_v24 = vsel %vm1914_vm15, %v691_v15, 0.0 }
  0x66   : > { %v697_v25 = vsel %vm1893_vm12, %v696_v16, 0.0  ;;  %v583_v27 = vrot.slane %v582_v17, 1  ;;  %v645_v29 = vadd.f32 %v644_v22, %v643_v18  ;;  %v694_v28 = vadd.f32 %v692_v23, %v689_v19 }
  0x67   : > { %v695_v30 = vadd.f32 %v693_v24, %v690_v20  ;;  %v1119_v31 = vunpack.c.h.bf16 %v1870_v53  ;;  %v698_v32 = vsel %vm1898_vm13, %v696_v16, 0.0  ;;  %v699_v33 = vstv %s1881_s15 }
  0x68   : > { %v1122_v34 = vunpack.c.l.bf16 %v1937_v21  ;;  %v584_v36 = vadd.f32 %v583_v27, %v582_v17  ;;  %v646_v37 = vrot.slane %v645_v29, 4  ;;  %v700_v38 = vsel %vm1909_vm14, %v699_v33, 0.0 }
  0x69   : > { %v701_v39 = vsel %vm1914_vm15, %v699_v33, 0.0  ;;  %v702_v40 = vadd.f32 %v700_v38, %v697_v25  ;;  %v704_v42 = vmul.f32 %v1114_v61, %v694_v28  ;;  %v705_v43 = vmul.f32 %v1115_v62, %v695_v30  ;;  %v1060_v62 = vld [vmem:[%s1275_s11] sm:$0xff] }
  0x6a   : > { %v703_v41 = vadd.f32 %v701_v39, %v698_v32  ;;  %585 = vst.msk [vmem:[#allocation3 + $0x4] sm:$0x1] %vm315_vm9, %v584_v36  ;;  %v647_v45 = vadd.f32 %v646_v37, %v645_v29  ;;  %v1123_v46 = vunpack.c.h.bf16 %v1937_v21  ;;  %v1126_v47 = vunpack.c.l.bf16 %v1125_v35  ;;  %832 = vmatpush.bf16.msra.mxu0 %v1060_v62 }
  0x6b   : > { %v749_v48 = vstv %s1890_s27  ;;  %v706_v49 = vmul.f32 %v1118_v0, %v702_v40  ;;  %v752_v54 = vstv %s1920_s10  ;;  %v755_v55 = vstv %s1926_s8 }
  0x6c   : > { %v707_v50 = vmul.f32 %v1119_v31, %v703_v41  ;;  %vm1972_vm0 = vcmp.eq.s32.totalorder %v1283_v2, %v749_v48  ;;  %vm1977_vm1 = vcmp.eq.s32.totalorder %v1293_v3, %v749_v48  ;;  %v648_v53 = vrot.slane %v647_v45, 2 }
  0x6d   : > { %v758_v57 = vstv %s1935_s18  ;;  %v708_v58 = vadd.f32 %v706_v49, %v704_v42  ;;  %vm1985_vm2 = vcmp.eq.s32.totalorder %v1283_v2, %v752_v54  ;;  %vm1990_vm3 = vcmp.eq.s32.totalorder %v1293_v3, %v752_v54  ;;  %v787_v42 = vld [vmem:[#allocation2] sm:$0xff] }
  0x6e   : > { %v709_v59 = vadd.f32 %v707_v50, %v705_v43  ;;  %v649_v63 = vadd.f32 %v648_v53, %v647_v45  ;;  %v756_v56 = vsel %vm1972_vm0, %v755_v55, 0.0  ;;  %v757_v0 = vsel %vm1977_vm1, %v755_v55, 0.0 }
  0x6f   : > { %v759_v2 = vsel %vm1985_vm2, %v758_v57, 0.0  ;;  %v710_v1 = vsel %vm305_vm4, %v708_v58, 0.0  ;;  %v760_v3 = vsel %vm1990_vm3, %v758_v57, 0.0  ;;  %v763_v9 = vstv %s1961_s24 }
  0x70   : > { %v711_v4 = vsel %vm305_vm4, %v709_v59, 0.0  ;;  %v761_v5 = vadd.f32 %v759_v2, %v756_v56  ;;  %v650_v6 = vrot.slane %v649_v63, 1  ;;  %v762_v8 = vadd.f32 %v760_v3, %v757_v0 }
  0x71   : > { %v712_v7 = vadd.f32 %v711_v4, %v710_v1  ;;  %v1127_v10 = vunpack.c.h.bf16 %v1125_v35  ;;  %v764_v11 = vsel %vm1972_vm0, %v763_v9, 0.0  ;;  %v765_v12 = vsel %vm1977_vm1, %v763_v9, 0.0 }
  0x72   : > { %v766_v13 = vstv %s1965_s26  ;;  %v651_v14 = vadd.f32 %v650_v6, %v649_v63  ;;  %v771_v20 = vmul.f32 %v1122_v34, %v761_v5  ;;  %v772_v21 = vmul.f32 %v1123_v46, %v762_v8 }
  0x73   : > { %v713_v15 = vrot.slane %v712_v7, 4  ;;  %v767_v16 = vsel %vm1985_vm2, %v766_v13, 0.0  ;;  %v768_v17 = vsel %vm1990_vm3, %v766_v13, 0.0 }
  0x74   : > { %v769_v18 = vadd.f32 %v767_v16, %v764_v11  ;;  %v770_v19 = vadd.f32 %v768_v17, %v765_v12  ;;  %652 = vst.msk [vmem:[#allocation3 + $0x5] sm:$0x1] %vm315_vm9, %v651_v14 }
  0x75   : > { %v714_v22 = vadd.f32 %v713_v15, %v712_v7 }
  0x76   : > { %v773_v23 = vmul.f32 %v1126_v47, %v769_v18  ;;  %v774_v24 = vmul.f32 %v1127_v10, %v770_v19 }
  0x77   : > { %v715_v25 = vrot.slane %v714_v22, 2 }
  0x78   : > { %v775_v26 = vadd.f32 %v773_v23, %v771_v20  ;;  %v776_v27 = vadd.f32 %v774_v24, %v772_v21 }
  0x79   : > { %v716_v29 = vadd.f32 %v715_v25, %v714_v22 }
  0x7a   : > { %v777_v28 = vsel %vm305_vm4, %v775_v26, 0.0  ;;  %v778_v30 = vsel %vm305_vm4, %v776_v27, 0.0 }
  0x7b   : > { %v717_v31 = vrot.slane %v716_v29, 1  ;;  %v779_v32 = vadd.f32 %v778_v30, %v777_v28 }
  0x7d   : > { %v718_v33 = vadd.f32 %v717_v31, %v716_v29  ;;  %v780_v35 = vrot.slane %v779_v32, 4 }
  0x7f   : > { %719 = vst.msk [vmem:[#allocation3 + $0x6] sm:$0x1] %vm315_vm9, %v718_v33  ;;  %v781_v34 = vadd.f32 %v780_v35, %v779_v32 }
  0x81   : > { %v782_v36 = vrot.slane %v781_v34, 2 }
  0x83   : > { %v783_v37 = vadd.f32 %v782_v36, %v781_v34 }
  0x85   : > { %v784_v38 = vrot.slane %v783_v37, 1 }
  0x87   : > { %v785_v39 = vadd.f32 %v784_v38, %v783_v37 }
  0x89   : > { %786 = vst.msk [vmem:[#allocation3 + $0x7] sm:$0x1] %vm315_vm9, %v785_v39 }
  0x90   : > { %v788_v40 = vld [vmem:[#allocation3] sm:$0xff] }
  0x91   : > { %v789_v41 = vpack.c.bf16 %v788_v40, %v788_v40 }
  0x93   : > { %1024 = vmatmul.msk.bf16.vlgmr.msra.gmra.mxu0 %vm305_vm4, %v789_v41 }
 0x110   : > { %v834_v43 = vpop.f32.mrf.mxu0 }
 0x111   : > { %v838_v44 = vadd.f32 %v834_v43, %v787_v42 }
 0x113   : > { %839 = vst [vmem:[#allocation2] sm:$0xff] %v838_v44 }
 0x114   : > { %843 = sbr.rel (%p1025_p6) target bundleno = 290 (0x122), region = 44 }
 0x118   : > { %v836_v45 = vpop.f32.mrf.mxu0 }
 0x119   : > { %v1155_v47 = vld [vmem:[%s2043_s4] ss:$0 sm:$0xff] }
 0x11a   : > { %v844_v46 = vld [vmem:[#allocation2] sm:$0xff] }
 0x11b   : > { %v849_v48 = vadd.f32 %v1155_v47, %v844_v46  ;;  %v851_v49 = vld [vmem:[%s2044_s5] sm:$0xff] }
 0x11d   : > { %v850_v50 = vmul.f32 4.0, %v849_v48 }
 0x11f   : > { %v852_v51 = vadd.f32 %v851_v49, %v850_v50 }
 0x121   : > { %853 = vst [vmem:[%s2045_s6] sm:$0xff] %v852_v51 }
 0x122 PF: > { %s29_s7 = sadd.s32 1, %s1204_s7   ;;  %s2117_s29 = smov %s1200_s30 }
 0x123   : > { %p26_p7 = scmp.ge.s32.totalorder %s29_s7, 11   ;;  %s2118_s30 = smov %s2120_s0 }
 0x125   :  { %28 = sbr.rel (!%p26_p7) target bundleno = 9 (0x9), region = 93 }

// kernel: refine_forward.2
= control target key start
LH: loop header
LB: loop body
LE: loop exit
PB: predicated region body
PF: predicated region fallthrough
CT: control target
= control target key end

     0   :  { %s5393_s18 = smov 0   ;;  %s7771_s0 = inlined_call_operand.vmem [shape: bf16[2,256,4], index: 0, kind: input, shape index: {}]   ;;  %s7772_s1 = inlined_call_operand.vmem [shape: bf16[9,4,256], index: 1, kind: input, shape index: {}]   ;;  %s7773_s2 = inlined_call_operand.vmem [shape: f32[1,256], index: 2, kind: input, shape index: {}]   ;;  %s7774_s3 = inlined_call_operand.vmem [shape: bf16[256,64], index: 3, kind: input, shape index: {}]   ;;  %s7775_s4 = inlined_call_operand.vmem [shape: f32[1,64], index: 4, kind: input, shape index: {}]   ;;  %s7776_s5 = inlined_call_operand.vmem [shape: bf16[2,256,64], index: 5, kind: output, shape index: {}]  }
   0x1 LB: > { %s4873_s19 = sadd.s32 4294967295, %s5358_s18   ;;  %p4877_p0 = scmp.ge.s32.totalorder %s5358_s18, 1  ;;  %s5358_s18 = sphi %s5393_s18, %s15_s18  }
   0x2   : > { %p187_p1 = scmp.lt.s32.totalorder %s5358_s18, 3 }
   0x4   : > { %p188_p2 = pnand %p4877_p0, %p187_p1 }
   0x6   : > { %191 = sbr.rel (%p188_p2) target bundleno = 1584 (0x630), region = 40 }
   0xb   : > { %v4882_v0 = vld [vmem:[%s7772_s1 + $0x4] sm:$0xf]  ;;  %p215_p3 = scmp.lt.s32.totalorder %s4873_s19, 1  ;;  %vm1281_vm0 = vcmask 1041408   ;;  %v1076_v1 = vld [vmem:[%s7772_s1] sm:$0xf]  ;;  %v421_v6 = vlaneseq }
   0xc   : > { %1229 = vst [vmem:[#allocation1] ss:$4 sm:$0xff] %v4882_v0  ;;  %vm7829_vm1 = vcmask 1040384   ;;  %v4945_v19 = vld [vmem:[%s7772_s1 + $0x8] sm:$0xf]  ;;  %v5360_v23 = vmov 0  }
   0xd   : > { %s8559_s19 = smov (!%p215_p3, %s4873_s19), 1  ;;  %v5427_v17 = vshrl.u32 %v421_v6, 7  ;;  %vm7836_vm2 = vsmask.f32 7424  ;;  %v5434_v24 = vrot.slane %v5360_v23, 1  ;;  %vm1232_vm3 = vcmask 31744  }
   0xe   : > { %s5242_s22 = sshll.u32 %s8559_s19, 7  ;;  %v5361_v35 = vmov 0.0|0.0   ;;  %v4978_v37 = vld [vmem:[%s7772_s1 + $0xc] sm:$0xf] }
   0xf   : > { %s5412_s25 = scalar_lea.vmem %s7771_s0, %s5242_s22  ;;  %7973 = vst [vmem:[#allocation2_spill] sm:$0xff] %v5434_v24  ;;  %v424_v25 = vadd.s32 16, %v5427_v17  ;;  %v426_v53 = vadd.s32 32, %v5427_v17  ;;  %s7607_s11 = scalar_lea.vmem %s7776_s5, %s5242_s22 }
  0x10   : > { %v5261_v2 = vld [vmem:[%s5412_s25] sm:$0xff]   ;;  %v5324_v5 = vld [vmem:[%s5412_s25 + $0x8] sm:$0xff]   ;;  %v5325_v39 = vld [vmem:[%s5412_s25 + $0x10] sm:$0xff]  }
  0x11   : > { %v5262_v3 = vunpack.c.l.bf16 %v5261_v2  ;;  %v5263_v4 = vunpack.c.h.bf16 %v5261_v2  ;;  %v5266_v13 = vunpack.c.l.bf16 %v5324_v5  ;;  %v5267_v14 = vunpack.c.h.bf16 %v5324_v5  ;;  %v5326_v61 = vld [vmem:[%s5412_s25 + $0x18] sm:$0xff]  }
  0x12   : > { %v472_v34 = vand.u32 15, %v424_v25  ;;  %v5270_v46 = vunpack.c.l.bf16 %v5325_v39  ;;  %v5271_v47 = vunpack.c.h.bf16 %v5325_v39  ;;  %v486_v58 = vand.u32 15, %v426_v53 }
  0x13   : > { %v1230_v7 = vld.sshfl [vmem:[#allocation1] sm:$0xff pattern:$0x73625140]  ;;  %v1231_v8 = vld.sshfl [vmem:[#allocation1 + $0x8] sm:$0xff pattern:$0x73625140]  ;;  %v5274_v0 = vunpack.c.l.bf16 %v5326_v61 }
  0x14   : > { %v1282_v9 = vsel %vm1281_vm0, %v1230_v7, 0  ;;  %v1284_v10 = vsel %vm1281_vm0, %v1231_v8, 0  ;;  %1465 = vst [vmem:[#allocation1] ss:$4 sm:$0xff] %v1076_v1  ;;  %v323_v11 = vrot.slane %v5262_v3, 7  ;;  %v324_v12 = vrot.slane %v5263_v4, 7 }
  0x15   : > { %1293 = vmatpush.bf16.msra.mxu0 %v1282_v9  ;;  %1382 = vmatpush.bf16.msra.mxu1 %v1284_v10  ;;  %v326_v21 = vrot.slane %v5266_v13, 7  ;;  %v328_v22 = vrot.slane %v5267_v14, 7  ;;  %v5454_v38 = vadd.s32 4294967295, %v472_v34  ;;  %v330_v51 = vrot.slane %v5270_v46, 7 }
  0x16   : > { %v5422_v15 = vsel %vm7829_vm1, %v323_v11, %v324_v12  ;;  %v5425_v16 = vsel %vm7829_vm1, 0.0, %v323_v11  ;;  %v332_v52 = vrot.slane %v5271_v47, 7  ;;  %v5482_v60 = vadd.s32 4294967295, %v486_v58 }
  0x17   : > { %v1077_v18 = vpack.c.bf16 %v5422_v15, %v5425_v16  ;;  %v5440_v31 = vsel %vm7829_vm1, %v324_v12, %v326_v21  ;;  %v5443_v32 = vsel %vm7829_vm1, %v326_v21, %v328_v22  ;;  %7976 = vst [vmem:[#allocation5_spill] sm:$0xff] %v5454_v38  ;;  %vm7843_vm4 = vcmp.ge.s32.totalorder %v5454_v38, 0 }
  0x18   : > { %7974 = vst [vmem:[#allocation3_spill] sm:$0xff] %v5440_v31  ;;  %v1078_v36 = vpack.c.bf16 %v5443_v32, %v5440_v31  ;;  %v1030_v50 = vsel %vm7843_vm4, %v5425_v16, 0.0  ;;  %v5469_v56 = vsel %vm7829_vm1, %v328_v22, %v330_v51  ;;  %v5472_v57 = vsel %vm7829_vm1, %v330_v51, %v332_v52 }
  0x19   : > { %v1104_v20 = vshll.u32 %v1077_v18, 16  ;;  %7975 = vst [vmem:[#allocation4_spill] sm:$0xff] %v5443_v32  ;;  %v1108_v44 = vshrl.u32 %v1077_v18, 16  ;;  %v1061_v55 = vpack.c.bf16 %v5422_v15, %v1030_v50  ;;  %v1079_v59 = vpack.c.bf16 %v5472_v57, %v5469_v56  ;;  %v5327_v18 = vld [vmem:[%s5412_s25 + $0x20] sm:$0xff]  }
  0x1a   : > { %v1112_v45 = vshll.u32 %v1078_v36, 16  ;;  %7978 = vst [vmem:[#allocation7_spill] sm:$0xff] %v5469_v56  ;;  %v1116_v62 = vshrl.u32 %v1078_v36, 16  ;;  %v5275_v1 = vunpack.c.h.bf16 %v5326_v61  ;;  %vm7851_vm5 = vcmp.ge.s32.totalorder %v5482_v60, 0 }
  0x1b   : > { %v1466_v26 = vld.sshfl [vmem:[#allocation1] sm:$0xff pattern:$0x73625140]  ;;  %v1467_v27 = vld.sshfl [vmem:[#allocation1 + $0x8] sm:$0xff pattern:$0x73625140]  ;;  %v5278_v21 = vunpack.c.l.bf16 %v5327_v18  ;;  %v5279_v22 = vunpack.c.h.bf16 %v5327_v18 }
  0x1c   : > { %v1515_v28 = vsel %vm1281_vm0, %v1466_v26, 0  ;;  %v1517_v29 = vsel %vm1281_vm0, %v1467_v27, 0  ;;  %2039 = vst [vmem:[#allocation1] ss:$4 sm:$0xff] %v4945_v19  ;;  %v1106_v30 = vrot.slane %v1104_v20, 1  ;;  %v1114_v49 = vrot.slane %v1112_v45, 1 }
  0x1d   : > { %1526 = vmatpush.bf16.msra.mxu2 %v1515_v28  ;;  %1615 = vmatpush.bf16.msra.mxu3 %v1517_v29  ;;  %7979 = vst [vmem:[#allocation8_spill] sm:$0xff] %v5472_v57  ;;  %v1120_v63 = vshll.u32 %v1079_v59, 16  ;;  %v1032_v4 = vsel %vm7851_vm5, %v5440_v31, 0.0  ;;  %v334_v5 = vrot.slane %v5274_v0, 7  ;;  %v336_v6 = vrot.slane %v5275_v1, 7 }
  0x1e   : > { %v1107_v33 = vsel %vm7836_vm2, %v5434_v24, %v1106_v30  ;;  %v1110_v48 = vor.u32 %v1108_v44, %v1106_v30  ;;  %7980 = vst [vmem:[#allocation9_spill] sm:$0xff] %v5482_v60  ;;  %v1118_v2 = vor.u32 %v1116_v62, %v1114_v49  ;;  %v428_v7 = vadd.s32 48, %v5427_v17  ;;  %v5329_v62 = vld [vmem:[%s5412_s25 + $0x30] sm:$0xff]  }
  0x1f   : > { %4883 = vmatmul.msk.bf16.vlgmr.msra.gmra.mxu0 %vm1232_vm3, %v1107_v33  ;;  %4899 = vmatmul.msk.bf16.vlgmr.msra.gmra.mxu1 %vm1232_vm3, %v1107_v33  ;;  %v1122_v3 = vrot.slane %v1120_v63, 1  ;;  %v1062_v9 = vpack.c.bf16 %v5443_v32, %v1032_v4  ;;  %v5495_v10 = vsel %vm7829_vm1, %v332_v52, %v334_v5  ;;  %v5498_v11 = vsel %vm7829_vm1, %v334_v5, %v336_v6 }
  0x20   : > { %1527 = vmatmul.bf16.vlgmr.msra.gmra.mxu2 %v5361_v35  ;;  %1616 = vmatmul.bf16.vlgmr.msra.gmra.mxu3 %v5361_v35  ;;  %v5465_v54 = vsel %vm7836_vm2, %v1110_v48, %v1114_v49  ;;  %7982 = vst [vmem:[#allocation11_spill] sm:$0xff] %v5495_v10  ;;  %v500_v12 = vand.u32 15, %v428_v7  ;;  %v1080_v13 = vpack.c.bf16 %v5498_v11, %v5495_v10  ;;  %v1124_v19 = vshrl.u32 %v1079_v59, 16 }
  0x21   : > { %7977 = vst [vmem:[#allocation6_spill] sm:$0xff] %v5465_v54  ;;  %v5491_v8 = vsel %vm7836_vm2, %v1118_v2, %v1122_v3  ;;  %v338_v27 = vrot.slane %v5278_v21, 7  ;;  %v340_v28 = vrot.slane %v5279_v22, 7  ;;  %v430_v29 = vadd.s32 64, %v5427_v17 }
  0x22   : > { %7981 = vst [vmem:[#allocation10_spill] sm:$0xff] %v5491_v8  ;;  %v5508_v14 = vadd.s32 4294967295, %v500_v12  ;;  %v1128_v20 = vshll.u32 %v1080_v13, 16  ;;  %v1126_v23 = vor.u32 %v1124_v19, %v1122_v3  ;;  %v432_v50 = vadd.s32 80, %v5427_v17 }
  0x23   : > { %v2040_v40 = vld.sshfl [vmem:[#allocation1] sm:$0xff pattern:$0x73625140]  ;;  %v2041_v41 = vld.sshfl [vmem:[#allocation1 + $0x8] sm:$0xff pattern:$0x73625140]  ;;  %v5521_v34 = vsel %vm7829_vm1, %v336_v6, %v338_v27  ;;  %v5524_v35 = vsel %vm7829_vm1, %v338_v27, %v340_v28  ;;  %v5286_v1 = vunpack.c.l.bf16 %v5329_v62  ;;  %v5287_v2 = vunpack.c.h.bf16 %v5329_v62 }
  0x24   : > { %v2090_v42 = vsel %vm1281_vm0, %v2040_v40, 0  ;;  %v2092_v43 = vsel %vm1281_vm0, %v2041_v41, 0  ;;  %2387 = vst [vmem:[#allocation1] ss:$4 sm:$0xff] %v4978_v37  ;;  %vm7857_vm6 = vcmp.ge.s32.totalorder %v5508_v14, 0  ;;  %v1130_v25 = vrot.slane %v1128_v20, 1 }
  0x25   : > { %2101 = vmatpush.bf16.msrb.mxu0 %v2090_v42  ;;  %2190 = vmatpush.bf16.msrb.mxu1 %v2092_v43  ;;  %7983 = vst [vmem:[#allocation12_spill] sm:$0xff] %v5498_v11  ;;  %v1034_v26 = vsel %vm7857_vm6, %v5469_v56, 0.0  ;;  %v514_v36 = vand.u32 15, %v430_v29  ;;  %v1081_v37 = vpack.c.bf16 %v5524_v35, %v5521_v34  ;;  %v5328_v40 = vld [vmem:[%s5412_s25 + $0x28] sm:$0xff]   ;;  %v1132_v41 = vshrl.u32 %v1080_v13, 16 }
  0x26   : > { %7984 = vst [vmem:[#allocation13_spill] sm:$0xff] %v5508_v14  ;;  %v5517_v30 = vsel %vm7836_vm2, %v1126_v23, %v1130_v25  ;;  %v1063_v33 = vpack.c.bf16 %v5472_v57, %v1034_v26  ;;  %v5282_v43 = vunpack.c.l.bf16 %v5328_v40  ;;  %v5283_v44 = vunpack.c.h.bf16 %v5328_v40  ;;  %v5330_v23 = vld [vmem:[%s5412_s25 + $0x38] sm:$0xff]  }
  0x27   : > { %7985 = vst [vmem:[#allocation14_spill] sm:$0xff] %v5517_v30  ;;  %v5534_v39 = vadd.s32 4294967295, %v514_v36  ;;  %v1136_v42 = vshll.u32 %v1081_v37, 16  ;;  %v1134_v45 = vor.u32 %v1132_v41, %v1130_v25  ;;  %v528_v58 = vand.u32 15, %v432_v50 }
  0x28   : > { %7986 = vst [vmem:[#allocation15_spill] sm:$0xff] %v5521_v34  ;;  %v342_v48 = vrot.slane %v5282_v43, 7  ;;  %v344_v49 = vrot.slane %v5283_v44, 7  ;;  %v1140_v63 = vshrl.u32 %v1081_v37, 16  ;;  %v346_v6 = vrot.slane %v5286_v1, 7 }
  0x29   : > { %7987 = vst [vmem:[#allocation16_spill] sm:$0xff] %v5524_v35  ;;  %vm7863_vm7 = vcmp.ge.s32.totalorder %v5534_v39, 0  ;;  %v1138_v46 = vrot.slane %v1136_v42, 1  ;;  %v5560_v61 = vadd.s32 4294967295, %v528_v58  ;;  %v348_v7 = vrot.slane %v5287_v2, 7 }
  0x2a   : > { %7988 = vst [vmem:[#allocation17_spill] sm:$0xff] %v5534_v39  ;;  %v1036_v47 = vsel %vm7863_vm7, %v5495_v10, 0.0  ;;  %v5547_v53 = vsel %vm7829_vm1, %v340_v28, %v342_v48  ;;  %v5573_v18 = vsel %vm7829_vm1, %v344_v49, %v346_v6  ;;  %v5290_v27 = vunpack.c.l.bf16 %v5330_v23 }
  0x2b   : > { %v5543_v51 = vsel %vm7836_vm2, %v1134_v45, %v1138_v46  ;;  %v1064_v52 = vpack.c.bf16 %v5498_v11, %v1036_v47  ;;  %7990 = vst [vmem:[#allocation19_spill] sm:$0xff] %v5547_v53  ;;  %vm7869_vm8 = vcmp.ge.s32.totalorder %v5560_v61, 0  ;;  %v1142_v3 = vor.u32 %v1140_v63, %v1138_v46 }
  0x2c   : > { %7989 = vst [vmem:[#allocation18_spill] sm:$0xff] %v5543_v51  ;;  %v1038_v5 = vsel %vm7869_vm8, %v5521_v34, 0.0  ;;  %v5576_v19 = vsel %vm7829_vm1, %v346_v6, %v348_v7  ;;  %v5291_v28 = vunpack.c.h.bf16 %v5330_v23  ;;  %v350_v37 = vrot.slane %v5290_v27, 7 }
  0x2d   : > { %7992 = vst [vmem:[#allocation21_spill] sm:$0xff] %v5560_v61  ;;  %v1065_v13 = vpack.c.bf16 %v5524_v35, %v1038_v5  ;;  %v1083_v21 = vpack.c.bf16 %v5576_v19, %v5573_v18  ;;  %v436_v41 = vadd.s32 112, %v5427_v17 }
  0x2e   : > { %7994 = vst [vmem:[#allocation23_spill] sm:$0xff] %v5573_v18  ;;  %v352_v40 = vrot.slane %v5291_v28, 7  ;;  %v5599_v44 = vsel %vm7829_vm1, %v348_v7, %v350_v37  ;;  %v2388_v28 = vld.sshfl [vmem:[#allocation1] sm:$0xff pattern:$0x73625140] }
  0x2f   : > { %4884 = vmatmul.msk.bf16.gmra.mxu0 %vm1232_vm3, %v5465_v54  ;;  %4900 = vmatmul.msk.bf16.gmra.mxu1 %vm1232_vm3, %v5465_v54  ;;  %7995 = vst [vmem:[#allocation24_spill] sm:$0xff] %v5576_v19  ;;  %v1152_v26 = vshll.u32 %v1083_v21, 16  ;;  %v556_v46 = vand.u32 15, %v436_v41  ;;  %v1156_v50 = vshrl.u32 %v1083_v21, 16 }
  0x30   : > { %4915 = vmatmul.msk.bf16.gmra.mxu2 %vm1232_vm3, %v1061_v55  ;;  %4930 = vmatmul.msk.bf16.gmra.mxu3 %vm1232_vm3, %v1061_v55  ;;  %v5550_v55 = vsel %vm7829_vm1, %v342_v48, %v344_v49  ;;  %7998 = vst [vmem:[#allocation27_spill] sm:$0xff] %v5599_v44  ;;  %v5602_v45 = vsel %vm7829_vm1, %v350_v37, %v352_v40  ;;  %v5331_v48 = vld [vmem:[%s5412_s25 + $0x40] sm:$0xff]   ;;  %v5011_v37 = vld [vmem:[%s7772_s1 + $0x10] sm:$0xf] }
  0x31   : > { %7991 = vst [vmem:[#allocation20_spill] sm:$0xff] %v5550_v55  ;;  %v1082_v59 = vpack.c.bf16 %v5550_v55, %v5547_v53  ;;  %v1084_v47 = vpack.c.bf16 %v5602_v45, %v5599_v44  ;;  %v5613_v49 = vadd.s32 4294967295, %v556_v46  ;;  %v5294_v58 = vunpack.c.l.bf16 %v5331_v48 }
  0x32   : > { %7999 = vst [vmem:[#allocation28_spill] sm:$0xff] %v5602_v45 }
  0x33   : > { %v1144_v0 = vshll.u32 %v1082_v59, 16  ;;  %v1148_v25 = vshrl.u32 %v1082_v59, 16  ;;  %8000 = vst [vmem:[#allocation29_spill] sm:$0xff] %v5613_v49  ;;  %v5295_v59 = vunpack.c.h.bf16 %v5331_v48  ;;  %vm7881_vm10 = vcmp.ge.s32.totalorder %v5613_v49, 0 }
  0x34   : > { %v1042_v2 = vsel %vm7881_vm10, %v5573_v18, 0.0  ;;  %v1164_v23 = vshrl.u32 %v1084_v47, 16  ;;  %v440_v48 = vadd.s32 144, %v5427_v17 }
  0x35   : > { %v1146_v4 = vrot.slane %v1144_v0, 1  ;;  %v354_v0 = vrot.slane %v5294_v58, 7  ;;  %v356_v1 = vrot.slane %v5295_v59, 7  ;;  %v1067_v5 = vpack.c.bf16 %v5576_v19, %v1042_v2 }
  0x37   : > { %v5569_v12 = vsel %vm7836_vm2, %v1142_v3, %v1146_v4  ;;  %v1150_v29 = vor.u32 %v1148_v25, %v1146_v4  ;;  %v438_v3 = vadd.s32 128, %v5427_v17  ;;  %v5625_v6 = vsel %vm7829_vm1, %v352_v40, %v354_v0 }
  0x38   : > { %7993 = vst [vmem:[#allocation22_spill] sm:$0xff] %v5569_v12  ;;  %v5628_v7 = vsel %vm7829_vm1, %v354_v0, %v356_v1  ;;  %v584_v0 = vand.u32 15, %v440_v48 }
  0x39   : > { %8002 = vst [vmem:[#allocation31_spill] sm:$0xff] %v5625_v6 }
  0x3a   : > { %8003 = vst [vmem:[#allocation32_spill] sm:$0xff] %v5628_v7 }
  0x3f   : > { %4885 = vmatmul.msk.bf16.gmra.mxu0 %vm1232_vm3, %v5491_v8  ;;  %4901 = vmatmul.msk.bf16.gmra.mxu1 %vm1232_vm3, %v5491_v8 }
  0x40   : > { %4916 = vmatmul.msk.bf16.gmra.mxu2 %vm1232_vm3, %v1062_v9  ;;  %4931 = vmatmul.msk.bf16.gmra.mxu3 %vm1232_vm3, %v1062_v9  ;;  %v434_v9 = vadd.s32 96, %v5427_v17 }
  0x42   : > { %v542_v20 = vand.u32 15, %v434_v9  ;;  %v570_v9 = vand.u32 15, %v438_v3  ;;  %v5669_v3 = vadd.s32 4294967295, %v584_v0 }
  0x44   : > { %v5586_v22 = vadd.s32 4294967295, %v542_v20  ;;  %v5332_v20 = vld [vmem:[%s5412_s25 + $0x48] sm:$0xff]   ;;  %v5639_v21 = vadd.s32 4294967295, %v570_v9  ;;  %8008 = vst [vmem:[#allocation37_spill] sm:$0xff] %v5669_v3  ;;  %vm7896_vm12 = vcmp.ge.s32.totalorder %v5669_v3, 0 }
  0x45   : > { %v5299_v27 = vunpack.c.h.bf16 %v5332_v20 }
  0x46   : > { %7996 = vst [vmem:[#allocation25_spill] sm:$0xff] %v5586_v22  ;;  %vm7875_vm9 = vcmp.ge.s32.totalorder %v5586_v22, 0  ;;  %vm7893_vm11 = vcmp.ge.s32.totalorder %v5639_v21, 0 }
  0x47   : > { %v1040_v36 = vsel %vm7875_vm9, %v5547_v53, 0.0  ;;  %8004 = vst [vmem:[#allocation33_spill] sm:$0xff] %v5639_v21  ;;  %v360_v46 = vrot.slane %v5299_v27, 7 }
  0x48   : > { %v1066_v43 = vpack.c.bf16 %v5550_v55, %v1040_v36 }
  0x4f   : > { %4886 = vmatmul.msk.bf16.gmra.mxu0 %vm1232_vm3, %v5517_v30  ;;  %4902 = vmatmul.msk.bf16.gmra.mxu1 %vm1232_vm3, %v5517_v30 }
  0x50   : > { %4917 = vmatmul.msk.bf16.gmra.mxu2 %vm1232_vm3, %v1063_v33  ;;  %4932 = vmatmul.msk.bf16.gmra.mxu3 %vm1232_vm3, %v1063_v33  ;;  %v1154_v33 = vrot.slane %v1152_v26, 1  ;;  %v5298_v26 = vunpack.c.l.bf16 %v5332_v20 }
  0x52   : > { %v5595_v42 = vsel %vm7836_vm2, %v1150_v29, %v1154_v33  ;;  %v1158_v62 = vor.u32 %v1156_v50, %v1154_v33  ;;  %v2389_v29 = vld.sshfl [vmem:[#allocation1 + $0x8] sm:$0xff pattern:$0x73625140]  ;;  %v2438_v33 = vsel %vm1281_vm0, %v2388_v28, 0 }
  0x53   : > { %7997 = vst [vmem:[#allocation26_spill] sm:$0xff] %v5595_v42  ;;  %v2440_v36 = vsel %vm1281_vm0, %v2389_v29, 0  ;;  %2449 = vmatpush.bf16.msrb.mxu2 %v2438_v33 }
  0x54   : > { %2538 = vmatpush.bf16.msrb.mxu3 %v2440_v36  ;;  %2702 = vst [vmem:[#allocation1] ss:$4 sm:$0xff] %v5011_v37 }
  0x5f   : > { %4887 = vmatmul.msk.bf16.gmra.mxu0 %vm1232_vm3, %v5543_v51  ;;  %4903 = vmatmul.msk.bf16.gmra.mxu1 %vm1232_vm3, %v5543_v51 }
  0x60   : > { %4918 = vmatmul.msk.bf16.gmra.mxu2 %vm1232_vm3, %v1064_v52  ;;  %4933 = vmatmul.msk.bf16.gmra.mxu3 %vm1232_vm3, %v1064_v52  ;;  %v1160_v52 = vshll.u32 %v1084_v47, 16  ;;  %v1044_v47 = vsel %vm7893_vm11, %v5599_v44, 0.0 }
  0x61   : > { %v1068_v59 = vpack.c.bf16 %v5602_v45, %v1044_v47 }
  0x62   : > { %v1162_v63 = vrot.slane %v1160_v52, 1 }
  0x64   : > { %v5621_v4 = vsel %vm7836_vm2, %v1158_v62, %v1162_v63  ;;  %v1166_v40 = vor.u32 %v1164_v23, %v1162_v63 }
  0x65   : > { %8001 = vst [vmem:[#allocation30_spill] sm:$0xff] %v5621_v4 }
  0x6f   : > { %4888 = vmatmul.msk.bf16.gmra.mxu0 %vm1232_vm3, %v5569_v12  ;;  %4904 = vmatmul.msk.bf16.gmra.mxu1 %vm1232_vm3, %v5569_v12 }
  0x70   : > { %4919 = vmatmul.msk.bf16.gmra.mxu2 %vm1232_vm3, %v1065_v13  ;;  %4934 = vmatmul.msk.bf16.gmra.mxu3 %vm1232_vm3, %v1065_v13  ;;  %v1085_v13 = vpack.c.bf16 %v5628_v7, %v5625_v6 }
  0x72   : > { %v1168_v25 = vshll.u32 %v1085_v13, 16  ;;  %v1172_v20 = vshrl.u32 %v1085_v13, 16  ;;  %v442_v13 = vadd.s32 160, %v5427_v17 }
  0x74   : > { %v1170_v41 = vrot.slane %v1168_v25, 1 }
  0x76   : > { %v5652_v58 = vsel %vm7836_vm2, %v1166_v40, %v1170_v41  ;;  %v1174_v36 = vor.u32 %v1172_v20, %v1170_v41  ;;  %v1046_v40 = vsel %vm7896_vm12, %v5625_v6, 0.0 }
  0x77   : > { %8005 = vst [vmem:[#allocation34_spill] sm:$0xff] %v5652_v58 }
  0x7f   : > { %4889 = vmatmul.msk.bf16.gmra.mxu0 %vm1232_vm3, %v5595_v42  ;;  %4905 = vmatmul.msk.bf16.gmra.mxu1 %vm1232_vm3, %v5595_v42 }
  0x80   : > { %4920 = vmatmul.msk.bf16.gmra.mxu2 %vm1232_vm3, %v1066_v43  ;;  %4935 = vmatmul.msk.bf16.gmra.mxu3 %vm1232_vm3, %v1066_v43  ;;  %v358_v43 = vrot.slane %v5298_v26, 7 }
  0x82   : > { %v5656_v62 = vsel %vm7829_vm1, %v356_v1, %v358_v43  ;;  %v5659_v63 = vsel %vm7829_vm1, %v358_v43, %v360_v46  ;;  %v5333_v1 = vld [vmem:[%s5412_s25 + $0x50] sm:$0xff]  }
  0x83   : > { %8006 = vst [vmem:[#allocation35_spill] sm:$0xff] %v5656_v62  ;;  %v1086_v2 = vpack.c.bf16 %v5659_v63, %v5656_v62  ;;  %v5302_v29 = vunpack.c.l.bf16 %v5333_v1  ;;  %v5303_v33 = vunpack.c.h.bf16 %v5333_v1 }
  0x84   : > { %8007 = vst [vmem:[#allocation36_spill] sm:$0xff] %v5659_v63 }
  0x85   : > { %v1176_v23 = vshll.u32 %v1086_v2, 16  ;;  %v362_v43 = vrot.slane %v5302_v29, 7  ;;  %v364_v47 = vrot.slane %v5303_v33, 7 }
  0x87   : > { %v1178_v37 = vrot.slane %v1176_v23, 1  ;;  %v5693_v20 = vsel %vm7829_vm1, %v362_v43, %v364_v47  ;;  %v598_v23 = vand.u32 15, %v442_v13 }
  0x88   : > { %8011 = vst [vmem:[#allocation40_spill] sm:$0xff] %v5693_v20 }
  0x8f   : > { %4890 = vmatmul.msk.bf16.gmra.mxu0 %vm1232_vm3, %v5621_v4  ;;  %4906 = vmatmul.msk.bf16.gmra.mxu1 %vm1232_vm3, %v5621_v4 }
  0x90   : > { %4921 = vmatmul.msk.bf16.gmra.mxu2 %vm1232_vm3, %v1067_v5  ;;  %4936 = vmatmul.msk.bf16.gmra.mxu3 %vm1232_vm3, %v1067_v5 }
  0x9c   : > { %v1295_v50 = vpop.f32.mrf.mxu0  ;;  %v1384_v52 = vpop.f32.mrf.mxu1 }
  0x9f   : > { %4891 = vmatmul.msk.bf16.gmra.mxu0 %vm1232_vm3, %v5652_v58  ;;  %4907 = vmatmul.msk.bf16.gmra.mxu1 %vm1232_vm3, %v5652_v58 }
  0xa0   : > { %4922 = vmatmul.msk.bf16.gmra.mxu2 %vm1232_vm3, %v1068_v59  ;;  %4937 = vmatmul.msk.bf16.gmra.mxu3 %vm1232_vm3, %v1068_v59 }
  0xa3   : > { %v1528_v5 = vpop.f32.mrf.mxu2  ;;  %v1617_v9 = vpop.f32.mrf.mxu3 }
  0xa4   : > { %v1297_v25 = vpop.f32.mrf.mxu0  ;;  %v1386_v26 = vpop.f32.mrf.mxu1  ;;  %v5672_v27 = vadd.f32 %v1528_v5, %v1295_v50  ;;  %v5674_v28 = vadd.f32 %v1617_v9, %v1384_v52  ;;  %v5682_v50 = vsel %vm7836_vm2, %v1174_v36, %v1178_v37  ;;  %v1069_v52 = vpack.c.bf16 %v5628_v7, %v1046_v40 }
  0xa5   : > { %8009 = vst [vmem:[#allocation38_spill] sm:$0xff] %v5682_v50  ;;  %v5690_v9 = vsel %vm7829_vm1, %v360_v46, %v362_v43  ;;  %v5334_v46 = vld [vmem:[%s5412_s25 + $0x58] sm:$0xff]   ;;  %v1180_v36 = vshrl.u32 %v1086_v2, 16  ;;  %v444_v2 = vadd.s32 176, %v5427_v17 }
  0xa6   : > { %8010 = vst [vmem:[#allocation39_spill] sm:$0xff] %v5690_v9  ;;  %v1087_v29 = vpack.c.bf16 %v5693_v20, %v5690_v9  ;;  %v5306_v24 = vunpack.c.l.bf16 %v5334_v46 }
  0xa7   : > { %v1182_v58 = vor.u32 %v1180_v36, %v1178_v37 }
  0xa8   : > { %v1184_v40 = vshll.u32 %v1087_v29, 16 }
  0xaa   : > { %v1186_v4 = vrot.slane %v1184_v40, 1 }
  0xab   : > { %v1530_v48 = vpop.f32.mrf.mxu2  ;;  %v1619_v59 = vpop.f32.mrf.mxu3 }
  0xac   : > { %v1300_v0 = vpop.f32.mrf.mxu0  ;;  %v1389_v1 = vpop.f32.mrf.mxu1  ;;  %v5685_v41 = vadd.f32 %v1530_v48, %v1297_v25  ;;  %v5687_v5 = vadd.f32 %v1619_v59, %v1386_v26  ;;  %v5703_v25 = vadd.s32 4294967295, %v598_v23  ;;  %v366_v23 = vrot.slane %v5306_v24, 7 }
  0xae   : > { %8012 = vst [vmem:[#allocation41_spill] sm:$0xff] %v5703_v25  ;;  %vm7906_vm13 = vcmp.ge.s32.totalorder %v5703_v25, 0  ;;  %v5724_v36 = vsel %vm7829_vm1, %v364_v47, %v366_v23 }
  0xaf   : > { %4892 = vmatmul.msk.bf16.gmra.mxu0 %vm1232_vm3, %v5682_v50  ;;  %4908 = vmatmul.msk.bf16.gmra.mxu1 %vm1232_vm3, %v5682_v50  ;;  %v5307_v50 = vunpack.c.h.bf16 %v5334_v46  ;;  %8017 = vst [vmem:[#allocation46_spill] sm:$0xff] %v5724_v36 }
  0xb0   : > { %4923 = vmatmul.msk.bf16.gmra.mxu2 %vm1232_vm3, %v1069_v52  ;;  %4938 = vmatmul.msk.bf16.gmra.mxu3 %vm1232_vm3, %v1069_v52  ;;  %v1048_v52 = vsel %vm7906_vm13, %v5656_v62, 0.0 }
  0xb1   : > { %v368_v42 = vrot.slane %v5307_v50, 7  ;;  %v612_v50 = vand.u32 15, %v444_v2 }
  0xb3   : > { %v1533_v26 = vpop.f32.mrf.mxu2  ;;  %v1622_v33 = vpop.f32.mrf.mxu3  ;;  %v5727_v24 = vsel %vm7829_vm1, %v366_v23, %v368_v42 }
  0xb4   : > { %v1302_v43 = vpop.f32.mrf.mxu0  ;;  %v1391_v13 = vpop.f32.mrf.mxu1  ;;  %v5706_v48 = vadd.f32 %v1533_v26, %v1300_v0  ;;  %v5708_v59 = vadd.f32 %v1622_v33, %v1389_v1  ;;  %v5716_v0 = vsel %vm7836_vm2, %v1182_v58, %v1186_v4  ;;  %v1070_v1 = vpack.c.bf16 %v5659_v63, %v1048_v52  ;;  %8018 = vst [vmem:[#allocation47_spill] sm:$0xff] %v5727_v24 }
  0xb5   : > { %8014 = vst [vmem:[#allocation43_spill] sm:$0xff] %v5716_v0  ;;  %v1088_v58 = vpack.c.bf16 %v5727_v24, %v5724_v36 }
  0xb6   : > { %8013 = vst [vmem:[#allocation42_spill] sm:$0xff] %v5708_v59 }
  0xbb   : > { %v1535_v12 = vpop.f32.mrf.mxu2  ;;  %v1624_v51 = vpop.f32.mrf.mxu3 }
  0xbc   : > { %v1305_v46 = vpop.f32.mrf.mxu0  ;;  %v1394_v26 = vpop.f32.mrf.mxu1  ;;  %v5719_v37 = vadd.f32 %v1535_v12, %v1302_v43  ;;  %v5721_v33 = vadd.f32 %v1624_v51, %v1391_v13  ;;  %v5737_v51 = vadd.s32 4294967295, %v612_v50  ;;  %v5335_v12 = vld [vmem:[%s5412_s25 + $0x60] sm:$0xff]   ;;  %v1188_v43 = vshrl.u32 %v1087_v29, 16 }
  0xbd   : > { %v1192_v13 = vshll.u32 %v1088_v58, 16  ;;  %v5311_v8 = vunpack.c.h.bf16 %v5335_v12  ;;  %v446_v29 = vadd.s32 192, %v5427_v17 }
  0xbe   : > { %8015 = vst [vmem:[#allocation44_spill] sm:$0xff] %v5719_v37  ;;  %vm7913_vm14 = vcmp.ge.s32.totalorder %v5737_v51, 0  ;;  %v1190_v54 = vor.u32 %v1188_v43, %v1186_v4 }
  0xbf   : > { %8016 = vst [vmem:[#allocation45_spill] sm:$0xff] %v5721_v33  ;;  %4893 = vmatmul.msk.bf16.gmra.mxu0 %vm1232_vm3, %v5716_v0  ;;  %4909 = vmatmul.msk.bf16.gmra.mxu1 %vm1232_vm3, %v5716_v0  ;;  %v5310_v0 = vunpack.c.l.bf16 %v5335_v12  ;;  %v1194_v25 = vrot.slane %v1192_v13, 1  ;;  %v372_v33 = vrot.slane %v5311_v8, 7 }
  0xc0   : > { %4924 = vmatmul.msk.bf16.gmra.mxu2 %vm1232_vm3, %v1070_v1  ;;  %4939 = vmatmul.msk.bf16.gmra.mxu3 %vm1232_vm3, %v1070_v1  ;;  %8019 = vst [vmem:[#allocation48_spill] sm:$0xff] %v5737_v51  ;;  %v1050_v1 = vsel %vm7913_vm14, %v5690_v9, 0.0 }
  0xc1   : > { %v370_v50 = vrot.slane %v5310_v0, 7  ;;  %v626_v0 = vand.u32 15, %v446_v29 }
  0xc3   : > { %v1538_v47 = vpop.f32.mrf.mxu2  ;;  %v1627_v40 = vpop.f32.mrf.mxu3  ;;  %v5758_v43 = vsel %vm7829_vm1, %v368_v42, %v370_v50  ;;  %v5761_v8 = vsel %vm7829_vm1, %v370_v50, %v372_v33  ;;  %v5336_v42 = vld [vmem:[%s5412_s25 + $0x68] sm:$0xff]  }
  0xc4   : > { %v1307_v52 = vpop.f32.mrf.mxu0  ;;  %v1396_v23 = vpop.f32.mrf.mxu1  ;;  %v5740_v2 = vadd.f32 %v1538_v47, %v1305_v46  ;;  %v5742_v30 = vadd.f32 %v1627_v40, %v1394_v26  ;;  %v5750_v46 = vsel %vm7836_vm2, %v1190_v54, %v1194_v25  ;;  %v1071_v26 = vpack.c.bf16 %v5693_v20, %v1050_v1  ;;  %8025 = vst [vmem:[#allocation54_spill] sm:$0xff] %v5758_v43 }
  0xc5   : > { %8022 = vst [vmem:[#allocation51_spill] sm:$0xff] %v5750_v46  ;;  %v1089_v54 = vpack.c.bf16 %v5761_v8, %v5758_v43 }
  0xc6   : > { %8020 = vst [vmem:[#allocation49_spill] sm:$0xff] %v5740_v2  ;;  %v8112_v3 = vld [vmem:[#allocation45_spill] sm:$0xff] }
  0xc7   : > { %8021 = vst [vmem:[#allocation50_spill] sm:$0xff] %v5742_v30 }
  0xc8   : > { %8026 = vst [vmem:[#allocation55_spill] sm:$0xff] %v5761_v8 }
  0xcb   : > { %v1540_v37 = vpop.f32.mrf.mxu2  ;;  %v1629_v59 = vpop.f32.mrf.mxu3 }
  0xcc   : > { %v1310_v12 = vpop.f32.mrf.mxu0  ;;  %v1399_v47 = vpop.f32.mrf.mxu1  ;;  %v5753_v4 = vadd.f32 %v1540_v37, %v1307_v52  ;;  %v5755_v40 = vadd.f32 %v1629_v59, %v1396_v23  ;;  %v5771_v59 = vadd.s32 4294967295, %v626_v0  ;;  %v1196_v52 = vshrl.u32 %v1088_v58, 16 }
  0xcd   : > { %v1200_v23 = vshll.u32 %v1089_v54, 16  ;;  %v448_v58 = vadd.s32 208, %v5427_v17 }
  0xce   : > { %8023 = vst [vmem:[#allocation52_spill] sm:$0xff] %v5753_v4  ;;  %vm7812_vm15 = vcmp.ge.s32.totalorder %v5771_v59, 0  ;;  %v1198_v4 = vor.u32 %v1196_v52, %v1194_v25 }
  0xcf   : > { %8024 = vst [vmem:[#allocation53_spill] sm:$0xff] %v5755_v40  ;;  %4894 = vmatmul.msk.bf16.gmra.mxu0 %vm1232_vm3, %v5750_v46  ;;  %4910 = vmatmul.msk.bf16.gmra.mxu1 %vm1232_vm3, %v5750_v46  ;;  %v5314_v46 = vunpack.c.l.bf16 %v5336_v42  ;;  %v5315_v40 = vunpack.c.h.bf16 %v5336_v42  ;;  %v1202_v30 = vrot.slane %v1200_v23, 1 }
  0xd0   : > { %4925 = vmatmul.msk.bf16.gmra.mxu2 %vm1232_vm3, %v1071_v26  ;;  %4940 = vmatmul.msk.bf16.gmra.mxu3 %vm1232_vm3, %v1071_v26  ;;  %8027 = vst [vmem:[#allocation56_spill] sm:$0xff] %v5771_v59  ;;  %v1052_v26 = vsel %vm7812_vm15, %v5724_v36, 0.0 }
  0xd1   : > { %v374_v0 = vrot.slane %v5314_v46, 7  ;;  %v376_v2 = vrot.slane %v5315_v40, 7  ;;  %v640_v40 = vand.u32 15, %v448_v58 }
  0xd3   : > { %v1543_v37 = vpop.f32.mrf.mxu2  ;;  %v1632_v13 = vpop.f32.mrf.mxu3  ;;  %v5792_v52 = vsel %vm7829_vm1, %v372_v33, %v374_v0  ;;  %v5795_v46 = vsel %vm7829_vm1, %v374_v0, %v376_v2 }
  0xd4   : > { %v1312_v1 = vpop.f32.mrf.mxu0  ;;  %v1401_v50 = vpop.f32.mrf.mxu1  ;;  %v5774_v29 = vadd.f32 %v1543_v37, %v1310_v12  ;;  %v5776_v51 = vadd.f32 %v1632_v13, %v1399_v47  ;;  %v5784_v12 = vsel %vm7836_vm2, %v1198_v4, %v1202_v30  ;;  %v1072_v47 = vpack.c.bf16 %v5727_v24, %v1052_v26  ;;  %8033 = vst [vmem:[#allocation62_spill] sm:$0xff] %v5792_v52 }
  0xd5   : > { %8030 = vst [vmem:[#allocation59_spill] sm:$0xff] %v5784_v12  ;;  %v1090_v4 = vpack.c.bf16 %v5795_v46, %v5792_v52 }
  0xd6   : > { %8028 = vst [vmem:[#allocation57_spill] sm:$0xff] %v5774_v29 }
  0xd7   : > { %8029 = vst [vmem:[#allocation58_spill] sm:$0xff] %v5776_v51 }
  0xd8   : > { %8034 = vst [vmem:[#allocation63_spill] sm:$0xff] %v5795_v46 }
  0xdb   : > { %v1545_v20 = vpop.f32.mrf.mxu2  ;;  %v1634_v9 = vpop.f32.mrf.mxu3 }
  0xdc   : > { %v1315_v42 = vpop.f32.mrf.mxu0  ;;  %v1404_v37 = vpop.f32.mrf.mxu1  ;;  %v5787_v25 = vadd.f32 %v1545_v20, %v1312_v1  ;;  %v5789_v13 = vadd.f32 %v1634_v9, %v1401_v50  ;;  %v5805_v9 = vadd.s32 4294967295, %v640_v40  ;;  %v5337_v20 = vld [vmem:[%s5412_s25 + $0x70] sm:$0xff]   ;;  %v1204_v1 = vshrl.u32 %v1089_v54, 16 }
  0xdd   : > { %v1208_v50 = vshll.u32 %v1090_v4, 16  ;;  %v450_v54 = vadd.s32 224, %v5427_v17 }
  0xde   : > { %8031 = vst [vmem:[#allocation60_spill] sm:$0xff] %v5787_v25  ;;  %vm7819_vm15 = vcmp.ge.s32.totalorder %v5805_v9, 0  ;;  %v1206_v25 = vor.u32 %v1204_v1, %v1202_v30 }
  0xdf   : > { %8032 = vst [vmem:[#allocation61_spill] sm:$0xff] %v5789_v13  ;;  %4895 = vmatmul.msk.bf16.gmra.mxu0 %vm1232_vm3, %v5784_v12  ;;  %4911 = vmatmul.msk.bf16.gmra.mxu1 %vm1232_vm3, %v5784_v12  ;;  %v5318_v12 = vunpack.c.l.bf16 %v5337_v20  ;;  %v5319_v13 = vunpack.c.h.bf16 %v5337_v20  ;;  %v1210_v51 = vrot.slane %v1208_v50, 1 }
  0xe0   : > { %4926 = vmatmul.msk.bf16.gmra.mxu2 %vm1232_vm3, %v1072_v47  ;;  %4941 = vmatmul.msk.bf16.gmra.mxu3 %vm1232_vm3, %v1072_v47  ;;  %8035 = vst [vmem:[#allocation64_spill] sm:$0xff] %v5805_v9  ;;  %v1054_v47 = vsel %vm7819_vm15, %v5758_v43, 0.0 }
  0xe1   : > { %v378_v40 = vrot.slane %v5318_v12, 7  ;;  %v380_v29 = vrot.slane %v5319_v13, 7  ;;  %v1073_v20 = vpack.c.bf16 %v5761_v8, %v1054_v47  ;;  %v654_v13 = vand.u32 15, %v450_v54 }
  0xe2   : > { %v1212_v47 = vshrl.u32 %v1090_v4, 16  ;;  %v452_v4 = vadd.s32 240, %v5427_v17 }
  0xe3   : > { %v1548_v33 = vpop.f32.mrf.mxu2  ;;  %v1637_v23 = vpop.f32.mrf.mxu3  ;;  %v5826_v50 = vsel %vm7829_vm1, %v376_v2, %v378_v40  ;;  %v5829_v12 = vsel %vm7829_vm1, %v378_v40, %v380_v29  ;;  %v5840_v2 = vadd.s32 4294967295, %v654_v13 }
  0xe4   : > { %v1317_v26 = vpop.f32.mrf.mxu0  ;;  %v1406_v0 = vpop.f32.mrf.mxu1  ;;  %v5808_v58 = vadd.f32 %v1548_v33, %v1315_v42  ;;  %v5810_v59 = vadd.f32 %v1637_v23, %v1404_v37  ;;  %v5818_v37 = vsel %vm7836_vm2, %v1206_v25, %v1210_v51  ;;  %8041 = vst [vmem:[#allocation70_spill] sm:$0xff] %v5826_v50  ;;  %v1091_v25 = vpack.c.bf16 %v5829_v12, %v5826_v50 }
  0xe5   : > { %8038 = vst [vmem:[#allocation67_spill] sm:$0xff] %v5818_v37  ;;  %vm7831_vm15 = vcmp.ge.s32.totalorder %v5840_v2, 0 }
  0xe6   : > { %8036 = vst [vmem:[#allocation65_spill] sm:$0xff] %v5808_v58  ;;  %v1216_v40 = vshll.u32 %v1091_v25, 16 }
  0xe7   : > { %8037 = vst [vmem:[#allocation66_spill] sm:$0xff] %v5810_v59 }
  0xe8   : > { %8042 = vst [vmem:[#allocation71_spill] sm:$0xff] %v5829_v12  ;;  %v1218_v59 = vrot.slane %v1216_v40, 1  ;;  %v423_v40 = vadd.s32 8, %v5427_v17 }
  0xe9   : > { %8043 = vst [vmem:[#allocation72_spill] sm:$0xff] %v5840_v2  ;;  %v2703_v2 = vld.sshfl [vmem:[#allocation1] sm:$0xff pattern:$0x73625140] }
  0xeb   : > { %v1550_v24 = vpop.f32.mrf.mxu2  ;;  %v1639_v42 = vpop.f32.mrf.mxu3 }
  0xec   : > { %v1320_v33 = vpop.f32.mrf.mxu0  ;;  %v1409_v23 = vpop.f32.mrf.mxu1  ;;  %v5821_v30 = vadd.f32 %v1550_v24, %v1317_v26  ;;  %v5823_v1 = vadd.f32 %v1639_v42, %v1406_v0  ;;  %v5338_v24 = vld [vmem:[%s5412_s25 + $0x78] sm:$0xff]  }
  0xee   : > { %8039 = vst [vmem:[#allocation68_spill] sm:$0xff] %v5821_v30  ;;  %v1214_v30 = vor.u32 %v1212_v47, %v1210_v51  ;;  %v668_v47 = vand.u32 15, %v452_v4 }
  0xef   : > { %8040 = vst [vmem:[#allocation69_spill] sm:$0xff] %v5823_v1  ;;  %4896 = vmatmul.msk.bf16.gmra.mxu0 %vm1232_vm3, %v5818_v37  ;;  %4912 = vmatmul.msk.bf16.gmra.mxu1 %vm1232_vm3, %v5818_v37  ;;  %v5322_v37 = vunpack.c.l.bf16 %v5338_v24 }
  0xf0   : > { %4927 = vmatmul.msk.bf16.gmra.mxu2 %vm1232_vm3, %v1073_v20  ;;  %4942 = vmatmul.msk.bf16.gmra.mxu3 %vm1232_vm3, %v1073_v20  ;;  %v1056_v20 = vsel %vm7831_vm15, %v5792_v52, 0.0 }
  0xf1   : > { %v5847_v58 = vrot.slane %v5322_v37, 7  ;;  %v1074_v51 = vpack.c.bf16 %v5795_v46, %v1056_v20 }
  0xf3   : > { %v1553_v26 = vpop.f32.mrf.mxu2  ;;  %v1642_v0 = vpop.f32.mrf.mxu3  ;;  %8044 = vst [vmem:[#allocation73_spill] sm:$0xff] %v5847_v58  ;;  %v5863_v37 = vsel %vm7829_vm1, %v380_v29, %v5847_v58 }
  0xf4   : > { %v1322_v54 = vpop.f32.mrf.mxu0  ;;  %v1411_v42 = vpop.f32.mrf.mxu1  ;;  %v5842_v9 = vadd.f32 %v1553_v26, %v1320_v33  ;;  %v5844_v1 = vadd.f32 %v1642_v0, %v1409_v23  ;;  %v5854_v33 = vsel %vm7836_vm2, %v1214_v30, %v1218_v59  ;;  %8048 = vst [vmem:[#allocation77_spill] sm:$0xff] %v5863_v37  ;;  %v1092_v30 = vpack.c.bf16 %v5863_v37, %v5863_v37  ;;  %v2704_v37 = vld.sshfl [vmem:[#allocation1 + $0x8] sm:$0xff pattern:$0x73625140] }
  0xf5   : > { %8045 = vst [vmem:[#allocation74_spill] sm:$0xff] %v5854_v33 }
  0xf6   : > { %v1224_v20 = vshll.u32 %v1092_v30, 16  ;;  %v1896_v30 = vrot.slane %v5422_v15, 2 }
  0xfb   : > { %v1555_v13 = vpop.f32.mrf.mxu2  ;;  %v1644_v8 = vpop.f32.mrf.mxu3 }
  0xfc   : > { %v1325_v23 = vpop.f32.mrf.mxu0  ;;  %v1414_v26 = vpop.f32.mrf.mxu1  ;;  %v5856_v24 = vadd.f32 %v1555_v13, %v1322_v54  ;;  %v5858_v0 = vadd.f32 %v1644_v8, %v1411_v42  ;;  %v5873_v8 = vadd.s32 4294967295, %v668_v47  ;;  %v1220_v42 = vshrl.u32 %v1091_v25, 16 }
  0xfd   : > { %v465_v47 = vand.u32 15, %v423_v40  ;;  %v1226_v25 = vrot.slane %v1224_v20, 1  ;;  %v1894_v20 = vrot.slane %v5425_v16, 2 }
  0xfe   : > { %8046 = vst [vmem:[#allocation75_spill] sm:$0xff] %v5856_v24  ;;  %vm7830_vm1 = vcmp.ge.s32.totalorder %v5873_v8, 0  ;;  %v5883_v24 = vor.u32 %v1220_v42, %v1218_v59 }
  0xff   : > { %8047 = vst [vmem:[#allocation76_spill] sm:$0xff] %v5858_v0  ;;  %4897 = vmatmul.msk.bf16.gmra.mxu0 %vm1232_vm3, %v5854_v33  ;;  %4913 = vmatmul.msk.bf16.gmra.mxu1 %vm1232_vm3, %v5854_v33  ;;  %v2711_v0 = vsel %vm1281_vm0, %v2703_v2, 0  ;;  %v7832_v2 = vrot.slane %v5440_v31, 2 }
 0x100   : > { %4928 = vmatmul.msk.bf16.gmra.mxu2 %vm1232_vm3, %v1074_v51  ;;  %4943 = vmatmul.msk.bf16.gmra.mxu3 %vm1232_vm3, %v1074_v51  ;;  %8049 = vst [vmem:[#allocation78_spill] sm:$0xff] %v5873_v8  ;;  %v2713_v51 = vsel %vm1281_vm0, %v2704_v37, 0  ;;  %v1227_v59 = vsel %vm7836_vm2, %v5883_v24, %v1226_v25 }
 0x101   : > { %2722 = vmatpush.bf16.msra.mxu0 %v2711_v0  ;;  %2811 = vmatpush.bf16.msra.mxu1 %v2713_v51  ;;  %8051 = vst [vmem:[#allocation80_spill] sm:$0xff] %v5883_v24  ;;  %v458_v51 = vand.u32 15, %v5427_v17 }
 0x103   : > { %v1558_v29 = vpop.f32.mrf.mxu2  ;;  %v1647_v54 = vpop.f32.mrf.mxu3 }
 0x104   : > { %v1327_v4 = vpop.f32.mrf.mxu0  ;;  %v1416_v13 = vpop.f32.mrf.mxu1  ;;  %v5876_v58 = vadd.f32 %v1558_v29, %v1325_v23  ;;  %v5878_v33 = vadd.f32 %v1647_v54, %v1414_v26  ;;  %v1058_v23 = vsel %vm7830_vm1, %v5826_v50, 0.0  ;;  %v5888_v26 = vadd.s32 1, %v465_v47 }
 0x105   : > { %v1075_v42 = vpack.c.bf16 %v5829_v12, %v1058_v23  ;;  %vm1891_vm1 = vcmask 1045504   ;;  %v5362_v23 = vmov 0.0  }
 0x106   : > { %8050 = vst [vmem:[#allocation79_spill] sm:$0xff] %v5878_v33  ;;  %vm7841_vm15 = vcmp.le.s32.totalorder %v5888_v26, 15  ;;  %v1899_v47 = vsel %vm1891_vm1, %v1896_v30, %v7832_v2 }
 0x107   : > { %8052 = vst [vmem:[#allocation81_spill] sm:$0xff] %v5888_v26 }
 0x10b   : > { %v1560_v29 = vpop.f32.mrf.mxu2  ;;  %v1649_v37 = vpop.f32.mrf.mxu3 }
 0x10c   : > { %v1330_v54 = vpop.f32.mrf.mxu0  ;;  %v1419_v33 = vpop.f32.mrf.mxu1  ;;  %v5892_v40 = vadd.f32 %v1560_v29, %v1327_v4  ;;  %v5894_v0 = vadd.f32 %v1649_v37, %v1416_v13  ;;  %v1897_v4 = vsel %vm1891_vm1, %v1894_v20, %v1896_v30  ;;  %v2965_v13 = vsel %vm7841_vm15, %v1899_v47, 0.0 }
 0x10d   : > { %v5912_v25 = vpack.c.bf16 %v2965_v13, %v1897_v4  ;;  %v5914_v29 = vrot.slane %v5362_v23, 2  ;;  %v5916_v37 = vadd.s32 4294967295, %v458_v51  ;;  %v425_v13 = vadd.s32 24, %v5427_v17 }
 0x10e   : > { %8053 = vst [vmem:[#allocation82_spill] sm:$0xff] %v5892_v40 }
 0x10f   : > { %8054 = vst [vmem:[#allocation83_spill] sm:$0xff] %v5894_v0  ;;  %4898 = vmatmul.msk.bf16.gmra.mxu0 %vm1232_vm3, %v1227_v59  ;;  %4914 = vmatmul.msk.bf16.gmra.mxu1 %vm1232_vm3, %v1227_v59  ;;  %v1895_v40 = vsel %vm1891_vm1, %v5914_v29, %v1894_v20  ;;  %vm7915_vm2 = vcmp.ge.s32.totalorder %v5916_v37, 0  ;;  %v479_v26 = vand.u32 15, %v425_v13 }
 0x110   : > { %4929 = vmatmul.msk.bf16.gmra.mxu2 %vm1232_vm3, %v1075_v42  ;;  %4944 = vmatmul.msk.bf16.gmra.mxu3 %vm1232_vm3, %v1075_v42  ;;  %8055 = vst [vmem:[#allocation84_spill] sm:$0xff] %v5912_v25  ;;  %v1989_v42 = vsel %vm7841_vm15, %v1895_v40, 0.0  ;;  %v2336_v51 = vsel %vm7915_vm2, %v5425_v16, 0.0 }
 0x111   : > { %8056 = vst [vmem:[#allocation85_spill] sm:$0xff] %v5914_v29  ;;  %v5941_v16 = vadd.s32 1, %v479_v26  ;;  %v427_v26 = vadd.s32 40, %v5427_v17 }
 0x112   : > { %8057 = vst [vmem:[#allocation86_spill] sm:$0xff] %v5916_v37 }
 0x113   : > { %v1563_v2 = vpop.f32.mrf.mxu2  ;;  %v1652_v24 = vpop.f32.mrf.mxu3  ;;  %8059 = vst [vmem:[#allocation88_spill] sm:$0xff] %v5941_v16  ;;  %vm1764_vm15 = vcmp.le.s32.totalorder %v5941_v16, 15 }
 0x114   : > { %v1332_v8 = vpop.f32.mrf.mxu0  ;;  %v1421_v59 = vpop.f32.mrf.mxu1  ;;  %v5918_v0 = vadd.f32 %v1563_v2, %v1330_v54  ;;  %v5920_v30 = vadd.f32 %v1652_v24, %v1419_v33  ;;  %v2020_v2 = vpack.c.bf16 %v1989_v42, %v5914_v29 }
 0x116   : > { %8058 = vst [vmem:[#allocation87_spill] sm:$0xff] %v5920_v30  ;;  %v2368_v30 = vpack.c.bf16 %v5422_v15, %v2336_v51  ;;  %v1991_v15 = vsel %vm1764_vm15, %v1899_v47, 0.0 }
 0x117   : > { %v2021_v13 = vpack.c.bf16 %v1991_v15, %v1897_v4  ;;  %v1900_v4 = vrot.slane %v5443_v32, 2 }
 0x11b   : > { %v1565_v23 = vpop.f32.mrf.mxu2  ;;  %v1654_v25 = vpop.f32.mrf.mxu3 }
 0x11c   : > { %v1335_v33 = vpop.f32.mrf.mxu0  ;;  %v1424_v24 = vpop.f32.mrf.mxu1  ;;  %v5932_v54 = vadd.f32 %v1565_v23, %v1332_v8  ;;  %v5934_v20 = vadd.f32 %v1654_v25, %v1421_v59  ;;  %v2338_v59 = vsel %vm7843_vm4, %v5440_v31, 0.0 }
 0x11f   : > { %4946 = vmatmul.msk.bf16.vlgmr.msrb.gmra.mxu0 %vm1232_vm3, %v2020_v2  ;;  %4962 = vmatmul.msk.bf16.vlgmr.msrb.gmra.mxu1 %vm1232_vm3, %v2020_v2 }
 0x120   : > { %4979 = vmatmul.msk.bf16.vlgmr.msrb.gmra.mxu2 %vm1232_vm3, %v2368_v30  ;;  %4995 = vmatmul.msk.bf16.vlgmr.msrb.gmra.mxu3 %vm1232_vm3, %v2368_v30 }
 0x123   : > { %v1568_v40 = vpop.f32.mrf.mxu2  ;;  %v1657_v42 = vpop.f32.mrf.mxu3 }
 0x124   : > { %v1337_v29 = vpop.f32.mrf.mxu0  ;;  %v1426_v8 = vpop.f32.mrf.mxu1  ;;  %v5943_v23 = vadd.f32 %v1568_v40, %v1335_v33  ;;  %v5945_v25 = vadd.f32 %v1657_v42, %v1424_v24  ;;  %v2369_v40 = vpack.c.bf16 %v5443_v32, %v2338_v59  ;;  %v493_v42 = vand.u32 15, %v427_v26 }
 0x126   : > { %v5963_v47 = vadd.s32 1, %v493_v42 }
 0x128   : > { %8060 = vst [vmem:[#allocation89_spill] sm:$0xff] %v5963_v47  ;;  %vm1766_vm4 = vcmp.le.s32.totalorder %v5963_v47, 15 }
 0x12b   : > { %v1570_v30 = vpop.f32.mrf.mxu2  ;;  %v1659_v51 = vpop.f32.mrf.mxu3 }
 0x12c   : > { %v1340_v2 = vpop.f32.mrf.mxu0  ;;  %v1429_v37 = vpop.f32.mrf.mxu1  ;;  %v5954_v33 = vadd.f32 %v1570_v30, %v1337_v29  ;;  %v5956_v24 = vadd.f32 %v1659_v51, %v1426_v8  ;;  %v1902_v29 = vrot.slane %v5469_v56, 2 }
 0x12f   : > { %4947 = vmatmul.msk.bf16.gmra.mxu0 %vm1232_vm3, %v2021_v13  ;;  %4963 = vmatmul.msk.bf16.gmra.mxu1 %vm1232_vm3, %v2021_v13  ;;  %v5973_v13 = vsel %vm1891_vm1, %v1900_v4, %v1902_v29 }
 0x130   : > { %4980 = vmatmul.msk.bf16.gmra.mxu2 %vm1232_vm3, %v2369_v40  ;;  %4996 = vmatmul.msk.bf16.gmra.mxu3 %vm1232_vm3, %v2369_v40  ;;  %8063 = vst [vmem:[#allocation92_spill] sm:$0xff] %v5973_v13  ;;  %v8064_v40 = vrot.slane %v5440_v31, 2  ;;  %v1993_v38 = vsel %vm1766_vm4, %v5973_v13, 0.0 }
 0x132   : > { %v5978_v42 = vsel %vm1891_vm1, %v8064_v40, %v1900_v4 }
 0x133   : > { %v1573_v15 = vpop.f32.mrf.mxu2  ;;  %v1662_v8 = vpop.f32.mrf.mxu3  ;;  %8065 = vst [vmem:[#allocation93_spill] sm:$0xff] %v5978_v42  ;;  %v2022_v32 = vpack.c.bf16 %v1993_v38, %v5978_v42  ;;  %v1904_v38 = vrot.slane %v5472_v57, 2 }
 0x134   : > { %v1342_v30 = vpop.f32.mrf.mxu0  ;;  %v1431_v51 = vpop.f32.mrf.mxu1  ;;  %v5967_v59 = vadd.f32 %v1573_v15, %v1340_v2  ;;  %v5969_v26 = vadd.f32 %v1662_v8, %v1429_v37  ;;  %v2340_v2 = vsel %vm7851_vm5, %v5469_v56, 0.0  ;;  %v429_v37 = vadd.s32 56, %v5427_v17 }
 0x135   : > { %v2370_v40 = vpack.c.bf16 %v5472_v57, %v2340_v2  ;;  %v2342_v57 = vsel %vm7857_vm6, %v5495_v10, 0.0 }
 0x136   : > { %8061 = vst [vmem:[#allocation90_spill] sm:$0xff] %v5967_v59  ;;  %v507_v47 = vand.u32 15, %v429_v37 }
 0x137   : > { %8062 = vst [vmem:[#allocation91_spill] sm:$0xff] %v5969_v26 }
 0x138   : > { %v5997_v60 = vadd.s32 1, %v507_v47  ;;  %v6010_v47 = vsel %vm1891_vm1, %v1902_v29, %v1904_v38 }
 0x139   : > { %8071 = vst [vmem:[#allocation99_spill] sm:$0xff] %v6010_v47 }
 0x13a   : > { %8067 = vst [vmem:[#allocation95_spill] sm:$0xff] %v5997_v60  ;;  %vm1768_vm5 = vcmp.le.s32.totalorder %v5997_v60, 15 }
 0x13b   : > { %v1575_v15 = vpop.f32.mrf.mxu2  ;;  %v1664_v8 = vpop.f32.mrf.mxu3 }
 0x13c   : > { %v1345_v26 = vpop.f32.mrf.mxu0  ;;  %v1434_v59 = vpop.f32.mrf.mxu1  ;;  %v5988_v31 = vadd.f32 %v1575_v15, %v1342_v30  ;;  %v5990_v4 = vadd.f32 %v1664_v8, %v1431_v51  ;;  %v1906_v30 = vrot.slane %v5495_v10, 2 }
 0x13e   : > { %8066 = vst [vmem:[#allocation94_spill] sm:$0xff] %v5990_v4 }
 0x13f   : > { %4948 = vmatmul.msk.bf16.gmra.mxu0 %vm1232_vm3, %v2022_v32  ;;  %4964 = vmatmul.msk.bf16.gmra.mxu1 %vm1232_vm3, %v2022_v32  ;;  %v6007_v32 = vsel %vm1891_vm1, %v1904_v38, %v1906_v30  ;;  %v2371_v38 = vpack.c.bf16 %v5498_v11, %v2342_v57 }
 0x140   : > { %4981 = vmatmul.msk.bf16.gmra.mxu2 %vm1232_vm3, %v2370_v40  ;;  %4997 = vmatmul.msk.bf16.gmra.mxu3 %vm1232_vm3, %v2370_v40  ;;  %8070 = vst [vmem:[#allocation98_spill] sm:$0xff] %v6007_v32  ;;  %v1995_v40 = vsel %vm1768_vm5, %v6007_v32, 0.0 }
 0x143   : > { %v1578_v15 = vpop.f32.mrf.mxu2  ;;  %v1667_v51 = vpop.f32.mrf.mxu3 }
 0x144   : > { %v1347_v8 = vpop.f32.mrf.mxu0  ;;  %v1436_v56 = vpop.f32.mrf.mxu1  ;;  %v6001_v2 = vadd.f32 %v1578_v15, %v1345_v26  ;;  %v6003_v37 = vadd.f32 %v1667_v51, %v1434_v59  ;;  %v431_v26 = vadd.s32 72, %v5427_v17  ;;  %v2023_v51 = vpack.c.bf16 %v1995_v40, %v6010_v47 }
 0x145   : > { %v1908_v40 = vrot.slane %v5498_v11, 2  ;;  %v2344_v11 = vsel %vm7863_vm7, %v5521_v34, 0.0 }
 0x146   : > { %8068 = vst [vmem:[#allocation96_spill] sm:$0xff] %v6001_v2  ;;  %v521_v60 = vand.u32 15, %v431_v26 }
 0x147   : > { %8069 = vst [vmem:[#allocation97_spill] sm:$0xff] %v6003_v37 }
 0x148   : > { %v6029_v14 = vadd.s32 1, %v521_v60  ;;  %v6042_v60 = vsel %vm1891_vm1, %v1906_v30, %v1908_v40 }
 0x149   : > { %8077 = vst [vmem:[#allocation105_spill] sm:$0xff] %v6042_v60 }
 0x14a   : > { %8073 = vst [vmem:[#allocation101_spill] sm:$0xff] %v6029_v14  ;;  %vm1770_vm6 = vcmp.le.s32.totalorder %v6029_v14, 15 }
 0x14b   : > { %v1580_v59 = vpop.f32.mrf.mxu2  ;;  %v1669_v15 = vpop.f32.mrf.mxu3 }
 0x14c   : > { %v1350_v37 = vpop.f32.mrf.mxu0  ;;  %v1439_v2 = vpop.f32.mrf.mxu1  ;;  %v6020_v4 = vadd.f32 %v1580_v59, %v1347_v8  ;;  %v6022_v29 = vadd.f32 %v1669_v15, %v1436_v56  ;;  %v1910_v8 = vrot.slane %v5521_v34, 2 }
 0x14e   : > { %8072 = vst [vmem:[#allocation100_spill] sm:$0xff] %v6022_v29 }
 0x14f   : > { %4949 = vmatmul.msk.bf16.gmra.mxu0 %vm1232_vm3, %v2023_v51  ;;  %4965 = vmatmul.msk.bf16.gmra.mxu1 %vm1232_vm3, %v2023_v51  ;;  %v6039_v51 = vsel %vm1891_vm1, %v1908_v40, %v1910_v8  ;;  %v2372_v40 = vpack.c.bf16 %v5524_v35, %v2344_v11 }
 0x150   : > { %4982 = vmatmul.msk.bf16.gmra.mxu2 %vm1232_vm3, %v2371_v38  ;;  %4998 = vmatmul.msk.bf16.gmra.mxu3 %vm1232_vm3, %v2371_v38  ;;  %8076 = vst [vmem:[#allocation104_spill] sm:$0xff] %v6039_v51  ;;  %v1997_v38 = vsel %vm1770_vm6, %v6039_v51, 0.0 }
 0x153   : > { %v1583_v59 = vpop.f32.mrf.mxu2  ;;  %v1672_v56 = vpop.f32.mrf.mxu3 }
 0x154   : > { %v1352_v15 = vpop.f32.mrf.mxu0  ;;  %v1441_v10 = vpop.f32.mrf.mxu1  ;;  %v6033_v57 = vadd.f32 %v1583_v59, %v1350_v37  ;;  %v6035_v26 = vadd.f32 %v1672_v56, %v1439_v2  ;;  %v433_v37 = vadd.s32 88, %v5427_v17  ;;  %v2024_v56 = vpack.c.bf16 %v1997_v38, %v6042_v60 }
 0x155   : > { %v1912_v38 = vrot.slane %v5524_v35, 2  ;;  %v2346_v35 = vsel %vm7869_vm8, %v5547_v53, 0.0 }
 0x156   : > { %8074 = vst [vmem:[#allocation102_spill] sm:$0xff] %v6033_v57  ;;  %v535_v14 = vand.u32 15, %v433_v37 }
 0x157   : > { %8075 = vst [vmem:[#allocation103_spill] sm:$0xff] %v6035_v26 }
 0x158   : > { %v6061_v39 = vadd.s32 1, %v535_v14  ;;  %v6074_v14 = vsel %vm1891_vm1, %v1910_v8, %v1912_v38 }
 0x159   : > { %8083 = vst [vmem:[#allocation111_spill] sm:$0xff] %v6074_v14 }
 0x15a   : > { %8079 = vst [vmem:[#allocation107_spill] sm:$0xff] %v6061_v39  ;;  %vm1772_vm7 = vcmp.le.s32.totalorder %v6061_v39, 15 }
 0x15b   : > { %v1585_v2 = vpop.f32.mrf.mxu2  ;;  %v1674_v59 = vpop.f32.mrf.mxu3 }
 0x15c   : > { %v1355_v26 = vpop.f32.mrf.mxu0  ;;  %v1444_v57 = vpop.f32.mrf.mxu1  ;;  %v6052_v29 = vadd.f32 %v1585_v2, %v1352_v15  ;;  %v6054_v30 = vadd.f32 %v1674_v59, %v1441_v10  ;;  %v1914_v15 = vrot.slane %v5547_v53, 2 }
 0x15e   : > { %8078 = vst [vmem:[#allocation106_spill] sm:$0xff] %v6054_v30 }
 0x15f   : > { %4950 = vmatmul.msk.bf16.gmra.mxu0 %vm1232_vm3, %v2024_v56  ;;  %4966 = vmatmul.msk.bf16.gmra.mxu1 %vm1232_vm3, %v2024_v56  ;;  %v6071_v56 = vsel %vm1891_vm1, %v1912_v38, %v1914_v15  ;;  %v2373_v38 = vpack.c.bf16 %v5550_v55, %v2346_v35 }
 0x160   : > { %4983 = vmatmul.msk.bf16.gmra.mxu2 %vm1232_vm3, %v2372_v40  ;;  %4999 = vmatmul.msk.bf16.gmra.mxu3 %vm1232_vm3, %v2372_v40  ;;  %8082 = vst [vmem:[#allocation110_spill] sm:$0xff] %v6071_v56  ;;  %v1999_v40 = vsel %vm1772_vm7, %v6071_v56, 0.0 }
 0x163   : > { %v1588_v2 = vpop.f32.mrf.mxu2  ;;  %v1677_v10 = vpop.f32.mrf.mxu3 }
 0x164   : > { %v1357_v59 = vpop.f32.mrf.mxu0  ;;  %v1446_v34 = vpop.f32.mrf.mxu1  ;;  %v6065_v11 = vadd.f32 %v1588_v2, %v1355_v26  ;;  %v6067_v37 = vadd.f32 %v1677_v10, %v1444_v57  ;;  %v435_v26 = vadd.s32 104, %v5427_v17  ;;  %v2025_v10 = vpack.c.bf16 %v1999_v40, %v6074_v14 }
 0x165   : > { %v1916_v40 = vrot.slane %v5550_v55, 2  ;;  %v2348_v55 = vsel %vm7875_vm9, %v5573_v18, 0.0 }
 0x166   : > { %8080 = vst [vmem:[#allocation108_spill] sm:$0xff] %v6065_v11  ;;  %v549_v39 = vand.u32 15, %v435_v26 }
 0x167   : > { %8081 = vst [vmem:[#allocation109_spill] sm:$0xff] %v6067_v37 }
 0x168   : > { %v6093_v61 = vadd.s32 1, %v549_v39  ;;  %v6106_v39 = vsel %vm1891_vm1, %v1914_v15, %v1916_v40 }
 0x169   : > { %8089 = vst [vmem:[#allocation117_spill] sm:$0xff] %v6106_v39 }
 0x16a   : > { %8085 = vst [vmem:[#allocation113_spill] sm:$0xff] %v6093_v61  ;;  %vm1774_vm8 = vcmp.le.s32.totalorder %v6093_v61, 15 }
 0x16b   : > { %v1590_v57 = vpop.f32.mrf.mxu2  ;;  %v1679_v2 = vpop.f32.mrf.mxu3 }
 0x16c   : > { %v1360_v37 = vpop.f32.mrf.mxu0  ;;  %v1449_v11 = vpop.f32.mrf.mxu1  ;;  %v6084_v30 = vadd.f32 %v1590_v57, %v1357_v59  ;;  %v6086_v8 = vadd.f32 %v1679_v2, %v1446_v34  ;;  %v1918_v59 = vrot.slane %v5573_v18, 2 }
 0x16e   : > { %8084 = vst [vmem:[#allocation112_spill] sm:$0xff] %v6086_v8 }
 0x16f   : > { %4951 = vmatmul.msk.bf16.gmra.mxu0 %vm1232_vm3, %v2025_v10  ;;  %4967 = vmatmul.msk.bf16.gmra.mxu1 %vm1232_vm3, %v2025_v10  ;;  %v6103_v10 = vsel %vm1891_vm1, %v1916_v40, %v1918_v59  ;;  %v2374_v40 = vpack.c.bf16 %v5576_v19, %v2348_v55 }
 0x170   : > { %4984 = vmatmul.msk.bf16.gmra.mxu2 %vm1232_vm3, %v2373_v38  ;;  %5000 = vmatmul.msk.bf16.gmra.mxu3 %vm1232_vm3, %v2373_v38  ;;  %8088 = vst [vmem:[#allocation116_spill] sm:$0xff] %v6103_v10  ;;  %v2001_v38 = vsel %vm1774_vm8, %v6103_v10, 0.0 }
 0x173   : > { %v1593_v57 = vpop.f32.mrf.mxu2  ;;  %v1682_v34 = vpop.f32.mrf.mxu3 }
 0x174   : > { %v1362_v2 = vpop.f32.mrf.mxu0  ;;  %v1451_v53 = vpop.f32.mrf.mxu1  ;;  %v6097_v35 = vadd.f32 %v1593_v57, %v1360_v37  ;;  %v6099_v26 = vadd.f32 %v1682_v34, %v1449_v11  ;;  %v437_v37 = vadd.s32 120, %v5427_v17  ;;  %v2026_v34 = vpack.c.bf16 %v2001_v38, %v6106_v39 }
 0x175   : > { %v1920_v38 = vrot.slane %v5576_v19, 2  ;;  %v2350_v19 = vsel %vm7881_vm10, %v5599_v44, 0.0 }
 0x176   : > { %8086 = vst [vmem:[#allocation114_spill] sm:$0xff] %v6097_v35  ;;  %v563_v61 = vand.u32 15, %v437_v37 }
 0x177   : > { %8087 = vst [vmem:[#allocation115_spill] sm:$0xff] %v6099_v26 }
 0x178   : > { %v6125_v22 = vadd.s32 1, %v563_v61  ;;  %v6138_v61 = vsel %vm1891_vm1, %v1918_v59, %v1920_v38 }
 0x179   : > { %8095 = vst [vmem:[#allocation123_spill] sm:$0xff] %v6138_v61 }
 0x17a   : > { %8091 = vst [vmem:[#allocation119_spill] sm:$0xff] %v6125_v22  ;;  %vm1776_vm9 = vcmp.le.s32.totalorder %v6125_v22, 15 }
 0x17b   : > { %v1595_v11 = vpop.f32.mrf.mxu2  ;;  %v1684_v57 = vpop.f32.mrf.mxu3 }
 0x17c   : > { %v1365_v26 = vpop.f32.mrf.mxu0  ;;  %v1454_v35 = vpop.f32.mrf.mxu1  ;;  %v6116_v8 = vadd.f32 %v1595_v11, %v1362_v2  ;;  %v6118_v15 = vadd.f32 %v1684_v57, %v1451_v53  ;;  %v1922_v2 = vrot.slane %v5599_v44, 2 }
 0x17e   : > { %8090 = vst [vmem:[#allocation118_spill] sm:$0xff] %v6118_v15 }
 0x17f   : > { %4952 = vmatmul.msk.bf16.gmra.mxu0 %vm1232_vm3, %v2026_v34  ;;  %4968 = vmatmul.msk.bf16.gmra.mxu1 %vm1232_vm3, %v2026_v34  ;;  %v6135_v34 = vsel %vm1891_vm1, %v1920_v38, %v1922_v2  ;;  %v2375_v38 = vpack.c.bf16 %v5602_v45, %v2350_v19 }
 0x180   : > { %4985 = vmatmul.msk.bf16.gmra.mxu2 %vm1232_vm3, %v2374_v40  ;;  %5001 = vmatmul.msk.bf16.gmra.mxu3 %vm1232_vm3, %v2374_v40  ;;  %8094 = vst [vmem:[#allocation122_spill] sm:$0xff] %v6135_v34  ;;  %v2003_v40 = vsel %vm1776_vm9, %v6135_v34, 0.0 }
 0x183   : > { %v1598_v11 = vpop.f32.mrf.mxu2  ;;  %v1687_v53 = vpop.f32.mrf.mxu3 }
 0x184   : > { %v1367_v57 = vpop.f32.mrf.mxu0  ;;  %v1456_v18 = vpop.f32.mrf.mxu1  ;;  %v6129_v55 = vadd.f32 %v1598_v11, %v1365_v26  ;;  %v6131_v37 = vadd.f32 %v1687_v53, %v1454_v35  ;;  %v439_v26 = vadd.s32 136, %v5427_v17  ;;  %v2027_v53 = vpack.c.bf16 %v2003_v40, %v6138_v61 }
 0x185   : > { %v1924_v40 = vrot.slane %v5602_v45, 2 }
 0x186   : > { %8092 = vst [vmem:[#allocation120_spill] sm:$0xff] %v6129_v55  ;;  %v577_v22 = vand.u32 15, %v439_v26 }
 0x187   : > { %8093 = vst [vmem:[#allocation121_spill] sm:$0xff] %v6131_v37 }
 0x188   : > { %v6157_v49 = vadd.s32 1, %v577_v22  ;;  %v5044_v22 = vld [vmem:[%s7772_s1 + $0x14] sm:$0xf] }
 0x189   : > { %3015 = vst [vmem:[#allocation1] ss:$4 sm:$0xff] %v5044_v22 }
 0x18a   : > { %8098 = vst [vmem:[#allocation126_spill] sm:$0xff] %v6157_v49  ;;  %vm1778_vm10 = vcmp.le.s32.totalorder %v6157_v49, 15 }
 0x18b   : > { %v1600_v35 = vpop.f32.mrf.mxu2  ;;  %v1689_v11 = vpop.f32.mrf.mxu3 }
 0x18c   : > { %v1370_v37 = vpop.f32.mrf.mxu0  ;;  %v1459_v55 = vpop.f32.mrf.mxu1  ;;  %v6148_v15 = vadd.f32 %v1600_v35, %v1367_v57  ;;  %v6150_v59 = vadd.f32 %v1689_v11, %v1456_v18  ;;  %v1926_v57 = vrot.slane %v5625_v6, 2 }
 0x18e   : > { %8096 = vst [vmem:[#allocation124_spill] sm:$0xff] %v6148_v15 }
 0x18f   : > { %8097 = vst [vmem:[#allocation125_spill] sm:$0xff] %v6150_v59  ;;  %4953 = vmatmul.msk.bf16.gmra.mxu0 %vm1232_vm3, %v2027_v53  ;;  %4969 = vmatmul.msk.bf16.gmra.mxu1 %vm1232_vm3, %v2027_v53  ;;  %v6167_v53 = vsel %vm1891_vm1, %v1924_v40, %v1926_v57 }
 0x190   : > { %4986 = vmatmul.msk.bf16.gmra.mxu2 %vm1232_vm3, %v2375_v38  ;;  %5002 = vmatmul.msk.bf16.gmra.mxu3 %vm1232_vm3, %v2375_v38  ;;  %8101 = vst [vmem:[#allocation129_spill] sm:$0xff] %v6167_v53  ;;  %v6173_v38 = vsel %vm1891_vm1, %v1922_v2, %v1924_v40  ;;  %v3016_v61 = vld.sshfl [vmem:[#allocation1] sm:$0xff pattern:$0x73625140] }
 0x191   : > { %8102 = vst [vmem:[#allocation130_spill] sm:$0xff] %v6173_v38  ;;  %v3017_v21 = vld.sshfl [vmem:[#allocation1 + $0x8] sm:$0xff pattern:$0x73625140] }
 0x192   : > { %v3068_v34 = vsel %vm1281_vm0, %v3017_v21, 0 }
 0x193   : > { %v1603_v35 = vpop.f32.mrf.mxu2  ;;  %v1692_v18 = vpop.f32.mrf.mxu3  ;;  %3166 = vmatpush.bf16.msra.mxu3 %v3068_v34 }
 0x194   : > { %v1372_v11 = vpop.f32.mrf.mxu0  ;;  %v1461_v44 = vpop.f32.mrf.mxu1  ;;  %v6161_v19 = vadd.f32 %v1603_v35, %v1370_v37  ;;  %v6163_v26 = vadd.f32 %v1692_v18, %v1459_v55  ;;  %v2005_v37 = vsel %vm1778_vm10, %v6167_v53, 0.0  ;;  %v441_v55 = vadd.s32 152, %v5427_v17 }
 0x195   : > { %v2352_v35 = vsel %vm7893_vm11, %v5625_v6, 0.0  ;;  %v3066_v6 = vsel %vm1281_vm0, %v3016_v61, 0 }
 0x196   : > { %8099 = vst [vmem:[#allocation127_spill] sm:$0xff] %v6161_v19  ;;  %v2376_v59 = vpack.c.bf16 %v5628_v7, %v2352_v35  ;;  %v591_v49 = vand.u32 15, %v441_v55  ;;  %3077 = vmatpush.bf16.msra.mxu2 %v3066_v6 }
 0x197   : > { %8100 = vst [vmem:[#allocation128_spill] sm:$0xff] %v6163_v26  ;;  %v2028_v26 = vpack.c.bf16 %v2005_v37, %v6173_v38 }
 0x19b   : > { %v1605_v18 = vpop.f32.mrf.mxu2  ;;  %v1694_v45 = vpop.f32.mrf.mxu3 }
 0x19c   : > { %v6183_v19 = vadd.f32 %v1605_v18, %v1372_v11  ;;  %v6185_v22 = vadd.f32 %v1694_v45, %v1461_v44  ;;  %v2103_v2 = vpop.f32.mrf.mxu0  ;;  %v2192_v40 = vpop.f32.mrf.mxu1  ;;  %v6196_v44 = vadd.s32 1, %v591_v49  ;;  %v1928_v45 = vrot.slane %v5628_v7, 2 }
 0x19d   : > { %v2272_v53 = vadd.f32 %v2103_v2, %v5672_v27  ;;  %v2273_v15 = vadd.f32 %v2192_v40, %v5674_v28  ;;  %v1930_v27 = vrot.slane %v5656_v62, 2 }
 0x19e   : > { %8103 = vst [vmem:[#allocation131_spill] sm:$0xff] %v6196_v44  ;;  %vm1780_vm11 = vcmp.le.s32.totalorder %v6196_v44, 15  ;;  %v6211_v6 = vsel %vm1891_vm1, %v1926_v57, %v1928_v45  ;;  %v8120_v44 = vld [vmem:[#allocation50_spill] sm:$0xff] }
 0x19f   : > { %4954 = vmatmul.msk.bf16.gmra.mxu0 %vm1232_vm3, %v2028_v26  ;;  %4970 = vmatmul.msk.bf16.gmra.mxu1 %vm1232_vm3, %v2028_v26  ;;  %v6208_v49 = vsel %vm1891_vm1, %v1928_v45, %v1930_v27  ;;  %8105 = vst [vmem:[#allocation133_spill] sm:$0xff] %v6211_v6 }
 0x1a0   : > { %4987 = vmatmul.msk.bf16.gmra.mxu2 %vm1232_vm3, %v2376_v59  ;;  %5003 = vmatmul.msk.bf16.gmra.mxu3 %vm1232_vm3, %v2376_v59  ;;  %8104 = vst [vmem:[#allocation132_spill] sm:$0xff] %v6208_v49  ;;  %v2007_v34 = vsel %vm1780_vm11, %v6208_v49, 0.0 }
 0x1a1   : > { %v2029_v35 = vpack.c.bf16 %v2007_v34, %v6211_v6 }
 0x1a3   : > { %v2451_v28 = vpop.f32.mrf.mxu2  ;;  %v2540_v61 = vpop.f32.mrf.mxu3 }
 0x1a4   : > { %v2105_v11 = vpop.f32.mrf.mxu0  ;;  %v2194_v21 = vpop.f32.mrf.mxu1  ;;  %v6200_v37 = vadd.f32 %v2451_v28, %v2272_v53  ;;  %v6202_v55 = vadd.f32 %v2540_v61, %v2273_v15  ;;  %v2354_v15 = vsel %vm7896_vm12, %v5656_v62, 0.0  ;;  %v8106_v61 = vld [vmem:[#allocation42_spill] sm:$0xff] }
 0x1a5   : > { %v2274_v26 = vadd.f32 %v2105_v11, %v5685_v41  ;;  %v2275_v59 = vadd.f32 %v2194_v21, %v5687_v5  ;;  %v443_v41 = vadd.s32 168, %v5427_v17  ;;  %v2377_v45 = vpack.c.bf16 %v5659_v63, %v2354_v15 }
 0x1a7   : > { %v605_v21 = vand.u32 15, %v443_v41 }
 0x1a9   : > { %v6232_v34 = vadd.s32 1, %v605_v21 }
 0x1ab   : > { %v2453_v53 = vpop.f32.mrf.mxu2  ;;  %v2542_v5 = vpop.f32.mrf.mxu3  ;;  %8107 = vst [vmem:[#allocation42_spill] sm:$0xff] %v6232_v34  ;;  %vm1782_vm12 = vcmp.le.s32.totalorder %v6232_v34, 15  ;;  %v8119_v34 = vld [vmem:[#allocation49_spill] sm:$0xff] }
 0x1ac   : > { %v2108_v18 = vpop.f32.mrf.mxu0  ;;  %v2197_v2 = vpop.f32.mrf.mxu1  ;;  %v6221_v40 = vadd.f32 %v2453_v53, %v2274_v26  ;;  %v6223_v57 = vadd.f32 %v2542_v5, %v2275_v59  ;;  %v1932_v26 = vrot.slane %v5659_v63, 2  ;;  %v8108_v59 = vld [vmem:[#allocation39_spill] sm:$0xff] }
 0x1ad   : > { %v2276_v28 = vadd.f32 %v2108_v18, %v5706_v48  ;;  %v2277_v11 = vadd.f32 %v2197_v2, %v8106_v61  ;;  %v1934_v53 = vrot.slane %v8108_v59, 2  ;;  %v8111_v61 = vld [vmem:[#allocation44_spill] sm:$0xff] }
 0x1ae   : > { %v6247_v21 = vsel %vm1891_vm1, %v1930_v27, %v1932_v26 }
 0x1af   : > { %4955 = vmatmul.msk.bf16.gmra.mxu0 %vm1232_vm3, %v2029_v35  ;;  %4971 = vmatmul.msk.bf16.gmra.mxu1 %vm1232_vm3, %v2029_v35  ;;  %8114 = vst [vmem:[#allocation45_spill] sm:$0xff] %v6247_v21 }
 0x1b0   : > { %4988 = vmatmul.msk.bf16.gmra.mxu2 %vm1232_vm3, %v2377_v45  ;;  %5004 = vmatmul.msk.bf16.gmra.mxu3 %vm1232_vm3, %v2377_v45  ;;  %v6244_v45 = vsel %vm1891_vm1, %v1932_v26, %v1934_v53  ;;  %v8118_v26 = vld [vmem:[#allocation40_spill] sm:$0xff] }
 0x1b1   : > { %8113 = vst [vmem:[#allocation44_spill] sm:$0xff] %v6244_v45  ;;  %v2009_v63 = vsel %vm1782_vm12, %v6244_v45, 0.0 }
 0x1b3   : > { %v2456_v15 = vpop.f32.mrf.mxu2  ;;  %v2545_v5 = vpop.f32.mrf.mxu3 }
 0x1b4   : > { %v2110_v48 = vpop.f32.mrf.mxu0  ;;  %v2199_v18 = vpop.f32.mrf.mxu1  ;;  %v6236_v2 = vadd.f32 %v2456_v15, %v2276_v28  ;;  %v6238_v41 = vadd.f32 %v2545_v5, %v2277_v11  ;;  %v2356_v11 = vsel %vm7906_vm13, %v8108_v59, 0.0  ;;  %v445_v15 = vadd.s32 184, %v5427_v17 }
 0x1b5   : > { %v2278_v35 = vadd.f32 %v2110_v48, %v8111_v61  ;;  %v2279_v62 = vadd.f32 %v2199_v18, %v8112_v3  ;;  %v2030_v48 = vpack.c.bf16 %v2009_v63, %v6247_v21 }
 0x1b6   : > { %8109 = vst [vmem:[#allocation134_spill] sm:$0xff] %v6236_v2  ;;  %v619_v28 = vand.u32 15, %v445_v15 }
 0x1b7   : > { %8110 = vst [vmem:[#allocation135_spill] sm:$0xff] %v6238_v41  ;;  %v2378_v41 = vpack.c.bf16 %v8118_v26, %v2356_v11 }
 0x1b8   : > { %v6268_v63 = vadd.s32 1, %v619_v28 }
 0x1ba   : > { %8121 = vst [vmem:[#allocation49_spill] sm:$0xff] %v6268_v63  ;;  %vm7935_vm13 = vcmp.le.s32.totalorder %v6268_v63, 15  ;;  %v8132_v63 = vld [vmem:[#allocation57_spill] sm:$0xff] }
 0x1bb   : > { %v2458_v5 = vpop.f32.mrf.mxu2  ;;  %v2547_v3 = vpop.f32.mrf.mxu3 }
 0x1bc   : > { %v2113_v18 = vpop.f32.mrf.mxu0  ;;  %v2202_v61 = vpop.f32.mrf.mxu1  ;;  %v6257_v7 = vadd.f32 %v2458_v5, %v2278_v35  ;;  %v6259_v27 = vadd.f32 %v2547_v3, %v2279_v62  ;;  %v1936_v62 = vrot.slane %v8118_v26, 2  ;;  %v1938_v35 = vrot.slane %v5724_v36, 2 }
 0x1bd   : > { %v2280_v2 = vadd.f32 %v2113_v18, %v8119_v34  ;;  %v2281_v45 = vadd.f32 %v2202_v61, %v8120_v44  ;;  %v8124_v18 = vld [vmem:[#allocation52_spill] sm:$0xff]  ;;  %v8125_v61 = vld [vmem:[#allocation53_spill] sm:$0xff] }
 0x1be   : > { %8116 = vst [vmem:[#allocation136_spill] sm:$0xff] %v6257_v7  ;;  %v6283_v28 = vsel %vm1891_vm1, %v1934_v53, %v1936_v62 }
 0x1bf   : > { %8117 = vst [vmem:[#allocation137_spill] sm:$0xff] %v6259_v27  ;;  %4956 = vmatmul.msk.bf16.gmra.mxu0 %vm1232_vm3, %v2030_v48  ;;  %4972 = vmatmul.msk.bf16.gmra.mxu1 %vm1232_vm3, %v2030_v48  ;;  %v8133_v27 = vld [vmem:[#allocation58_spill] sm:$0xff] }
 0x1c0   : > { %4989 = vmatmul.msk.bf16.gmra.mxu2 %vm1232_vm3, %v2378_v41  ;;  %5005 = vmatmul.msk.bf16.gmra.mxu3 %vm1232_vm3, %v2378_v41  ;;  %v6280_v41 = vsel %vm1891_vm1, %v1936_v62, %v1938_v35  ;;  %8127 = vst [vmem:[#allocation53_spill] sm:$0xff] %v6283_v28  ;;  %v8131_v62 = vld [vmem:[#allocation47_spill] sm:$0xff] }
 0x1c1   : > { %8126 = vst [vmem:[#allocation52_spill] sm:$0xff] %v6280_v41  ;;  %v2011_v26 = vsel %vm7935_vm13, %v6280_v41, 0.0 }
 0x1c3   : > { %v2461_v11 = vpop.f32.mrf.mxu2  ;;  %v2550_v5 = vpop.f32.mrf.mxu3 }
 0x1c4   : > { %v2115_v34 = vpop.f32.mrf.mxu0  ;;  %v2204_v3 = vpop.f32.mrf.mxu1  ;;  %v6272_v44 = vadd.f32 %v2461_v11, %v2280_v2  ;;  %v6274_v15 = vadd.f32 %v2550_v5, %v2281_v45  ;;  %v2358_v45 = vsel %vm7913_vm14, %v5724_v36, 0.0  ;;  %v447_v11 = vadd.s32 200, %v5427_v17 }
 0x1c5   : > { %v2282_v48 = vadd.f32 %v2115_v34, %v8124_v18  ;;  %v2283_v59 = vadd.f32 %v2204_v3, %v8125_v61  ;;  %v2031_v3 = vpack.c.bf16 %v2011_v26, %v6283_v28 }
 0x1c6   : > { %8122 = vst [vmem:[#allocation50_spill] sm:$0xff] %v6272_v44  ;;  %v2379_v44 = vpack.c.bf16 %v8131_v62, %v2358_v45  ;;  %v633_v2 = vand.u32 15, %v447_v11 }
 0x1c7   : > { %8123 = vst [vmem:[#allocation138_spill] sm:$0xff] %v6274_v15 }
 0x1c8   : > { %v6304_v26 = vadd.s32 1, %v633_v2 }
 0x1ca   : > { %8134 = vst [vmem:[#allocation57_spill] sm:$0xff] %v6304_v26  ;;  %vm7922_vm14 = vcmp.le.s32.totalorder %v6304_v26, 15  ;;  %v8144_v26 = vld [vmem:[#allocation65_spill] sm:$0xff] }
 0x1cb   : > { %v2463_v5 = vpop.f32.mrf.mxu2  ;;  %v2552_v34 = vpop.f32.mrf.mxu3 }
 0x1cc   : > { %v2118_v18 = vpop.f32.mrf.mxu0  ;;  %v2207_v61 = vpop.f32.mrf.mxu1  ;;  %v6293_v15 = vadd.f32 %v2463_v5, %v2282_v48  ;;  %v6295_v53 = vadd.f32 %v2552_v34, %v2283_v59  ;;  %v1940_v59 = vrot.slane %v8131_v62, 2  ;;  %v1942_v48 = vrot.slane %v5758_v43, 2 }
 0x1cd   : > { %v2284_v41 = vadd.f32 %v2118_v18, %v8132_v63  ;;  %v2285_v7 = vadd.f32 %v2207_v61, %v8133_v27  ;;  %v8137_v18 = vld [vmem:[#allocation60_spill] sm:$0xff]  ;;  %v8138_v61 = vld [vmem:[#allocation61_spill] sm:$0xff] }
 0x1ce   : > { %8129 = vst [vmem:[#allocation139_spill] sm:$0xff] %v6293_v15  ;;  %v6319_v2 = vsel %vm1891_vm1, %v1938_v35, %v1940_v59 }
 0x1cf   : > { %8130 = vst [vmem:[#allocation140_spill] sm:$0xff] %v6295_v53  ;;  %4957 = vmatmul.msk.bf16.gmra.mxu0 %vm1232_vm3, %v2031_v3  ;;  %4973 = vmatmul.msk.bf16.gmra.mxu1 %vm1232_vm3, %v2031_v3  ;;  %v8145_v53 = vld [vmem:[#allocation66_spill] sm:$0xff] }
 0x1d0   : > { %4990 = vmatmul.msk.bf16.gmra.mxu2 %vm1232_vm3, %v2379_v44  ;;  %5006 = vmatmul.msk.bf16.gmra.mxu3 %vm1232_vm3, %v2379_v44  ;;  %v6316_v44 = vsel %vm1891_vm1, %v1940_v59, %v1942_v48  ;;  %8140 = vst [vmem:[#allocation61_spill] sm:$0xff] %v6319_v2  ;;  %v8143_v59 = vld [vmem:[#allocation55_spill] sm:$0xff] }
 0x1d1   : > { %8139 = vst [vmem:[#allocation60_spill] sm:$0xff] %v6316_v44  ;;  %v2013_v62 = vsel %vm7922_vm14, %v6316_v44, 0.0 }
 0x1d3   : > { %v2466_v45 = vpop.f32.mrf.mxu2  ;;  %v2555_v5 = vpop.f32.mrf.mxu3 }
 0x1d4   : > { %v2120_v63 = vpop.f32.mrf.mxu0  ;;  %v2209_v34 = vpop.f32.mrf.mxu1  ;;  %v6308_v27 = vadd.f32 %v2466_v45, %v2284_v41  ;;  %v6310_v11 = vadd.f32 %v2555_v5, %v2285_v7  ;;  %v8141_v41 = vld [vmem:[#allocation56_spill] sm:$0xff]  ;;  %v449_v45 = vadd.s32 216, %v5427_v17 }
 0x1d5   : > { %v2286_v3 = vadd.f32 %v2120_v63, %v8137_v18  ;;  %v2287_v36 = vadd.f32 %v2209_v34, %v8138_v61  ;;  %vm8142_vm2 = vcmp.ge.s32.totalorder %v8141_v41, 0  ;;  %v2032_v34 = vpack.c.bf16 %v2013_v62, %v6319_v2 }
 0x1d6   : > { %8135 = vst [vmem:[#allocation58_spill] sm:$0xff] %v6308_v27  ;;  %v2360_v7 = vsel %vm8142_vm2, %v5758_v43, 0.0  ;;  %v647_v41 = vand.u32 15, %v449_v45 }
 0x1d7   : > { %8136 = vst [vmem:[#allocation141_spill] sm:$0xff] %v6310_v11  ;;  %v2380_v27 = vpack.c.bf16 %v8143_v59, %v2360_v7 }
 0x1d8   : > { %v6340_v62 = vadd.s32 1, %v647_v41 }
 0x1da   : > { %8146 = vst [vmem:[#allocation65_spill] sm:$0xff] %v6340_v62  ;;  %vm7927_vm2 = vcmp.le.s32.totalorder %v6340_v62, 15 }
 0x1db   : > { %v2468_v5 = vpop.f32.mrf.mxu2  ;;  %v2557_v63 = vpop.f32.mrf.mxu3 }
 0x1dc   : > { %v2123_v18 = vpop.f32.mrf.mxu0  ;;  %v2212_v61 = vpop.f32.mrf.mxu1  ;;  %v6329_v11 = vadd.f32 %v2468_v5, %v2286_v3  ;;  %v6331_v35 = vadd.f32 %v2557_v63, %v2287_v36  ;;  %v1944_v36 = vrot.slane %v8143_v59, 2  ;;  %v1946_v3 = vrot.slane %v5792_v52, 2 }
 0x1dd   : > { %v2288_v44 = vadd.f32 %v2123_v18, %v8144_v26  ;;  %v2289_v15 = vadd.f32 %v2212_v61, %v8145_v53  ;;  %v8149_v18 = vld [vmem:[#allocation68_spill] sm:$0xff]  ;;  %v8150_v61 = vld [vmem:[#allocation69_spill] sm:$0xff] }
 0x1de   : > { %v6355_v41 = vsel %vm1891_vm1, %v1942_v48, %v1944_v36 }
 0x1df   : > { %4958 = vmatmul.msk.bf16.gmra.mxu0 %vm1232_vm3, %v2032_v34  ;;  %4974 = vmatmul.msk.bf16.gmra.mxu1 %vm1232_vm3, %v2032_v34  ;;  %8152 = vst [vmem:[#allocation69_spill] sm:$0xff] %v6355_v41 }
 0x1e0   : > { %4991 = vmatmul.msk.bf16.gmra.mxu2 %vm1232_vm3, %v2380_v27  ;;  %5007 = vmatmul.msk.bf16.gmra.mxu3 %vm1232_vm3, %v2380_v27  ;;  %v6352_v27 = vsel %vm1891_vm1, %v1944_v36, %v1946_v3 }
 0x1e1   : > { %8151 = vst [vmem:[#allocation68_spill] sm:$0xff] %v6352_v27  ;;  %v2015_v59 = vsel %vm7927_vm2, %v6352_v27, 0.0 }
 0x1e3   : > { %v2471_v7 = vpop.f32.mrf.mxu2  ;;  %v2560_v5 = vpop.f32.mrf.mxu3 }
 0x1e4   : > { %v2125_v26 = vpop.f32.mrf.mxu0  ;;  %v2214_v63 = vpop.f32.mrf.mxu1  ;;  %v6344_v53 = vadd.f32 %v2471_v7, %v2288_v44  ;;  %v6346_v45 = vadd.f32 %v2560_v5, %v2289_v15  ;;  %v8153_v44 = vld [vmem:[#allocation64_spill] sm:$0xff]  ;;  %v451_v7 = vadd.s32 232, %v5427_v17 }
 0x1e5   : > { %v2290_v34 = vadd.f32 %v2125_v26, %v8149_v18  ;;  %v2291_v43 = vadd.f32 %v2214_v63, %v8150_v61  ;;  %vm8154_vm14 = vcmp.ge.s32.totalorder %v8153_v44, 0  ;;  %v2033_v63 = vpack.c.bf16 %v2015_v59, %v6355_v41 }
 0x1e6   : > { %8147 = vst [vmem:[#allocation66_spill] sm:$0xff] %v6344_v53  ;;  %v2362_v15 = vsel %vm8154_vm14, %v5792_v52, 0.0  ;;  %v661_v44 = vand.u32 15, %v451_v7 }
 0x1e7   : > { %8148 = vst [vmem:[#allocation142_spill] sm:$0xff] %v6346_v45  ;;  %v2381_v36 = vpack.c.bf16 %v5795_v46, %v2362_v15 }
 0x1e8   : > { %v6376_v59 = vadd.s32 1, %v661_v44 }
 0x1ea   : > { %8155 = vst [vmem:[#allocation143_spill] sm:$0xff] %v6376_v59  ;;  %vm7934_vm14 = vcmp.le.s32.totalorder %v6376_v59, 15 }
 0x1eb   : > { %v2473_v5 = vpop.f32.mrf.mxu2  ;;  %v2562_v26 = vpop.f32.mrf.mxu3 }
 0x1ec   : > { %v2128_v18 = vpop.f32.mrf.mxu0  ;;  %v2217_v61 = vpop.f32.mrf.mxu1  ;;  %v6365_v45 = vadd.f32 %v2473_v5, %v2290_v34  ;;  %v6367_v48 = vadd.f32 %v2562_v26, %v2291_v43  ;;  %v1948_v43 = vrot.slane %v5795_v46, 2  ;;  %v1950_v34 = vrot.slane %v5826_v50, 2 }
 0x1ed   : > { %v2292_v62 = vadd.f32 %v2128_v18, %v5842_v9  ;;  %v2293_v53 = vadd.f32 %v2217_v61, %v5844_v1  ;;  %v8158_v18 = vld [vmem:[#allocation75_spill] sm:$0xff]  ;;  %v8159_v61 = vld [vmem:[#allocation76_spill] sm:$0xff] }
 0x1ee   : > { %v6388_v44 = vsel %vm1891_vm1, %v1948_v43, %v1950_v34 }
 0x1ef   : > { %4959 = vmatmul.msk.bf16.gmra.mxu0 %vm1232_vm3, %v2033_v63  ;;  %4975 = vmatmul.msk.bf16.gmra.mxu1 %vm1232_vm3, %v2033_v63  ;;  %8160 = vst [vmem:[#allocation75_spill] sm:$0xff] %v6388_v44  ;;  %v2017_v46 = vsel %vm7934_vm14, %v6388_v44, 0.0  ;;  %vm8177_vm14 = vcmask 1040384  }
 0x1f0   : > { %4992 = vmatmul.msk.bf16.gmra.mxu2 %vm1232_vm3, %v2381_v36  ;;  %5008 = vmatmul.msk.bf16.gmra.mxu3 %vm1232_vm3, %v2381_v36  ;;  %v6391_v36 = vsel %vm1891_vm1, %v1946_v3, %v1948_v43 }
 0x1f1   : > { %8161 = vst [vmem:[#allocation76_spill] sm:$0xff] %v6391_v36 }
 0x1f3   : > { %v2476_v15 = vpop.f32.mrf.mxu2  ;;  %v2565_v5 = vpop.f32.mrf.mxu3 }
 0x1f4   : > { %v2130_v9 = vpop.f32.mrf.mxu0  ;;  %v2219_v26 = vpop.f32.mrf.mxu1  ;;  %v6380_v1 = vadd.f32 %v2476_v15, %v2292_v62  ;;  %v6382_v7 = vadd.f32 %v2565_v5, %v2293_v53  ;;  %v453_v62 = vadd.s32 248, %v5427_v17  ;;  %v8162_v53 = vld [vmem:[#allocation72_spill] sm:$0xff] }
 0x1f5   : > { %v2294_v63 = vadd.f32 %v2130_v9, %v8158_v18  ;;  %v2295_v52 = vadd.f32 %v2219_v26, %v8159_v61  ;;  %vm8163_vm2 = vcmp.ge.s32.totalorder %v8162_v53, 0  ;;  %v2034_v26 = vpack.c.bf16 %v2017_v46, %v6391_v36 }
 0x1f6   : > { %8156 = vst [vmem:[#allocation144_spill] sm:$0xff] %v6380_v1  ;;  %v2364_v15 = vsel %vm8163_vm2, %v5826_v50, 0.0  ;;  %v675_v59 = vand.u32 15, %v453_v62  ;;  %v8166_v1 = vld [vmem:[#allocation79_spill] sm:$0xff] }
 0x1f7   : > { %8157 = vst [vmem:[#allocation145_spill] sm:$0xff] %v6382_v7  ;;  %v2382_v43 = vpack.c.bf16 %v5829_v12, %v2364_v15  ;;  %v5351_v15 = vld [vmem:[%s5412_s25 + $0x78] sm:$0xff]  }
 0x1f8   : > { %v6412_v46 = vadd.s32 1, %v675_v59  ;;  %v5323_v62 = vunpack.c.h.bf16 %v5351_v15  ;;  %v8172_v59 = vld [vmem:[#allocation83_spill] sm:$0xff] }
 0x1fa   : > { %8167 = vst [vmem:[#allocation79_spill] sm:$0xff] %v6412_v46  ;;  %vm1792_vm2 = vcmp.le.s32.totalorder %v6412_v46, 15  ;;  %v6429_v15 = vrot.slane %v5323_v62, 7  ;;  %v8179_v62 = vld [vmem:[#allocation78_spill] sm:$0xff] }
 0x1fb   : > { %v2478_v5 = vpop.f32.mrf.mxu2  ;;  %v2567_v9 = vpop.f32.mrf.mxu3  ;;  %vm8180_vm13 = vcmp.ge.s32.totalorder %v8179_v62, 0 }
 0x1fc   : > { %v2133_v18 = vpop.f32.mrf.mxu0  ;;  %v2222_v61 = vpop.f32.mrf.mxu1  ;;  %v6401_v7 = vadd.f32 %v2478_v5, %v2294_v63  ;;  %v6403_v3 = vadd.f32 %v2567_v9, %v2295_v52  ;;  %v1952_v52 = vrot.slane %v5829_v12, 2  ;;  %v8168_v63 = vld [vmem:[#allocation77_spill] sm:$0xff]  ;;  %8174 = vst [vmem:[#allocation83_spill] sm:$0xff] %v6429_v15 }
 0x1fd   : > { %v2296_v17 = vadd.f32 %v2133_v18, %v5876_v58  ;;  %v2297_v44 = vadd.f32 %v2222_v61, %v8166_v1  ;;  %v7936_v5 = vrot.slane %v8168_v63, 2 }
 0x1fe   : > { %8164 = vst [vmem:[#allocation146_spill] sm:$0xff] %v6401_v7 }
 0x1ff   : > { %8165 = vst [vmem:[#allocation147_spill] sm:$0xff] %v6403_v3  ;;  %4960 = vmatmul.msk.bf16.gmra.mxu0 %vm1232_vm3, %v2034_v26  ;;  %4976 = vmatmul.msk.bf16.gmra.mxu1 %vm1232_vm3, %v2034_v26  ;;  %v8171_v26 = vld [vmem:[#allocation82_spill] sm:$0xff]  ;;  %v6427_v12 = vsel %vm1891_vm1, %v1952_v52, %v7936_v5 }
 0x200   : > { %4993 = vmatmul.msk.bf16.gmra.mxu2 %vm1232_vm3, %v2382_v43  ;;  %5009 = vmatmul.msk.bf16.gmra.mxu3 %vm1232_vm3, %v2382_v43  ;;  %8173 = vst [vmem:[#allocation82_spill] sm:$0xff] %v6427_v12 }
 0x203   : > { %v2481_v9 = vpop.f32.mrf.mxu2  ;;  %v2570_v58 = vpop.f32.mrf.mxu3 }
 0x204   : > { %v2135_v18 = vpop.f32.mrf.mxu0  ;;  %v2224_v1 = vpop.f32.mrf.mxu1  ;;  %v6417_v61 = vadd.f32 %v2481_v9, %v2296_v17  ;;  %v6419_v53 = vadd.f32 %v2570_v58, %v2297_v44  ;;  %v5077_v17 = vld [vmem:[%s7772_s1 + $0x18] sm:$0xf]  ;;  %v6435_v44 = vsel %vm1891_vm1, %v1950_v34, %v1952_v52  ;;  %v2019_v9 = vsel %vm1792_vm2, %v6427_v12, 0.0  ;;  %v8176_v58 = vld [vmem:[#allocation73_spill] sm:$0xff] }
 0x205   : > { %v2298_v43 = vadd.f32 %v2135_v18, %v8171_v26  ;;  %v2299_v50 = vadd.f32 %v2224_v1, %v8172_v59  ;;  %3362 = vst [vmem:[#allocation1] ss:$4 sm:$0xff] %v5077_v17  ;;  %v6443_v18 = vsel %vm8177_vm14, %v8176_v58, %v6429_v15  ;;  %v2366_v1 = vsel %vm8180_vm13, %v8168_v63, 0.0  ;;  %v8181_v58 = vld [vmem:[#allocation87_spill] sm:$0xff] }
 0x206   : > { %8169 = vst [vmem:[#allocation77_spill] sm:$0xff] %v6417_v61  ;;  %v2035_v17 = vpack.c.bf16 %v2019_v9, %v6435_v44  ;;  %v2383_v46 = vpack.c.bf16 %v6443_v18, %v2366_v1 }
 0x207   : > { %8170 = vst [vmem:[#allocation148_spill] sm:$0xff] %v6419_v53 }
 0x208   : > { %8175 = vst [vmem:[#allocation149_spill] sm:$0xff] %v6435_v44 }
 0x209   : > { %8178 = vst [vmem:[#allocation73_spill] sm:$0xff] %v6443_v18 }
 0x20b   : > { %v2483_v26 = vpop.f32.mrf.mxu2  ;;  %v2572_v59 = vpop.f32.mrf.mxu3 }
 0x20c   : > { %v2138_v5 = vpop.f32.mrf.mxu0  ;;  %v2227_v34 = vpop.f32.mrf.mxu1  ;;  %v6449_v52 = vadd.f32 %v2483_v26, %v2298_v43  ;;  %v6451_v53 = vadd.f32 %v2572_v59, %v2299_v50  ;;  %v3363_v12 = vld.sshfl [vmem:[#allocation1] sm:$0xff pattern:$0x73625140]  ;;  %v3364_v3 = vld.sshfl [vmem:[#allocation1 + $0x8] sm:$0xff pattern:$0x73625140] }
 0x20d   : > { %v2300_v61 = vadd.f32 %v2138_v5, %v5918_v0  ;;  %v2301_v15 = vadd.f32 %v2227_v34, %v8181_v58  ;;  %v3413_v62 = vsel %vm1281_vm0, %v3363_v12, 0  ;;  %v3415_v7 = vsel %vm1281_vm0, %v3364_v3, 0 }
 0x20e   : > { %3424 = vmatpush.bf16.msrb.mxu0 %v3413_v62  ;;  %3513 = vmatpush.bf16.msrb.mxu1 %v3415_v7 }
 0x20f   : > { %4961 = vmatmul.msk.bf16.gmra.mxu0 %vm1232_vm3, %v2035_v17  ;;  %4977 = vmatmul.msk.bf16.gmra.mxu1 %vm1232_vm3, %v2035_v17 }
 0x210   : > { %4994 = vmatmul.msk.bf16.gmra.mxu2 %vm1232_vm3, %v2383_v46  ;;  %5010 = vmatmul.msk.bf16.gmra.mxu3 %vm1232_vm3, %v2383_v46 }
 0x213   : > { %v2486_v50 = vpop.f32.mrf.mxu2  ;;  %v2575_v0 = vpop.f32.mrf.mxu3 }
 0x214   : > { %v2140_v5 = vpop.f32.mrf.mxu0  ;;  %v2229_v43 = vpop.f32.mrf.mxu1  ;;  %v6462_v9 = vadd.f32 %v2486_v50, %v2300_v61  ;;  %v6464_v1 = vadd.f32 %v2575_v0, %v2301_v15  ;;  %v8182_v61 = vld [vmem:[#allocation6_spill] sm:$0xff] }
 0x215   : > { %v2302_v12 = vadd.f32 %v2140_v5, %v5932_v54  ;;  %v2303_v3 = vadd.f32 %v2229_v43, %v5934_v20  ;;  %v8183_v54 = vld [vmem:[#allocation84_spill] sm:$0xff] }
 0x21b   : > { %v2488_v26 = vpop.f32.mrf.mxu2  ;;  %v2577_v59 = vpop.f32.mrf.mxu3 }
 0x21c   : > { %v2143_v17 = vpop.f32.mrf.mxu0  ;;  %v2232_v34 = vpop.f32.mrf.mxu1  ;;  %v6468_v58 = vadd.f32 %v2488_v26, %v2302_v12  ;;  %v6470_v46 = vadd.f32 %v2577_v59, %v2303_v3  ;;  %v2967_v12 = vsel %vm1764_vm15, %v5973_v13, 0.0 }
 0x21d   : > { %v2304_v7 = vadd.f32 %v2143_v17, %v5943_v23  ;;  %v2305_v62 = vadd.f32 %v2232_v34, %v5945_v25 }
 0x21f   : > { %5012 = vmatmul.msk.bf16.vlgmr.msra.gmra.mxu0 %vm1232_vm3, %v8182_v61  ;;  %5028 = vmatmul.msk.bf16.vlgmr.msra.gmra.mxu1 %vm1232_vm3, %v8182_v61 }
 0x220   : > { %5045 = vmatmul.msk.bf16.vlgmr.msra.gmra.mxu2 %vm1232_vm3, %v8183_v54  ;;  %5061 = vmatmul.msk.bf16.vlgmr.msra.gmra.mxu3 %vm1232_vm3, %v8183_v54 }
 0x223   : > { %v2491_v20 = vpop.f32.mrf.mxu2  ;;  %v2580_v15 = vpop.f32.mrf.mxu3 }
 0x224   : > { %v2145_v50 = vpop.f32.mrf.mxu0  ;;  %v2234_v0 = vpop.f32.mrf.mxu1  ;;  %v6482_v5 = vadd.f32 %v2491_v20, %v2304_v7  ;;  %v6484_v23 = vadd.f32 %v2580_v15, %v2305_v62  ;;  %v2997_v7 = vpack.c.bf16 %v2967_v12, %v5978_v42  ;;  %v8185_v62 = vld [vmem:[#allocation90_spill] sm:$0xff]  ;;  %v8186_v20 = vld [vmem:[#allocation91_spill] sm:$0xff] }
 0x225   : > { %v2306_v25 = vadd.f32 %v2145_v50, %v5954_v33  ;;  %v2307_v43 = vadd.f32 %v2234_v0, %v5956_v24  ;;  %v8187_v15 = vld [vmem:[#allocation10_spill] sm:$0xff] }
 0x22b   : > { %v2493_v3 = vpop.f32.mrf.mxu2  ;;  %v2582_v26 = vpop.f32.mrf.mxu3 }
 0x22c   : > { %v2148_v59 = vpop.f32.mrf.mxu0  ;;  %v2237_v17 = vpop.f32.mrf.mxu1  ;;  %v6491_v34 = vadd.f32 %v2493_v3, %v2306_v25  ;;  %v6493_v61 = vadd.f32 %v2582_v26, %v2307_v43  ;;  %v8188_v26 = vld [vmem:[#allocation94_spill] sm:$0xff] }
 0x22d   : > { %v2308_v54 = vadd.f32 %v2148_v59, %v8185_v62  ;;  %v2309_v33 = vadd.f32 %v2237_v17, %v8186_v20  ;;  %v2969_v62 = vsel %vm1766_vm4, %v6007_v32, 0.0 }
 0x22e   : > { %8184 = vst [vmem:[#allocation87_spill] sm:$0xff] %v6493_v61 }
 0x22f   : > { %5013 = vmatmul.msk.bf16.gmra.mxu0 %vm1232_vm3, %v8187_v15  ;;  %5029 = vmatmul.msk.bf16.gmra.mxu1 %vm1232_vm3, %v8187_v15 }
 0x230   : > { %5046 = vmatmul.msk.bf16.gmra.mxu2 %vm1232_vm3, %v2997_v7  ;;  %5062 = vmatmul.msk.bf16.gmra.mxu3 %vm1232_vm3, %v2997_v7 }
 0x233   : > { %v2496_v24 = vpop.f32.mrf.mxu2  ;;  %v2585_v50 = vpop.f32.mrf.mxu3 }
 0x234   : > { %v2150_v0 = vpop.f32.mrf.mxu0  ;;  %v2239_v25 = vpop.f32.mrf.mxu1  ;;  %v6504_v43 = vadd.f32 %v2496_v24, %v2308_v54  ;;  %v6506_v12 = vadd.f32 %v2585_v50, %v2309_v33  ;;  %v2998_v54 = vpack.c.bf16 %v2969_v62, %v6010_v47  ;;  %v8192_v33 = vld [vmem:[#allocation96_spill] sm:$0xff]  ;;  %v8193_v50 = vld [vmem:[#allocation97_spill] sm:$0xff] }
 0x235   : > { %v2310_v3 = vadd.f32 %v2150_v0, %v5988_v31  ;;  %v2311_v59 = vadd.f32 %v2239_v25, %v8188_v26  ;;  %v8194_v0 = vld [vmem:[#allocation14_spill] sm:$0xff] }
 0x23b   : > { %v2498_v20 = vpop.f32.mrf.mxu2  ;;  %v2587_v16 = vpop.f32.mrf.mxu3 }
 0x23c   : > { %v2153_v42 = vpop.f32.mrf.mxu0  ;;  %v2242_v7 = vpop.f32.mrf.mxu1  ;;  %v6513_v13 = vadd.f32 %v2498_v20, %v2310_v3  ;;  %v6515_v61 = vadd.f32 %v2587_v16, %v2311_v59  ;;  %v8195_v20 = vld [vmem:[#allocation100_spill] sm:$0xff] }
 0x23d   : > { %v2312_v24 = vadd.f32 %v2153_v42, %v8192_v33  ;;  %v2313_v31 = vadd.f32 %v2242_v7, %v8193_v50  ;;  %v2971_v50 = vsel %vm1768_vm5, %v6039_v51, 0.0 }
 0x23e   : > { %8190 = vst [vmem:[#allocation6_spill] sm:$0xff] %v6513_v13 }
 0x23f   : > { %8191 = vst [vmem:[#allocation84_spill] sm:$0xff] %v6515_v61  ;;  %5014 = vmatmul.msk.bf16.gmra.mxu0 %vm1232_vm3, %v8194_v0  ;;  %5030 = vmatmul.msk.bf16.gmra.mxu1 %vm1232_vm3, %v8194_v0 }
 0x240   : > { %5047 = vmatmul.msk.bf16.gmra.mxu2 %vm1232_vm3, %v2998_v54  ;;  %5063 = vmatmul.msk.bf16.gmra.mxu3 %vm1232_vm3, %v2998_v54 }
 0x243   : > { %v2501_v25 = vpop.f32.mrf.mxu2  ;;  %v2590_v3 = vpop.f32.mrf.mxu3 }
 0x244   : > { %v2155_v16 = vpop.f32.mrf.mxu0  ;;  %v2244_v26 = vpop.f32.mrf.mxu1  ;;  %v6526_v59 = vadd.f32 %v2501_v25, %v2312_v24  ;;  %v6528_v62 = vadd.f32 %v2590_v3, %v2313_v31  ;;  %v2999_v24 = vpack.c.bf16 %v2971_v50, %v6042_v60  ;;  %v8199_v31 = vld [vmem:[#allocation102_spill] sm:$0xff]  ;;  %v8200_v3 = vld [vmem:[#allocation103_spill] sm:$0xff] }
 0x245   : > { %v2314_v42 = vadd.f32 %v2155_v16, %v6020_v4  ;;  %v2315_v7 = vadd.f32 %v2244_v26, %v8195_v20  ;;  %v8201_v16 = vld [vmem:[#allocation18_spill] sm:$0xff] }
 0x246   : > { %v8202_v50 = vld [vmem:[#allocation106_spill] sm:$0xff] }
 0x24b   : > { %v2503_v17 = vpop.f32.mrf.mxu2  ;;  %v2592_v47 = vpop.f32.mrf.mxu3 }
 0x24c   : > { %v2158_v32 = vpop.f32.mrf.mxu0  ;;  %v2247_v54 = vpop.f32.mrf.mxu1  ;;  %v6535_v61 = vadd.f32 %v2503_v17, %v2314_v42  ;;  %v6537_v13 = vadd.f32 %v2592_v47, %v2315_v7 }
 0x24d   : > { %v2316_v25 = vadd.f32 %v2158_v32, %v8199_v31  ;;  %v2317_v4 = vadd.f32 %v2247_v54, %v8200_v3  ;;  %v2973_v3 = vsel %vm1770_vm6, %v6071_v56, 0.0 }
 0x24e   : > { %8197 = vst [vmem:[#allocation90_spill] sm:$0xff] %v6535_v61 }
 0x24f   : > { %8198 = vst [vmem:[#allocation91_spill] sm:$0xff] %v6537_v13  ;;  %5015 = vmatmul.msk.bf16.gmra.mxu0 %vm1232_vm3, %v8201_v16  ;;  %5031 = vmatmul.msk.bf16.gmra.mxu1 %vm1232_vm3, %v8201_v16 }
 0x250   : > { %5048 = vmatmul.msk.bf16.gmra.mxu2 %vm1232_vm3, %v2999_v24  ;;  %5064 = vmatmul.msk.bf16.gmra.mxu3 %vm1232_vm3, %v2999_v24 }
 0x253   : > { %v2506_v17 = vpop.f32.mrf.mxu2  ;;  %v2595_v26 = vpop.f32.mrf.mxu3 }
 0x254   : > { %v2160_v47 = vpop.f32.mrf.mxu0  ;;  %v2249_v42 = vpop.f32.mrf.mxu1  ;;  %v6548_v20 = vadd.f32 %v2506_v17, %v2316_v25  ;;  %v6550_v7 = vadd.f32 %v2595_v26, %v2317_v4  ;;  %v3000_v25 = vpack.c.bf16 %v2973_v3, %v6074_v14  ;;  %v8206_v4 = vld [vmem:[#allocation108_spill] sm:$0xff]  ;;  %v8207_v26 = vld [vmem:[#allocation109_spill] sm:$0xff] }
 0x255   : > { %v2318_v32 = vadd.f32 %v2160_v47, %v6052_v29  ;;  %v2319_v54 = vadd.f32 %v2249_v42, %v8202_v50  ;;  %v8208_v47 = vld [vmem:[#allocation22_spill] sm:$0xff]  ;;  %v8209_v3 = vld [vmem:[#allocation112_spill] sm:$0xff] }
 0x25b   : > { %v2508_v33 = vpop.f32.mrf.mxu2  ;;  %v2597_v60 = vpop.f32.mrf.mxu3 }
 0x25c   : > { %v2163_v51 = vpop.f32.mrf.mxu0  ;;  %v2252_v24 = vpop.f32.mrf.mxu1  ;;  %v6557_v13 = vadd.f32 %v2508_v33, %v2318_v32  ;;  %v6559_v61 = vadd.f32 %v2597_v60, %v2319_v54 }
 0x25d   : > { %v2320_v17 = vadd.f32 %v2163_v51, %v8206_v4  ;;  %v2321_v29 = vadd.f32 %v2252_v24, %v8207_v26  ;;  %v2975_v26 = vsel %vm1772_vm7, %v6103_v10, 0.0 }
 0x25e   : > { %8204 = vst [vmem:[#allocation10_spill] sm:$0xff] %v6557_v13 }
 0x25f   : > { %8205 = vst [vmem:[#allocation94_spill] sm:$0xff] %v6559_v61  ;;  %5016 = vmatmul.msk.bf16.gmra.mxu0 %vm1232_vm3, %v8208_v47  ;;  %5032 = vmatmul.msk.bf16.gmra.mxu1 %vm1232_vm3, %v8208_v47 }
 0x260   : > { %5049 = vmatmul.msk.bf16.gmra.mxu2 %vm1232_vm3, %v3000_v25  ;;  %5065 = vmatmul.msk.bf16.gmra.mxu3 %vm1232_vm3, %v3000_v25 }
 0x263   : > { %v2511_v33 = vpop.f32.mrf.mxu2  ;;  %v2600_v42 = vpop.f32.mrf.mxu3 }
 0x264   : > { %v2165_v60 = vpop.f32.mrf.mxu0  ;;  %v2254_v32 = vpop.f32.mrf.mxu1  ;;  %v6570_v50 = vadd.f32 %v2511_v33, %v2320_v17  ;;  %v6572_v54 = vadd.f32 %v2600_v42, %v2321_v29  ;;  %v3001_v17 = vpack.c.bf16 %v2975_v26, %v6106_v39  ;;  %v8213_v29 = vld [vmem:[#allocation114_spill] sm:$0xff]  ;;  %v8214_v42 = vld [vmem:[#allocation115_spill] sm:$0xff] }
 0x265   : > { %v2322_v51 = vadd.f32 %v2165_v60, %v6084_v30  ;;  %v2323_v24 = vadd.f32 %v2254_v32, %v8209_v3  ;;  %v8215_v60 = vld [vmem:[#allocation26_spill] sm:$0xff] }
 0x266   : > { %v8218_v26 = vld [vmem:[#allocation118_spill] sm:$0xff] }
 0x26b   : > { %v2513_v31 = vpop.f32.mrf.mxu2  ;;  %v2602_v14 = vpop.f32.mrf.mxu3 }
 0x26c   : > { %v2168_v56 = vpop.f32.mrf.mxu0  ;;  %v2257_v25 = vpop.f32.mrf.mxu1  ;;  %v6579_v61 = vadd.f32 %v2513_v31, %v2322_v51  ;;  %v6581_v13 = vadd.f32 %v2602_v14, %v2323_v24 }
 0x26d   : > { %v2324_v33 = vadd.f32 %v2168_v56, %v8213_v29  ;;  %v2325_v30 = vadd.f32 %v2257_v25, %v8214_v42  ;;  %v8219_v29 = vld [vmem:[#allocation122_spill] sm:$0xff] }
 0x26e   : > { %8211 = vst [vmem:[#allocation96_spill] sm:$0xff] %v6579_v61  ;;  %v2977_v4 = vsel %vm1774_vm8, %v8219_v29, 0.0 }
 0x26f   : > { %8212 = vst [vmem:[#allocation97_spill] sm:$0xff] %v6581_v13  ;;  %5017 = vmatmul.msk.bf16.gmra.mxu0 %vm1232_vm3, %v8215_v60  ;;  %5033 = vmatmul.msk.bf16.gmra.mxu1 %vm1232_vm3, %v8215_v60 }
 0x270   : > { %5050 = vmatmul.msk.bf16.gmra.mxu2 %vm1232_vm3, %v3001_v17  ;;  %5066 = vmatmul.msk.bf16.gmra.mxu3 %vm1232_vm3, %v3001_v17 }
 0x273   : > { %v2516_v31 = vpop.f32.mrf.mxu2  ;;  %v2605_v32 = vpop.f32.mrf.mxu3 }
 0x274   : > { %v2170_v14 = vpop.f32.mrf.mxu0  ;;  %v2259_v51 = vpop.f32.mrf.mxu1  ;;  %v6592_v3 = vadd.f32 %v2516_v31, %v2324_v33  ;;  %v6594_v24 = vadd.f32 %v2605_v32, %v2325_v30  ;;  %v8223_v33 = vld [vmem:[#allocation123_spill] sm:$0xff]  ;;  %v8224_v30 = vld [vmem:[#allocation120_spill] sm:$0xff] }
 0x275   : > { %v2326_v56 = vadd.f32 %v2170_v14, %v6116_v8  ;;  %v2327_v25 = vadd.f32 %v2259_v51, %v8218_v26  ;;  %v3002_v31 = vpack.c.bf16 %v2977_v4, %v8223_v33  ;;  %v8226_v14 = vld [vmem:[#allocation30_spill] sm:$0xff] }
 0x276   : > { %8216 = vst [vmem:[#allocation14_spill] sm:$0xff] %v6592_v3 }
 0x277   : > { %8217 = vst [vmem:[#allocation100_spill] sm:$0xff] %v6594_v24  ;;  %v8225_v24 = vld [vmem:[#allocation121_spill] sm:$0xff] }
 0x27b   : > { %v2518_v39 = vpop.f32.mrf.mxu2  ;;  %v2607_v10 = vpop.f32.mrf.mxu3 }
 0x27c   : > { %v2173_v13 = vpop.f32.mrf.mxu0  ;;  %v2262_v17 = vpop.f32.mrf.mxu1  ;;  %v6601_v61 = vadd.f32 %v2518_v39, %v2326_v56  ;;  %v6603_v60 = vadd.f32 %v2607_v10, %v2327_v25  ;;  %v8228_v25 = vld [vmem:[#allocation125_spill] sm:$0xff] }
 0x27d   : > { %v2328_v32 = vadd.f32 %v2173_v13, %v8224_v30  ;;  %v2329_v8 = vadd.f32 %v2262_v17, %v8225_v24  ;;  %v8227_v13 = vld [vmem:[#allocation124_spill] sm:$0xff]  ;;  %v8229_v30 = vld [vmem:[#allocation129_spill] sm:$0xff] }
 0x27e   : > { %8221 = vst [vmem:[#allocation102_spill] sm:$0xff] %v6601_v61  ;;  %v2979_v33 = vsel %vm1776_vm9, %v8229_v30, 0.0 }
 0x27f   : > { %8222 = vst [vmem:[#allocation103_spill] sm:$0xff] %v6603_v60  ;;  %5018 = vmatmul.msk.bf16.gmra.mxu0 %vm1232_vm3, %v8226_v14  ;;  %5034 = vmatmul.msk.bf16.gmra.mxu1 %vm1232_vm3, %v8226_v14 }
 0x280   : > { %5051 = vmatmul.msk.bf16.gmra.mxu2 %vm1232_vm3, %v3002_v31  ;;  %5067 = vmatmul.msk.bf16.gmra.mxu3 %vm1232_vm3, %v3002_v31 }
 0x283   : > { %v2521_v39 = vpop.f32.mrf.mxu2  ;;  %v2610_v51 = vpop.f32.mrf.mxu3 }
 0x284   : > { %v2175_v10 = vpop.f32.mrf.mxu0  ;;  %v2264_v56 = vpop.f32.mrf.mxu1  ;;  %v6614_v26 = vadd.f32 %v2521_v39, %v2328_v32  ;;  %v6616_v4 = vadd.f32 %v2610_v51, %v2329_v8  ;;  %v3003_v32 = vpack.c.bf16 %v2979_v33, %v6173_v38  ;;  %v8231_v8 = vld [vmem:[#allocation127_spill] sm:$0xff]  ;;  %v8232_v51 = vld [vmem:[#allocation128_spill] sm:$0xff] }
 0x285   : > { %v2330_v24 = vadd.f32 %v2175_v10, %v8227_v13  ;;  %v2331_v17 = vadd.f32 %v2264_v56, %v8228_v25  ;;  %v8233_v13 = vld [vmem:[#allocation34_spill] sm:$0xff] }
 0x28b   : > { %v2523_v29 = vpop.f32.mrf.mxu2  ;;  %v2612_v60 = vpop.f32.mrf.mxu3 }
 0x28c   : > { %v2178_v61 = vpop.f32.mrf.mxu0  ;;  %v2267_v31 = vpop.f32.mrf.mxu1  ;;  %v6623_v14 = vadd.f32 %v2523_v29, %v2330_v24  ;;  %v6625_v3 = vadd.f32 %v2612_v60, %v2331_v17 }
 0x28d   : > { %v2332_v39 = vadd.f32 %v2178_v61, %v8231_v8  ;;  %v2333_v10 = vadd.f32 %v2267_v31, %v8232_v51  ;;  %v5110_v31 = vld [vmem:[%s7772_s1 + $0x1c] sm:$0xf] }
 0x28e   : > { %3672 = vst [vmem:[#allocation1] ss:$4 sm:$0xff] %v5110_v31 }
 0x28f   : > { %5019 = vmatmul.msk.bf16.gmra.mxu0 %vm1232_vm3, %v8233_v13  ;;  %5035 = vmatmul.msk.bf16.gmra.mxu1 %vm1232_vm3, %v8233_v13 }
 0x290   : > { %5052 = vmatmul.msk.bf16.gmra.mxu2 %vm1232_vm3, %v3003_v32  ;;  %5068 = vmatmul.msk.bf16.gmra.mxu3 %vm1232_vm3, %v3003_v32  ;;  %v2981_v32 = vsel %vm1778_vm10, %v6208_v49, 0.0  ;;  %v8236_v49 = vld [vmem:[#allocation38_spill] sm:$0xff] }
 0x293   : > { %v2526_v29 = vpop.f32.mrf.mxu2  ;;  %v2615_v56 = vpop.f32.mrf.mxu3 }
 0x294   : > { %v2180_v60 = vpop.f32.mrf.mxu0  ;;  %v2269_v24 = vpop.f32.mrf.mxu1  ;;  %v6636_v25 = vadd.f32 %v2526_v29, %v2332_v39  ;;  %v6638_v33 = vadd.f32 %v2615_v56, %v2333_v10 }
 0x295   : > { %v2334_v61 = vadd.f32 %v2180_v60, %v6183_v19  ;;  %v2335_v17 = vadd.f32 %v2269_v24, %v6185_v22  ;;  %v3004_v19 = vpack.c.bf16 %v2981_v32, %v6211_v6  ;;  %v3673_v60 = vld.sshfl [vmem:[#allocation1] sm:$0xff pattern:$0x73625140]  ;;  %v3674_v24 = vld.sshfl [vmem:[#allocation1 + $0x8] sm:$0xff pattern:$0x73625140] }
 0x296   : > { %v3681_v31 = vsel %vm1281_vm0, %v3673_v60, 0  ;;  %v3683_v8 = vsel %vm1281_vm0, %v3674_v24, 0  ;;  %v8258_v60 = vld [vmem:[#allocation49_spill] sm:$0xff] }
 0x297   : > { %3692 = vmatpush.bf16.msrb.mxu2 %v3681_v31  ;;  %3781 = vmatpush.bf16.msrb.mxu3 %v3683_v8  ;;  %vm8259_vm13 = vcmp.le.s32.totalorder %v8258_v60, 15 }
 0x29b   : > { %v2528_v51 = vpop.f32.mrf.mxu2  ;;  %v2617_v42 = vpop.f32.mrf.mxu3 }
 0x29c   : > { %v6648_v38 = vadd.f32 %v2528_v51, %v2334_v61  ;;  %v6650_v39 = vadd.f32 %v2617_v42, %v2335_v17  ;;  %v2724_v10 = vpop.f32.mrf.mxu0  ;;  %v2813_v29 = vpop.f32.mrf.mxu1 }
 0x29d   : > { %v2893_v22 = vadd.f32 %v2724_v10, %v6200_v37  ;;  %v2894_v56 = vadd.f32 %v2813_v29, %v6202_v55  ;;  %v8238_v29 = vld [vmem:[#allocation44_spill] sm:$0xff] }
 0x29e   : > { %8235 = vst [vmem:[#allocation18_spill] sm:$0xff] %v6650_v39  ;;  %v2983_v24 = vsel %vm1780_vm11, %v8238_v29, 0.0 }
 0x29f   : > { %5020 = vmatmul.msk.bf16.gmra.mxu0 %vm1232_vm3, %v8236_v49  ;;  %5036 = vmatmul.msk.bf16.gmra.mxu1 %vm1232_vm3, %v8236_v49 }
 0x2a0   : > { %5053 = vmatmul.msk.bf16.gmra.mxu2 %vm1232_vm3, %v3004_v19  ;;  %5069 = vmatmul.msk.bf16.gmra.mxu3 %vm1232_vm3, %v3004_v19 }
 0x2a3   : > { %v3079_v37 = vpop.f32.mrf.mxu2  ;;  %v3168_v55 = vpop.f32.mrf.mxu3 }
 0x2a4   : > { %v2726_v42 = vpop.f32.mrf.mxu0  ;;  %v2815_v61 = vpop.f32.mrf.mxu1  ;;  %v6663_v17 = vadd.f32 %v3079_v37, %v2893_v22  ;;  %v6665_v32 = vadd.f32 %v3168_v55, %v2894_v56  ;;  %v3005_v22 = vpack.c.bf16 %v2983_v24, %v6247_v21  ;;  %v8242_v56 = vld [vmem:[#allocation134_spill] sm:$0xff]  ;;  %v8243_v55 = vld [vmem:[#allocation135_spill] sm:$0xff] }
 0x2a5   : > { %v2895_v51 = vadd.f32 %v2726_v42, %v6221_v40  ;;  %v2896_v10 = vadd.f32 %v2815_v61, %v6223_v57  ;;  %v8244_v42 = vld [vmem:[#allocation43_spill] sm:$0xff] }
 0x2a6   : > { %8237 = vst [vmem:[#allocation106_spill] sm:$0xff] %v6665_v32 }
 0x2ab   : > { %v3081_v6 = vpop.f32.mrf.mxu2  ;;  %v3170_v19 = vpop.f32.mrf.mxu3 }
 0x2ac   : > { %v2729_v31 = vpop.f32.mrf.mxu0  ;;  %v2818_v8 = vpop.f32.mrf.mxu1  ;;  %v6672_v30 = vadd.f32 %v3081_v6, %v2895_v51  ;;  %v6674_v39 = vadd.f32 %v3170_v19, %v2896_v10  ;;  %v8246_v19 = vld [vmem:[#allocation136_spill] sm:$0xff] }
 0x2ad   : > { %v2897_v37 = vadd.f32 %v2729_v31, %v8242_v56  ;;  %v2898_v40 = vadd.f32 %v2818_v8, %v8243_v55  ;;  %v8247_v8 = vld [vmem:[#allocation137_spill] sm:$0xff]  ;;  %v8248_v55 = vld [vmem:[#allocation52_spill] sm:$0xff] }
 0x2ae   : > { %8240 = vst [vmem:[#allocation108_spill] sm:$0xff] %v6672_v30  ;;  %v2985_v21 = vsel %vm1782_vm12, %v8248_v55, 0.0 }
 0x2af   : > { %8241 = vst [vmem:[#allocation109_spill] sm:$0xff] %v6674_v39  ;;  %5021 = vmatmul.msk.bf16.gmra.mxu0 %vm1232_vm3, %v8244_v42  ;;  %5037 = vmatmul.msk.bf16.gmra.mxu1 %vm1232_vm3, %v8244_v42 }
 0x2b0   : > { %5054 = vmatmul.msk.bf16.gmra.mxu2 %vm1232_vm3, %v3005_v22  ;;  %5070 = vmatmul.msk.bf16.gmra.mxu3 %vm1232_vm3, %v3005_v22 }
 0x2b3   : > { %v3084_v6 = vpop.f32.mrf.mxu2  ;;  %v3173_v57 = vpop.f32.mrf.mxu3 }
 0x2b4   : > { %v2731_v61 = vpop.f32.mrf.mxu0  ;;  %v2820_v51 = vpop.f32.mrf.mxu1  ;;  %v6685_v10 = vadd.f32 %v3084_v6, %v2897_v37  ;;  %v6687_v24 = vadd.f32 %v3173_v57, %v2898_v40  ;;  %v3006_v37 = vpack.c.bf16 %v2985_v21, %v6283_v28  ;;  %v8252_v40 = vld [vmem:[#allocation50_spill] sm:$0xff] }
 0x2b5   : > { %v2899_v31 = vadd.f32 %v2731_v61, %v8246_v19  ;;  %v2900_v56 = vadd.f32 %v2820_v51, %v8247_v8  ;;  %v8253_v57 = vld [vmem:[#allocation138_spill] sm:$0xff]  ;;  %v8254_v19 = vld [vmem:[#allocation51_spill] sm:$0xff] }
 0x2b6   : > { %8245 = vst [vmem:[#allocation22_spill] sm:$0xff] %v6687_v24 }
 0x2bb   : > { %v3086_v29 = vpop.f32.mrf.mxu2  ;;  %v3175_v39 = vpop.f32.mrf.mxu3 }
 0x2bc   : > { %v2734_v30 = vpop.f32.mrf.mxu0  ;;  %v2823_v22 = vpop.f32.mrf.mxu1  ;;  %v6694_v42 = vadd.f32 %v3086_v29, %v2899_v31  ;;  %v6696_v32 = vadd.f32 %v3175_v39, %v2900_v56 }
 0x2bd   : > { %v2901_v6 = vadd.f32 %v2734_v30, %v8252_v40  ;;  %v2902_v61 = vadd.f32 %v2823_v22, %v8253_v57  ;;  %v8255_v30 = vld [vmem:[#allocation139_spill] sm:$0xff]  ;;  %v8256_v22 = vld [vmem:[#allocation140_spill] sm:$0xff] }
 0x2be   : > { %8250 = vst [vmem:[#allocation112_spill] sm:$0xff] %v6694_v42  ;;  %v8257_v57 = vld [vmem:[#allocation60_spill] sm:$0xff] }
 0x2bf   : > { %8251 = vst [vmem:[#allocation114_spill] sm:$0xff] %v6696_v32  ;;  %5022 = vmatmul.msk.bf16.gmra.mxu0 %vm1232_vm3, %v8254_v19  ;;  %5038 = vmatmul.msk.bf16.gmra.mxu1 %vm1232_vm3, %v8254_v19  ;;  %v2987_v28 = vsel %vm8259_vm13, %v8257_v57, 0.0 }
 0x2c0   : > { %5055 = vmatmul.msk.bf16.gmra.mxu2 %vm1232_vm3, %v3006_v37  ;;  %5071 = vmatmul.msk.bf16.gmra.mxu3 %vm1232_vm3, %v3006_v37 }
 0x2c3   : > { %v3089_v29 = vpop.f32.mrf.mxu2  ;;  %v3178_v51 = vpop.f32.mrf.mxu3 }
 0x2c4   : > { %v2736_v39 = vpop.f32.mrf.mxu0  ;;  %v2825_v31 = vpop.f32.mrf.mxu1  ;;  %v6707_v8 = vadd.f32 %v3089_v29, %v2901_v6  ;;  %v6709_v21 = vadd.f32 %v3178_v51, %v2902_v61  ;;  %v3007_v6 = vpack.c.bf16 %v2987_v28, %v6319_v2  ;;  %v8261_v61 = vld [vmem:[#allocation58_spill] sm:$0xff]  ;;  %v8262_v51 = vld [vmem:[#allocation141_spill] sm:$0xff] }
 0x2c5   : > { %v2903_v56 = vadd.f32 %v2736_v39, %v8255_v30  ;;  %v2904_v40 = vadd.f32 %v2825_v31, %v8256_v22  ;;  %v8263_v30 = vld [vmem:[#allocation59_spill] sm:$0xff] }
 0x2cb   : > { %v3091_v55 = vpop.f32.mrf.mxu2  ;;  %v3180_v32 = vpop.f32.mrf.mxu3 }
 0x2cc   : > { %v2739_v42 = vpop.f32.mrf.mxu0  ;;  %v2828_v37 = vpop.f32.mrf.mxu1  ;;  %v6716_v19 = vadd.f32 %v3091_v55, %v2903_v56  ;;  %v6718_v24 = vadd.f32 %v3180_v32, %v2904_v40 }
 0x2cd   : > { %v2905_v29 = vadd.f32 %v2739_v42, %v8261_v61  ;;  %v2906_v39 = vadd.f32 %v2828_v37, %v8262_v51  ;;  %v8264_v37 = vld [vmem:[#allocation57_spill] sm:$0xff] }
 0x2ce   : > { %8260 = vst [vmem:[#allocation115_spill] sm:$0xff] %v6718_v24  ;;  %vm8265_vm14 = vcmp.le.s32.totalorder %v8264_v37, 15 }
 0x2cf   : > { %5023 = vmatmul.msk.bf16.gmra.mxu0 %vm1232_vm3, %v8263_v30  ;;  %5039 = vmatmul.msk.bf16.gmra.mxu1 %vm1232_vm3, %v8263_v30  ;;  %v2989_v61 = vsel %vm8265_vm14, %v6352_v27, 0.0 }
 0x2d0   : > { %5056 = vmatmul.msk.bf16.gmra.mxu2 %vm1232_vm3, %v3007_v6  ;;  %5072 = vmatmul.msk.bf16.gmra.mxu3 %vm1232_vm3, %v3007_v6 }
 0x2d3   : > { %v3094_v55 = vpop.f32.mrf.mxu2  ;;  %v3183_v31 = vpop.f32.mrf.mxu3 }
 0x2d4   : > { %v2741_v32 = vpop.f32.mrf.mxu0  ;;  %v2830_v56 = vpop.f32.mrf.mxu1  ;;  %v6729_v22 = vadd.f32 %v3094_v55, %v2905_v29  ;;  %v6731_v28 = vadd.f32 %v3183_v31, %v2906_v39  ;;  %v3008_v29 = vpack.c.bf16 %v2989_v61, %v6355_v41  ;;  %v8268_v39 = vld [vmem:[#allocation66_spill] sm:$0xff] }
 0x2d5   : > { %v2907_v42 = vadd.f32 %v2741_v32, %v6329_v11  ;;  %v2908_v40 = vadd.f32 %v2830_v56, %v6331_v35  ;;  %v8269_v31 = vld [vmem:[#allocation142_spill] sm:$0xff]  ;;  %v8270_v32 = vld [vmem:[#allocation67_spill] sm:$0xff] }
 0x2db   : > { %v3096_v51 = vpop.f32.mrf.mxu2  ;;  %v3185_v60 = vpop.f32.mrf.mxu3 }
 0x2dc   : > { %v2744_v2 = vpop.f32.mrf.mxu0  ;;  %v2833_v6 = vpop.f32.mrf.mxu1  ;;  %v6738_v57 = vadd.f32 %v3096_v51, %v2907_v42  ;;  %v6740_v24 = vadd.f32 %v3185_v60, %v2908_v40 }
 0x2dd   : > { %v2909_v55 = vadd.f32 %v2744_v2, %v8268_v39  ;;  %v2910_v11 = vadd.f32 %v2833_v6, %v8269_v31  ;;  %v8273_v6 = vld [vmem:[#allocation75_spill] sm:$0xff]  ;;  %v8274_v39 = vld [vmem:[#allocation65_spill] sm:$0xff] }
 0x2de   : > { %8266 = vst [vmem:[#allocation118_spill] sm:$0xff] %v6738_v57  ;;  %vm8275_vm13 = vcmp.le.s32.totalorder %v8274_v39, 15 }
 0x2df   : > { %8267 = vst [vmem:[#allocation120_spill] sm:$0xff] %v6740_v24  ;;  %5024 = vmatmul.msk.bf16.gmra.mxu0 %vm1232_vm3, %v8270_v32  ;;  %5040 = vmatmul.msk.bf16.gmra.mxu1 %vm1232_vm3, %v8270_v32  ;;  %v2991_v31 = vsel %vm8275_vm13, %v8273_v6, 0.0  ;;  %v8283_v6 = vld [vmem:[#allocation82_spill] sm:$0xff]  ;;  %vm8287_vm13 = vsmask.f32 7424 }
 0x2e0   : > { %5057 = vmatmul.msk.bf16.gmra.mxu2 %vm1232_vm3, %v3008_v29  ;;  %5073 = vmatmul.msk.bf16.gmra.mxu3 %vm1232_vm3, %v3008_v29 }
 0x2e3   : > { %v3099_v35 = vpop.f32.mrf.mxu2  ;;  %v3188_v56 = vpop.f32.mrf.mxu3 }
 0x2e4   : > { %v2746_v60 = vpop.f32.mrf.mxu0  ;;  %v2835_v42 = vpop.f32.mrf.mxu1  ;;  %v6751_v40 = vadd.f32 %v3099_v35, %v2909_v55  ;;  %v6753_v61 = vadd.f32 %v3188_v56, %v2910_v11  ;;  %v3009_v55 = vpack.c.bf16 %v2991_v31, %v6391_v36  ;;  %v8278_v11 = vld [vmem:[#allocation144_spill] sm:$0xff]  ;;  %v8279_v56 = vld [vmem:[#allocation145_spill] sm:$0xff] }
 0x2e5   : > { %v2911_v2 = vadd.f32 %v2746_v60, %v6365_v45  ;;  %v2912_v51 = vadd.f32 %v2835_v42, %v6367_v48  ;;  %v8280_v60 = vld [vmem:[#allocation74_spill] sm:$0xff] }
 0x2e6   : > { %8271 = vst [vmem:[#allocation121_spill] sm:$0xff] %v6751_v40 }
 0x2e7   : > { %8272 = vst [vmem:[#allocation124_spill] sm:$0xff] %v6753_v61 }
 0x2eb   : > { %v3101_v37 = vpop.f32.mrf.mxu2  ;;  %v3190_v41 = vpop.f32.mrf.mxu3 }
 0x2ec   : > { %v2749_v27 = vpop.f32.mrf.mxu0  ;;  %v2838_v29 = vpop.f32.mrf.mxu1  ;;  %v6760_v24 = vadd.f32 %v3101_v37, %v2911_v2  ;;  %v6762_v57 = vadd.f32 %v3190_v41, %v2912_v51  ;;  %v2684_v41 = vpack.c.bf16 %v6443_v18, %v8168_v63 }
 0x2ed   : > { %v2913_v35 = vadd.f32 %v2749_v27, %v8278_v11  ;;  %v2914_v45 = vadd.f32 %v2838_v29, %v8279_v56  ;;  %v8281_v29 = vld [vmem:[#allocation146_spill] sm:$0xff]  ;;  %v8282_v56 = vld [vmem:[#allocation147_spill] sm:$0xff] }
 0x2ee   : > { %8276 = vst [vmem:[#allocation125_spill] sm:$0xff] %v6760_v24  ;;  %v2689_v31 = vshll.u32 %v2684_v41, 16 }
 0x2ef   : > { %8277 = vst [vmem:[#allocation127_spill] sm:$0xff] %v6762_v57  ;;  %5025 = vmatmul.msk.bf16.gmra.mxu0 %vm1232_vm3, %v8280_v60  ;;  %5041 = vmatmul.msk.bf16.gmra.mxu1 %vm1232_vm3, %v8280_v60  ;;  %v8284_v57 = vld [vmem:[#allocation143_spill] sm:$0xff] }
 0x2f0   : > { %5058 = vmatmul.msk.bf16.gmra.mxu2 %vm1232_vm3, %v3009_v55  ;;  %5074 = vmatmul.msk.bf16.gmra.mxu3 %vm1232_vm3, %v3009_v55  ;;  %v2691_v36 = vrot.slane %v2689_v31, 1  ;;  %vm8285_vm14 = vcmp.le.s32.totalorder %v8284_v57, 15  ;;  %v8289_v31 = vld [vmem:[#allocation148_spill] sm:$0xff] }
 0x2f1   : > { %v2993_v55 = vsel %vm8285_vm14, %v8283_v6, 0.0  ;;  %vm8291_vm14 = vcmask 1040384   ;;  %v5143_v6 = vld [vmem:[%s7772_s1 + $0x20] sm:$0xf] }
 0x2f2   : > { %3980 = vst [vmem:[#allocation1] ss:$4 sm:$0xff] %v5143_v6 }
 0x2f3   : > { %v3104_v48 = vpop.f32.mrf.mxu2  ;;  %v3193_v37 = vpop.f32.mrf.mxu3 }
 0x2f4   : > { %v2751_v42 = vpop.f32.mrf.mxu0  ;;  %v2840_v2 = vpop.f32.mrf.mxu1  ;;  %v6775_v27 = vadd.f32 %v3104_v48, %v2913_v35  ;;  %v6777_v51 = vadd.f32 %v3193_v37, %v2914_v45  ;;  %v8286_v45 = vld [vmem:[#allocation80_spill] sm:$0xff]  ;;  %v3010_v37 = vpack.c.bf16 %v2993_v55, %v6435_v44 }
 0x2f5   : > { %v2915_v11 = vadd.f32 %v2751_v42, %v8281_v29  ;;  %v2916_v39 = vadd.f32 %v2840_v2, %v8282_v56  ;;  %v6790_v48 = vsel %vm8287_vm13, %v8286_v45, %v2691_v36  ;;  %v8288_v42 = vld [vmem:[#allocation77_spill] sm:$0xff]  ;;  %v8290_v56 = vld [vmem:[#allocation83_spill] sm:$0xff] }
 0x2f6   : > { %v6797_v57 = vsel %vm8291_vm14, %v8290_v56, 0.0 }
 0x2fb   : > { %v3106_v24 = vpop.f32.mrf.mxu2  ;;  %v3195_v60 = vpop.f32.mrf.mxu3 }
 0x2fc   : > { %v2754_v61 = vpop.f32.mrf.mxu0  ;;  %v2843_v40 = vpop.f32.mrf.mxu1  ;;  %v6784_v32 = vadd.f32 %v3106_v24, %v2915_v11  ;;  %v6786_v35 = vadd.f32 %v3195_v60, %v2916_v39  ;;  %v2685_v24 = vpack.c.bf16 %v6797_v57, %v6797_v57 }
 0x2fd   : > { %v2917_v2 = vadd.f32 %v2754_v61, %v8288_v42  ;;  %v2918_v29 = vadd.f32 %v2843_v40, %v8289_v31  ;;  %v2958_v61 = vrot.slane %v6443_v18, 2  ;;  %v7970_v40 = vrot.slane %v6797_v57, 2 }
 0x2fe   : > { %v2693_v31 = vshrl.u32 %v2684_v41, 16  ;;  %v2697_v56 = vshll.u32 %v2685_v24, 16  ;;  %v8294_v41 = vrot.slane %v8168_v63, 2 }
 0x2ff   : > { %5026 = vmatmul.msk.bf16.gmra.mxu0 %vm1232_vm3, %v6790_v48  ;;  %5042 = vmatmul.msk.bf16.gmra.mxu1 %vm1232_vm3, %v6790_v48  ;;  %v6821_v18 = vsel %vm1891_vm1, %v2958_v61, %v7970_v40 }
 0x300   : > { %5059 = vmatmul.msk.bf16.gmra.mxu2 %vm1232_vm3, %v3010_v37  ;;  %5075 = vmatmul.msk.bf16.gmra.mxu3 %vm1232_vm3, %v3010_v37  ;;  %8293 = vst [vmem:[#allocation34_spill] sm:$0xff] %v6821_v18  ;;  %v6828_v24 = vsel %vm1891_vm1, %v8294_v41, %v2958_v61  ;;  %v3982_v41 = vld.sshfl [vmem:[#allocation1 + $0x8] sm:$0xff pattern:$0x73625140] }
 0x301   : > { %8295 = vst [vmem:[#allocation38_spill] sm:$0xff] %v6828_v24 }
 0x303   : > { %v3109_v39 = vpop.f32.mrf.mxu2  ;;  %v3198_v60 = vpop.f32.mrf.mxu3 }
 0x304   : > { %v2756_v11 = vpop.f32.mrf.mxu0  ;;  %v2845_v55 = vpop.f32.mrf.mxu1  ;;  %v6809_v45 = vadd.f32 %v3109_v39, %v2917_v2  ;;  %v6811_v42 = vadd.f32 %v3198_v60, %v2918_v29  ;;  %v6823_v2 = vor.u32 %v2693_v31, %v2691_v36  ;;  %v2699_v29 = vrot.slane %v2697_v56, 1  ;;  %v3981_v56 = vld.sshfl [vmem:[#allocation1] sm:$0xff pattern:$0x73625140] }
 0x305   : > { %v2919_v44 = vadd.f32 %v2756_v11, %v6449_v52  ;;  %v2920_v37 = vadd.f32 %v2845_v55, %v6451_v53  ;;  %v2995_v52 = vsel %vm1792_vm2, %v6821_v18, 0.0  ;;  %v4031_v53 = vsel %vm1281_vm0, %v3981_v56, 0  ;;  %v8301_v56 = vld [vmem:[#allocation4_spill] sm:$0xff] }
 0x306   : > { %8292 = vst [vmem:[#allocation128_spill] sm:$0xff] %v6811_v42  ;;  %v2700_v36 = vsel %vm8287_vm13, %v6823_v2, %v2699_v29  ;;  %v3011_v6 = vpack.c.bf16 %v2995_v52, %v6828_v24  ;;  %v4033_v18 = vsel %vm1281_vm0, %v3982_v41, 0  ;;  %4042 = vmatpush.bf16.msra.mxu0 %v4031_v53 }
 0x307   : > { %4131 = vmatpush.bf16.msra.mxu1 %v4033_v18 }
 0x30b   : > { %v3111_v39 = vpop.f32.mrf.mxu2  ;;  %v3200_v60 = vpop.f32.mrf.mxu3 }
 0x30c   : > { %v2759_v11 = vpop.f32.mrf.mxu0  ;;  %v2848_v55 = vpop.f32.mrf.mxu1  ;;  %v6833_v42 = vadd.f32 %v3111_v39, %v2919_v44  ;;  %v6835_v40 = vadd.f32 %v3200_v60, %v2920_v37 }
 0x30d   : > { %v2921_v61 = vadd.f32 %v2759_v11, %v6462_v9  ;;  %v2922_v31 = vadd.f32 %v2848_v55, %v6464_v1  ;;  %v8298_v11 = vld [vmem:[#allocation3_spill] sm:$0xff]  ;;  %v8299_v55 = vld [vmem:[#allocation86_spill] sm:$0xff] }
 0x30e   : > { %8297 = vst [vmem:[#allocation134_spill] sm:$0xff] %v6835_v40  ;;  %vm8300_vm0 = vcmp.ge.s32.totalorder %v8299_v55, 0 }
 0x30f   : > { %5027 = vmatmul.msk.bf16.gmra.mxu0 %vm1232_vm3, %v2700_v36  ;;  %5043 = vmatmul.msk.bf16.gmra.mxu1 %vm1232_vm3, %v2700_v36  ;;  %v3312_v36 = vsel %vm8300_vm0, %v8298_v11, 0.0  ;;  %v8304_v11 = vld [vmem:[#allocation5_spill] sm:$0xff] }
 0x310   : > { %5060 = vmatmul.msk.bf16.gmra.mxu2 %vm1232_vm3, %v3011_v6  ;;  %5076 = vmatmul.msk.bf16.gmra.mxu3 %vm1232_vm3, %v3011_v6  ;;  %v3343_v6 = vpack.c.bf16 %v8301_v56, %v3312_v36  ;;  %vm8305_vm14 = vcmp.ge.s32.totalorder %v8304_v11, 0  ;;  %v8310_v11 = vld [vmem:[#allocation11_spill] sm:$0xff] }
 0x313   : > { %v3114_v44 = vpop.f32.mrf.mxu2  ;;  %v3203_v9 = vpop.f32.mrf.mxu3 }
 0x314   : > { %v2761_v37 = vpop.f32.mrf.mxu0  ;;  %v2850_v1 = vpop.f32.mrf.mxu1  ;;  %v6848_v29 = vadd.f32 %v3114_v44, %v2921_v61  ;;  %v6850_v52 = vadd.f32 %v3203_v9, %v2922_v31 }
 0x315   : > { %v2923_v39 = vadd.f32 %v2761_v37, %v6468_v58  ;;  %v2924_v60 = vadd.f32 %v2850_v1, %v6470_v46 }
 0x31b   : > { %v3116_v53 = vpop.f32.mrf.mxu2  ;;  %v3205_v18 = vpop.f32.mrf.mxu3 }
 0x31c   : > { %v2764_v41 = vpop.f32.mrf.mxu0  ;;  %v2853_v24 = vpop.f32.mrf.mxu1  ;;  %v6858_v40 = vadd.f32 %v3116_v53, %v2923_v39  ;;  %v6860_v61 = vadd.f32 %v3205_v18, %v2924_v60  ;;  %v8303_v60 = vld [vmem:[#allocation7_spill] sm:$0xff] }
 0x31d   : > { %v2925_v31 = vadd.f32 %v2764_v41, %v6482_v5  ;;  %v2926_v58 = vadd.f32 %v2853_v24, %v6484_v23  ;;  %v8302_v23 = vld [vmem:[#allocation87_spill] sm:$0xff]  ;;  %v3314_v55 = vsel %vm8305_vm14, %v8303_v60, 0.0 }
 0x31f   : > { %5078 = vmatmul.msk.bf16.vlgmr.msrb.gmra.mxu0 %vm1232_vm3, %v3343_v6  ;;  %5094 = vmatmul.msk.bf16.vlgmr.msrb.gmra.mxu1 %vm1232_vm3, %v3343_v6  ;;  %v8306_v6 = vld [vmem:[#allocation8_spill] sm:$0xff] }
 0x320   : > { %5111 = vmatmul.msk.bf16.vlgmr.msrb.gmra.mxu2 %vm1232_vm3, %v8187_v15  ;;  %5127 = vmatmul.msk.bf16.vlgmr.msrb.gmra.mxu3 %vm1232_vm3, %v8187_v15  ;;  %v3344_v15 = vpack.c.bf16 %v8306_v6, %v3314_v55  ;;  %v8311_v55 = vld [vmem:[#allocation9_spill] sm:$0xff] }
 0x321   : > { %vm8312_vm13 = vcmp.ge.s32.totalorder %v8311_v55, 0  ;;  %v8317_v55 = vld [vmem:[#allocation15_spill] sm:$0xff] }
 0x323   : > { %v3119_v46 = vpop.f32.mrf.mxu2  ;;  %v3208_v44 = vpop.f32.mrf.mxu3 }
 0x324   : > { %v2766_v9 = vpop.f32.mrf.mxu0  ;;  %v2855_v37 = vpop.f32.mrf.mxu1  ;;  %v6870_v1 = vadd.f32 %v3119_v46, %v2925_v31  ;;  %v6872_v39 = vadd.f32 %v3208_v44, %v2926_v58 }
 0x325   : > { %v2927_v5 = vadd.f32 %v2766_v9, %v6491_v34  ;;  %v2928_v24 = vadd.f32 %v2855_v37, %v8302_v23 }
 0x32b   : > { %v3121_v36 = vpop.f32.mrf.mxu2  ;;  %v3210_v56 = vpop.f32.mrf.mxu3 }
 0x32c   : > { %v2769_v53 = vpop.f32.mrf.mxu0  ;;  %v2858_v18 = vpop.f32.mrf.mxu1  ;;  %v6880_v41 = vadd.f32 %v3121_v36, %v2927_v5  ;;  %v6882_v31 = vadd.f32 %v3210_v56, %v2928_v24  ;;  %v8309_v24 = vld [vmem:[#allocation84_spill] sm:$0xff]  ;;  %v3316_v36 = vsel %vm8312_vm13, %v8310_v11, 0.0 }
 0x32d   : > { %v2929_v58 = vadd.f32 %v2769_v53, %v6504_v43  ;;  %v2930_v34 = vadd.f32 %v2858_v18, %v6506_v12  ;;  %v8308_v43 = vld [vmem:[#allocation6_spill] sm:$0xff] }
 0x32e   : > { %8307 = vst [vmem:[#allocation135_spill] sm:$0xff] %v6882_v31 }
 0x32f   : > { %5079 = vmatmul.msk.bf16.gmra.mxu0 %vm1232_vm3, %v3344_v15  ;;  %5095 = vmatmul.msk.bf16.gmra.mxu1 %vm1232_vm3, %v3344_v15  ;;  %v8313_v15 = vld [vmem:[#allocation12_spill] sm:$0xff] }
 0x330   : > { %5112 = vmatmul.msk.bf16.gmra.mxu2 %vm1232_vm3, %v8194_v0  ;;  %5128 = vmatmul.msk.bf16.gmra.mxu3 %vm1232_vm3, %v8194_v0  ;;  %v3345_v0 = vpack.c.bf16 %v8313_v15, %v3316_v36  ;;  %v8318_v36 = vld [vmem:[#allocation13_spill] sm:$0xff] }
 0x331   : > { %vm8319_vm0 = vcmp.ge.s32.totalorder %v8318_v36, 0  ;;  %v8324_v36 = vld [vmem:[#allocation19_spill] sm:$0xff] }
 0x333   : > { %v3124_v46 = vpop.f32.mrf.mxu2  ;;  %v3213_v44 = vpop.f32.mrf.mxu3 }
 0x334   : > { %v2771_v9 = vpop.f32.mrf.mxu0  ;;  %v2860_v37 = vpop.f32.mrf.mxu1  ;;  %v6892_v5 = vadd.f32 %v3124_v46, %v2929_v58  ;;  %v6894_v23 = vadd.f32 %v3213_v44, %v2930_v34 }
 0x335   : > { %v2931_v12 = vadd.f32 %v2771_v9, %v8308_v43  ;;  %v2932_v60 = vadd.f32 %v2860_v37, %v8309_v24 }
 0x33b   : > { %v3126_v56 = vpop.f32.mrf.mxu2  ;;  %v3215_v6 = vpop.f32.mrf.mxu3 }
 0x33c   : > { %v2774_v53 = vpop.f32.mrf.mxu0  ;;  %v2863_v18 = vpop.f32.mrf.mxu1  ;;  %v6902_v31 = vadd.f32 %v3126_v56, %v2931_v12  ;;  %v6904_v58 = vadd.f32 %v3215_v6, %v2932_v60  ;;  %v8316_v60 = vld [vmem:[#allocation91_spill] sm:$0xff]  ;;  %v3318_v56 = vsel %vm8319_vm0, %v8317_v55, 0.0 }
 0x33d   : > { %v2933_v34 = vadd.f32 %v2774_v53, %v6526_v59  ;;  %v2934_v46 = vadd.f32 %v2863_v18, %v6528_v62  ;;  %v8315_v59 = vld [vmem:[#allocation90_spill] sm:$0xff] }
 0x33e   : > { %8314 = vst [vmem:[#allocation136_spill] sm:$0xff] %v6904_v58 }
 0x33f   : > { %5080 = vmatmul.msk.bf16.gmra.mxu0 %vm1232_vm3, %v3345_v0  ;;  %5096 = vmatmul.msk.bf16.gmra.mxu1 %vm1232_vm3, %v3345_v0  ;;  %v8320_v0 = vld [vmem:[#allocation16_spill] sm:$0xff] }
 0x340   : > { %5113 = vmatmul.msk.bf16.gmra.mxu2 %vm1232_vm3, %v8201_v16  ;;  %5129 = vmatmul.msk.bf16.gmra.mxu3 %vm1232_vm3, %v8201_v16  ;;  %v3346_v16 = vpack.c.bf16 %v8320_v0, %v3318_v56  ;;  %v8325_v56 = vld [vmem:[#allocation17_spill] sm:$0xff] }
 0x341   : > { %vm8326_vm14 = vcmp.ge.s32.totalorder %v8325_v56, 0 }
 0x343   : > { %v3129_v44 = vpop.f32.mrf.mxu2  ;;  %v3218_v9 = vpop.f32.mrf.mxu3 }
 0x344   : > { %v2776_v37 = vpop.f32.mrf.mxu0  ;;  %v2865_v43 = vpop.f32.mrf.mxu1  ;;  %v6914_v12 = vadd.f32 %v3129_v44, %v2933_v34  ;;  %v6916_v24 = vadd.f32 %v3218_v9, %v2934_v46 }
 0x345   : > { %v2935_v62 = vadd.f32 %v2776_v37, %v8315_v59  ;;  %v2936_v11 = vadd.f32 %v2865_v43, %v8316_v60 }
 0x34b   : > { %v3131_v6 = vpop.f32.mrf.mxu2  ;;  %v3220_v15 = vpop.f32.mrf.mxu3 }
 0x34c   : > { %v2779_v53 = vpop.f32.mrf.mxu0  ;;  %v2868_v18 = vpop.f32.mrf.mxu1  ;;  %v6924_v58 = vadd.f32 %v3131_v6, %v2935_v62  ;;  %v6926_v34 = vadd.f32 %v3220_v15, %v2936_v11  ;;  %v8323_v11 = vld [vmem:[#allocation94_spill] sm:$0xff]  ;;  %v3320_v6 = vsel %vm8326_vm14, %v8324_v36, 0.0  ;;  %v8334_v36 = vld [vmem:[#allocation97_spill] sm:$0xff] }
 0x34d   : > { %v2937_v46 = vadd.f32 %v2779_v53, %v6548_v20  ;;  %v2938_v44 = vadd.f32 %v2868_v18, %v6550_v7  ;;  %v8322_v20 = vld [vmem:[#allocation10_spill] sm:$0xff] }
 0x34e   : > { %8321 = vst [vmem:[#allocation137_spill] sm:$0xff] %v6926_v34 }
 0x34f   : > { %5081 = vmatmul.msk.bf16.gmra.mxu0 %vm1232_vm3, %v3346_v16  ;;  %5097 = vmatmul.msk.bf16.gmra.mxu1 %vm1232_vm3, %v3346_v16  ;;  %v8327_v16 = vld [vmem:[#allocation20_spill] sm:$0xff] }
 0x350   : > { %5114 = vmatmul.msk.bf16.gmra.mxu2 %vm1232_vm3, %v8208_v47  ;;  %5130 = vmatmul.msk.bf16.gmra.mxu3 %vm1232_vm3, %v8208_v47  ;;  %v3347_v47 = vpack.c.bf16 %v8327_v16, %v3320_v6  ;;  %v8335_v6 = vld [vmem:[#allocation23_spill] sm:$0xff] }
 0x353   : > { %v3134_v9 = vpop.f32.mrf.mxu2  ;;  %v3223_v37 = vpop.f32.mrf.mxu3 }
 0x354   : > { %v2781_v43 = vpop.f32.mrf.mxu0  ;;  %v2870_v59 = vpop.f32.mrf.mxu1  ;;  %v6936_v62 = vadd.f32 %v3134_v9, %v2937_v46  ;;  %v6938_v60 = vadd.f32 %v3223_v37, %v2938_v44  ;;  %v8330_v37 = vld [vmem:[#allocation26_spill] sm:$0xff] }
 0x355   : > { %v2939_v7 = vadd.f32 %v2781_v43, %v8322_v20  ;;  %v2940_v55 = vadd.f32 %v2870_v59, %v8323_v11 }
 0x35b   : > { %v3136_v15 = vpop.f32.mrf.mxu2  ;;  %v3225_v0 = vpop.f32.mrf.mxu3 }
 0x35c   : > { %v2784_v53 = vpop.f32.mrf.mxu0  ;;  %v2873_v18 = vpop.f32.mrf.mxu1  ;;  %v6946_v34 = vadd.f32 %v3136_v15, %v2939_v7  ;;  %v6948_v46 = vadd.f32 %v3225_v0, %v2940_v55  ;;  %v8336_v15 = vld [vmem:[#allocation21_spill] sm:$0xff] }
 0x35d   : > { %v2941_v44 = vadd.f32 %v2784_v53, %v6570_v50  ;;  %v2942_v9 = vadd.f32 %v2873_v18, %v6572_v54  ;;  %v8333_v50 = vld [vmem:[#allocation96_spill] sm:$0xff]  ;;  %vm8337_vm13 = vcmp.ge.s32.totalorder %v8336_v15, 0 }
 0x35e   : > { %8328 = vst [vmem:[#allocation50_spill] sm:$0xff] %v6946_v34  ;;  %v3322_v0 = vsel %vm8337_vm13, %v8335_v6, 0.0  ;;  %v8338_v53 = vld [vmem:[#allocation24_spill] sm:$0xff] }
 0x35f   : > { %8329 = vst [vmem:[#allocation138_spill] sm:$0xff] %v6948_v46  ;;  %5082 = vmatmul.msk.bf16.gmra.mxu0 %vm1232_vm3, %v3347_v47  ;;  %5098 = vmatmul.msk.bf16.gmra.mxu1 %vm1232_vm3, %v3347_v47  ;;  %v3348_v18 = vpack.c.bf16 %v8338_v53, %v3322_v0  ;;  %v8344_v0 = vld [vmem:[#allocation102_spill] sm:$0xff]  ;;  %v8346_v53 = vld [vmem:[#allocation27_spill] sm:$0xff] }
 0x360   : > { %5115 = vmatmul.msk.bf16.gmra.mxu2 %vm1232_vm3, %v8330_v37  ;;  %5131 = vmatmul.msk.bf16.gmra.mxu3 %vm1232_vm3, %v8330_v37 }
 0x363   : > { %v3139_v43 = vpop.f32.mrf.mxu2  ;;  %v3228_v59 = vpop.f32.mrf.mxu3 }
 0x364   : > { %v2786_v20 = vpop.f32.mrf.mxu0  ;;  %v2875_v7 = vpop.f32.mrf.mxu1  ;;  %v6958_v11 = vadd.f32 %v3139_v43, %v2941_v44  ;;  %v6960_v55 = vadd.f32 %v3228_v59, %v2942_v9  ;;  %v8341_v9 = vld [vmem:[#allocation14_spill] sm:$0xff]  ;;  %v8342_v59 = vld [vmem:[#allocation100_spill] sm:$0xff] }
 0x365   : > { %v2943_v54 = vadd.f32 %v2786_v20, %v8333_v50  ;;  %v2944_v56 = vadd.f32 %v2875_v7, %v8334_v36  ;;  %v8343_v7 = vld [vmem:[#allocation30_spill] sm:$0xff] }
 0x366   : > { %8331 = vst [vmem:[#allocation139_spill] sm:$0xff] %v6958_v11 }
 0x367   : > { %8332 = vst [vmem:[#allocation140_spill] sm:$0xff] %v6960_v55 }
 0x36b   : > { %v3141_v16 = vpop.f32.mrf.mxu2  ;;  %v3230_v47 = vpop.f32.mrf.mxu3 }
 0x36c   : > { %v2789_v37 = vpop.f32.mrf.mxu0  ;;  %v2878_v46 = vpop.f32.mrf.mxu1  ;;  %v6968_v34 = vadd.f32 %v3141_v16, %v2943_v54  ;;  %v6970_v44 = vadd.f32 %v3230_v47, %v2944_v56  ;;  %v8345_v16 = vld [vmem:[#allocation103_spill] sm:$0xff] }
 0x36d   : > { %v2945_v43 = vadd.f32 %v2789_v37, %v8341_v9  ;;  %v2946_v20 = vadd.f32 %v2878_v46, %v8342_v59 }
 0x36e   : > { %8339 = vst [vmem:[#allocation58_spill] sm:$0xff] %v6968_v34 }
 0x36f   : > { %8340 = vst [vmem:[#allocation141_spill] sm:$0xff] %v6970_v44  ;;  %5083 = vmatmul.msk.bf16.gmra.mxu0 %vm1232_vm3, %v3348_v18  ;;  %5099 = vmatmul.msk.bf16.gmra.mxu1 %vm1232_vm3, %v3348_v18  ;;  %v8347_v18 = vld [vmem:[#allocation25_spill] sm:$0xff]  ;;  %v8349_v44 = vld [vmem:[#allocation28_spill] sm:$0xff] }
 0x370   : > { %5116 = vmatmul.msk.bf16.gmra.mxu2 %vm1232_vm3, %v8343_v7  ;;  %5132 = vmatmul.msk.bf16.gmra.mxu3 %vm1232_vm3, %v8343_v7  ;;  %vm8348_vm0 = vcmp.ge.s32.totalorder %v8347_v18, 0  ;;  %v8353_v18 = vld [vmem:[#allocation32_spill] sm:$0xff] }
 0x371   : > { %v3324_v37 = vsel %vm8348_vm0, %v8346_v53, 0.0 }
 0x372   : > { %v3349_v7 = vpack.c.bf16 %v8349_v44, %v3324_v37 }
 0x373   : > { %v3144_v50 = vpop.f32.mrf.mxu2  ;;  %v3233_v36 = vpop.f32.mrf.mxu3 }
 0x374   : > { %v2791_v54 = vpop.f32.mrf.mxu0  ;;  %v2880_v6 = vpop.f32.mrf.mxu1  ;;  %v6980_v56 = vadd.f32 %v3144_v50, %v2945_v43  ;;  %v6982_v15 = vadd.f32 %v3233_v36, %v2946_v20 }
 0x375   : > { %v2947_v46 = vadd.f32 %v2791_v54, %v8344_v0  ;;  %v2948_v47 = vadd.f32 %v2880_v6, %v8345_v16 }
 0x37b   : > { %v3146_v9 = vpop.f32.mrf.mxu2  ;;  %v3235_v59 = vpop.f32.mrf.mxu3 }
 0x37c   : > { %v2794_v34 = vpop.f32.mrf.mxu0  ;;  %v2883_v55 = vpop.f32.mrf.mxu1  ;;  %v6990_v11 = vadd.f32 %v3146_v9, %v2947_v46  ;;  %v6992_v43 = vadd.f32 %v3235_v59, %v2948_v47 }
 0x37d   : > { %v2949_v20 = vadd.f32 %v2794_v34, %v6614_v26  ;;  %v2950_v50 = vadd.f32 %v2883_v55, %v6616_v4  ;;  %v8350_v34 = vld [vmem:[#allocation31_spill] sm:$0xff]  ;;  %v8351_v55 = vld [vmem:[#allocation29_spill] sm:$0xff] }
 0x37e   : > { %vm8352_vm14 = vcmp.ge.s32.totalorder %v8351_v55, 0  ;;  %v8356_v55 = vld [vmem:[#allocation33_spill] sm:$0xff] }
 0x37f   : > { %5084 = vmatmul.msk.bf16.gmra.mxu0 %vm1232_vm3, %v3349_v7  ;;  %5100 = vmatmul.msk.bf16.gmra.mxu1 %vm1232_vm3, %v3349_v7  ;;  %v3326_v16 = vsel %vm8352_vm14, %v8350_v34, 0.0  ;;  %v8355_v34 = vld [vmem:[#allocation35_spill] sm:$0xff]  ;;  %vm8357_vm13 = vcmp.ge.s32.totalorder %v8356_v55, 0  ;;  %v8364_v55 = vld [vmem:[#allocation109_spill] sm:$0xff] }
 0x380   : > { %5117 = vmatmul.msk.bf16.gmra.mxu2 %vm1232_vm3, %v8233_v13  ;;  %5133 = vmatmul.msk.bf16.gmra.mxu3 %vm1232_vm3, %v8233_v13  ;;  %v3350_v13 = vpack.c.bf16 %v8353_v18, %v3326_v16  ;;  %v3328_v16 = vsel %vm8357_vm13, %v8355_v34, 0.0  ;;  %v8358_v18 = vld [vmem:[#allocation36_spill] sm:$0xff] }
 0x383   : > { %v3149_v44 = vpop.f32.mrf.mxu2  ;;  %v3238_v36 = vpop.f32.mrf.mxu3 }
 0x384   : > { %v2796_v54 = vpop.f32.mrf.mxu0  ;;  %v2885_v6 = vpop.f32.mrf.mxu1  ;;  %v7002_v0 = vadd.f32 %v3149_v44, %v2949_v20  ;;  %v7004_v46 = vadd.f32 %v3238_v36, %v2950_v50 }
 0x385   : > { %v2951_v26 = vadd.f32 %v2796_v54, %v6623_v14  ;;  %v2952_v4 = vadd.f32 %v2885_v6, %v6625_v3 }
 0x38b   : > { %v3151_v47 = vpop.f32.mrf.mxu2  ;;  %v3240_v53 = vpop.f32.mrf.mxu3 }
 0x38c   : > { %v2799_v37 = vpop.f32.mrf.mxu0  ;;  %v2888_v9 = vpop.f32.mrf.mxu1  ;;  %v7012_v59 = vadd.f32 %v3151_v47, %v2951_v26  ;;  %v7014_v7 = vadd.f32 %v3240_v53, %v2952_v4  ;;  %v5251_v4 = vld [vmem:[%s7774_s3 + $0x38] sm:$0xff] }
 0x38d   : > { %v2953_v20 = vadd.f32 %v2799_v37, %v6636_v25  ;;  %v2954_v14 = vadd.f32 %v2888_v9, %v6638_v33  ;;  %v8354_v33 = vld [vmem:[#allocation18_spill] sm:$0xff]  ;;  %4575 = vmatpush.bf16.msra.mxu2 %v5251_v4 }
 0x38f   : > { %5085 = vmatmul.msk.bf16.gmra.mxu0 %vm1232_vm3, %v3350_v13  ;;  %5101 = vmatmul.msk.bf16.gmra.mxu1 %vm1232_vm3, %v3350_v13 }
 0x390   : > { %5118 = vmatmul.msk.bf16.gmra.mxu2 %vm1232_vm3, %v8236_v49  ;;  %5134 = vmatmul.msk.bf16.gmra.mxu3 %vm1232_vm3, %v8236_v49  ;;  %v5259_v49 = vld [vmem:[%s7774_s3 + $0x78] sm:$0xff] }
 0x391   : > { %4664 = vmatpush.bf16.msra.mxu3 %v5259_v49 }
 0x393   : > { %v3154_v3 = vpop.f32.mrf.mxu2  ;;  %v3243_v50 = vpop.f32.mrf.mxu3 }
 0x394   : > { %v2801_v44 = vpop.f32.mrf.mxu0  ;;  %v2890_v36 = vpop.f32.mrf.mxu1  ;;  %v7024_v54 = vadd.f32 %v3154_v3, %v2953_v20  ;;  %v7026_v6 = vadd.f32 %v3243_v50, %v2954_v14  ;;  %v8361_v3 = vld [vmem:[#allocation106_spill] sm:$0xff] }
 0x395   : > { %v2955_v25 = vadd.f32 %v2801_v44, %v6648_v38  ;;  %v2956_v26 = vadd.f32 %v2890_v36, %v8354_v33  ;;  %v3351_v38 = vpack.c.bf16 %v8358_v18, %v3328_v16  ;;  %v8362_v44 = vld [vmem:[#allocation43_spill] sm:$0xff] }
 0x39b   : > { %v3156_v47 = vpop.f32.mrf.mxu2  ;;  %v3245_v53 = vpop.f32.mrf.mxu3 }
 0x39c   : > { %v7040_v13 = vadd.f32 %v3156_v47, %v2955_v25  ;;  %v7042_v37 = vadd.f32 %v3245_v53, %v2956_v26  ;;  %v3426_v9 = vpop.f32.mrf.mxu0  ;;  %v3515_v20 = vpop.f32.mrf.mxu1  ;;  %v8365_v47 = vld [vmem:[#allocation39_spill] sm:$0xff]  ;;  %v8366_v53 = vld [vmem:[#allocation37_spill] sm:$0xff] }
 0x39d   : > { %v3595_v14 = vadd.f32 %v3426_v9, %v6663_v17  ;;  %v3596_v50 = vadd.f32 %v3515_v20, %v8361_v3  ;;  %v8363_v17 = vld [vmem:[#allocation108_spill] sm:$0xff]  ;;  %vm8367_vm0 = vcmp.ge.s32.totalorder %v8366_v53, 0  ;;  %v8373_v53 = vld [vmem:[#allocation114_spill] sm:$0xff] }
 0x39e   : > { %8359 = vst [vmem:[#allocation59_spill] sm:$0xff] %v7040_v13  ;;  %v3330_v18 = vsel %vm8367_vm0, %v8365_v47, 0.0  ;;  %v8368_v20 = vld [vmem:[#allocation40_spill] sm:$0xff] }
 0x39f   : > { %8360 = vst [vmem:[#allocation66_spill] sm:$0xff] %v7042_v37  ;;  %5086 = vmatmul.msk.bf16.gmra.mxu0 %vm1232_vm3, %v3351_v38  ;;  %5102 = vmatmul.msk.bf16.gmra.mxu1 %vm1232_vm3, %v3351_v38  ;;  %v3352_v3 = vpack.c.bf16 %v8368_v20, %v3330_v18  ;;  %v8374_v20 = vld [vmem:[#allocation46_spill] sm:$0xff] }
 0x3a0   : > { %5119 = vmatmul.msk.bf16.gmra.mxu2 %vm1232_vm3, %v8362_v44  ;;  %5135 = vmatmul.msk.bf16.gmra.mxu3 %vm1232_vm3, %v8362_v44 }
 0x3a3   : > { %v3694_v36 = vpop.f32.mrf.mxu2  ;;  %v3783_v25 = vpop.f32.mrf.mxu3 }
 0x3a4   : > { %v3428_v33 = vpop.f32.mrf.mxu0  ;;  %v3517_v26 = vpop.f32.mrf.mxu1  ;;  %v7052_v4 = vadd.f32 %v3694_v36, %v3595_v14  ;;  %v7054_v49 = vadd.f32 %v3783_v25, %v3596_v50  ;;  %v8369_v36 = vld [vmem:[#allocation22_spill] sm:$0xff] }
 0x3a5   : > { %v3597_v34 = vadd.f32 %v3428_v33, %v8363_v17  ;;  %v3598_v16 = vadd.f32 %v3517_v26, %v8364_v55  ;;  %v8370_v33 = vld [vmem:[#allocation51_spill] sm:$0xff] }
 0x3ab   : > { %v3696_v38 = vpop.f32.mrf.mxu2  ;;  %v3785_v9 = vpop.f32.mrf.mxu3 }
 0x3ac   : > { %v3431_v44 = vpop.f32.mrf.mxu0  ;;  %v3520_v37 = vpop.f32.mrf.mxu1  ;;  %v7062_v13 = vadd.f32 %v3696_v38, %v3597_v34  ;;  %v7064_v14 = vadd.f32 %v3785_v9, %v3598_v16  ;;  %v5250_v38 = vld [vmem:[%s7774_s3 + $0x30] sm:$0xff] }
 0x3ad   : > { %v3599_v50 = vadd.f32 %v3431_v44, %v6685_v10  ;;  %v3600_v25 = vadd.f32 %v3520_v37, %v8369_v36  ;;  %v8372_v10 = vld [vmem:[#allocation112_spill] sm:$0xff]  ;;  %v5258_v9 = vld [vmem:[%s7774_s3 + $0x70] sm:$0xff]  ;;  %4576 = vmatpush.bf16.msra.mxu2 %v5250_v38 }
 0x3ae   : > { %4665 = vmatpush.bf16.msra.mxu3 %v5258_v9 }
 0x3af   : > { %5087 = vmatmul.msk.bf16.gmra.mxu0 %vm1232_vm3, %v3352_v3  ;;  %5103 = vmatmul.msk.bf16.gmra.mxu1 %vm1232_vm3, %v3352_v3  ;;  %v8375_v3 = vld [vmem:[#allocation41_spill] sm:$0xff] }
 0x3b0   : > { %5120 = vmatmul.msk.bf16.gmra.mxu2 %vm1232_vm3, %v8370_v33  ;;  %5136 = vmatmul.msk.bf16.gmra.mxu3 %vm1232_vm3, %v8370_v33  ;;  %vm8376_vm14 = vcmp.ge.s32.totalorder %v8375_v3, 0 }
 0x3b1   : > { %v3332_v44 = vsel %vm8376_vm14, %v8374_v20, 0.0 }
 0x3b3   : > { %v3699_v26 = vpop.f32.mrf.mxu2  ;;  %v3788_v17 = vpop.f32.mrf.mxu3 }
 0x3b4   : > { %v3433_v34 = vpop.f32.mrf.mxu0  ;;  %v3522_v55 = vpop.f32.mrf.mxu1  ;;  %v7074_v16 = vadd.f32 %v3699_v26, %v3599_v50  ;;  %v7076_v47 = vadd.f32 %v3788_v17, %v3600_v25  ;;  %v8377_v25 = vld [vmem:[#allocation47_spill] sm:$0xff] }
 0x3b5   : > { %v3601_v37 = vadd.f32 %v3433_v34, %v8372_v10  ;;  %v3602_v18 = vadd.f32 %v3522_v55, %v8373_v53  ;;  %v3353_v33 = vpack.c.bf16 %v8377_v25, %v3332_v44 }
 0x3b6   : > { %8371 = vst [vmem:[#allocation142_spill] sm:$0xff] %v7076_v47 }
 0x3bb   : > { %v3701_v50 = vpop.f32.mrf.mxu2  ;;  %v3790_v36 = vpop.f32.mrf.mxu3 }
 0x3bc   : > { %v3436_v26 = vpop.f32.mrf.mxu0  ;;  %v3525_v17 = vpop.f32.mrf.mxu1  ;;  %v7090_v34 = vadd.f32 %v3701_v50, %v3601_v37  ;;  %v7092_v55 = vadd.f32 %v3790_v36, %v3602_v18  ;;  %v8381_v50 = vld [vmem:[#allocation54_spill] sm:$0xff]  ;;  %v8382_v36 = vld [vmem:[#allocation48_spill] sm:$0xff] }
 0x3bd   : > { %v3603_v10 = vadd.f32 %v3436_v26, %v6707_v8  ;;  %v3604_v53 = vadd.f32 %v3525_v17, %v6709_v21  ;;  %v8380_v21 = vld [vmem:[#allocation115_spill] sm:$0xff]  ;;  %vm8383_vm13 = vcmp.ge.s32.totalorder %v8382_v36, 0  ;;  %v5257_v36 = vld [vmem:[%s7774_s3 + $0x68] sm:$0xff] }
 0x3be   : > { %8378 = vst [vmem:[#allocation144_spill] sm:$0xff] %v7090_v34  ;;  %v3334_v25 = vsel %vm8383_vm13, %v8381_v50, 0.0  ;;  %v8384_v17 = vld [vmem:[#allocation55_spill] sm:$0xff]  ;;  %v5249_v50 = vld [vmem:[%s7774_s3 + $0x28] sm:$0xff]  ;;  %4666 = vmatpush.bf16.msra.mxu3 %v5257_v36 }
 0x3bf   : > { %8379 = vst [vmem:[#allocation145_spill] sm:$0xff] %v7092_v55  ;;  %5088 = vmatmul.msk.bf16.gmra.mxu0 %vm1232_vm3, %v3353_v33  ;;  %5104 = vmatmul.msk.bf16.gmra.mxu1 %vm1232_vm3, %v3353_v33 }
 0x3c0   : > { %5121 = vmatmul.msk.bf16.gmra.mxu2 %vm1232_vm3, %v8263_v30  ;;  %5137 = vmatmul.msk.bf16.gmra.mxu3 %vm1232_vm3, %v8263_v30  ;;  %v3354_v30 = vpack.c.bf16 %v8384_v17, %v3334_v25  ;;  %v8389_v25 = vld [vmem:[#allocation62_spill] sm:$0xff] }
 0x3c1   : > { %4577 = vmatpush.bf16.msra.mxu2 %v5249_v50  ;;  %v8397_v50 = vld [vmem:[#allocation74_spill] sm:$0xff] }
 0x3c3   : > { %v3704_v38 = vpop.f32.mrf.mxu2  ;;  %v3793_v9 = vpop.f32.mrf.mxu3 }
 0x3c4   : > { %v3438_v37 = vpop.f32.mrf.mxu0  ;;  %v3527_v20 = vpop.f32.mrf.mxu1  ;;  %v7102_v18 = vadd.f32 %v3704_v38, %v3603_v10  ;;  %v7104_v3 = vadd.f32 %v3793_v9, %v3604_v53  ;;  %v8385_v38 = vld [vmem:[#allocation67_spill] sm:$0xff] }
 0x3c5   : > { %v3605_v8 = vadd.f32 %v3438_v37, %v6716_v19  ;;  %v3606_v44 = vadd.f32 %v3527_v20, %v8380_v21 }
 0x3cb   : > { %v3706_v33 = vpop.f32.mrf.mxu2  ;;  %v3795_v26 = vpop.f32.mrf.mxu3 }
 0x3cc   : > { %v3441_v55 = vpop.f32.mrf.mxu0  ;;  %v3530_v34 = vpop.f32.mrf.mxu1  ;;  %v7112_v47 = vadd.f32 %v3706_v33, %v3605_v8  ;;  %v7114_v10 = vadd.f32 %v3795_v26, %v3606_v44  ;;  %v8390_v33 = vld [vmem:[#allocation56_spill] sm:$0xff] }
 0x3cd   : > { %v3607_v53 = vadd.f32 %v3441_v55, %v6729_v22  ;;  %v3608_v19 = vadd.f32 %v3530_v34, %v6731_v28  ;;  %v8387_v22 = vld [vmem:[#allocation118_spill] sm:$0xff]  ;;  %v8388_v34 = vld [vmem:[#allocation120_spill] sm:$0xff]  ;;  %vm8391_vm0 = vcmp.ge.s32.totalorder %v8390_v33, 0 }
 0x3ce   : > { %v3336_v26 = vsel %vm8391_vm0, %v8389_v25, 0.0  ;;  %vm8412_vm0 = vsmask.f32 7424 }
 0x3cf   : > { %5089 = vmatmul.msk.bf16.gmra.mxu0 %vm1232_vm3, %v3354_v30  ;;  %5105 = vmatmul.msk.bf16.gmra.mxu1 %vm1232_vm3, %v3354_v30 }
 0x3d0   : > { %5122 = vmatmul.msk.bf16.gmra.mxu2 %vm1232_vm3, %v8385_v38  ;;  %5138 = vmatmul.msk.bf16.gmra.mxu3 %vm1232_vm3, %v8385_v38 }
 0x3d3   : > { %v3709_v9 = vpop.f32.mrf.mxu2  ;;  %v3798_v37 = vpop.f32.mrf.mxu3 }
 0x3d4   : > { %v3443_v20 = vpop.f32.mrf.mxu0  ;;  %v3532_v8 = vpop.f32.mrf.mxu1  ;;  %v7124_v21 = vadd.f32 %v3709_v9, %v3607_v53  ;;  %v7126_v44 = vadd.f32 %v3798_v37, %v3608_v19  ;;  %v8392_v53 = vld [vmem:[#allocation63_spill] sm:$0xff] }
 0x3d5   : > { %v3609_v28 = vadd.f32 %v3443_v20, %v8387_v22  ;;  %v3610_v55 = vadd.f32 %v3532_v8, %v8388_v34  ;;  %v3355_v19 = vpack.c.bf16 %v8392_v53, %v3336_v26  ;;  %v8395_v8 = vld [vmem:[#allocation121_spill] sm:$0xff]  ;;  %v8396_v34 = vld [vmem:[#allocation124_spill] sm:$0xff]  ;;  %v8399_v53 = vld [vmem:[#allocation127_spill] sm:$0xff] }
 0x3d6   : > { %8386 = vst [vmem:[#allocation146_spill] sm:$0xff] %v7126_v44 }
 0x3db   : > { %v3711_v17 = vpop.f32.mrf.mxu2  ;;  %v3800_v30 = vpop.f32.mrf.mxu3 }
 0x3dc   : > { %v3446_v38 = vpop.f32.mrf.mxu0  ;;  %v3535_v9 = vpop.f32.mrf.mxu1  ;;  %v7140_v37 = vadd.f32 %v3711_v17, %v3609_v28  ;;  %v7142_v20 = vadd.f32 %v3800_v30, %v3610_v55  ;;  %v8398_v17 = vld [vmem:[#allocation125_spill] sm:$0xff] }
 0x3dd   : > { %v3611_v22 = vadd.f32 %v3446_v38, %v8395_v8  ;;  %v3612_v44 = vadd.f32 %v3535_v9, %v8396_v34  ;;  %v8401_v9 = vld [vmem:[#allocation64_spill] sm:$0xff] }
 0x3de   : > { %8393 = vst [vmem:[#allocation147_spill] sm:$0xff] %v7140_v37  ;;  %vm8402_vm14 = vcmp.ge.s32.totalorder %v8401_v9, 0 }
 0x3df   : > { %8394 = vst [vmem:[#allocation80_spill] sm:$0xff] %v7142_v20  ;;  %5090 = vmatmul.msk.bf16.gmra.mxu0 %vm1232_vm3, %v3355_v19  ;;  %5106 = vmatmul.msk.bf16.gmra.mxu1 %vm1232_vm3, %v3355_v19  ;;  %v8400_v19 = vld [vmem:[#allocation70_spill] sm:$0xff]  ;;  %v8403_v20 = vld [vmem:[#allocation71_spill] sm:$0xff] }
 0x3e0   : > { %5123 = vmatmul.msk.bf16.gmra.mxu2 %vm1232_vm3, %v8397_v50  ;;  %5139 = vmatmul.msk.bf16.gmra.mxu3 %vm1232_vm3, %v8397_v50  ;;  %v3338_v8 = vsel %vm8402_vm14, %v8400_v19, 0.0 }
 0x3e1   : > { %v3356_v37 = vpack.c.bf16 %v8403_v20, %v3338_v8  ;;  %v5256_v8 = vld [vmem:[%s7774_s3 + $0x60] sm:$0xff] }
 0x3e2   : > { %4667 = vmatpush.bf16.msra.mxu3 %v5256_v8 }
 0x3e3   : > { %v3714_v36 = vpop.f32.mrf.mxu2  ;;  %v3803_v25 = vpop.f32.mrf.mxu3 }
 0x3e4   : > { %v3448_v28 = vpop.f32.mrf.mxu0  ;;  %v3537_v33 = vpop.f32.mrf.mxu1  ;;  %v7152_v55 = vadd.f32 %v3714_v36, %v3611_v22  ;;  %v7154_v26 = vadd.f32 %v3803_v25, %v3612_v44 }
 0x3e5   : > { %v7157_v30 = vadd.f32 %v3448_v28, %v8398_v17  ;;  %v7160_v38 = vadd.f32 %v3537_v33, %v8399_v53  ;;  %v3659_v28 = vpack.c.bf16 0.0, %v6797_v57 }
 0x3e7   : > { %v3663_v9 = vshll.u32 %v3659_v28, 16 }
 0x3eb   : > { %v7165_v34 = vpop.f32.mrf.mxu2  ;;  %v7167_v50 = vpop.f32.mrf.mxu3 }
 0x3ec   : > { %v3451_v22 = vpop.f32.mrf.mxu0  ;;  %v3540_v36 = vpop.f32.mrf.mxu1 }
 0x3ed   : > { %v3615_v44 = vadd.f32 %v3451_v22, %v6775_v27  ;;  %v3616_v25 = vadd.f32 %v3540_v36, %v6777_v51  ;;  %v8406_v22 = vld [vmem:[#allocation72_spill] sm:$0xff] }
 0x3ee   : > { %vm8407_vm13 = vcmp.ge.s32.totalorder %v8406_v22, 0 }
 0x3ef   : > { %5091 = vmatmul.msk.bf16.gmra.mxu0 %vm1232_vm3, %v3356_v37  ;;  %5107 = vmatmul.msk.bf16.gmra.mxu1 %vm1232_vm3, %v3356_v37  ;;  %v3340_v36 = vsel %vm8407_vm13, %v8168_v63, 0.0  ;;  %vm8417_vm13 = vmmov %vm8412_vm0 }
 0x3f0   : > { %5124 = vmatmul.msk.bf16.gmra.mxu2 %vm1232_vm3, %v6790_v48  ;;  %5140 = vmatmul.msk.bf16.gmra.mxu3 %vm1232_vm3, %v6790_v48  ;;  %v5248_v48 = vld [vmem:[%s7774_s3 + $0x20] sm:$0xff] }
 0x3f1   : > { %4578 = vmatpush.bf16.msra.mxu2 %v5248_v48 }
 0x3f3   : > { %v3719_v33 = vpop.f32.mrf.mxu2  ;;  %v3808_v20 = vpop.f32.mrf.mxu3 }
 0x3f4   : > { %v3453_v17 = vpop.f32.mrf.mxu0  ;;  %v3542_v53 = vpop.f32.mrf.mxu1  ;;  %v7179_v19 = vadd.f32 %v3719_v33, %v3615_v44  ;;  %v7181_v27 = vadd.f32 %v3808_v20, %v3616_v25  ;;  %v8410_v25 = vld [vmem:[#allocation73_spill] sm:$0xff] }
 0x3f5   : > { %v7184_v51 = vadd.f32 %v3453_v17, %v6784_v32  ;;  %v7187_v37 = vadd.f32 %v3542_v53, %v6786_v35  ;;  %v3665_v32 = vrot.slane %v3663_v9, 1  ;;  %v3357_v33 = vpack.c.bf16 %v8410_v25, %v3340_v36 }
 0x3f7   : > { %8404 = vst [vmem:[#allocation77_spill] sm:$0xff] %v7184_v51  ;;  %v3666_v48 = vsel %vm8412_vm0, %v6823_v2, %v3665_v32  ;;  %v8413_v2 = vld [vmem:[#allocation134_spill] sm:$0xff] }
 0x3f8   : > { %8405 = vst [vmem:[#allocation148_spill] sm:$0xff] %v7187_v37  ;;  %v8411_v37 = vld [vmem:[#allocation128_spill] sm:$0xff] }
 0x3fb   : > { %v7198_v44 = vpop.f32.mrf.mxu2  ;;  %v7200_v35 = vpop.f32.mrf.mxu3 }
 0x3fc   : > { %8408 = vst [vmem:[#allocation83_spill] sm:$0xff] %v7198_v44  ;;  %v3456_v20 = vpop.f32.mrf.mxu0  ;;  %v3545_v17 = vpop.f32.mrf.mxu1 }
 0x3fd   : > { %8409 = vst [vmem:[#allocation3_spill] sm:$0xff] %v7200_v35  ;;  %v3619_v53 = vadd.f32 %v3456_v20, %v6809_v45  ;;  %v3620_v51 = vadd.f32 %v3545_v17, %v8411_v37  ;;  %v3667_v20 = vshrl.u32 %v3659_v28, 16 }
 0x3ff   : > { %5092 = vmatmul.msk.bf16.gmra.mxu0 %vm1232_vm3, %v3357_v33  ;;  %5108 = vmatmul.msk.bf16.gmra.mxu1 %vm1232_vm3, %v3357_v33  ;;  %v8414_v33 = vld [vmem:[#allocation78_spill] sm:$0xff] }
 0x400   : > { %5125 = vmatmul.msk.bf16.gmra.mxu2 %vm1232_vm3, %v3666_v48  ;;  %5141 = vmatmul.msk.bf16.gmra.mxu3 %vm1232_vm3, %v3666_v48  ;;  %vm8415_vm14 = vcmp.ge.s32.totalorder %v8414_v33, 0  ;;  %v3669_v48 = vor.u32 %v3667_v20, %v3665_v32 }
 0x401   : > { %v3342_v17 = vsel %vm8415_vm14, %v6797_v57, 0.0 }
 0x403   : > { %v3724_v63 = vpop.f32.mrf.mxu2  ;;  %v3813_v9 = vpop.f32.mrf.mxu3 }
 0x404   : > { %v3458_v8 = vpop.f32.mrf.mxu0  ;;  %v3547_v22 = vpop.f32.mrf.mxu1  ;;  %v7211_v36 = vadd.f32 %v3724_v63, %v3619_v53  ;;  %v7213_v45 = vadd.f32 %v3813_v9, %v3620_v51  ;;  %v3358_v53 = vpack.c.bf16 0.0, %v3342_v17 }
 0x405   : > { %v7216_v37 = vadd.f32 %v3458_v8, %v6833_v42  ;;  %v7219_v25 = vadd.f32 %v3547_v22, %v8413_v2  ;;  %v8416_v8 = vld [vmem:[#allocation2_spill] sm:$0xff] }
 0x406   : > { %v3670_v22 = vsel %vm8417_vm13, %v3669_v48, %v8416_v8  ;;  %v5247_v48 = vld [vmem:[%s7774_s3 + $0x18] sm:$0xff] }
 0x407   : > { %4579 = vmatpush.bf16.msra.mxu2 %v5247_v48 }
 0x40b   : > { %v7224_v35 = vpop.f32.mrf.mxu2  ;;  %v7226_v44 = vpop.f32.mrf.mxu3 }
 0x40c   : > { %v3461_v63 = vpop.f32.mrf.mxu0  ;;  %v3550_v51 = vpop.f32.mrf.mxu1 }
 0x40d   : > { %v3623_v9 = vadd.f32 %v3461_v63, %v6848_v29  ;;  %v3624_v42 = vadd.f32 %v3550_v51, %v6850_v52  ;;  %v8420_v63 = vld [vmem:[#allocation92_spill] sm:$0xff]  ;;  %v8421_v51 = vld [vmem:[#allocation81_spill] sm:$0xff] }
 0x40e   : > { %vm8422_vm0 = vcmp.le.s32.totalorder %v8421_v51, 15 }
 0x40f   : > { %5093 = vmatmul.msk.bf16.gmra.mxu0 %vm1232_vm3, %v3358_v53  ;;  %5109 = vmatmul.msk.bf16.gmra.mxu1 %vm1232_vm3, %v3358_v53  ;;  %v5255_v53 = vld [vmem:[%s7774_s3 + $0x58] sm:$0xff] }
 0x410   : > { %5126 = vmatmul.msk.bf16.gmra.mxu2 %vm1232_vm3, %v3670_v22  ;;  %5142 = vmatmul.msk.bf16.gmra.mxu3 %vm1232_vm3, %v3670_v22 }
 0x411   : > { %4668 = vmatpush.bf16.msra.mxu3 %v5255_v53 }
 0x413   : > { %v3729_v28 = vpop.f32.mrf.mxu2  ;;  %v3818_v32 = vpop.f32.mrf.mxu3 }
 0x414   : > { %v3463_v2 = vpop.f32.mrf.mxu0  ;;  %v3552_v20 = vpop.f32.mrf.mxu1  ;;  %v7236_v33 = vadd.f32 %v3729_v28, %v3623_v9  ;;  %v7238_v29 = vadd.f32 %v3818_v32, %v3624_v42  ;;  %v3930_v9 = vsel %vm8422_vm0, %v8420_v63, 0.0  ;;  %v8423_v42 = vld [vmem:[#allocation93_spill] sm:$0xff] }
 0x415   : > { %v7241_v52 = vadd.f32 %v3463_v2, %v6858_v40  ;;  %v7244_v17 = vadd.f32 %v3552_v20, %v6860_v61  ;;  %v3961_v40 = vpack.c.bf16 %v3930_v9, %v8423_v42 }
 0x417   : > { %8418 = vst [vmem:[#allocation86_spill] sm:$0xff] %v7241_v52 }
 0x418   : > { %8419 = vst [vmem:[#allocation4_spill] sm:$0xff] %v7244_v17 }
 0x41b   : > { %v7256_v8 = vpop.f32.mrf.mxu2  ;;  %v7258_v61 = vpop.f32.mrf.mxu3 }
 0x41c   : > { %8424 = vst [vmem:[#allocation87_spill] sm:$0xff] %v7256_v8  ;;  %v3466_v22 = vpop.f32.mrf.mxu0  ;;  %v3555_v28 = vpop.f32.mrf.mxu1  ;;  %v8430_v8 = vld [vmem:[#allocation99_spill] sm:$0xff] }
 0x41d   : > { %8425 = vst [vmem:[#allocation7_spill] sm:$0xff] %v7258_v61  ;;  %v3627_v32 = vadd.f32 %v3466_v22, %v6870_v1  ;;  %v3628_v2 = vadd.f32 %v3555_v28, %v6872_v39  ;;  %v8426_v61 = vld [vmem:[#allocation135_spill] sm:$0xff]  ;;  %v8427_v1 = vld [vmem:[#allocation98_spill] sm:$0xff] }
 0x41e   : > { %v3932_v22 = vsel %vm1764_vm15, %v8427_v1, 0.0 }
 0x41f   : > { %5144 = vmatmul.msk.bf16.vlgmr.msra.gmra.mxu0 %vm1232_vm3, %v3961_v40  ;;  %5160 = vmatmul.msk.bf16.vlgmr.msra.gmra.mxu1 %vm1232_vm3, %v3961_v40  ;;  %v3962_v52 = vpack.c.bf16 %v3932_v22, %v8430_v8  ;;  %v8433_v22 = vld [vmem:[#allocation136_spill] sm:$0xff] }
 0x423   : > { %v3734_v20 = vpop.f32.mrf.mxu2  ;;  %v3823_v48 = vpop.f32.mrf.mxu3 }
 0x424   : > { %v3468_v53 = vpop.f32.mrf.mxu0  ;;  %v3557_v63 = vpop.f32.mrf.mxu1  ;;  %v7264_v51 = vadd.f32 %v3734_v20, %v3627_v32  ;;  %v7266_v9 = vadd.f32 %v3823_v48, %v3628_v2 }
 0x425   : > { %v7269_v42 = vadd.f32 %v3468_v53, %v6880_v41  ;;  %v7272_v17 = vadd.f32 %v3557_v63, %v8426_v61 }
 0x42b   : > { %v7277_v28 = vpop.f32.mrf.mxu2  ;;  %v7279_v40 = vpop.f32.mrf.mxu3 }
 0x42c   : > { %8429 = vst [vmem:[#allocation5_spill] sm:$0xff] %v7279_v40  ;;  %v3471_v32 = vpop.f32.mrf.mxu0  ;;  %v3560_v20 = vpop.f32.mrf.mxu1 }
 0x42d   : > { %v3631_v2 = vadd.f32 %v3471_v32, %v6892_v5  ;;  %v3632_v41 = vadd.f32 %v3560_v20, %v6894_v23  ;;  %v5246_v5 = vld [vmem:[%s7774_s3 + $0x10] sm:$0xff] }
 0x42e   : > { %v5254_v23 = vld [vmem:[%s7774_s3 + $0x50] sm:$0xff]  ;;  %4580 = vmatpush.bf16.msra.mxu2 %v5246_v5 }
 0x42f   : > { %5145 = vmatmul.msk.bf16.gmra.mxu0 %vm1232_vm3, %v3962_v52  ;;  %5161 = vmatmul.msk.bf16.gmra.mxu1 %vm1232_vm3, %v3962_v52  ;;  %v8435_v52 = vld [vmem:[#allocation104_spill] sm:$0xff] }
 0x430   : > { %4669 = vmatpush.bf16.msra.mxu3 %v5254_v23  ;;  %v3934_v20 = vsel %vm1766_vm4, %v8435_v52, 0.0 }
 0x433   : > { %v3739_v61 = vpop.f32.mrf.mxu2  ;;  %v3828_v48 = vpop.f32.mrf.mxu3 }
 0x434   : > { %v3473_v53 = vpop.f32.mrf.mxu0  ;;  %v3562_v63 = vpop.f32.mrf.mxu1  ;;  %v7286_v1 = vadd.f32 %v3739_v61, %v3631_v2  ;;  %v7288_v39 = vadd.f32 %v3828_v48, %v3632_v41  ;;  %v8439_v41 = vld [vmem:[#allocation105_spill] sm:$0xff] }
 0x435   : > { %v7291_v8 = vadd.f32 %v3473_v53, %v6902_v31  ;;  %v7294_v40 = vadd.f32 %v3562_v63, %v8433_v22  ;;  %v3963_v61 = vpack.c.bf16 %v3934_v20, %v8439_v41  ;;  %v8441_v41 = vld [vmem:[#allocation137_spill] sm:$0xff] }
 0x436   : > { %8431 = vst [vmem:[#allocation8_spill] sm:$0xff] %v7288_v39 }
 0x437   : > { %8432 = vst [vmem:[#allocation6_spill] sm:$0xff] %v7291_v8  ;;  %v8447_v8 = vld [vmem:[#allocation111_spill] sm:$0xff] }
 0x438   : > { %8434 = vst [vmem:[#allocation84_spill] sm:$0xff] %v7294_v40 }
 0x43b   : > { %v7305_v2 = vpop.f32.mrf.mxu2  ;;  %v7307_v31 = vpop.f32.mrf.mxu3 }
 0x43c   : > { %8437 = vst [vmem:[#allocation11_spill] sm:$0xff] %v7305_v2  ;;  %v3476_v48 = vpop.f32.mrf.mxu0  ;;  %v3565_v53 = vpop.f32.mrf.mxu1 }
 0x43d   : > { %8438 = vst [vmem:[#allocation9_spill] sm:$0xff] %v7307_v31  ;;  %v3635_v63 = vadd.f32 %v3476_v48, %v6914_v12  ;;  %v3636_v22 = vadd.f32 %v3565_v53, %v6916_v24  ;;  %v8443_v12 = vld [vmem:[#allocation110_spill] sm:$0xff] }
 0x43e   : > { %v3936_v48 = vsel %vm1768_vm5, %v8443_v12, 0.0 }
 0x43f   : > { %5146 = vmatmul.msk.bf16.gmra.mxu0 %vm1232_vm3, %v3963_v61  ;;  %5162 = vmatmul.msk.bf16.gmra.mxu1 %vm1232_vm3, %v3963_v61  ;;  %v3964_v39 = vpack.c.bf16 %v3936_v48, %v8447_v8  ;;  %v8452_v48 = vld [vmem:[#allocation138_spill] sm:$0xff] }
 0x443   : > { %v3744_v5 = vpop.f32.mrf.mxu2  ;;  %v3833_v23 = vpop.f32.mrf.mxu3 }
 0x444   : > { %v3478_v32 = vpop.f32.mrf.mxu0  ;;  %v3567_v52 = vpop.f32.mrf.mxu1  ;;  %v7314_v40 = vadd.f32 %v3744_v5, %v3635_v63  ;;  %v7316_v2 = vadd.f32 %v3833_v23, %v3636_v22 }
 0x445   : > { %v7319_v20 = vadd.f32 %v3478_v32, %v6924_v58  ;;  %v7322_v31 = vadd.f32 %v3567_v52, %v8441_v41 }
 0x447   : > { %8440 = vst [vmem:[#allocation12_spill] sm:$0xff] %v7319_v20 }
 0x448   : > { %8442 = vst [vmem:[#allocation90_spill] sm:$0xff] %v7322_v31 }
 0x44b   : > { %v7327_v53 = vpop.f32.mrf.mxu2  ;;  %v7329_v61 = vpop.f32.mrf.mxu3 }
 0x44c   : > { %8445 = vst [vmem:[#allocation91_spill] sm:$0xff] %v7327_v53  ;;  %v3481_v63 = vpop.f32.mrf.mxu0  ;;  %v3570_v5 = vpop.f32.mrf.mxu1  ;;  %v8465_v53 = vld [vmem:[#allocation123_spill] sm:$0xff] }
 0x44d   : > { %8446 = vst [vmem:[#allocation15_spill] sm:$0xff] %v7329_v61  ;;  %v3639_v22 = vadd.f32 %v3481_v63, %v6936_v62  ;;  %v3640_v58 = vadd.f32 %v3570_v5, %v6938_v60  ;;  %v8450_v61 = vld [vmem:[#allocation50_spill] sm:$0xff] }
 0x44e   : > { %v5245_v62 = vld [vmem:[%s7774_s3 + $0x8] sm:$0xff] }
 0x44f   : > { %5147 = vmatmul.msk.bf16.gmra.mxu0 %vm1232_vm3, %v3964_v39  ;;  %5163 = vmatmul.msk.bf16.gmra.mxu1 %vm1232_vm3, %v3964_v39  ;;  %v5253_v60 = vld [vmem:[%s7774_s3 + $0x48] sm:$0xff]  ;;  %v8454_v39 = vld [vmem:[#allocation116_spill] sm:$0xff] }
 0x450   : > { %4581 = vmatpush.bf16.msra.mxu2 %v5245_v62  ;;  %4670 = vmatpush.bf16.msra.mxu3 %v5253_v60  ;;  %v3938_v5 = vsel %vm1770_vm6, %v8454_v39, 0.0 }
 0x453   : > { %v3749_v23 = vpop.f32.mrf.mxu2  ;;  %v3838_v32 = vpop.f32.mrf.mxu3 }
 0x454   : > { %v3483_v52 = vpop.f32.mrf.mxu0  ;;  %v3572_v41 = vpop.f32.mrf.mxu1  ;;  %v7336_v12 = vadd.f32 %v3749_v23, %v3639_v22  ;;  %v7338_v24 = vadd.f32 %v3838_v32, %v3640_v58  ;;  %v8458_v58 = vld [vmem:[#allocation117_spill] sm:$0xff] }
 0x455   : > { %v7341_v8 = vadd.f32 %v3483_v52, %v8450_v61  ;;  %v7344_v31 = vadd.f32 %v3572_v41, %v8452_v48  ;;  %v3965_v23 = vpack.c.bf16 %v3938_v5, %v8458_v58  ;;  %v8459_v41 = vld [vmem:[#allocation139_spill] sm:$0xff]  ;;  %v8462_v58 = vld [vmem:[#allocation141_spill] sm:$0xff] }
 0x456   : > { %8448 = vst [vmem:[#allocation13_spill] sm:$0xff] %v7336_v12 }
 0x457   : > { %8449 = vst [vmem:[#allocation16_spill] sm:$0xff] %v7338_v24 }
 0x458   : > { %8451 = vst [vmem:[#allocation10_spill] sm:$0xff] %v7341_v8 }
 0x459   : > { %8453 = vst [vmem:[#allocation94_spill] sm:$0xff] %v7344_v31  ;;  %v8460_v31 = vld [vmem:[#allocation140_spill] sm:$0xff] }
 0x45b   : > { %v7355_v22 = vpop.f32.mrf.mxu2  ;;  %v7357_v61 = vpop.f32.mrf.mxu3 }
 0x45c   : > { %8456 = vst [vmem:[#allocation19_spill] sm:$0xff] %v7355_v22  ;;  %v3486_v32 = vpop.f32.mrf.mxu0  ;;  %v3575_v52 = vpop.f32.mrf.mxu1 }
 0x45d   : > { %8457 = vst [vmem:[#allocation17_spill] sm:$0xff] %v7357_v61  ;;  %v3643_v48 = vadd.f32 %v3486_v32, %v8459_v41  ;;  %v3644_v8 = vadd.f32 %v3575_v52, %v8460_v31  ;;  %v8461_v61 = vld [vmem:[#allocation58_spill] sm:$0xff] }
 0x45e   : > { %v8463_v32 = vld [vmem:[#allocation122_spill] sm:$0xff] }
 0x45f   : > { %5148 = vmatmul.msk.bf16.gmra.mxu0 %vm1232_vm3, %v3965_v23  ;;  %5164 = vmatmul.msk.bf16.gmra.mxu1 %vm1232_vm3, %v3965_v23  ;;  %v3940_v52 = vsel %vm1772_vm7, %v8463_v32, 0.0 }
 0x460   : > { %v3966_v20 = vpack.c.bf16 %v3940_v52, %v8465_v53 }
 0x463   : > { %v3754_v62 = vpop.f32.mrf.mxu2  ;;  %v3843_v60 = vpop.f32.mrf.mxu3 }
 0x464   : > { %v3488_v63 = vpop.f32.mrf.mxu0  ;;  %v3577_v39 = vpop.f32.mrf.mxu1  ;;  %v7364_v24 = vadd.f32 %v3754_v62, %v3643_v48  ;;  %v7366_v22 = vadd.f32 %v3843_v60, %v3644_v8 }
 0x465   : > { %v7369_v5 = vadd.f32 %v3488_v63, %v8461_v61  ;;  %v7372_v12 = vadd.f32 %v3577_v39, %v8462_v58 }
 0x46b   : > { %v7377_v41 = vpop.f32.mrf.mxu2  ;;  %v7379_v23 = vpop.f32.mrf.mxu3 }
 0x46c   : > { %v3491_v48 = vpop.f32.mrf.mxu0  ;;  %v3580_v62 = vpop.f32.mrf.mxu1 }
 0x46d   : > { %v3647_v8 = vadd.f32 %v3491_v48, %v6980_v56  ;;  %v3648_v61 = vadd.f32 %v3580_v62, %v6982_v15  ;;  %v5244_v56 = vld [vmem:[%s7774_s3] sm:$0xff] }
 0x46e   : > { %v5252_v15 = vld [vmem:[%s7774_s3 + $0x40] sm:$0xff]  ;;  %4582 = vmatpush.bf16.msra.mxu2 %v5244_v56 }
 0x46f   : > { %5149 = vmatmul.msk.bf16.gmra.mxu0 %vm1232_vm3, %v3966_v20  ;;  %5165 = vmatmul.msk.bf16.gmra.mxu1 %vm1232_vm3, %v3966_v20  ;;  %v8468_v20 = vld [vmem:[#allocation129_spill] sm:$0xff] }
 0x470   : > { %4671 = vmatpush.bf16.msra.mxu3 %v5252_v15  ;;  %v3942_v62 = vsel %vm1774_vm8, %v8468_v20, 0.0 }
 0x473   : > { %v3759_v60 = vpop.f32.mrf.mxu2  ;;  %v3848_v63 = vpop.f32.mrf.mxu3 }
 0x474   : > { %v3493_v39 = vpop.f32.mrf.mxu0  ;;  %v3582_v58 = vpop.f32.mrf.mxu1  ;;  %v7386_v32 = vadd.f32 %v3759_v60, %v3647_v8  ;;  %v7388_v31 = vadd.f32 %v3848_v63, %v3648_v61 }
 0x475   : > { %v7391_v53 = vadd.f32 %v3493_v39, %v6990_v11  ;;  %v7394_v52 = vadd.f32 %v3582_v58, %v6992_v43  ;;  %v8472_v43 = vld [vmem:[#allocation130_spill] sm:$0xff] }
 0x476   : > { %v3967_v61 = vpack.c.bf16 %v3942_v62, %v8472_v43 }
 0x477   : > { %8466 = vst [vmem:[#allocation20_spill] sm:$0xff] %v7391_v53 }
 0x478   : > { %8467 = vst [vmem:[#allocation26_spill] sm:$0xff] %v7394_v52 }
 0x47b   : > { %v7405_v8 = vpop.f32.mrf.mxu2  ;;  %v7407_v11 = vpop.f32.mrf.mxu3 }
 0x47c   : > { %8470 = vst [vmem:[#allocation96_spill] sm:$0xff] %v7405_v8  ;;  %v3496_v60 = vpop.f32.mrf.mxu0  ;;  %v3585_v63 = vpop.f32.mrf.mxu1 }
 0x47d   : > { %8471 = vst [vmem:[#allocation97_spill] sm:$0xff] %v7407_v11  ;;  %v3651_v39 = vadd.f32 %v3496_v60, %v7002_v0  ;;  %v3652_v58 = vadd.f32 %v3585_v63, %v7004_v46  ;;  %v8476_v0 = vld [vmem:[#allocation132_spill] sm:$0xff]  ;;  %v8480_v11 = vld [vmem:[#allocation133_spill] sm:$0xff] }
 0x47e   : > { %v3944_v60 = vsel %vm1776_vm9, %v8476_v0, 0.0 }
 0x47f   : > { %5150 = vmatmul.msk.bf16.gmra.mxu0 %vm1232_vm3, %v3967_v61  ;;  %5166 = vmatmul.msk.bf16.gmra.mxu1 %vm1232_vm3, %v3967_v61  ;;  %v3968_v53 = vpack.c.bf16 %v3944_v60, %v8480_v11  ;;  %v8485_v60 = vld [vmem:[#allocation66_spill] sm:$0xff] }
 0x483   : > { %v3764_v56 = vpop.f32.mrf.mxu2  ;;  %v3853_v15 = vpop.f32.mrf.mxu3 }
 0x484   : > { %v3498_v48 = vpop.f32.mrf.mxu0  ;;  %v3587_v20 = vpop.f32.mrf.mxu1  ;;  %v7414_v52 = vadd.f32 %v3764_v56, %v3651_v39  ;;  %v7416_v8 = vadd.f32 %v3853_v15, %v3652_v58 }
 0x485   : > { %v7419_v62 = vadd.f32 %v3498_v48, %v7012_v59  ;;  %v7422_v43 = vadd.f32 %v3587_v20, %v7014_v7 }
 0x486   : > { %8473 = vst [vmem:[#allocation23_spill] sm:$0xff] %v7416_v8 }
 0x487   : > { %8474 = vst [vmem:[#allocation21_spill] sm:$0xff] %v7419_v62 }
 0x488   : > { %8475 = vst [vmem:[#allocation24_spill] sm:$0xff] %v7422_v43 }
 0x48b   : > { %v7427_v63 = vpop.f32.mrf.mxu2  ;;  %v7429_v61 = vpop.f32.mrf.mxu3 }
 0x48c   : > { %8478 = vst [vmem:[#allocation14_spill] sm:$0xff] %v7427_v63  ;;  %v3501_v39 = vpop.f32.mrf.mxu0  ;;  %v3590_v56 = vpop.f32.mrf.mxu1 }
 0x48d   : > { %8479 = vst [vmem:[#allocation100_spill] sm:$0xff] %v7429_v61  ;;  %v3655_v58 = vadd.f32 %v3501_v39, %v7024_v54  ;;  %v3656_v59 = vadd.f32 %v3590_v56, %v7026_v6  ;;  %v8483_v61 = vld [vmem:[#allocation59_spill] sm:$0xff]  ;;  %v8487_v54 = vld [vmem:[#allocation44_spill] sm:$0xff]  ;;  %v8489_v56 = vld [vmem:[#allocation45_spill] sm:$0xff] }
 0x48e   : > { %v3946_v39 = vsel %vm1778_vm10, %v8487_v54, 0.0 }
 0x48f   : > { %5151 = vmatmul.msk.bf16.gmra.mxu0 %vm1232_vm3, %v3968_v53  ;;  %5167 = vmatmul.msk.bf16.gmra.mxu1 %vm1232_vm3, %v3968_v53  ;;  %v3969_v53 = vpack.c.bf16 %v3946_v39, %v8489_v56 }
 0x493   : > { %v3769_v7 = vpop.f32.mrf.mxu2  ;;  %v3858_v15 = vpop.f32.mrf.mxu3 }
 0x494   : > { %v3503_v48 = vpop.f32.mrf.mxu0  ;;  %v3592_v20 = vpop.f32.mrf.mxu1  ;;  %v7436_v0 = vadd.f32 %v3769_v7, %v3655_v58  ;;  %v7438_v46 = vadd.f32 %v3858_v15, %v3656_v59  ;;  %v4277_v58 = vld [vmem:[%s7773_s2] sm:$0x3] }
 0x495   : > { %v7441_v11 = vadd.f32 %v3503_v48, %v8483_v61  ;;  %v7444_v43 = vadd.f32 %v3592_v20, %v8485_v60  ;;  %v7456_v59 = vperm.slane %v4277_v58, 0  ;;  %v7459_v15 = vperm.slane %v4277_v58, 1 }
 0x496   : > { %8481 = vst [vmem:[#allocation30_spill] sm:$0xff] %v7436_v0  ;;  %v8492_v0 = vld [vmem:[#allocation53_spill] sm:$0xff] }
 0x497   : > { %8482 = vst [vmem:[#allocation102_spill] sm:$0xff] %v7438_v46 }
 0x498   : > { %8484 = vst [vmem:[#allocation103_spill] sm:$0xff] %v7441_v11 }
 0x499   : > { %8486 = vst [vmem:[#allocation27_spill] sm:$0xff] %v7444_v43 }
 0x49c   : > { %v4044_v63 = vpop.f32.mrf.mxu0  ;;  %v4133_v62 = vpop.f32.mrf.mxu1 }
 0x49d   : > { %v4213_v61 = vadd.f32 %v4044_v63, %v7052_v4  ;;  %v4214_v7 = vadd.f32 %v4133_v62, %v7054_v49  ;;  %v8490_v63 = vld [vmem:[#allocation52_spill] sm:$0xff] }
 0x49e   : > { %v3948_v49 = vsel %vm1780_vm11, %v8490_v63, 0.0  ;;  %v8496_v63 = vld [vmem:[#allocation60_spill] sm:$0xff] }
 0x49f   : > { %5152 = vmatmul.msk.bf16.gmra.mxu0 %vm1232_vm3, %v3969_v53  ;;  %5168 = vmatmul.msk.bf16.gmra.mxu1 %vm1232_vm3, %v3969_v53  ;;  %v4283_v60 = vadd.f32 %v7456_v59, %v4213_v61  ;;  %v4284_v54 = vadd.f32 %v7459_v15, %v4214_v7  ;;  %v3970_v7 = vpack.c.bf16 %v3948_v49, %v8492_v0  ;;  %v8500_v53 = vld [vmem:[#allocation49_spill] sm:$0xff] }
 0x4a0   : > { %vm8501_vm4 = vcmp.le.s32.totalorder %v8500_v53, 15 }
 0x4a1   : > { %v4347_v62 = vmax.f32 %v4283_v60, 0.0  ;;  %v4348_v58 = vmax.f32 %v4284_v54, 0.0 }
 0x4a4   : > { %v4046_v48 = vpop.f32.mrf.mxu0  ;;  %v4135_v20 = vpop.f32.mrf.mxu1 }
 0x4a5   : > { %v4215_v6 = vadd.f32 %v4046_v48, %v7062_v13  ;;  %v4216_v39 = vadd.f32 %v4135_v20, %v7064_v14  ;;  %v8493_v48 = vld [vmem:[#allocation142_spill] sm:$0xff] }
 0x4a7   : > { %v4285_v56 = vadd.f32 %v7456_v59, %v4215_v6  ;;  %v4286_v4 = vadd.f32 %v7459_v15, %v4216_v39  ;;  %v8495_v39 = vld [vmem:[#allocation145_spill] sm:$0xff] }
 0x4a9   : > { %v4349_v43 = vmax.f32 %v4285_v56, 0.0  ;;  %v4350_v11 = vmax.f32 %v4286_v4, 0.0 }
 0x4ab   : > { %v4411_v46 = vpack.c.bf16 %v4349_v43, %v4347_v62  ;;  %v4412_v61 = vpack.c.bf16 %v4350_v11, %v4348_v58  ;;  %v8494_v11 = vld [vmem:[#allocation144_spill] sm:$0xff] }
 0x4ac   : > { %v4049_v8 = vpop.f32.mrf.mxu0  ;;  %v4138_v13 = vpop.f32.mrf.mxu1 }
 0x4ad   : > { %4583 = vmatmul.bf16.vlgmr.msra.gmra.mxu2 %v4411_v46  ;;  %4672 = vmatmul.bf16.vlgmr.msra.gmra.mxu3 %v4412_v61  ;;  %v4217_v14 = vadd.f32 %v4049_v8, %v7074_v16  ;;  %v4218_v20 = vadd.f32 %v4138_v13, %v8493_v48  ;;  %v3950_v16 = vsel %vm1782_vm12, %v8496_v63, 0.0  ;;  %v8498_v13 = vld [vmem:[#allocation61_spill] sm:$0xff]  ;;  %v8499_v63 = vld [vmem:[#allocation68_spill] sm:$0xff] }
 0x4af   : > { %5153 = vmatmul.msk.bf16.gmra.mxu0 %vm1232_vm3, %v3970_v7  ;;  %5169 = vmatmul.msk.bf16.gmra.mxu1 %vm1232_vm3, %v3970_v7  ;;  %v4287_v6 = vadd.f32 %v7456_v59, %v4217_v14  ;;  %v4288_v43 = vadd.f32 %v7459_v15, %v4218_v20  ;;  %v3971_v14 = vpack.c.bf16 %v3950_v16, %v8498_v13 }
 0x4b1   : > { %v4351_v8 = vmax.f32 %v4287_v6, 0.0  ;;  %v4352_v49 = vmax.f32 %v4288_v43, 0.0 }
 0x4b4   : > { %v4051_v60 = vpop.f32.mrf.mxu0  ;;  %v4140_v54 = vpop.f32.mrf.mxu1 }
 0x4b5   : > { %v4219_v0 = vadd.f32 %v4051_v60, %v8494_v11  ;;  %v4220_v56 = vadd.f32 %v4140_v54, %v8495_v39 }
 0x4b7   : > { %v4289_v46 = vadd.f32 %v7456_v59, %v4219_v0  ;;  %v4290_v4 = vadd.f32 %v7459_v15, %v4220_v56 }
 0x4b9   : > { %v4353_v62 = vmax.f32 %v4289_v46, 0.0  ;;  %v4354_v58 = vmax.f32 %v4290_v4, 0.0 }
 0x4bb   : > { %v4413_v61 = vpack.c.bf16 %v4353_v62, %v4351_v8  ;;  %v4414_v7 = vpack.c.bf16 %v4354_v58, %v4352_v49 }
 0x4bc   : > { %v4054_v48 = vpop.f32.mrf.mxu0  ;;  %v4143_v20 = vpop.f32.mrf.mxu1 }
 0x4bd   : > { %4588 = vmatmul.bf16.gmra.mxu2 %v4413_v61  ;;  %4677 = vmatmul.bf16.gmra.mxu3 %v4414_v7  ;;  %v4221_v60 = vadd.f32 %v4054_v48, %v7102_v18  ;;  %v4222_v54 = vadd.f32 %v4143_v20, %v7104_v3  ;;  %v3952_v18 = vsel %vm8501_vm4, %v8499_v63, 0.0  ;;  %v8502_v61 = vld [vmem:[#allocation69_spill] sm:$0xff] }
 0x4be   : > { %v3972_v7 = vpack.c.bf16 %v3952_v18, %v8502_v61  ;;  %v8507_v63 = vld [vmem:[#allocation57_spill] sm:$0xff] }
 0x4bf   : > { %5154 = vmatmul.msk.bf16.gmra.mxu0 %vm1232_vm3, %v3971_v14  ;;  %5170 = vmatmul.msk.bf16.gmra.mxu1 %vm1232_vm3, %v3971_v14  ;;  %v4291_v11 = vadd.f32 %v7456_v59, %v4221_v60  ;;  %v4292_v0 = vadd.f32 %v7459_v15, %v4222_v54  ;;  %v8503_v14 = vld [vmem:[#allocation146_spill] sm:$0xff]  ;;  %vm8508_vm5 = vcmp.le.s32.totalorder %v8507_v63, 15 }
 0x4c1   : > { %v4355_v16 = vmax.f32 %v4291_v11, 0.0  ;;  %v4356_v3 = vmax.f32 %v4292_v0, 0.0  ;;  %v8505_v0 = vld [vmem:[#allocation80_spill] sm:$0xff] }
 0x4c4   : > { %v4056_v6 = vpop.f32.mrf.mxu0  ;;  %v4145_v43 = vpop.f32.mrf.mxu1 }
 0x4c5   : > { %v4223_v39 = vadd.f32 %v4056_v6, %v7112_v47  ;;  %v4224_v56 = vadd.f32 %v4145_v43, %v7114_v10  ;;  %v8504_v43 = vld [vmem:[#allocation147_spill] sm:$0xff] }
 0x4c7   : > { %v4293_v46 = vadd.f32 %v7456_v59, %v4223_v39  ;;  %v4294_v4 = vadd.f32 %v7459_v15, %v4224_v56 }
 0x4c9   : > { %v4357_v8 = vmax.f32 %v4293_v46, 0.0  ;;  %v4358_v49 = vmax.f32 %v4294_v4, 0.0  ;;  %v8506_v4 = vld [vmem:[#allocation75_spill] sm:$0xff] }
 0x4cb   : > { %v4415_v62 = vpack.c.bf16 %v4357_v8, %v4355_v16  ;;  %v4416_v58 = vpack.c.bf16 %v4358_v49, %v4356_v3 }
 0x4cc   : > { %v4059_v13 = vpop.f32.mrf.mxu0  ;;  %v4148_v47 = vpop.f32.mrf.mxu1 }
 0x4cd   : > { %4593 = vmatmul.bf16.gmra.mxu2 %v4415_v62  ;;  %4682 = vmatmul.bf16.gmra.mxu3 %v4416_v58  ;;  %v4225_v10 = vadd.f32 %v4059_v13, %v7124_v21  ;;  %v4226_v48 = vadd.f32 %v4148_v47, %v8503_v14  ;;  %v3954_v21 = vsel %vm8508_vm5, %v8506_v4, 0.0  ;;  %v8509_v62 = vld [vmem:[#allocation76_spill] sm:$0xff]  ;;  %v3882_v14 = vadd.f32 %v7167_v50, %v7160_v38  ;;  %v8513_v4 = vld [vmem:[#allocation149_spill] sm:$0xff] }
 0x4ce   : > { %v3973_v58 = vpack.c.bf16 %v3954_v21, %v8509_v62  ;;  %v8516_v62 = vld [vmem:[#allocation148_spill] sm:$0xff] }
 0x4cf   : > { %5155 = vmatmul.msk.bf16.gmra.mxu0 %vm1232_vm3, %v3972_v7  ;;  %5171 = vmatmul.msk.bf16.gmra.mxu1 %vm1232_vm3, %v3972_v7  ;;  %v4295_v54 = vadd.f32 %v7456_v59, %v4225_v10  ;;  %v4296_v6 = vadd.f32 %v7459_v15, %v4226_v48  ;;  %v3881_v10 = vadd.f32 %v7165_v34, %v7157_v30 }
 0x4d1   : > { %v4359_v53 = vmax.f32 %v4295_v54, 0.0  ;;  %v4360_v18 = vmax.f32 %v4296_v6, 0.0 }
 0x4d4   : > { %v4061_v20 = vpop.f32.mrf.mxu0  ;;  %v4150_v60 = vpop.f32.mrf.mxu1 }
 0x4d5   : > { %v4227_v11 = vadd.f32 %v4061_v20, %v8504_v43  ;;  %v4228_v39 = vadd.f32 %v4150_v60, %v8505_v0  ;;  %v8510_v0 = vld [vmem:[#allocation82_spill] sm:$0xff] }
 0x4d7   : > { %v4297_v56 = vadd.f32 %v7456_v59, %v4227_v11  ;;  %v4298_v46 = vadd.f32 %v7459_v15, %v4228_v39 }
 0x4d9   : > { %v4361_v16 = vmax.f32 %v4297_v56, 0.0  ;;  %v4362_v3 = vmax.f32 %v4298_v46, 0.0 }
 0x4db   : > { %v4417_v8 = vpack.c.bf16 %v4361_v16, %v4359_v53  ;;  %v4418_v49 = vpack.c.bf16 %v4362_v3, %v4360_v18  ;;  %v8514_v3 = vld [vmem:[#allocation77_spill] sm:$0xff] }
 0x4dc   : > { %v4064_v61 = vpop.f32.mrf.mxu0  ;;  %v4153_v7 = vpop.f32.mrf.mxu1 }
 0x4dd   : > { %4598 = vmatmul.bf16.gmra.mxu2 %v4417_v8  ;;  %4687 = vmatmul.bf16.gmra.mxu3 %v4418_v49  ;;  %v4229_v13 = vadd.f32 %v4064_v61, %v7152_v55  ;;  %v4230_v47 = vadd.f32 %v4153_v7, %v7154_v26  ;;  %v8511_v26 = vld [vmem:[#allocation65_spill] sm:$0xff]  ;;  %v8515_v8 = vld [vmem:[#allocation83_spill] sm:$0xff] }
 0x4de   : > { %vm8512_vm6 = vcmp.le.s32.totalorder %v8511_v26, 15  ;;  %v3885_v49 = vadd.f32 %v8515_v8, %v8514_v3 }
 0x4df   : > { %5156 = vmatmul.msk.bf16.gmra.mxu0 %vm1232_vm3, %v3973_v58  ;;  %5172 = vmatmul.msk.bf16.gmra.mxu1 %vm1232_vm3, %v3973_v58  ;;  %v4299_v60 = vadd.f32 %v7456_v59, %v4229_v13  ;;  %v4300_v54 = vadd.f32 %v7459_v15, %v4230_v47  ;;  %v3956_v39 = vsel %vm8512_vm6, %v8510_v0, 0.0  ;;  %v8517_v58 = vld [vmem:[#allocation3_spill] sm:$0xff] }
 0x4e0   : > { %v3974_v63 = vpack.c.bf16 %v3956_v39, %v8513_v4  ;;  %v3886_v61 = vadd.f32 %v8517_v58, %v8516_v62  ;;  %v8521_v39 = vld [vmem:[#allocation38_spill] sm:$0xff]  ;;  %v3890_v4 = vadd.f32 %v7226_v44, %v7219_v25 }
 0x4e1   : > { %v4363_v30 = vmax.f32 %v4299_v60, 0.0  ;;  %v4364_v34 = vmax.f32 %v4300_v54, 0.0  ;;  %v8518_v60 = vld [vmem:[#allocation34_spill] sm:$0xff] }
 0x4e4   : > { %v4066_v48 = vpop.f32.mrf.mxu0  ;;  %v4155_v20 = vpop.f32.mrf.mxu1 }
 0x4e5   : > { %v4231_v6 = vadd.f32 %v4066_v48, %v3881_v10  ;;  %v4232_v43 = vadd.f32 %v4155_v20, %v3882_v14 }
 0x4e7   : > { %v4301_v11 = vadd.f32 %v7456_v59, %v4231_v6  ;;  %v4302_v55 = vadd.f32 %v7459_v15, %v4232_v43 }
 0x4e9   : > { %v4365_v56 = vmax.f32 %v4301_v11, 0.0  ;;  %v4366_v38 = vmax.f32 %v4302_v55, 0.0 }
 0x4eb   : > { %v4419_v50 = vpack.c.bf16 %v4365_v56, %v4363_v30  ;;  %v4420_v46 = vpack.c.bf16 %v4366_v38, %v4364_v34 }
 0x4ec   : > { %v4069_v21 = vpop.f32.mrf.mxu0  ;;  %v4158_v53 = vpop.f32.mrf.mxu1 }
 0x4ed   : > { %4603 = vmatmul.bf16.gmra.mxu2 %v4419_v50  ;;  %4692 = vmatmul.bf16.gmra.mxu3 %v4420_v46  ;;  %v4233_v18 = vadd.f32 %v4069_v21, %v7179_v19  ;;  %v4234_v16 = vadd.f32 %v4158_v53, %v7181_v27  ;;  %v8519_v27 = vld [vmem:[#allocation143_spill] sm:$0xff]  ;;  %v3889_v46 = vadd.f32 %v7224_v35, %v7216_v37 }
 0x4ee   : > { %vm8520_vm7 = vcmp.le.s32.totalorder %v8519_v27, 15  ;;  %v8527_v27 = vld [vmem:[#allocation4_spill] sm:$0xff] }
 0x4ef   : > { %5157 = vmatmul.msk.bf16.gmra.mxu0 %vm1232_vm3, %v3974_v63  ;;  %5173 = vmatmul.msk.bf16.gmra.mxu1 %vm1232_vm3, %v3974_v63  ;;  %v4303_v47 = vadd.f32 %v7456_v59, %v4233_v18  ;;  %v4304_v10 = vadd.f32 %v7459_v15, %v4234_v16  ;;  %v3958_v54 = vsel %vm8520_vm7, %v8518_v60, 0.0 }
 0x4f0   : > { %v3975_v30 = vpack.c.bf16 %v3958_v54, %v8521_v39  ;;  %v8528_v54 = vld [vmem:[#allocation7_spill] sm:$0xff] }
 0x4f1   : > { %v4367_v6 = vmax.f32 %v4303_v47, 0.0  ;;  %v4368_v43 = vmax.f32 %v4304_v10, 0.0 }
 0x4f4   : > { %v4071_v7 = vpop.f32.mrf.mxu0  ;;  %v4160_v13 = vpop.f32.mrf.mxu1 }
 0x4f5   : > { %v4235_v14 = vadd.f32 %v4071_v7, %v3885_v49  ;;  %v4236_v48 = vadd.f32 %v4160_v13, %v3886_v61  ;;  %v8522_v49 = vld [vmem:[#allocation85_spill] sm:$0xff] }
 0x4f6   : > { %v3960_v44 = vsel %vm1792_vm2, %v8522_v49, 0.0 }
 0x4f7   : > { %v4305_v20 = vadd.f32 %v7456_v59, %v4235_v14  ;;  %v4306_v19 = vadd.f32 %v7459_v15, %v4236_v48 }
 0x4f9   : > { %v4369_v11 = vmax.f32 %v4305_v20, 0.0  ;;  %v4370_v55 = vmax.f32 %v4306_v19, 0.0  ;;  %v8525_v20 = vld [vmem:[#allocation86_spill] sm:$0xff]  ;;  %v8526_v19 = vld [vmem:[#allocation87_spill] sm:$0xff] }
 0x4fa   : > { %v3893_v60 = vadd.f32 %v8526_v19, %v8525_v20 }
 0x4fb   : > { %v4421_v0 = vpack.c.bf16 %v4369_v11, %v4367_v6  ;;  %v4422_v26 = vpack.c.bf16 %v4370_v55, %v4368_v43  ;;  %v3894_v6 = vadd.f32 %v8528_v54, %v8527_v27  ;;  %v8532_v27 = vld [vmem:[#allocation11_spill] sm:$0xff] }
 0x4fc   : > { %v4074_v34 = vpop.f32.mrf.mxu0  ;;  %v4163_v56 = vpop.f32.mrf.mxu1 }
 0x4fd   : > { %4608 = vmatmul.bf16.gmra.mxu2 %v4421_v0  ;;  %4697 = vmatmul.bf16.gmra.mxu3 %v4422_v26  ;;  %v4237_v38 = vadd.f32 %v4074_v34, %v7211_v36  ;;  %v4238_v50 = vadd.f32 %v4163_v56, %v7213_v45  ;;  %v8523_v45 = vrot.slane %v6797_v57, 2 }
 0x4ff   : > { %5158 = vmatmul.msk.bf16.gmra.mxu0 %vm1232_vm3, %v3975_v30  ;;  %5174 = vmatmul.msk.bf16.gmra.mxu1 %vm1232_vm3, %v3975_v30  ;;  %v4307_v53 = vadd.f32 %v7456_v59, %v4237_v38  ;;  %v4308_v18 = vadd.f32 %v7459_v15, %v4238_v50  ;;  %v3927_v35 = vsel %vm1891_vm1, %v8523_v45, %v8522_v49  ;;  %vm4785_vm1 = vcmask 519168  }
 0x500   : > { %v3976_v47 = vpack.c.bf16 %v3960_v44, %v3927_v35 }
 0x501   : > { %v4371_v25 = vmax.f32 %v4307_v53, 0.0  ;;  %v4372_v62 = vmax.f32 %v4308_v18, 0.0  ;;  %v3897_v18 = vadd.f32 %v7277_v28, %v7269_v42 }
 0x504   : > { %v4076_v63 = vpop.f32.mrf.mxu0  ;;  %v4165_v21 = vpop.f32.mrf.mxu1 }
 0x505   : > { %v4239_v16 = vadd.f32 %v4076_v63, %v3889_v46  ;;  %v4240_v3 = vadd.f32 %v4165_v21, %v3890_v4 }
 0x507   : > { %v4309_v8 = vadd.f32 %v7456_v59, %v4239_v16  ;;  %v4310_v36 = vadd.f32 %v7459_v15, %v4240_v3  ;;  %v8529_v16 = vld [vmem:[#allocation5_spill] sm:$0xff] }
 0x508   : > { %v3898_v3 = vadd.f32 %v8529_v16, %v7272_v17 }
 0x509   : > { %v4373_v58 = vmax.f32 %v4309_v8, 0.0  ;;  %v4374_v61 = vmax.f32 %v4310_v36, 0.0 }
 0x50b   : > { %v4423_v7 = vpack.c.bf16 %v4373_v58, %v4371_v25  ;;  %v4424_v13 = vpack.c.bf16 %v4374_v61, %v4372_v62  ;;  %v7586_v25 = vpop.f32.mrf.mxu2 }
 0x50c   : > { %v4079_v10 = vpop.f32.mrf.mxu0  ;;  %v4168_v14 = vpop.f32.mrf.mxu1 }
 0x50d   : > { %4613 = vmatmul.bf16.gmra.mxu2 %v4423_v7  ;;  %4702 = vmatmul.bf16.gmra.mxu3 %v4424_v13  ;;  %v4241_v57 = vadd.f32 %v4079_v10, %v7236_v33  ;;  %v4242_v48 = vadd.f32 %v4168_v14, %v7238_v29 }
 0x50f   : > { %5159 = vmatmul.msk.bf16.gmra.mxu0 %vm1232_vm3, %v3976_v47  ;;  %5175 = vmatmul.msk.bf16.gmra.mxu1 %vm1232_vm3, %v3976_v47  ;;  %v4311_v55 = vadd.f32 %v7456_v59, %v4241_v57  ;;  %v4312_v0 = vadd.f32 %v7459_v15, %v4242_v48  ;;  %v7593_v47 = vld [vmem:[%s7775_s4] ss:$0 sm:$0xff]  ;;  %v8530_v48 = vld [vmem:[#allocation8_spill] sm:$0xff] }
 0x511   : > { %v4375_v34 = vmax.f32 %v4311_v55, 0.0  ;;  %v4376_v29 = vmax.f32 %v4312_v0, 0.0 }
 0x514   : > { %v4081_v43 = vpop.f32.mrf.mxu0  ;;  %v4170_v11 = vpop.f32.mrf.mxu1 }
 0x515   : > { %v4243_v26 = vadd.f32 %v4081_v43, %v3893_v60  ;;  %v4244_v39 = vadd.f32 %v4170_v11, %v3894_v6  ;;  %v8531_v60 = vld [vmem:[#allocation6_spill] sm:$0xff]  ;;  %v8533_v6 = vld [vmem:[#allocation84_spill] sm:$0xff]  ;;  %v8534_v43 = vld [vmem:[#allocation9_spill] sm:$0xff] }
 0x516   : > { %v3901_v54 = vadd.f32 %v8532_v27, %v8531_v60  ;;  %v3902_v11 = vadd.f32 %v8534_v43, %v8533_v6 }
 0x517   : > { %v4313_v30 = vadd.f32 %v7456_v59, %v4243_v26  ;;  %v4314_v33 = vadd.f32 %v7459_v15, %v4244_v39 }
 0x519   : > { %v4377_v56 = vmax.f32 %v4313_v30, 0.0  ;;  %v4378_v38 = vmax.f32 %v4314_v33, 0.0 }
 0x51b   : > { %v4425_v50 = vpack.c.bf16 %v4377_v56, %v4375_v34  ;;  %v4426_v46 = vpack.c.bf16 %v4378_v38, %v4376_v29 }
 0x51c   : > { %v4084_v4 = vpop.f32.mrf.mxu0  ;;  %v4173_v63 = vpop.f32.mrf.mxu1 }
 0x51d   : > { %4618 = vmatmul.bf16.gmra.mxu2 %v4425_v50  ;;  %4707 = vmatmul.bf16.gmra.mxu3 %v4426_v46  ;;  %v4245_v21 = vadd.f32 %v4084_v4, %v7264_v51  ;;  %v4246_v53 = vadd.f32 %v4173_v63, %v7266_v9  ;;  %v7588_v9 = vpop.f32.mrf.mxu3 }
 0x51f   : > { %v4315_v49 = vadd.f32 %v7456_v59, %v4245_v21  ;;  %v4316_v45 = vadd.f32 %v7459_v15, %v4246_v53 }
 0x521   : > { %v4379_v42 = vmax.f32 %v4315_v49, 0.0  ;;  %v4380_v28 = vmax.f32 %v4316_v45, 0.0 }
 0x524   : > { %v4086_v8 = vpop.f32.mrf.mxu0  ;;  %v4175_v36 = vpop.f32.mrf.mxu1 }
 0x525   : > { %v4247_v35 = vadd.f32 %v4086_v8, %v3897_v18  ;;  %v4248_v37 = vadd.f32 %v4175_v36, %v3898_v3 }
 0x527   : > { %v4317_v44 = vadd.f32 %v7456_v59, %v4247_v35  ;;  %v4318_v51 = vadd.f32 %v7459_v15, %v4248_v37 }
 0x529   : > { %v4381_v62 = vmax.f32 %v4317_v44, 0.0  ;;  %v4382_v17 = vmax.f32 %v4318_v51, 0.0 }
 0x52b   : > { %v4427_v58 = vpack.c.bf16 %v4381_v62, %v4379_v42  ;;  %v4428_v61 = vpack.c.bf16 %v4382_v17, %v4380_v28  ;;  %v8535_v42 = vld [vmem:[#allocation12_spill] sm:$0xff]  ;;  %v8536_v28 = vld [vmem:[#allocation91_spill] sm:$0xff]  ;;  %v8537_v17 = vld [vmem:[#allocation90_spill] sm:$0xff] }
 0x52c   : > { %v4089_v7 = vpop.f32.mrf.mxu0  ;;  %v4178_v13 = vpop.f32.mrf.mxu1  ;;  %v3905_v62 = vadd.f32 %v8536_v28, %v8535_v42 }
 0x52d   : > { %4623 = vmatmul.bf16.gmra.mxu2 %v4427_v58  ;;  %4712 = vmatmul.bf16.gmra.mxu3 %v4428_v61  ;;  %v4249_v10 = vadd.f32 %v4089_v7, %v7286_v1  ;;  %v4250_v20 = vadd.f32 %v4178_v13, %v8530_v48  ;;  %v8538_v58 = vld [vmem:[#allocation15_spill] sm:$0xff] }
 0x52e   : > { %v3906_v61 = vadd.f32 %v8538_v58, %v8537_v17 }
 0x52f   : > { %v4319_v1 = vadd.f32 %v7456_v59, %v4249_v10  ;;  %v4320_v39 = vadd.f32 %v7459_v15, %v4250_v20 }
 0x530   : > { %v4584_v14 = vpop.f32.mrf.mxu2  ;;  %v4673_v57 = vpop.f32.mrf.mxu3 }
 0x531   : > { %v4585_v19 = vadd.f32 %v7593_v47, %v4584_v14  ;;  %v4383_v38 = vmax.f32 %v4319_v1, 0.0  ;;  %v4384_v4 = vmax.f32 %v4320_v39, 0.0 }
 0x533   : > { %v4674_v55 = vadd.f32 %v4673_v57, %v4585_v19 }
 0x534   : > { %v4091_v0 = vpop.f32.mrf.mxu0  ;;  %v4180_v26 = vpop.f32.mrf.mxu1 }
 0x535   : > { %v4753_v30 = vpack.c.bf16 %v4674_v55, %v4674_v55  ;;  %v4251_v33 = vadd.f32 %v4091_v0, %v3901_v54  ;;  %v4252_v34 = vadd.f32 %v4180_v26, %v3902_v11 }
 0x537   : > { %4786 = vst.msk [vmem:[%s7607_s11] sm:$0xf] %vm4785_vm1, %v4753_v30  ;;  %v4321_v29 = vadd.f32 %v7456_v59, %v4251_v33  ;;  %v4322_v56 = vadd.f32 %v7459_v15, %v4252_v34  ;;  %v8539_v34 = vld [vmem:[#allocation13_spill] sm:$0xff] }
 0x538   : > { %v4586_v50 = vpop.f32.mrf.mxu2  ;;  %v4675_v46 = vpop.f32.mrf.mxu3 }
 0x539   : > { %v4385_v63 = vmax.f32 %v4321_v29, 0.0  ;;  %v4386_v21 = vmax.f32 %v4322_v56, 0.0  ;;  %v4587_v53 = vadd.f32 %v7593_v47, %v4586_v50  ;;  %v8540_v50 = vld [vmem:[#allocation16_spill] sm:$0xff] }
 0x53b   : > { %v4676_v18 = vadd.f32 %v4675_v46, %v4587_v53  ;;  %v4429_v16 = vpack.c.bf16 %v4385_v63, %v4383_v38  ;;  %v4430_v3 = vpack.c.bf16 %v4386_v21, %v4384_v4  ;;  %v8541_v63 = vld [vmem:[#allocation10_spill] sm:$0xff]  ;;  %v8542_v21 = vld [vmem:[#allocation19_spill] sm:$0xff] }
 0x53c   : > { %v4094_v8 = vpop.f32.mrf.mxu0  ;;  %v4183_v36 = vpop.f32.mrf.mxu1  ;;  %v3909_v53 = vadd.f32 %v8542_v21, %v8541_v63 }
 0x53d   : > { %v4754_v49 = vpack.c.bf16 %v4676_v18, %v4676_v18  ;;  %4628 = vmatmul.bf16.gmra.mxu2 %v4429_v16  ;;  %4717 = vmatmul.bf16.gmra.mxu3 %v4430_v3  ;;  %v4253_v45 = vadd.f32 %v4094_v8, %v7314_v40  ;;  %v4254_v44 = vadd.f32 %v4183_v36, %v7316_v2  ;;  %v8543_v18 = vld [vmem:[#allocation94_spill] sm:$0xff]  ;;  %v8544_v16 = vld [vmem:[#allocation17_spill] sm:$0xff] }
 0x53e   : > { %v3910_v3 = vadd.f32 %v8544_v16, %v8543_v18 }
 0x53f   : > { %4787 = vst.msk [vmem:[%s7607_s11 + $0x4] sm:$0xf] %vm4785_vm1, %v4754_v49  ;;  %v4323_v13 = vadd.f32 %v7456_v59, %v4253_v45  ;;  %v4324_v57 = vadd.f32 %v7459_v15, %v4254_v44 }
 0x540   : > { %v4589_v35 = vpop.f32.mrf.mxu2  ;;  %v4678_v37 = vpop.f32.mrf.mxu3 }
 0x541   : > { %v4590_v51 = vadd.f32 %v7593_v47, %v4589_v35  ;;  %v4387_v60 = vmax.f32 %v4323_v13, 0.0  ;;  %v4388_v6 = vmax.f32 %v4324_v57, 0.0 }
 0x543   : > { %v4679_v7 = vadd.f32 %v4678_v37, %v4590_v51 }
 0x544   : > { %v4096_v10 = vpop.f32.mrf.mxu0  ;;  %v4185_v14 = vpop.f32.mrf.mxu1 }
 0x545   : > { %v4755_v40 = vpack.c.bf16 %v4679_v7, %v4679_v7  ;;  %v4255_v48 = vadd.f32 %v4096_v10, %v3905_v62  ;;  %v4256_v20 = vadd.f32 %v4185_v14, %v3906_v61 }
 0x547   : > { %4788 = vst.msk [vmem:[%s7607_s11 + $0x8] sm:$0xf] %vm4785_vm1, %v4755_v40  ;;  %v4325_v2 = vadd.f32 %v7456_v59, %v4255_v48  ;;  %v4326_v19 = vadd.f32 %v7459_v15, %v4256_v20 }
 0x548   : > { %v4591_v27 = vpop.f32.mrf.mxu2  ;;  %v4680_v54 = vpop.f32.mrf.mxu3 }
 0x549   : > { %v4389_v43 = vmax.f32 %v4325_v2, 0.0  ;;  %v4390_v11 = vmax.f32 %v4326_v19, 0.0  ;;  %v4592_v55 = vadd.f32 %v7593_v47, %v4591_v27 }
 0x54b   : > { %v4681_v1 = vadd.f32 %v4680_v54, %v4592_v55  ;;  %v4431_v0 = vpack.c.bf16 %v4389_v43, %v4387_v60  ;;  %v4432_v26 = vpack.c.bf16 %v4390_v11, %v4388_v6  ;;  %v3913_v43 = vadd.f32 %v7377_v41, %v7369_v5 }
 0x54c   : > { %v4099_v39 = vpop.f32.mrf.mxu0  ;;  %v4188_v30 = vpop.f32.mrf.mxu1  ;;  %v3914_v11 = vadd.f32 %v7379_v23, %v7372_v12 }
 0x54d   : > { %v4756_v33 = vpack.c.bf16 %v4681_v1, %v4681_v1  ;;  %4633 = vmatmul.bf16.gmra.mxu2 %v4431_v0  ;;  %4722 = vmatmul.bf16.gmra.mxu3 %v4432_v26  ;;  %v4257_v29 = vadd.f32 %v4099_v39, %v8539_v34  ;;  %v4258_v46 = vadd.f32 %v4188_v30, %v8540_v50 }
 0x54f   : > { %4789 = vst.msk [vmem:[%s7607_s11 + $0xc] sm:$0xf] %vm4785_vm1, %v4756_v33  ;;  %v4327_v36 = vadd.f32 %v7456_v59, %v4257_v29  ;;  %v4328_v35 = vadd.f32 %v7459_v15, %v4258_v46 }
 0x550   : > { %v4594_v56 = vpop.f32.mrf.mxu2  ;;  %v4683_v38 = vpop.f32.mrf.mxu3 }
 0x551   : > { %v4595_v4 = vadd.f32 %v7593_v47, %v4594_v56  ;;  %v4391_v62 = vmax.f32 %v4327_v36, 0.0  ;;  %v4392_v61 = vmax.f32 %v4328_v35, 0.0 }
 0x553   : > { %v4684_v8 = vadd.f32 %v4683_v38, %v4595_v4 }
 0x554   : > { %v4101_v49 = vpop.f32.mrf.mxu0  ;;  %v4190_v45 = vpop.f32.mrf.mxu1 }
 0x555   : > { %v4757_v37 = vpack.c.bf16 %v4684_v8, %v4684_v8  ;;  %v4259_v44 = vadd.f32 %v4101_v49, %v3909_v53  ;;  %v4260_v51 = vadd.f32 %v4190_v45, %v3910_v3  ;;  %v8545_v49 = vld [vmem:[#allocation20_spill] sm:$0xff] }
 0x556   : > { %v8546_v45 = vld [vmem:[#allocation96_spill] sm:$0xff] }
 0x557   : > { %4790 = vst.msk [vmem:[%s7607_s11 + $0x10] sm:$0xf] %vm4785_vm1, %v4757_v37  ;;  %v4329_v42 = vadd.f32 %v7456_v59, %v4259_v44  ;;  %v4330_v28 = vadd.f32 %v7459_v15, %v4260_v51  ;;  %v3917_v35 = vadd.f32 %v8546_v45, %v8545_v49  ;;  %v8547_v37 = vld [vmem:[#allocation26_spill] sm:$0xff]  ;;  %v8548_v44 = vld [vmem:[#allocation97_spill] sm:$0xff] }
 0x558   : > { %v4596_v17 = vpop.f32.mrf.mxu2  ;;  %v4685_v58 = vpop.f32.mrf.mxu3  ;;  %v3918_v51 = vadd.f32 %v8548_v44, %v8547_v37 }
 0x559   : > { %v4393_v7 = vmax.f32 %v4329_v42, 0.0  ;;  %v4394_v13 = vmax.f32 %v4330_v28, 0.0  ;;  %v4597_v10 = vadd.f32 %v7593_v47, %v4596_v17 }
 0x55b   : > { %v4686_v14 = vadd.f32 %v4685_v58, %v4597_v10  ;;  %v4433_v57 = vpack.c.bf16 %v4393_v7, %v4391_v62  ;;  %v4434_v40 = vpack.c.bf16 %v4394_v13, %v4392_v61 }
 0x55c   : > { %v4104_v48 = vpop.f32.mrf.mxu0  ;;  %v4193_v20 = vpop.f32.mrf.mxu1 }
 0x55d   : > { %v4758_v2 = vpack.c.bf16 %v4686_v14, %v4686_v14  ;;  %4638 = vmatmul.bf16.gmra.mxu2 %v4433_v57  ;;  %4727 = vmatmul.bf16.gmra.mxu3 %v4434_v40  ;;  %v4261_v19 = vadd.f32 %v4104_v48, %v7364_v24  ;;  %v4262_v54 = vadd.f32 %v4193_v20, %v7366_v22 }
 0x55f   : > { %4791 = vst.msk [vmem:[%s7607_s11 + $0x14] sm:$0xf] %vm4785_vm1, %v4758_v2  ;;  %v4331_v1 = vadd.f32 %v7456_v59, %v4261_v19  ;;  %v4332_v39 = vadd.f32 %v7459_v15, %v4262_v54 }
 0x560   : > { %v4599_v60 = vpop.f32.mrf.mxu2  ;;  %v4688_v27 = vpop.f32.mrf.mxu3 }
 0x561   : > { %v4600_v6 = vadd.f32 %v7593_v47, %v4599_v60  ;;  %v4395_v5 = vmax.f32 %v4331_v1, 0.0  ;;  %v4396_v23 = vmax.f32 %v4332_v39, 0.0 }
 0x563   : > { %v4689_v55 = vadd.f32 %v4688_v27, %v4600_v6 }
 0x564   : > { %v4106_v0 = vpop.f32.mrf.mxu0  ;;  %v4195_v26 = vpop.f32.mrf.mxu1 }
 0x565   : > { %v4759_v24 = vpack.c.bf16 %v4689_v55, %v4689_v55  ;;  %v4263_v30 = vadd.f32 %v4106_v0, %v3913_v43  ;;  %v4264_v33 = vadd.f32 %v4195_v26, %v3914_v11  ;;  %v8549_v0 = vld [vmem:[#allocation23_spill] sm:$0xff] }
 0x567   : > { %4792 = vst.msk [vmem:[%s7607_s11 + $0x18] sm:$0xf] %vm4785_vm1, %v4759_v24  ;;  %v4333_v22 = vadd.f32 %v7456_v59, %v4263_v30  ;;  %v4334_v34 = vadd.f32 %v7459_v15, %v4264_v33  ;;  %v8550_v24 = vld [vmem:[#allocation21_spill] sm:$0xff]  ;;  %v8551_v30 = vld [vmem:[#allocation14_spill] sm:$0xff] }
 0x568   : > { %v4601_v41 = vpop.f32.mrf.mxu2  ;;  %v4690_v12 = vpop.f32.mrf.mxu3  ;;  %v3921_v33 = vadd.f32 %v8551_v30, %v8550_v24 }
 0x569   : > { %v4397_v29 = vmax.f32 %v4333_v22, 0.0  ;;  %v4398_v56 = vmax.f32 %v4334_v34, 0.0  ;;  %v4602_v38 = vadd.f32 %v7593_v47, %v4601_v41  ;;  %v8552_v22 = vld [vmem:[#allocation24_spill] sm:$0xff] }
 0x56a   : > { %v8553_v34 = vld [vmem:[#allocation100_spill] sm:$0xff] }
 0x56b   : > { %v4691_v50 = vadd.f32 %v4690_v12, %v4602_v38  ;;  %v4435_v46 = vpack.c.bf16 %v4397_v29, %v4395_v5  ;;  %v4436_v4 = vpack.c.bf16 %v4398_v56, %v4396_v23  ;;  %v3922_v5 = vadd.f32 %v8553_v34, %v8552_v22 }
 0x56c   : > { %v4109_v63 = vpop.f32.mrf.mxu0  ;;  %v4198_v21 = vpop.f32.mrf.mxu1 }
 0x56d   : > { %v4760_v53 = vpack.c.bf16 %v4691_v50, %v4691_v50  ;;  %4643 = vmatmul.bf16.gmra.mxu2 %v4435_v46  ;;  %4732 = vmatmul.bf16.gmra.mxu3 %v4436_v4  ;;  %v4265_v18 = vadd.f32 %v4109_v63, %v7386_v32  ;;  %v4266_v8 = vadd.f32 %v4198_v21, %v7388_v31 }
 0x56f   : > { %4793 = vst.msk [vmem:[%s7607_s11 + $0x1c] sm:$0xf] %vm4785_vm1, %v4760_v53  ;;  %v4335_v28 = vadd.f32 %v7456_v59, %v4265_v18  ;;  %v4336_v58 = vadd.f32 %v7459_v15, %v4266_v8 }
 0x570   : > { %v4604_v16 = vpop.f32.mrf.mxu2  ;;  %v4693_v3 = vpop.f32.mrf.mxu3 }
 0x571   : > { %v4605_v36 = vadd.f32 %v7593_v47, %v4604_v16  ;;  %v4399_v10 = vmax.f32 %v4335_v28, 0.0  ;;  %v4400_v40 = vmax.f32 %v4336_v58, 0.0 }
 0x573   : > { %v4694_v42 = vadd.f32 %v4693_v3, %v4605_v36 }
 0x574   : > { %v4111_v62 = vpop.f32.mrf.mxu0  ;;  %v4200_v17 = vpop.f32.mrf.mxu1 }
 0x575   : > { %v4761_v32 = vpack.c.bf16 %v4694_v42, %v4694_v42  ;;  %v4267_v61 = vadd.f32 %v4111_v62, %v3917_v35  ;;  %v4268_v7 = vadd.f32 %v4200_v17, %v3918_v51  ;;  %v8554_v51 = vld [vmem:[#allocation30_spill] sm:$0xff] }
 0x576   : > { %v8555_v17 = vld [vmem:[#allocation102_spill] sm:$0xff] }
 0x577   : > { %4794 = vst.msk [vmem:[%s7607_s11 + $0x20] sm:$0xf] %vm4785_vm1, %v4761_v32  ;;  %v4337_v31 = vadd.f32 %v7456_v59, %v4267_v61  ;;  %v4338_v13 = vadd.f32 %v7459_v15, %v4268_v7  ;;  %v8556_v61 = vld [vmem:[#allocation103_spill] sm:$0xff] }
 0x578   : > { %v4606_v14 = vpop.f32.mrf.mxu2  ;;  %v4695_v57 = vpop.f32.mrf.mxu3  ;;  %v3925_v7 = vadd.f32 %v7586_v25, %v8556_v61 }
 0x579   : > { %v4401_v48 = vmax.f32 %v4337_v31, 0.0  ;;  %v4402_v20 = vmax.f32 %v4338_v13, 0.0  ;;  %v4607_v2 = vadd.f32 %v7593_v47, %v4606_v14  ;;  %v8557_v31 = vld [vmem:[#allocation27_spill] sm:$0xff] }
 0x57a   : > { %v3926_v13 = vadd.f32 %v7588_v9, %v8557_v31 }
 0x57b   : > { %v4696_v19 = vadd.f32 %v4695_v57, %v4607_v2  ;;  %v4437_v60 = vpack.c.bf16 %v4401_v48, %v4399_v10  ;;  %v4438_v27 = vpack.c.bf16 %v4402_v20, %v4400_v40 }
 0x57c   : > { %v4114_v54 = vpop.f32.mrf.mxu0  ;;  %v4203_v6 = vpop.f32.mrf.mxu1 }
 0x57d   : > { %v4762_v43 = vpack.c.bf16 %v4696_v19, %v4696_v19  ;;  %4648 = vmatmul.bf16.gmra.mxu2 %v4437_v60  ;;  %4737 = vmatmul.bf16.gmra.mxu3 %v4438_v27  ;;  %v4269_v11 = vadd.f32 %v4114_v54, %v7414_v52  ;;  %v4270_v26 = vadd.f32 %v4203_v6, %v8549_v0 }
 0x57f   : > { %4795 = vst.msk [vmem:[%s7607_s11 + $0x24] sm:$0xf] %vm4785_vm1, %v4762_v43  ;;  %v4339_v12 = vadd.f32 %v7456_v59, %v4269_v11  ;;  %v4340_v56 = vadd.f32 %v7459_v15, %v4270_v26 }
 0x580   : > { %v4609_v55 = vpop.f32.mrf.mxu2  ;;  %v4698_v1 = vpop.f32.mrf.mxu3 }
 0x581   : > { %v4610_v39 = vadd.f32 %v7593_v47, %v4609_v55  ;;  %v4403_v63 = vmax.f32 %v4339_v12, 0.0  ;;  %v4404_v18 = vmax.f32 %v4340_v56, 0.0 }
 0x583   : > { %v4699_v41 = vadd.f32 %v4698_v1, %v4610_v39 }
 0x584   : > { %v4116_v23 = vpop.f32.mrf.mxu0  ;;  %v4205_v29 = vpop.f32.mrf.mxu1 }
 0x585   : > { %v4763_v52 = vpack.c.bf16 %v4699_v41, %v4699_v41  ;;  %v4271_v38 = vadd.f32 %v4116_v23, %v3921_v33  ;;  %v4272_v50 = vadd.f32 %v4205_v29, %v3922_v5 }
 0x587   : > { %4796 = vst.msk [vmem:[%s7607_s11 + $0x28] sm:$0xf] %vm4785_vm1, %v4763_v52  ;;  %v4341_v46 = vadd.f32 %v7456_v59, %v4271_v38  ;;  %v4342_v4 = vadd.f32 %v7459_v15, %v4272_v50 }
 0x588   : > { %v4611_v21 = vpop.f32.mrf.mxu2  ;;  %v4700_v53 = vpop.f32.mrf.mxu3 }
 0x589   : > { %v4405_v16 = vmax.f32 %v4341_v46, 0.0  ;;  %v4406_v3 = vmax.f32 %v4342_v4, 0.0  ;;  %v4612_v8 = vadd.f32 %v7593_v47, %v4611_v21 }
 0x58b   : > { %v4701_v36 = vadd.f32 %v4700_v53, %v4612_v8  ;;  %v4439_v49 = vpack.c.bf16 %v4405_v16, %v4403_v63  ;;  %v4440_v45 = vpack.c.bf16 %v4406_v3, %v4404_v18 }
 0x58c   : > { %v4119_v35 = vpop.f32.mrf.mxu0  ;;  %v4208_v37 = vpop.f32.mrf.mxu1 }
 0x58d   : > { %v4764_v44 = vpack.c.bf16 %v4701_v36, %v4701_v36  ;;  %4653 = vmatmul.bf16.gmra.mxu2 %v4439_v49  ;;  %4742 = vmatmul.bf16.gmra.mxu3 %v4440_v45  ;;  %v4273_v42 = vadd.f32 %v4119_v35, %v8554_v51  ;;  %v4274_v58 = vadd.f32 %v4208_v37, %v8555_v17 }
 0x58f   : > { %4797 = vst.msk [vmem:[%s7607_s11 + $0x2c] sm:$0xf] %vm4785_vm1, %v4764_v44  ;;  %v4343_v14 = vadd.f32 %v7456_v59, %v4273_v42  ;;  %v4344_v48 = vadd.f32 %v7459_v15, %v4274_v58 }
 0x590   : > { %v4614_v28 = vpop.f32.mrf.mxu2  ;;  %v4703_v62 = vpop.f32.mrf.mxu3 }
 0x591   : > { %v4615_v32 = vadd.f32 %v7593_v47, %v4614_v28  ;;  %v4407_v27 = vmax.f32 %v4343_v14, 0.0  ;;  %v4408_v6 = vmax.f32 %v4344_v48, 0.0 }
 0x593   : > { %v4704_v10 = vadd.f32 %v4703_v62, %v4615_v32 }
 0x594   : > { %v4121_v57 = vpop.f32.mrf.mxu0  ;;  %v4210_v40 = vpop.f32.mrf.mxu1 }
 0x595   : > { %v4765_v20 = vpack.c.bf16 %v4704_v10, %v4704_v10  ;;  %v4275_v2 = vadd.f32 %v4121_v57, %v3925_v7  ;;  %v4276_v19 = vadd.f32 %v4210_v40, %v3926_v13 }
 0x597   : > { %4798 = vst.msk [vmem:[%s7607_s11 + $0x30] sm:$0xf] %vm4785_vm1, %v4765_v20  ;;  %v4345_v60 = vadd.f32 %v7456_v59, %v4275_v2  ;;  %v4346_v25 = vadd.f32 %v7459_v15, %v4276_v19 }
 0x598   : > { %v4616_v54 = vpop.f32.mrf.mxu2  ;;  %v4705_v9 = vpop.f32.mrf.mxu3 }
 0x599   : > { %v4409_v43 = vmax.f32 %v4345_v60, 0.0  ;;  %v4410_v11 = vmax.f32 %v4346_v25, 0.0  ;;  %v4617_v55 = vadd.f32 %v7593_v47, %v4616_v54 }
 0x59b   : > { %v4706_v1 = vadd.f32 %v4705_v9, %v4617_v55  ;;  %v4441_v0 = vpack.c.bf16 %v4409_v43, %v4407_v27  ;;  %v4442_v26 = vpack.c.bf16 %v4410_v11, %v4408_v6 }
 0x59d   : > { %v4766_v39 = vpack.c.bf16 %v4706_v1, %v4706_v1  ;;  %4658 = vmatmul.bf16.gmra.mxu2 %v4441_v0  ;;  %4747 = vmatmul.bf16.gmra.mxu3 %v4442_v26 }
 0x59f   : > { %4799 = vst.msk [vmem:[%s7607_s11 + $0x34] sm:$0xf] %vm4785_vm1, %v4766_v39 }
 0x5a0   : > { %v4619_v59 = vpop.f32.mrf.mxu2  ;;  %v4708_v15 = vpop.f32.mrf.mxu3 }
 0x5a1   : > { %v4620_v24 = vadd.f32 %v7593_v47, %v4619_v59 }
 0x5a3   : > { %v4709_v30 = vadd.f32 %v4708_v15, %v4620_v24 }
 0x5a5   : > { %v4767_v33 = vpack.c.bf16 %v4709_v30, %v4709_v30 }
 0x5a7   : > { %4800 = vst.msk [vmem:[%s7607_s11 + $0x38] sm:$0xf] %vm4785_vm1, %v4767_v33 }
 0x5a8   : > { %v4621_v22 = vpop.f32.mrf.mxu2  ;;  %v4710_v34 = vpop.f32.mrf.mxu3 }
 0x5a9   : > { %v4622_v5 = vadd.f32 %v7593_v47, %v4621_v22 }
 0x5ab   : > { %v4711_v41 = vadd.f32 %v4710_v34, %v4622_v5 }
 0x5ad   : > { %v4768_v12 = vpack.c.bf16 %v4711_v41, %v4711_v41 }
 0x5af   : > { %4801 = vst.msk [vmem:[%s7607_s11 + $0x3c] sm:$0xf] %vm4785_vm1, %v4768_v12 }
 0x5b0   : > { %v4624_v23 = vpop.f32.mrf.mxu2  ;;  %v4713_v29 = vpop.f32.mrf.mxu3 }
 0x5b1   : > { %v4625_v56 = vadd.f32 %v7593_v47, %v4624_v23 }
 0x5b3   : > { %v4714_v52 = vadd.f32 %v4713_v29, %v4625_v56 }
 0x5b5   : > { %v4769_v38 = vpack.c.bf16 %v4714_v52, %v4714_v52 }
 0x5b7   : > { %4802 = vst.msk [vmem:[%s7607_s11 + $0x40] sm:$0xf] %vm4785_vm1, %v4769_v38 }
 0x5b8   : > { %v4626_v50 = vpop.f32.mrf.mxu2  ;;  %v4715_v46 = vpop.f32.mrf.mxu3 }
 0x5b9   : > { %v4627_v4 = vadd.f32 %v7593_v47, %v4626_v50 }
 0x5bb   : > { %v4716_v63 = vadd.f32 %v4715_v46, %v4627_v4 }
 0x5bd   : > { %v4770_v21 = vpack.c.bf16 %v4716_v63, %v4716_v63 }
 0x5bf   : > { %4803 = vst.msk [vmem:[%s7607_s11 + $0x44] sm:$0xf] %vm4785_vm1, %v4770_v21 }
 0x5c0   : > { %v4629_v53 = vpop.f32.mrf.mxu2  ;;  %v4718_v18 = vpop.f32.mrf.mxu3 }
 0x5c1   : > { %v4630_v16 = vadd.f32 %v7593_v47, %v4629_v53 }
 0x5c3   : > { %v4719_v3 = vadd.f32 %v4718_v18, %v4630_v16 }
 0x5c5   : > { %v4771_v8 = vpack.c.bf16 %v4719_v3, %v4719_v3 }
 0x5c7   : > { %4804 = vst.msk [vmem:[%s7607_s11 + $0x48] sm:$0xf] %vm4785_vm1, %v4771_v8 }
 0x5c8   : > { %v4631_v36 = vpop.f32.mrf.mxu2  ;;  %v4720_v49 = vpop.f32.mrf.mxu3 }
 0x5c9   : > { %v4632_v45 = vadd.f32 %v7593_v47, %v4631_v36 }
 0x5cb   : > { %v4721_v35 = vadd.f32 %v4720_v49, %v4632_v45 }
 0x5cd   : > { %v4772_v37 = vpack.c.bf16 %v4721_v35, %v4721_v35 }
 0x5cf   : > { %4805 = vst.msk [vmem:[%s7607_s11 + $0x4c] sm:$0xf] %vm4785_vm1, %v4772_v37 }
 0x5d0   : > { %v4634_v44 = vpop.f32.mrf.mxu2  ;;  %v4723_v51 = vpop.f32.mrf.mxu3 }
 0x5d1   : > { %v4635_v42 = vadd.f32 %v7593_v47, %v4634_v44 }
 0x5d3   : > { %v4724_v28 = vadd.f32 %v4723_v51, %v4635_v42 }
 0x5d5   : > { %v4773_v62 = vpack.c.bf16 %v4724_v28, %v4724_v28 }
 0x5d7   : > { %4806 = vst.msk [vmem:[%s7607_s11 + $0x50] sm:$0xf] %vm4785_vm1, %v4773_v62 }
 0x5d8   : > { %v4636_v17 = vpop.f32.mrf.mxu2  ;;  %v4725_v58 = vpop.f32.mrf.mxu3 }
 0x5d9   : > { %v4637_v32 = vadd.f32 %v7593_v47, %v4636_v17 }
 0x5db   : > { %v4726_v61 = vadd.f32 %v4725_v58, %v4637_v32 }
 0x5dd   : > { %v4774_v7 = vpack.c.bf16 %v4726_v61, %v4726_v61 }
 0x5df   : > { %4807 = vst.msk [vmem:[%s7607_s11 + $0x54] sm:$0xf] %vm4785_vm1, %v4774_v7 }
 0x5e0   : > { %v4639_v31 = vpop.f32.mrf.mxu2  ;;  %v4728_v13 = vpop.f32.mrf.mxu3 }
 0x5e1   : > { %v4640_v10 = vadd.f32 %v7593_v47, %v4639_v31 }
 0x5e3   : > { %v4729_v14 = vadd.f32 %v4728_v13, %v4640_v10 }
 0x5e5   : > { %v4775_v57 = vpack.c.bf16 %v4729_v14, %v4729_v14 }
 0x5e7   : > { %4808 = vst.msk [vmem:[%s7607_s11 + $0x58] sm:$0xf] %vm4785_vm1, %v4775_v57 }
 0x5e8   : > { %v4641_v40 = vpop.f32.mrf.mxu2  ;;  %v4730_v48 = vpop.f32.mrf.mxu3 }
 0x5e9   : > { %v4642_v20 = vadd.f32 %v7593_v47, %v4641_v40 }
 0x5eb   : > { %v4731_v2 = vadd.f32 %v4730_v48, %v4642_v20 }
 0x5ed   : > { %v4776_v19 = vpack.c.bf16 %v4731_v2, %v4731_v2 }
 0x5ef   : > { %4809 = vst.msk [vmem:[%s7607_s11 + $0x5c] sm:$0xf] %vm4785_vm1, %v4776_v19 }
 0x5f0   : > { %v4644_v60 = vpop.f32.mrf.mxu2  ;;  %v4733_v25 = vpop.f32.mrf.mxu3 }
 0x5f1   : > { %v4645_v27 = vadd.f32 %v7593_v47, %v4644_v60 }
 0x5f3   : > { %v4734_v54 = vadd.f32 %v4733_v25, %v4645_v27 }
 0x5f5   : > { %v4777_v9 = vpack.c.bf16 %v4734_v54, %v4734_v54 }
 0x5f7   : > { %4810 = vst.msk [vmem:[%s7607_s11 + $0x60] sm:$0xf] %vm4785_vm1, %v4777_v9 }
 0x5f8   : > { %v4646_v6 = vpop.f32.mrf.mxu2  ;;  %v4735_v43 = vpop.f32.mrf.mxu3 }
 0x5f9   : > { %v4647_v11 = vadd.f32 %v7593_v47, %v4646_v6 }
 0x5fb   : > { %v4736_v55 = vadd.f32 %v4735_v43, %v4647_v11 }
 0x5fd   : > { %v4778_v1 = vpack.c.bf16 %v4736_v55, %v4736_v55 }
 0x5ff   : > { %4811 = vst.msk [vmem:[%s7607_s11 + $0x64] sm:$0xf] %vm4785_vm1, %v4778_v1 }
 0x600   : > { %v4649_v0 = vpop.f32.mrf.mxu2  ;;  %v4738_v26 = vpop.f32.mrf.mxu3 }
 0x601   : > { %v4650_v39 = vadd.f32 %v7593_v47, %v4649_v0 }
 0x603   : > { %v4739_v59 = vadd.f32 %v4738_v26, %v4650_v39 }
 0x605   : > { %v4779_v15 = vpack.c.bf16 %v4739_v59, %v4739_v59 }
 0x607   : > { %4812 = vst.msk [vmem:[%s7607_s11 + $0x68] sm:$0xf] %vm4785_vm1, %v4779_v15 }
 0x608   : > { %v4651_v24 = vpop.f32.mrf.mxu2  ;;  %v4740_v30 = vpop.f32.mrf.mxu3 }
 0x609   : > { %v4652_v33 = vadd.f32 %v7593_v47, %v4651_v24 }
 0x60b   : > { %v4741_v22 = vadd.f32 %v4740_v30, %v4652_v33 }
 0x60d   : > { %v4780_v34 = vpack.c.bf16 %v4741_v22, %v4741_v22 }
 0x60f   : > { %4813 = vst.msk [vmem:[%s7607_s11 + $0x6c] sm:$0xf] %vm4785_vm1, %v4780_v34 }
 0x610   : > { %v4654_v5 = vpop.f32.mrf.mxu2  ;;  %v4743_v41 = vpop.f32.mrf.mxu3 }
 0x611   : > { %v4655_v12 = vadd.f32 %v7593_v47, %v4654_v5 }
 0x613   : > { %v4744_v23 = vadd.f32 %v4743_v41, %v4655_v12 }
 0x615   : > { %v4781_v29 = vpack.c.bf16 %v4744_v23, %v4744_v23 }
 0x617   : > { %4814 = vst.msk [vmem:[%s7607_s11 + $0x70] sm:$0xf] %vm4785_vm1, %v4781_v29 }
 0x618   : > { %v4656_v56 = vpop.f32.mrf.mxu2  ;;  %v4745_v52 = vpop.f32.mrf.mxu3 }
 0x619   : > { %v4657_v38 = vadd.f32 %v7593_v47, %v4656_v56 }
 0x61b   : > { %v4746_v50 = vadd.f32 %v4745_v52, %v4657_v38 }
 0x61d   : > { %v4782_v46 = vpack.c.bf16 %v4746_v50, %v4746_v50 }
 0x61f   : > { %4815 = vst.msk [vmem:[%s7607_s11 + $0x74] sm:$0xf] %vm4785_vm1, %v4782_v46 }
 0x620   : > { %v4659_v4 = vpop.f32.mrf.mxu2  ;;  %v4748_v63 = vpop.f32.mrf.mxu3 }
 0x621   : > { %v4660_v21 = vadd.f32 %v7593_v47, %v4659_v4 }
 0x623   : > { %v4749_v53 = vadd.f32 %v4748_v63, %v4660_v21 }
 0x625   : > { %v4783_v18 = vpack.c.bf16 %v4749_v53, %v4749_v53 }
 0x627   : > { %4816 = vst.msk [vmem:[%s7607_s11 + $0x78] sm:$0xf] %vm4785_vm1, %v4783_v18 }
 0x628   : > { %v4661_v16 = vpop.f32.mrf.mxu2  ;;  %v4750_v8 = vpop.f32.mrf.mxu3 }
 0x629   : > { %v4662_v3 = vadd.f32 %v7593_v47, %v4661_v16 }
 0x62b   : > { %v4751_v36 = vadd.f32 %v4750_v8, %v4662_v3 }
 0x62d   : > { %v4784_v49 = vpack.c.bf16 %v4751_v36, %v4751_v36 }
 0x62f   : > { %4817 = vst.msk [vmem:[%s7607_s11 + $0x7c] sm:$0xf] %vm4785_vm1, %v4784_v49 }
 0x630 PF: > { %s15_s18 = sadd.s32 1, %s5358_s18  }
 0x631   : > { %p12_p4 = scmp.ge.s32.totalorder %s15_s18, 4  }
 0x633   :  { %14 = sbr.rel (!%p12_p4) target bundleno = 1 (0x1), region = 78 }

</bundles_post_ra>
